<compile_context>
chip_gen: v5e
topology: v5e:2x2
jax: 0.10.0
libtpu: 0.0.40
codegen_flags: <defaults>
</compile_context>

<pallas_src>
import jax
import jax.numpy as jnp
from jax.experimental import pallas as pl
from jax.experimental.pallas import tpu as pltpu

LANES = 128


def _round_up(x, m):
    return (x + m - 1) // m * m


def _pad_gates(w, M, MP):
    """(rows, 3M) -> (rows, 3MP): each r|z|n gate block zero-padded to MP lanes."""
    if M == MP:
        return w
    rows = w.shape[0]
    out = jnp.zeros((rows, 3 * MP), w.dtype)
    for g in range(3):
        out = out.at[:, g * MP:g * MP + M].set(w[:, g * M:(g + 1) * M])
    return out


# ------------------------------------------------------------------ fused kernel
def _make_kernel(T, B, D, L, MP, K, din_pad,
                 bx_rows, bhn_rows, fc_row, fcb_row, fc_off,
                 wih_offs, whh_offs):
    """All shapes / row offsets are static Python ints; gate order is r|z|n."""

    def cell(gx, gh, b_hn, h):
        # 128-aligned gate slices -> free static views.
        r = jax.nn.sigmoid(gx[:, 0:MP] + gh[:, 0:MP])
        z = jax.nn.sigmoid(gx[:, MP:2 * MP] + gh[:, MP:2 * MP])
        n = jnp.tanh(gx[:, 2 * MP:3 * MP] + r * (gh[:, 2 * MP:3 * MP] + b_hn))
        return (1.0 - z) * n + z * h

    def kernel(x_ref, w_ref, out_ref):
        # One-time unpack of the packed parameter buffer (tiny static row reads).
        b_x = [w_ref[bx_rows[l]:bx_rows[l] + 1, :] for l in range(L)]          # (1, 3MP)
        b_hn = [w_ref[bhn_rows[l]:bhn_rows[l] + 1, 0:MP] for l in range(L)]    # (1, MP)
        if D == 1:
            wih0_row = w_ref[wih_offs[0]:wih_offs[0] + 1, :]                   # (1, 3MP)

        h = [jnp.zeros((B, MP), jnp.float32) for _ in range(L)]

        # Wavefront recurrence, fully unrolled (T, L static) -> single basic block.
        # Layer l at step t depends only on h[l-1]_t and h[l]_{t-1}, so layer l's
        # step t overlaps with layer l-1's step t+1 in the LLO schedule.
        for t in range(T):
            for l in range(L):
                if l == 0:
                    x_t = x_ref[t * B:(t + 1) * B, :]                          # (B, D)
                    if D == 1:
                        # depth-1 input projection == outer product -> VPU only
                        gx = x_t * wih0_row + b_x[0]
                    else:
                        gx = jnp.dot(
                            x_t, w_ref[wih_offs[0]:wih_offs[0] + din_pad, :],
                            preferred_element_type=jnp.float32) + b_x[0]
                else:
                    gx = jnp.dot(
                        h[l - 1], w_ref[wih_offs[l]:wih_offs[l] + MP, :],
                        preferred_element_type=jnp.float32) + b_x[l]
                gh = jnp.dot(
                    h[l], w_ref[whh_offs[l]:whh_offs[l] + MP, :],
                    preferred_element_type=jnp.float32)
                h[l] = cell(gx, gh, b_hn[l], h[l])

        hT = h[L - 1]
        if K == 1:
            # VPU multiply + XLU lane reduction instead of a degenerate N=1 MXU push.
            fc_w_row = w_ref[fc_row:fc_row + 1, 0:MP]                          # (1, MP)
            out_ref[...] = (jnp.sum(hT * fc_w_row, axis=-1, keepdims=True)
                            + w_ref[fcb_row:fcb_row + 1, 0:K])
        else:
            out_ref[...] = (jnp.dot(hT, w_ref[fc_off:fc_off + MP, 0:K],
                                    preferred_element_type=jnp.float32)
                            + w_ref[fcb_row:fcb_row + 1, 0:K])

    return kernel


# ------------------------------------------------------------------ full model
@jax.jit
def rnn_forward(x, params):
    """Equivalent of RNN.forward: x (B, T, D) -> (B, K). Single fused pallas_call."""
    B, T, D = x.shape
    layers = params["gru"]
    L = len(layers)
    M = layers[0]["whh_t"].shape[0]
    K = params["fc_w_t"].shape[1]
    MP = max(LANES, _round_up(M, LANES))           # hidden dim padded to lane boundary
    din_pad = _round_up(max(D, 1), 8)

    # ---- static row layout of the single packed parameter buffer (one entry DMA) ----
    misc_rows = _round_up(2 * L + 2, 8)
    bx_rows = tuple(range(L))                      # folded b_ih+b_hh (r,z) | b_in
    bhn_rows = tuple(range(L, 2 * L))              # b_hn (stays inside r*(.))
    fc_row = 2 * L                                 # fc weight as a row (K == 1 path)
    fcb_row = 2 * L + 1                            # fc bias
    wih_offs, whh_offs = [], []
    off = misc_rows
    for l in range(L):
        wih_offs.append(off)
        off += din_pad if l == 0 else MP
        whh_offs.append(off)
        off += MP
    fc_off = off                                   # fc weight block (K > 1 path only)
    total_rows = off + (MP if K > 1 else 0)

    wbuf = jnp.zeros((total_rows, 3 * MP), jnp.float32)
    for l, layer in enumerate(layers):
        wih_t, whh_t = layer["wih_t"], layer["whh_t"]          # (din, 3M), (M, 3M)
        bih, bhh = layer["bih"], layer["bhh"]                  # (3M,), (3M,)
        b_x = jnp.concatenate([bih[:2 * M] + bhh[:2 * M], bih[2 * M:]]).reshape(1, 3 * M)
        wbuf = wbuf.at[bx_rows[l]:bx_rows[l] + 1, :].set(_pad_gates(b_x, M, MP))
        wbuf = wbuf.at[bhn_rows[l], :M].set(bhh[2 * M:])
        wbuf = wbuf.at[wih_offs[l]:wih_offs[l] + wih_t.shape[0], :].set(
            _pad_gates(wih_t, M, MP))
        wbuf = wbuf.at[whh_offs[l]:whh_offs[l] + M, :].set(_pad_gates(whh_t, M, MP))
    if K == 1:
        wbuf = wbuf.at[fc_row, :M].set(params["fc_w_t"][:, 0])
    else:
        wbuf = wbuf.at[fc_off:fc_off + M, :K].set(params["fc_w_t"])
    wbuf = wbuf.at[fcb_row, :K].set(params["fc_b"])

    # time-major flattened input: row t*B + b == x[b, t, :]
    x_flat = jnp.transpose(x, (1, 0, 2)).reshape(T * B, D)
    if D > 1 and D != din_pad:
        x_flat = jnp.pad(x_flat, ((0, 0), (0, din_pad - D)))

    kernel = _make_kernel(T, B, D, L, MP, K, din_pad,
                          bx_rows, bhn_rows, fc_row, fcb_row, fc_off,
                          tuple(wih_offs), tuple(whh_offs))
    vmem = pl.BlockSpec(memory_space=pltpu.MemorySpace.VMEM)
    # TODO(synk): for large B, add a leading batch grid axis with
    # dimension_semantics=("parallel",) to use the second TensorCore on v7x; never split T.
    return pl.pallas_call(
        kernel,
        out_shape=jax.ShapeDtypeStruct((B, K), jnp.float32),
        in_specs=[vmem, vmem],
        out_specs=vmem,
    )(x_flat, wbuf)


# ------------------------------------------------------------------ reference
def rnn_forward_ref(x, params):
    """Pure-JAX reference (PyTorch nn.GRU semantics) for correctness check."""
    seq = x                                 # (B, T, D)
    for layer in params["gru"]:
        wih_t, whh_t = layer["wih_t"], layer["whh_t"]
        bih, bhh = layer["bih"], layer["bhh"]
        M = whh_t.shape[0]
        B, T, _ = seq.shape
        h = jnp.zeros((B, M), jnp.float32)
        outs = []
        for t in range(T):
            x_t = seq[:, t, :]
            gx = x_t @ wih_t + bih
            gh = h @ whh_t + bhh
            r = jax.nn.sigmoid(gx[:, :M] + gh[:, :M])
            z = jax.nn.sigmoid(gx[:, M:2 * M] + gh[:, M:2 * M])
            n = jnp.tanh(gx[:, 2 * M:] + r * gh[:, 2 * M:])
            h = (1.0 - z) * n + z * h
            outs.append(h)
        seq = jnp.stack(outs, axis=1)
    return seq[:, -1, :] @ params["fc_w_t"] + params["fc_b"]


# ------------------------------------------------------------------ params
def init_params(key, D, M, L, K):
    """Deterministic init mimicking PyTorch's U(-1/sqrt(M), 1/sqrt(M))."""
    bound = 1.0 / jnp.sqrt(jnp.float32(M))
    layers = []
    for layer_idx in range(L):
        din = D if layer_idx == 0 else M
        key, k1, k2, k3, k4 = jax.random.split(key, 5)
        layers.append({
            # stored transposed: (din, 3M) and (M, 3M); gate order r|z|n
            "wih_t": jax.random.uniform(k1, (din, 3 * M), jnp.float32, -bound, bound),
            "whh_t": jax.random.uniform(k2, (M, 3 * M), jnp.float32, -bound, bound),
            "bih": jax.random.uniform(k3, (3 * M,), jnp.float32, -bound, bound),
            "bhh": jax.random.uniform(k4, (3 * M,), jnp.float32, -bound, bound),
        })
    key, k5, k6 = jax.random.split(key, 3)
    return {
        "gru": layers,
        "fc_w_t": jax.random.uniform(k5, (M, K), jnp.float32, -bound, bound),
        "fc_b": jax.random.uniform(k6, (K,), jnp.float32, -bound, bound),
    }


if __name__ == "__main__":
    # Module config implied by the script: D=1 (X reshaped to (-1, T, 1)), T=10.
    B, T, D, M, L, K = 8, 10, 1, 32, 2, 1

    key = jax.random.PRNGKey(0)
    key, kx = jax.random.split(key)
    x = jax.random.normal(kx, (B, T, D), jnp.float32)

    params = init_params(key, D, M, L, K)

    out = rnn_forward(x, params)
    out = jax.block_until_ready(out)

    ref = rnn_forward_ref(x, params)
    assert out.shape == (B, K)
    assert jnp.allclose(out, ref, atol=1e-4, rtol=1e-5), (out, ref)

    print("KERNEL_OK")
</pallas_src>

<mosaic_0001>
module attributes {stable_mosaic.version = 11 : i64} {
  func.func @kernel(%arg0: memref<80x1xf32, #tpu.memory_space<vmem>>, %arg1: memref<400x384xf32, #tpu.memory_space<vmem>>, %arg2: memref<8x1xf32, #tpu.memory_space<vmem>>) attributes {dimension_semantics = [], scalar_prefetch = 0 : i64, scratch_operands = 0 : i64, tpu.core_type = #tpu.core_type<tc>} {
    %c0 = arith.constant 0 : index
    %c0_0 = arith.constant 0 : index
    %0 = vector.load %arg1[%c0, %c0_0] : memref<400x384xf32, #tpu.memory_space<vmem>>, vector<1x384xf32>
    %c1 = arith.constant 1 : index
    %c0_1 = arith.constant 0 : index
    %1 = vector.load %arg1[%c1, %c0_1] : memref<400x384xf32, #tpu.memory_space<vmem>>, vector<1x384xf32>
    %c2 = arith.constant 2 : index
    %c0_2 = arith.constant 0 : index
    %2 = vector.load %arg1[%c2, %c0_2] : memref<400x384xf32, #tpu.memory_space<vmem>>, vector<1x128xf32>
    %c3 = arith.constant 3 : index
    %c0_3 = arith.constant 0 : index
    %3 = vector.load %arg1[%c3, %c0_3] : memref<400x384xf32, #tpu.memory_space<vmem>>, vector<1x128xf32>
    %c8 = arith.constant 8 : index
    %c0_4 = arith.constant 0 : index
    %4 = vector.load %arg1[%c8, %c0_4] : memref<400x384xf32, #tpu.memory_space<vmem>>, vector<1x384xf32>
    %cst = arith.constant 0.000000e+00 : f32
    %5 = vector.broadcast %cst : f32 to vector<8x128xf32>
    %cst_5 = arith.constant 0.000000e+00 : f32
    %6 = vector.broadcast %cst_5 : f32 to vector<8x128xf32>
    %c0_6 = arith.constant 0 : index
    %c0_7 = arith.constant 0 : index
    %7 = vector.load %arg0[%c0_6, %c0_7] : memref<80x1xf32, #tpu.memory_space<vmem>>, vector<8x1xf32>
    %8 = vector.broadcast %7 : vector<8x1xf32> to vector<8x384xf32>
    %9 = vector.broadcast %4 : vector<1x384xf32> to vector<8x384xf32>
    %10 = arith.mulf %8, %9 : vector<8x384xf32>
    %11 = vector.broadcast %0 : vector<1x384xf32> to vector<8x384xf32>
    %12 = arith.addf %10, %11 : vector<8x384xf32>
    %c16 = arith.constant 16 : index
    %c0_8 = arith.constant 0 : index
    %13 = vector.load %arg1[%c16, %c0_8] : memref<400x384xf32, #tpu.memory_space<vmem>>, vector<128x384xf32>
    %cst_9 = arith.constant dense<0.000000e+00> : vector<8x384xf32>
    %14 = tpu.matmul %5, %13, %cst_9 {dimension_numbers = #tpu.dot_dimension_numbers<[1], [0], [0], [1], [0, 0, 1, 1], [], []>} : vector<8x128xf32>, vector<128x384xf32>, vector<8x384xf32> -> vector<8x384xf32>
    %15 = vector.extract_strided_slice %12 {offsets = [0, 0], sizes = [8, 128], strides = [1, 1]} : vector<8x384xf32> to vector<8x128xf32>
    %16 = vector.extract_strided_slice %14 {offsets = [0, 0], sizes = [8, 128], strides = [1, 1]} : vector<8x384xf32> to vector<8x128xf32>
    %17 = arith.addf %15, %16 : vector<8x128xf32>
    %18 = arith.negf %17 : vector<8x128xf32>
    %19 = math.exp %18 : vector<8x128xf32>
    %cst_10 = arith.constant 1.000000e+00 : f32
    %20 = vector.broadcast %cst_10 : f32 to vector<8x128xf32>
    %21 = arith.addf %20, %19 : vector<8x128xf32>
    %22 = arith.divf %20, %21 : vector<8x128xf32>
    %23 = vector.extract_strided_slice %12 {offsets = [0, 128], sizes = [8, 128], strides = [1, 1]} : vector<8x384xf32> to vector<8x128xf32>
    %24 = vector.extract_strided_slice %14 {offsets = [0, 128], sizes = [8, 128], strides = [1, 1]} : vector<8x384xf32> to vector<8x128xf32>
    %25 = arith.addf %23, %24 : vector<8x128xf32>
    %26 = arith.negf %25 : vector<8x128xf32>
    %27 = math.exp %26 : vector<8x128xf32>
    %cst_11 = arith.constant 1.000000e+00 : f32
    %28 = vector.broadcast %cst_11 : f32 to vector<8x128xf32>
    %29 = arith.addf %28, %27 : vector<8x128xf32>
    %30 = arith.divf %28, %29 : vector<8x128xf32>
    %31 = vector.extract_strided_slice %12 {offsets = [0, 256], sizes = [8, 128], strides = [1, 1]} : vector<8x384xf32> to vector<8x128xf32>
    %32 = vector.extract_strided_slice %14 {offsets = [0, 256], sizes = [8, 128], strides = [1, 1]} : vector<8x384xf32> to vector<8x128xf32>
    %33 = vector.broadcast %2 : vector<1x128xf32> to vector<8x128xf32>
    %34 = arith.addf %32, %33 : vector<8x128xf32>
    %35 = arith.mulf %22, %34 : vector<8x128xf32>
    %36 = arith.addf %31, %35 : vector<8x128xf32>
    %37 = math.tanh %36 : vector<8x128xf32>
    %cst_12 = arith.constant 1.000000e+00 : f32
    %38 = vector.broadcast %cst_12 : f32 to vector<8x128xf32>
    %39 = arith.subf %38, %30 : vector<8x128xf32>
    %40 = arith.mulf %39, %37 : vector<8x128xf32>
    %41 = arith.mulf %30, %5 : vector<8x128xf32>
    %42 = arith.addf %40, %41 : vector<8x128xf32>
    %c144 = arith.constant 144 : index
    %c0_13 = arith.constant 0 : index
    %43 = vector.load %arg1[%c144, %c0_13] : memref<400x384xf32, #tpu.memory_space<vmem>>, vector<128x384xf32>
    %cst_14 = arith.constant dense<0.000000e+00> : vector<8x384xf32>
    %44 = tpu.matmul %42, %43, %cst_14 {dimension_numbers = #tpu.dot_dimension_numbers<[1], [0], [0], [1], [0, 0, 1, 1], [], []>} : vector<8x128xf32>, vector<128x384xf32>, vector<8x384xf32> -> vector<8x384xf32>
    %45 = vector.broadcast %1 : vector<1x384xf32> to vector<8x384xf32>
    %46 = arith.addf %44, %45 : vector<8x384xf32>
    %c272 = arith.constant 272 : index
    %c0_15 = arith.constant 0 : index
    %47 = vector.load %arg1[%c272, %c0_15] : memref<400x384xf32, #tpu.memory_space<vmem>>, vector<128x384xf32>
    %cst_16 = arith.constant dense<0.000000e+00> : vector<8x384xf32>
    %48 = tpu.matmul %6, %47, %cst_16 {dimension_numbers = #tpu.dot_dimension_numbers<[1], [0], [0], [1], [0, 0, 1, 1], [], []>} : vector<8x128xf32>, vector<128x384xf32>, vector<8x384xf32> -> vector<8x384xf32>
    %49 = vector.extract_strided_slice %46 {offsets = [0, 0], sizes = [8, 128], strides = [1, 1]} : vector<8x384xf32> to vector<8x128xf32>
    %50 = vector.extract_strided_slice %48 {offsets = [0, 0], sizes = [8, 128], strides = [1, 1]} : vector<8x384xf32> to vector<8x128xf32>
    %51 = arith.addf %49, %50 : vector<8x128xf32>
    %52 = arith.negf %51 : vector<8x128xf32>
    %53 = math.exp %52 : vector<8x128xf32>
    %cst_17 = arith.constant 1.000000e+00 : f32
    %54 = vector.broadcast %cst_17 : f32 to vector<8x128xf32>
    %55 = arith.addf %54, %53 : vector<8x128xf32>
    %56 = arith.divf %54, %55 : vector<8x128xf32>
    %57 = vector.extract_strided_slice %46 {offsets = [0, 128], sizes = [8, 128], strides = [1, 1]} : vector<8x384xf32> to vector<8x128xf32>
    %58 = vector.extract_strided_slice %48 {offsets = [0, 128], sizes = [8, 128], strides = [1, 1]} : vector<8x384xf32> to vector<8x128xf32>
    %59 = arith.addf %57, %58 : vector<8x128xf32>
    %60 = arith.negf %59 : vector<8x128xf32>
    %61 = math.exp %60 : vector<8x128xf32>
    %cst_18 = arith.constant 1.000000e+00 : f32
    %62 = vector.broadcast %cst_18 : f32 to vector<8x128xf32>
    %63 = arith.addf %62, %61 : vector<8x128xf32>
    %64 = arith.divf %62, %63 : vector<8x128xf32>
    %65 = vector.extract_strided_slice %46 {offsets = [0, 256], sizes = [8, 128], strides = [1, 1]} : vector<8x384xf32> to vector<8x128xf32>
    %66 = vector.extract_strided_slice %48 {offsets = [0, 256], sizes = [8, 128], strides = [1, 1]} : vector<8x384xf32> to vector<8x128xf32>
    %67 = vector.broadcast %3 : vector<1x128xf32> to vector<8x128xf32>
    %68 = arith.addf %66, %67 : vector<8x128xf32>
    %69 = arith.mulf %56, %68 : vector<8x128xf32>
    %70 = arith.addf %65, %69 : vector<8x128xf32>
    %71 = math.tanh %70 : vector<8x128xf32>
    %cst_19 = arith.constant 1.000000e+00 : f32
    %72 = vector.broadcast %cst_19 : f32 to vector<8x128xf32>
    %73 = arith.subf %72, %64 : vector<8x128xf32>
    %74 = arith.mulf %73, %71 : vector<8x128xf32>
    %75 = arith.mulf %64, %6 : vector<8x128xf32>
    %76 = arith.addf %74, %75 : vector<8x128xf32>
    %c8_20 = arith.constant 8 : index
    %c0_21 = arith.constant 0 : index
    %77 = vector.load %arg0[%c8_20, %c0_21] : memref<80x1xf32, #tpu.memory_space<vmem>>, vector<8x1xf32>
    %78 = vector.broadcast %77 : vector<8x1xf32> to vector<8x384xf32>
    %79 = vector.broadcast %4 : vector<1x384xf32> to vector<8x384xf32>
    %80 = arith.mulf %78, %79 : vector<8x384xf32>
    %81 = vector.broadcast %0 : vector<1x384xf32> to vector<8x384xf32>
    %82 = arith.addf %80, %81 : vector<8x384xf32>
    %c16_22 = arith.constant 16 : index
    %c0_23 = arith.constant 0 : index
    %83 = vector.load %arg1[%c16_22, %c0_23] : memref<400x384xf32, #tpu.memory_space<vmem>>, vector<128x384xf32>
    %cst_24 = arith.constant dense<0.000000e+00> : vector<8x384xf32>
    %84 = tpu.matmul %42, %83, %cst_24 {dimension_numbers = #tpu.dot_dimension_numbers<[1], [0], [0], [1], [0, 0, 1, 1], [], []>} : vector<8x128xf32>, vector<128x384xf32>, vector<8x384xf32> -> vector<8x384xf32>
    %85 = vector.extract_strided_slice %82 {offsets = [0, 0], sizes = [8, 128], strides = [1, 1]} : vector<8x384xf32> to vector<8x128xf32>
    %86 = vector.extract_strided_slice %84 {offsets = [0, 0], sizes = [8, 128], strides = [1, 1]} : vector<8x384xf32> to vector<8x128xf32>
    %87 = arith.addf %85, %86 : vector<8x128xf32>
    %88 = arith.negf %87 : vector<8x128xf32>
    %89 = math.exp %88 : vector<8x128xf32>
    %cst_25 = arith.constant 1.000000e+00 : f32
    %90 = vector.broadcast %cst_25 : f32 to vector<8x128xf32>
    %91 = arith.addf %90, %89 : vector<8x128xf32>
    %92 = arith.divf %90, %91 : vector<8x128xf32>
    %93 = vector.extract_strided_slice %82 {offsets = [0, 128], sizes = [8, 128], strides = [1, 1]} : vector<8x384xf32> to vector<8x128xf32>
    %94 = vector.extract_strided_slice %84 {offsets = [0, 128], sizes = [8, 128], strides = [1, 1]} : vector<8x384xf32> to vector<8x128xf32>
    %95 = arith.addf %93, %94 : vector<8x128xf32>
    %96 = arith.negf %95 : vector<8x128xf32>
    %97 = math.exp %96 : vector<8x128xf32>
    %cst_26 = arith.constant 1.000000e+00 : f32
    %98 = vector.broadcast %cst_26 : f32 to vector<8x128xf32>
    %99 = arith.addf %98, %97 : vector<8x128xf32>
    %100 = arith.divf %98, %99 : vector<8x128xf32>
    %101 = vector.extract_strided_slice %82 {offsets = [0, 256], sizes = [8, 128], strides = [1, 1]} : vector<8x384xf32> to vector<8x128xf32>
    %102 = vector.extract_strided_slice %84 {offsets = [0, 256], sizes = [8, 128], strides = [1, 1]} : vector<8x384xf32> to vector<8x128xf32>
    %103 = vector.broadcast %2 : vector<1x128xf32> to vector<8x128xf32>
    %104 = arith.addf %102, %103 : vector<8x128xf32>
    %105 = arith.mulf %92, %104 : vector<8x128xf32>
    %106 = arith.addf %101, %105 : vector<8x128xf32>
    %107 = math.tanh %106 : vector<8x128xf32>
    %cst_27 = arith.constant 1.000000e+00 : f32
    %108 = vector.broadcast %cst_27 : f32 to vector<8x128xf32>
    %109 = arith.subf %108, %100 : vector<8x128xf32>
    %110 = arith.mulf %109, %107 : vector<8x128xf32>
    %111 = arith.mulf %100, %42 : vector<8x128xf32>
    %112 = arith.addf %110, %111 : vector<8x128xf32>
    %c144_28 = arith.constant 144 : index
    %c0_29 = arith.constant 0 : index
    %113 = vector.load %arg1[%c144_28, %c0_29] : memref<400x384xf32, #tpu.memory_space<vmem>>, vector<128x384xf32>
    %cst_30 = arith.constant dense<0.000000e+00> : vector<8x384xf32>
    %114 = tpu.matmul %112, %113, %cst_30 {dimension_numbers = #tpu.dot_dimension_numbers<[1], [0], [0], [1], [0, 0, 1, 1], [], []>} : vector<8x128xf32>, vector<128x384xf32>, vector<8x384xf32> -> vector<8x384xf32>
    %115 = vector.broadcast %1 : vector<1x384xf32> to vector<8x384xf32>
    %116 = arith.addf %114, %115 : vector<8x384xf32>
    %c272_31 = arith.constant 272 : index
    %c0_32 = arith.constant 0 : index
    %117 = vector.load %arg1[%c272_31, %c0_32] : memref<400x384xf32, #tpu.memory_space<vmem>>, vector<128x384xf32>
    %cst_33 = arith.constant dense<0.000000e+00> : vector<8x384xf32>
    %118 = tpu.matmul %76, %117, %cst_33 {dimension_numbers = #tpu.dot_dimension_numbers<[1], [0], [0], [1], [0, 0, 1, 1], [], []>} : vector<8x128xf32>, vector<128x384xf32>, vector<8x384xf32> -> vector<8x384xf32>
    %119 = vector.extract_strided_slice %116 {offsets = [0, 0], sizes = [8, 128], strides = [1, 1]} : vector<8x384xf32> to vector<8x128xf32>
    %120 = vector.extract_strided_slice %118 {offsets = [0, 0], sizes = [8, 128], strides = [1, 1]} : vector<8x384xf32> to vector<8x128xf32>
    %121 = arith.addf %119, %120 : vector<8x128xf32>
    %122 = arith.negf %121 : vector<8x128xf32>
    %123 = math.exp %122 : vector<8x128xf32>
    %cst_34 = arith.constant 1.000000e+00 : f32
    %124 = vector.broadcast %cst_34 : f32 to vector<8x128xf32>
    %125 = arith.addf %124, %123 : vector<8x128xf32>
    %126 = arith.divf %124, %125 : vector<8x128xf32>
    %127 = vector.extract_strided_slice %116 {offsets = [0, 128], sizes = [8, 128], strides = [1, 1]} : vector<8x384xf32> to vector<8x128xf32>
    %128 = vector.extract_strided_slice %118 {offsets = [0, 128], sizes = [8, 128], strides = [1, 1]} : vector<8x384xf32> to vector<8x128xf32>
    %129 = arith.addf %127, %128 : vector<8x128xf32>
    %130 = arith.negf %129 : vector<8x128xf32>
    %131 = math.exp %130 : vector<8x128xf32>
    %cst_35 = arith.constant 1.000000e+00 : f32
    %132 = vector.broadcast %cst_35 : f32 to vector<8x128xf32>
    %133 = arith.addf %132, %131 : vector<8x128xf32>
    %134 = arith.divf %132, %133 : vector<8x128xf32>
    %135 = vector.extract_strided_slice %116 {offsets = [0, 256], sizes = [8, 128], strides = [1, 1]} : vector<8x384xf32> to vector<8x128xf32>
    %136 = vector.extract_strided_slice %118 {offsets = [0, 256], sizes = [8, 128], strides = [1, 1]} : vector<8x384xf32> to vector<8x128xf32>
    %137 = vector.broadcast %3 : vector<1x128xf32> to vector<8x128xf32>
    %138 = arith.addf %136, %137 : vector<8x128xf32>
    %139 = arith.mulf %126, %138 : vector<8x128xf32>
    %140 = arith.addf %135, %139 : vector<8x128xf32>
    %141 = math.tanh %140 : vector<8x128xf32>
    %cst_36 = arith.constant 1.000000e+00 : f32
    %142 = vector.broadcast %cst_36 : f32 to vector<8x128xf32>
    %143 = arith.subf %142, %134 : vector<8x128xf32>
    %144 = arith.mulf %143, %141 : vector<8x128xf32>
    %145 = arith.mulf %134, %76 : vector<8x128xf32>
    %146 = arith.addf %144, %145 : vector<8x128xf32>
    %c16_37 = arith.constant 16 : index
    %c0_38 = arith.constant 0 : index
    %147 = vector.load %arg0[%c16_37, %c0_38] : memref<80x1xf32, #tpu.memory_space<vmem>>, vector<8x1xf32>
    %148 = vector.broadcast %147 : vector<8x1xf32> to vector<8x384xf32>
    %149 = vector.broadcast %4 : vector<1x384xf32> to vector<8x384xf32>
    %150 = arith.mulf %148, %149 : vector<8x384xf32>
    %151 = vector.broadcast %0 : vector<1x384xf32> to vector<8x384xf32>
    %152 = arith.addf %150, %151 : vector<8x384xf32>
    %c16_39 = arith.constant 16 : index
    %c0_40 = arith.constant 0 : index
    %153 = vector.load %arg1[%c16_39, %c0_40] : memref<400x384xf32, #tpu.memory_space<vmem>>, vector<128x384xf32>
    %cst_41 = arith.constant dense<0.000000e+00> : vector<8x384xf32>
    %154 = tpu.matmul %112, %153, %cst_41 {dimension_numbers = #tpu.dot_dimension_numbers<[1], [0], [0], [1], [0, 0, 1, 1], [], []>} : vector<8x128xf32>, vector<128x384xf32>, vector<8x384xf32> -> vector<8x384xf32>
    %155 = vector.extract_strided_slice %152 {offsets = [0, 0], sizes = [8, 128], strides = [1, 1]} : vector<8x384xf32> to vector<8x128xf32>
    %156 = vector.extract_strided_slice %154 {offsets = [0, 0], sizes = [8, 128], strides = [1, 1]} : vector<8x384xf32> to vector<8x128xf32>
    %157 = arith.addf %155, %156 : vector<8x128xf32>
    %158 = arith.negf %157 : vector<8x128xf32>
    %159 = math.exp %158 : vector<8x128xf32>
    %cst_42 = arith.constant 1.000000e+00 : f32
    %160 = vector.broadcast %cst_42 : f32 to vector<8x128xf32>
    %161 = arith.addf %160, %159 : vector<8x128xf32>
    %162 = arith.divf %160, %161 : vector<8x128xf32>
    %163 = vector.extract_strided_slice %152 {offsets = [0, 128], sizes = [8, 128], strides = [1, 1]} : vector<8x384xf32> to vector<8x128xf32>
    %164 = vector.extract_strided_slice %154 {offsets = [0, 128], sizes = [8, 128], strides = [1, 1]} : vector<8x384xf32> to vector<8x128xf32>
    %165 = arith.addf %163, %164 : vector<8x128xf32>
    %166 = arith.negf %165 : vector<8x128xf32>
    %167 = math.exp %166 : vector<8x128xf32>
    %cst_43 = arith.constant 1.000000e+00 : f32
    %168 = vector.broadcast %cst_43 : f32 to vector<8x128xf32>
    %169 = arith.addf %168, %167 : vector<8x128xf32>
    %170 = arith.divf %168, %169 : vector<8x128xf32>
    %171 = vector.extract_strided_slice %152 {offsets = [0, 256], sizes = [8, 128], strides = [1, 1]} : vector<8x384xf32> to vector<8x128xf32>
    %172 = vector.extract_strided_slice %154 {offsets = [0, 256], sizes = [8, 128], strides = [1, 1]} : vector<8x384xf32> to vector<8x128xf32>
    %173 = vector.broadcast %2 : vector<1x128xf32> to vector<8x128xf32>
    %174 = arith.addf %172, %173 : vector<8x128xf32>
    %175 = arith.mulf %162, %174 : vector<8x128xf32>
    %176 = arith.addf %171, %175 : vector<8x128xf32>
    %177 = math.tanh %176 : vector<8x128xf32>
    %cst_44 = arith.constant 1.000000e+00 : f32
    %178 = vector.broadcast %cst_44 : f32 to vector<8x128xf32>
    %179 = arith.subf %178, %170 : vector<8x128xf32>
    %180 = arith.mulf %179, %177 : vector<8x128xf32>
    %181 = arith.mulf %170, %112 : vector<8x128xf32>
    %182 = arith.addf %180, %181 : vector<8x128xf32>
    %c144_45 = arith.constant 144 : index
    %c0_46 = arith.constant 0 : index
    %183 = vector.load %arg1[%c144_45, %c0_46] : memref<400x384xf32, #tpu.memory_space<vmem>>, vector<128x384xf32>
    %cst_47 = arith.constant dense<0.000000e+00> : vector<8x384xf32>
    %184 = tpu.matmul %182, %183, %cst_47 {dimension_numbers = #tpu.dot_dimension_numbers<[1], [0], [0], [1], [0, 0, 1, 1], [], []>} : vector<8x128xf32>, vector<128x384xf32>, vector<8x384xf32> -> vector<8x384xf32>
    %185 = vector.broadcast %1 : vector<1x384xf32> to vector<8x384xf32>
    %186 = arith.addf %184, %185 : vector<8x384xf32>
    %c272_48 = arith.constant 272 : index
    %c0_49 = arith.constant 0 : index
    %187 = vector.load %arg1[%c272_48, %c0_49] : memref<400x384xf32, #tpu.memory_space<vmem>>, vector<128x384xf32>
    %cst_50 = arith.constant dense<0.000000e+00> : vector<8x384xf32>
    %188 = tpu.matmul %146, %187, %cst_50 {dimension_numbers = #tpu.dot_dimension_numbers<[1], [0], [0], [1], [0, 0, 1, 1], [], []>} : vector<8x128xf32>, vector<128x384xf32>, vector<8x384xf32> -> vector<8x384xf32>
    %189 = vector.extract_strided_slice %186 {offsets = [0, 0], sizes = [8, 128], strides = [1, 1]} : vector<8x384xf32> to vector<8x128xf32>
    %190 = vector.extract_strided_slice %188 {offsets = [0, 0], sizes = [8, 128], strides = [1, 1]} : vector<8x384xf32> to vector<8x128xf32>
    %191 = arith.addf %189, %190 : vector<8x128xf32>
    %192 = arith.negf %191 : vector<8x128xf32>
    %193 = math.exp %192 : vector<8x128xf32>
    %cst_51 = arith.constant 1.000000e+00 : f32
    %194 = vector.broadcast %cst_51 : f32 to vector<8x128xf32>
    %195 = arith.addf %194, %193 : vector<8x128xf32>
    %196 = arith.divf %194, %195 : vector<8x128xf32>
    %197 = vector.extract_strided_slice %186 {offsets = [0, 128], sizes = [8, 128], strides = [1, 1]} : vector<8x384xf32> to vector<8x128xf32>
    %198 = vector.extract_strided_slice %188 {offsets = [0, 128], sizes = [8, 128], strides = [1, 1]} : vector<8x384xf32> to vector<8x128xf32>
    %199 = arith.addf %197, %198 : vector<8x128xf32>
    %200 = arith.negf %199 : vector<8x128xf32>
    %201 = math.exp %200 : vector<8x128xf32>
    %cst_52 = arith.constant 1.000000e+00 : f32
    %202 = vector.broadcast %cst_52 : f32 to vector<8x128xf32>
    %203 = arith.addf %202, %201 : vector<8x128xf32>
    %204 = arith.divf %202, %203 : vector<8x128xf32>
    %205 = vector.extract_strided_slice %186 {offsets = [0, 256], sizes = [8, 128], strides = [1, 1]} : vector<8x384xf32> to vector<8x128xf32>
    %206 = vector.extract_strided_slice %188 {offsets = [0, 256], sizes = [8, 128], strides = [1, 1]} : vector<8x384xf32> to vector<8x128xf32>
    %207 = vector.broadcast %3 : vector<1x128xf32> to vector<8x128xf32>
    %208 = arith.addf %206, %207 : vector<8x128xf32>
    %209 = arith.mulf %196, %208 : vector<8x128xf32>
    %210 = arith.addf %205, %209 : vector<8x128xf32>
    %211 = math.tanh %210 : vector<8x128xf32>
    %cst_53 = arith.constant 1.000000e+00 : f32
    %212 = vector.broadcast %cst_53 : f32 to vector<8x128xf32>
    %213 = arith.subf %212, %204 : vector<8x128xf32>
    %214 = arith.mulf %213, %211 : vector<8x128xf32>
    %215 = arith.mulf %204, %146 : vector<8x128xf32>
    %216 = arith.addf %214, %215 : vector<8x128xf32>
    %c24 = arith.constant 24 : index
    %c0_54 = arith.constant 0 : index
    %217 = vector.load %arg0[%c24, %c0_54] : memref<80x1xf32, #tpu.memory_space<vmem>>, vector<8x1xf32>
    %218 = vector.broadcast %217 : vector<8x1xf32> to vector<8x384xf32>
    %219 = vector.broadcast %4 : vector<1x384xf32> to vector<8x384xf32>
    %220 = arith.mulf %218, %219 : vector<8x384xf32>
    %221 = vector.broadcast %0 : vector<1x384xf32> to vector<8x384xf32>
    %222 = arith.addf %220, %221 : vector<8x384xf32>
    %c16_55 = arith.constant 16 : index
    %c0_56 = arith.constant 0 : index
    %223 = vector.load %arg1[%c16_55, %c0_56] : memref<400x384xf32, #tpu.memory_space<vmem>>, vector<128x384xf32>
    %cst_57 = arith.constant dense<0.000000e+00> : vector<8x384xf32>
    %224 = tpu.matmul %182, %223, %cst_57 {dimension_numbers = #tpu.dot_dimension_numbers<[1], [0], [0], [1], [0, 0, 1, 1], [], []>} : vector<8x128xf32>, vector<128x384xf32>, vector<8x384xf32> -> vector<8x384xf32>
    %225 = vector.extract_strided_slice %222 {offsets = [0, 0], sizes = [8, 128], strides = [1, 1]} : vector<8x384xf32> to vector<8x128xf32>
    %226 = vector.extract_strided_slice %224 {offsets = [0, 0], sizes = [8, 128], strides = [1, 1]} : vector<8x384xf32> to vector<8x128xf32>
    %227 = arith.addf %225, %226 : vector<8x128xf32>
    %228 = arith.negf %227 : vector<8x128xf32>
    %229 = math.exp %228 : vector<8x128xf32>
    %cst_58 = arith.constant 1.000000e+00 : f32
    %230 = vector.broadcast %cst_58 : f32 to vector<8x128xf32>
    %231 = arith.addf %230, %229 : vector<8x128xf32>
    %232 = arith.divf %230, %231 : vector<8x128xf32>
    %233 = vector.extract_strided_slice %222 {offsets = [0, 128], sizes = [8, 128], strides = [1, 1]} : vector<8x384xf32> to vector<8x128xf32>
    %234 = vector.extract_strided_slice %224 {offsets = [0, 128], sizes = [8, 128], strides = [1, 1]} : vector<8x384xf32> to vector<8x128xf32>
    %235 = arith.addf %233, %234 : vector<8x128xf32>
    %236 = arith.negf %235 : vector<8x128xf32>
    %237 = math.exp %236 : vector<8x128xf32>
    %cst_59 = arith.constant 1.000000e+00 : f32
    %238 = vector.broadcast %cst_59 : f32 to vector<8x128xf32>
    %239 = arith.addf %238, %237 : vector<8x128xf32>
    %240 = arith.divf %238, %239 : vector<8x128xf32>
    %241 = vector.extract_strided_slice %222 {offsets = [0, 256], sizes = [8, 128], strides = [1, 1]} : vector<8x384xf32> to vector<8x128xf32>
    %242 = vector.extract_strided_slice %224 {offsets = [0, 256], sizes = [8, 128], strides = [1, 1]} : vector<8x384xf32> to vector<8x128xf32>
    %243 = vector.broadcast %2 : vector<1x128xf32> to vector<8x128xf32>
    %244 = arith.addf %242, %243 : vector<8x128xf32>
    %245 = arith.mulf %232, %244 : vector<8x128xf32>
    %246 = arith.addf %241, %245 : vector<8x128xf32>
    %247 = math.tanh %246 : vector<8x128xf32>
    %cst_60 = arith.constant 1.000000e+00 : f32
    %248 = vector.broadcast %cst_60 : f32 to vector<8x128xf32>
    %249 = arith.subf %248, %240 : vector<8x128xf32>
    %250 = arith.mulf %249, %247 : vector<8x128xf32>
    %251 = arith.mulf %240, %182 : vector<8x128xf32>
    %252 = arith.addf %250, %251 : vector<8x128xf32>
    %c144_61 = arith.constant 144 : index
    %c0_62 = arith.constant 0 : index
    %253 = vector.load %arg1[%c144_61, %c0_62] : memref<400x384xf32, #tpu.memory_space<vmem>>, vector<128x384xf32>
    %cst_63 = arith.constant dense<0.000000e+00> : vector<8x384xf32>
    %254 = tpu.matmul %252, %253, %cst_63 {dimension_numbers = #tpu.dot_dimension_numbers<[1], [0], [0], [1], [0, 0, 1, 1], [], []>} : vector<8x128xf32>, vector<128x384xf32>, vector<8x384xf32> -> vector<8x384xf32>
    %255 = vector.broadcast %1 : vector<1x384xf32> to vector<8x384xf32>
    %256 = arith.addf %254, %255 : vector<8x384xf32>
    %c272_64 = arith.constant 272 : index
    %c0_65 = arith.constant 0 : index
    %257 = vector.load %arg1[%c272_64, %c0_65] : memref<400x384xf32, #tpu.memory_space<vmem>>, vector<128x384xf32>
    %cst_66 = arith.constant dense<0.000000e+00> : vector<8x384xf32>
    %258 = tpu.matmul %216, %257, %cst_66 {dimension_numbers = #tpu.dot_dimension_numbers<[1], [0], [0], [1], [0, 0, 1, 1], [], []>} : vector<8x128xf32>, vector<128x384xf32>, vector<8x384xf32> -> vector<8x384xf32>
    %259 = vector.extract_strided_slice %256 {offsets = [0, 0], sizes = [8, 128], strides = [1, 1]} : vector<8x384xf32> to vector<8x128xf32>
    %260 = vector.extract_strided_slice %258 {offsets = [0, 0], sizes = [8, 128], strides = [1, 1]} : vector<8x384xf32> to vector<8x128xf32>
    %261 = arith.addf %259, %260 : vector<8x128xf32>
    %262 = arith.negf %261 : vector<8x128xf32>
    %263 = math.exp %262 : vector<8x128xf32>
    %cst_67 = arith.constant 1.000000e+00 : f32
    %264 = vector.broadcast %cst_67 : f32 to vector<8x128xf32>
    %265 = arith.addf %264, %263 : vector<8x128xf32>
    %266 = arith.divf %264, %265 : vector<8x128xf32>
    %267 = vector.extract_strided_slice %256 {offsets = [0, 128], sizes = [8, 128], strides = [1, 1]} : vector<8x384xf32> to vector<8x128xf32>
    %268 = vector.extract_strided_slice %258 {offsets = [0, 128], sizes = [8, 128], strides = [1, 1]} : vector<8x384xf32> to vector<8x128xf32>
    %269 = arith.addf %267, %268 : vector<8x128xf32>
    %270 = arith.negf %269 : vector<8x128xf32>
    %271 = math.exp %270 : vector<8x128xf32>
    %cst_68 = arith.constant 1.000000e+00 : f32
    %272 = vector.broadcast %cst_68 : f32 to vector<8x128xf32>
    %273 = arith.addf %272, %271 : vector<8x128xf32>
    %274 = arith.divf %272, %273 : vector<8x128xf32>
    %275 = vector.extract_strided_slice %256 {offsets = [0, 256], sizes = [8, 128], strides = [1, 1]} : vector<8x384xf32> to vector<8x128xf32>
    %276 = vector.extract_strided_slice %258 {offsets = [0, 256], sizes = [8, 128], strides = [1, 1]} : vector<8x384xf32> to vector<8x128xf32>
    %277 = vector.broadcast %3 : vector<1x128xf32> to vector<8x128xf32>
    %278 = arith.addf %276, %277 : vector<8x128xf32>
    %279 = arith.mulf %266, %278 : vector<8x128xf32>
    %280 = arith.addf %275, %279 : vector<8x128xf32>
    %281 = math.tanh %280 : vector<8x128xf32>
    %cst_69 = arith.constant 1.000000e+00 : f32
    %282 = vector.broadcast %cst_69 : f32 to vector<8x128xf32>
    %283 = arith.subf %282, %274 : vector<8x128xf32>
    %284 = arith.mulf %283, %281 : vector<8x128xf32>
    %285 = arith.mulf %274, %216 : vector<8x128xf32>
    %286 = arith.addf %284, %285 : vector<8x128xf32>
    %c32 = arith.constant 32 : index
    %c0_70 = arith.constant 0 : index
    %287 = vector.load %arg0[%c32, %c0_70] : memref<80x1xf32, #tpu.memory_space<vmem>>, vector<8x1xf32>
    %288 = vector.broadcast %287 : vector<8x1xf32> to vector<8x384xf32>
    %289 = vector.broadcast %4 : vector<1x384xf32> to vector<8x384xf32>
    %290 = arith.mulf %288, %289 : vector<8x384xf32>
    %291 = vector.broadcast %0 : vector<1x384xf32> to vector<8x384xf32>
    %292 = arith.addf %290, %291 : vector<8x384xf32>
    %c16_71 = arith.constant 16 : index
    %c0_72 = arith.constant 0 : index
    %293 = vector.load %arg1[%c16_71, %c0_72] : memref<400x384xf32, #tpu.memory_space<vmem>>, vector<128x384xf32>
    %cst_73 = arith.constant dense<0.000000e+00> : vector<8x384xf32>
    %294 = tpu.matmul %252, %293, %cst_73 {dimension_numbers = #tpu.dot_dimension_numbers<[1], [0], [0], [1], [0, 0, 1, 1], [], []>} : vector<8x128xf32>, vector<128x384xf32>, vector<8x384xf32> -> vector<8x384xf32>
    %295 = vector.extract_strided_slice %292 {offsets = [0, 0], sizes = [8, 128], strides = [1, 1]} : vector<8x384xf32> to vector<8x128xf32>
    %296 = vector.extract_strided_slice %294 {offsets = [0, 0], sizes = [8, 128], strides = [1, 1]} : vector<8x384xf32> to vector<8x128xf32>
    %297 = arith.addf %295, %296 : vector<8x128xf32>
    %298 = arith.negf %297 : vector<8x128xf32>
    %299 = math.exp %298 : vector<8x128xf32>
    %cst_74 = arith.constant 1.000000e+00 : f32
    %300 = vector.broadcast %cst_74 : f32 to vector<8x128xf32>
    %301 = arith.addf %300, %299 : vector<8x128xf32>
    %302 = arith.divf %300, %301 : vector<8x128xf32>
    %303 = vector.extract_strided_slice %292 {offsets = [0, 128], sizes = [8, 128], strides = [1, 1]} : vector<8x384xf32> to vector<8x128xf32>
    %304 = vector.extract_strided_slice %294 {offsets = [0, 128], sizes = [8, 128], strides = [1, 1]} : vector<8x384xf32> to vector<8x128xf32>
    %305 = arith.addf %303, %304 : vector<8x128xf32>
    %306 = arith.negf %305 : vector<8x128xf32>
    %307 = math.exp %306 : vector<8x128xf32>
    %cst_75 = arith.constant 1.000000e+00 : f32
    %308 = vector.broadcast %cst_75 : f32 to vector<8x128xf32>
    %309 = arith.addf %308, %307 : vector<8x128xf32>
    %310 = arith.divf %308, %309 : vector<8x128xf32>
    %311 = vector.extract_strided_slice %292 {offsets = [0, 256], sizes = [8, 128], strides = [1, 1]} : vector<8x384xf32> to vector<8x128xf32>
    %312 = vector.extract_strided_slice %294 {offsets = [0, 256], sizes = [8, 128], strides = [1, 1]} : vector<8x384xf32> to vector<8x128xf32>
    %313 = vector.broadcast %2 : vector<1x128xf32> to vector<8x128xf32>
    %314 = arith.addf %312, %313 : vector<8x128xf32>
    %315 = arith.mulf %302, %314 : vector<8x128xf32>
    %316 = arith.addf %311, %315 : vector<8x128xf32>
    %317 = math.tanh %316 : vector<8x128xf32>
    %cst_76 = arith.constant 1.000000e+00 : f32
    %318 = vector.broadcast %cst_76 : f32 to vector<8x128xf32>
    %319 = arith.subf %318, %310 : vector<8x128xf32>
    %320 = arith.mulf %319, %317 : vector<8x128xf32>
    %321 = arith.mulf %310, %252 : vector<8x128xf32>
    %322 = arith.addf %320, %321 : vector<8x128xf32>
    %c144_77 = arith.constant 144 : index
    %c0_78 = arith.constant 0 : index
    %323 = vector.load %arg1[%c144_77, %c0_78] : memref<400x384xf32, #tpu.memory_space<vmem>>, vector<128x384xf32>
    %cst_79 = arith.constant dense<0.000000e+00> : vector<8x384xf32>
    %324 = tpu.matmul %322, %323, %cst_79 {dimension_numbers = #tpu.dot_dimension_numbers<[1], [0], [0], [1], [0, 0, 1, 1], [], []>} : vector<8x128xf32>, vector<128x384xf32>, vector<8x384xf32> -> vector<8x384xf32>
    %325 = vector.broadcast %1 : vector<1x384xf32> to vector<8x384xf32>
    %326 = arith.addf %324, %325 : vector<8x384xf32>
    %c272_80 = arith.constant 272 : index
    %c0_81 = arith.constant 0 : index
    %327 = vector.load %arg1[%c272_80, %c0_81] : memref<400x384xf32, #tpu.memory_space<vmem>>, vector<128x384xf32>
    %cst_82 = arith.constant dense<0.000000e+00> : vector<8x384xf32>
    %328 = tpu.matmul %286, %327, %cst_82 {dimension_numbers = #tpu.dot_dimension_numbers<[1], [0], [0], [1], [0, 0, 1, 1], [], []>} : vector<8x128xf32>, vector<128x384xf32>, vector<8x384xf32> -> vector<8x384xf32>
    %329 = vector.extract_strided_slice %326 {offsets = [0, 0], sizes = [8, 128], strides = [1, 1]} : vector<8x384xf32> to vector<8x128xf32>
    %330 = vector.extract_strided_slice %328 {offsets = [0, 0], sizes = [8, 128], strides = [1, 1]} : vector<8x384xf32> to vector<8x128xf32>
    %331 = arith.addf %329, %330 : vector<8x128xf32>
    %332 = arith.negf %331 : vector<8x128xf32>
    %333 = math.exp %332 : vector<8x128xf32>
    %cst_83 = arith.constant 1.000000e+00 : f32
    %334 = vector.broadcast %cst_83 : f32 to vector<8x128xf32>
    %335 = arith.addf %334, %333 : vector<8x128xf32>
    %336 = arith.divf %334, %335 : vector<8x128xf32>
    %337 = vector.extract_strided_slice %326 {offsets = [0, 128], sizes = [8, 128], strides = [1, 1]} : vector<8x384xf32> to vector<8x128xf32>
    %338 = vector.extract_strided_slice %328 {offsets = [0, 128], sizes = [8, 128], strides = [1, 1]} : vector<8x384xf32> to vector<8x128xf32>
    %339 = arith.addf %337, %338 : vector<8x128xf32>
    %340 = arith.negf %339 : vector<8x128xf32>
    %341 = math.exp %340 : vector<8x128xf32>
    %cst_84 = arith.constant 1.000000e+00 : f32
    %342 = vector.broadcast %cst_84 : f32 to vector<8x128xf32>
    %343 = arith.addf %342, %341 : vector<8x128xf32>
    %344 = arith.divf %342, %343 : vector<8x128xf32>
    %345 = vector.extract_strided_slice %326 {offsets = [0, 256], sizes = [8, 128], strides = [1, 1]} : vector<8x384xf32> to vector<8x128xf32>
    %346 = vector.extract_strided_slice %328 {offsets = [0, 256], sizes = [8, 128], strides = [1, 1]} : vector<8x384xf32> to vector<8x128xf32>
    %347 = vector.broadcast %3 : vector<1x128xf32> to vector<8x128xf32>
    %348 = arith.addf %346, %347 : vector<8x128xf32>
    %349 = arith.mulf %336, %348 : vector<8x128xf32>
    %350 = arith.addf %345, %349 : vector<8x128xf32>
    %351 = math.tanh %350 : vector<8x128xf32>
    %cst_85 = arith.constant 1.000000e+00 : f32
    %352 = vector.broadcast %cst_85 : f32 to vector<8x128xf32>
    %353 = arith.subf %352, %344 : vector<8x128xf32>
    %354 = arith.mulf %353, %351 : vector<8x128xf32>
    %355 = arith.mulf %344, %286 : vector<8x128xf32>
    %356 = arith.addf %354, %355 : vector<8x128xf32>
    %c40 = arith.constant 40 : index
    %c0_86 = arith.constant 0 : index
    %357 = vector.load %arg0[%c40, %c0_86] : memref<80x1xf32, #tpu.memory_space<vmem>>, vector<8x1xf32>
    %358 = vector.broadcast %357 : vector<8x1xf32> to vector<8x384xf32>
    %359 = vector.broadcast %4 : vector<1x384xf32> to vector<8x384xf32>
    %360 = arith.mulf %358, %359 : vector<8x384xf32>
    %361 = vector.broadcast %0 : vector<1x384xf32> to vector<8x384xf32>
    %362 = arith.addf %360, %361 : vector<8x384xf32>
    %c16_87 = arith.constant 16 : index
    %c0_88 = arith.constant 0 : index
    %363 = vector.load %arg1[%c16_87, %c0_88] : memref<400x384xf32, #tpu.memory_space<vmem>>, vector<128x384xf32>
    %cst_89 = arith.constant dense<0.000000e+00> : vector<8x384xf32>
    %364 = tpu.matmul %322, %363, %cst_89 {dimension_numbers = #tpu.dot_dimension_numbers<[1], [0], [0], [1], [0, 0, 1, 1], [], []>} : vector<8x128xf32>, vector<128x384xf32>, vector<8x384xf32> -> vector<8x384xf32>
    %365 = vector.extract_strided_slice %362 {offsets = [0, 0], sizes = [8, 128], strides = [1, 1]} : vector<8x384xf32> to vector<8x128xf32>
    %366 = vector.extract_strided_slice %364 {offsets = [0, 0], sizes = [8, 128], strides = [1, 1]} : vector<8x384xf32> to vector<8x128xf32>
    %367 = arith.addf %365, %366 : vector<8x128xf32>
    %368 = arith.negf %367 : vector<8x128xf32>
    %369 = math.exp %368 : vector<8x128xf32>
    %cst_90 = arith.constant 1.000000e+00 : f32
    %370 = vector.broadcast %cst_90 : f32 to vector<8x128xf32>
    %371 = arith.addf %370, %369 : vector<8x128xf32>
    %372 = arith.divf %370, %371 : vector<8x128xf32>
    %373 = vector.extract_strided_slice %362 {offsets = [0, 128], sizes = [8, 128], strides = [1, 1]} : vector<8x384xf32> to vector<8x128xf32>
    %374 = vector.extract_strided_slice %364 {offsets = [0, 128], sizes = [8, 128], strides = [1, 1]} : vector<8x384xf32> to vector<8x128xf32>
    %375 = arith.addf %373, %374 : vector<8x128xf32>
    %376 = arith.negf %375 : vector<8x128xf32>
    %377 = math.exp %376 : vector<8x128xf32>
    %cst_91 = arith.constant 1.000000e+00 : f32
    %378 = vector.broadcast %cst_91 : f32 to vector<8x128xf32>
    %379 = arith.addf %378, %377 : vector<8x128xf32>
    %380 = arith.divf %378, %379 : vector<8x128xf32>
    %381 = vector.extract_strided_slice %362 {offsets = [0, 256], sizes = [8, 128], strides = [1, 1]} : vector<8x384xf32> to vector<8x128xf32>
    %382 = vector.extract_strided_slice %364 {offsets = [0, 256], sizes = [8, 128], strides = [1, 1]} : vector<8x384xf32> to vector<8x128xf32>
    %383 = vector.broadcast %2 : vector<1x128xf32> to vector<8x128xf32>
    %384 = arith.addf %382, %383 : vector<8x128xf32>
    %385 = arith.mulf %372, %384 : vector<8x128xf32>
    %386 = arith.addf %381, %385 : vector<8x128xf32>
    %387 = math.tanh %386 : vector<8x128xf32>
    %cst_92 = arith.constant 1.000000e+00 : f32
    %388 = vector.broadcast %cst_92 : f32 to vector<8x128xf32>
    %389 = arith.subf %388, %380 : vector<8x128xf32>
    %390 = arith.mulf %389, %387 : vector<8x128xf32>
    %391 = arith.mulf %380, %322 : vector<8x128xf32>
    %392 = arith.addf %390, %391 : vector<8x128xf32>
    %c144_93 = arith.constant 144 : index
    %c0_94 = arith.constant 0 : index
    %393 = vector.load %arg1[%c144_93, %c0_94] : memref<400x384xf32, #tpu.memory_space<vmem>>, vector<128x384xf32>
    %cst_95 = arith.constant dense<0.000000e+00> : vector<8x384xf32>
    %394 = tpu.matmul %392, %393, %cst_95 {dimension_numbers = #tpu.dot_dimension_numbers<[1], [0], [0], [1], [0, 0, 1, 1], [], []>} : vector<8x128xf32>, vector<128x384xf32>, vector<8x384xf32> -> vector<8x384xf32>
    %395 = vector.broadcast %1 : vector<1x384xf32> to vector<8x384xf32>
    %396 = arith.addf %394, %395 : vector<8x384xf32>
    %c272_96 = arith.constant 272 : index
    %c0_97 = arith.constant 0 : index
    %397 = vector.load %arg1[%c272_96, %c0_97] : memref<400x384xf32, #tpu.memory_space<vmem>>, vector<128x384xf32>
    %cst_98 = arith.constant dense<0.000000e+00> : vector<8x384xf32>
    %398 = tpu.matmul %356, %397, %cst_98 {dimension_numbers = #tpu.dot_dimension_numbers<[1], [0], [0], [1], [0, 0, 1, 1], [], []>} : vector<8x128xf32>, vector<128x384xf32>, vector<8x384xf32> -> vector<8x384xf32>
    %399 = vector.extract_strided_slice %396 {offsets = [0, 0], sizes = [8, 128], strides = [1, 1]} : vector<8x384xf32> to vector<8x128xf32>
    %400 = vector.extract_strided_slice %398 {offsets = [0, 0], sizes = [8, 128], strides = [1, 1]} : vector<8x384xf32> to vector<8x128xf32>
    %401 = arith.addf %399, %400 : vector<8x128xf32>
    %402 = arith.negf %401 : vector<8x128xf32>
    %403 = math.exp %402 : vector<8x128xf32>
    %cst_99 = arith.constant 1.000000e+00 : f32
    %404 = vector.broadcast %cst_99 : f32 to vector<8x128xf32>
    %405 = arith.addf %404, %403 : vector<8x128xf32>
    %406 = arith.divf %404, %405 : vector<8x128xf32>
    %407 = vector.extract_strided_slice %396 {offsets = [0, 128], sizes = [8, 128], strides = [1, 1]} : vector<8x384xf32> to vector<8x128xf32>
    %408 = vector.extract_strided_slice %398 {offsets = [0, 128], sizes = [8, 128], strides = [1, 1]} : vector<8x384xf32> to vector<8x128xf32>
    %409 = arith.addf %407, %408 : vector<8x128xf32>
    %410 = arith.negf %409 : vector<8x128xf32>
    %411 = math.exp %410 : vector<8x128xf32>
    %cst_100 = arith.constant 1.000000e+00 : f32
    %412 = vector.broadcast %cst_100 : f32 to vector<8x128xf32>
    %413 = arith.addf %412, %411 : vector<8x128xf32>
    %414 = arith.divf %412, %413 : vector<8x128xf32>
    %415 = vector.extract_strided_slice %396 {offsets = [0, 256], sizes = [8, 128], strides = [1, 1]} : vector<8x384xf32> to vector<8x128xf32>
    %416 = vector.extract_strided_slice %398 {offsets = [0, 256], sizes = [8, 128], strides = [1, 1]} : vector<8x384xf32> to vector<8x128xf32>
    %417 = vector.broadcast %3 : vector<1x128xf32> to vector<8x128xf32>
    %418 = arith.addf %416, %417 : vector<8x128xf32>
    %419 = arith.mulf %406, %418 : vector<8x128xf32>
    %420 = arith.addf %415, %419 : vector<8x128xf32>
    %421 = math.tanh %420 : vector<8x128xf32>
    %cst_101 = arith.constant 1.000000e+00 : f32
    %422 = vector.broadcast %cst_101 : f32 to vector<8x128xf32>
    %423 = arith.subf %422, %414 : vector<8x128xf32>
    %424 = arith.mulf %423, %421 : vector<8x128xf32>
    %425 = arith.mulf %414, %356 : vector<8x128xf32>
    %426 = arith.addf %424, %425 : vector<8x128xf32>
    %c48 = arith.constant 48 : index
    %c0_102 = arith.constant 0 : index
    %427 = vector.load %arg0[%c48, %c0_102] : memref<80x1xf32, #tpu.memory_space<vmem>>, vector<8x1xf32>
    %428 = vector.broadcast %427 : vector<8x1xf32> to vector<8x384xf32>
    %429 = vector.broadcast %4 : vector<1x384xf32> to vector<8x384xf32>
    %430 = arith.mulf %428, %429 : vector<8x384xf32>
    %431 = vector.broadcast %0 : vector<1x384xf32> to vector<8x384xf32>
    %432 = arith.addf %430, %431 : vector<8x384xf32>
    %c16_103 = arith.constant 16 : index
    %c0_104 = arith.constant 0 : index
    %433 = vector.load %arg1[%c16_103, %c0_104] : memref<400x384xf32, #tpu.memory_space<vmem>>, vector<128x384xf32>
    %cst_105 = arith.constant dense<0.000000e+00> : vector<8x384xf32>
    %434 = tpu.matmul %392, %433, %cst_105 {dimension_numbers = #tpu.dot_dimension_numbers<[1], [0], [0], [1], [0, 0, 1, 1], [], []>} : vector<8x128xf32>, vector<128x384xf32>, vector<8x384xf32> -> vector<8x384xf32>
    %435 = vector.extract_strided_slice %432 {offsets = [0, 0], sizes = [8, 128], strides = [1, 1]} : vector<8x384xf32> to vector<8x128xf32>
    %436 = vector.extract_strided_slice %434 {offsets = [0, 0], sizes = [8, 128], strides = [1, 1]} : vector<8x384xf32> to vector<8x128xf32>
    %437 = arith.addf %435, %436 : vector<8x128xf32>
    %438 = arith.negf %437 : vector<8x128xf32>
    %439 = math.exp %438 : vector<8x128xf32>
    %cst_106 = arith.constant 1.000000e+00 : f32
    %440 = vector.broadcast %cst_106 : f32 to vector<8x128xf32>
    %441 = arith.addf %440, %439 : vector<8x128xf32>
    %442 = arith.divf %440, %441 : vector<8x128xf32>
    %443 = vector.extract_strided_slice %432 {offsets = [0, 128], sizes = [8, 128], strides = [1, 1]} : vector<8x384xf32> to vector<8x128xf32>
    %444 = vector.extract_strided_slice %434 {offsets = [0, 128], sizes = [8, 128], strides = [1, 1]} : vector<8x384xf32> to vector<8x128xf32>
    %445 = arith.addf %443, %444 : vector<8x128xf32>
    %446 = arith.negf %445 : vector<8x128xf32>
    %447 = math.exp %446 : vector<8x128xf32>
    %cst_107 = arith.constant 1.000000e+00 : f32
    %448 = vector.broadcast %cst_107 : f32 to vector<8x128xf32>
    %449 = arith.addf %448, %447 : vector<8x128xf32>
    %450 = arith.divf %448, %449 : vector<8x128xf32>
    %451 = vector.extract_strided_slice %432 {offsets = [0, 256], sizes = [8, 128], strides = [1, 1]} : vector<8x384xf32> to vector<8x128xf32>
    %452 = vector.extract_strided_slice %434 {offsets = [0, 256], sizes = [8, 128], strides = [1, 1]} : vector<8x384xf32> to vector<8x128xf32>
    %453 = vector.broadcast %2 : vector<1x128xf32> to vector<8x128xf32>
    %454 = arith.addf %452, %453 : vector<8x128xf32>
    %455 = arith.mulf %442, %454 : vector<8x128xf32>
    %456 = arith.addf %451, %455 : vector<8x128xf32>
    %457 = math.tanh %456 : vector<8x128xf32>
    %cst_108 = arith.constant 1.000000e+00 : f32
    %458 = vector.broadcast %cst_108 : f32 to vector<8x128xf32>
    %459 = arith.subf %458, %450 : vector<8x128xf32>
    %460 = arith.mulf %459, %457 : vector<8x128xf32>
    %461 = arith.mulf %450, %392 : vector<8x128xf32>
    %462 = arith.addf %460, %461 : vector<8x128xf32>
    %c144_109 = arith.constant 144 : index
    %c0_110 = arith.constant 0 : index
    %463 = vector.load %arg1[%c144_109, %c0_110] : memref<400x384xf32, #tpu.memory_space<vmem>>, vector<128x384xf32>
    %cst_111 = arith.constant dense<0.000000e+00> : vector<8x384xf32>
    %464 = tpu.matmul %462, %463, %cst_111 {dimension_numbers = #tpu.dot_dimension_numbers<[1], [0], [0], [1], [0, 0, 1, 1], [], []>} : vector<8x128xf32>, vector<128x384xf32>, vector<8x384xf32> -> vector<8x384xf32>
    %465 = vector.broadcast %1 : vector<1x384xf32> to vector<8x384xf32>
    %466 = arith.addf %464, %465 : vector<8x384xf32>
    %c272_112 = arith.constant 272 : index
    %c0_113 = arith.constant 0 : index
    %467 = vector.load %arg1[%c272_112, %c0_113] : memref<400x384xf32, #tpu.memory_space<vmem>>, vector<128x384xf32>
    %cst_114 = arith.constant dense<0.000000e+00> : vector<8x384xf32>
    %468 = tpu.matmul %426, %467, %cst_114 {dimension_numbers = #tpu.dot_dimension_numbers<[1], [0], [0], [1], [0, 0, 1, 1], [], []>} : vector<8x128xf32>, vector<128x384xf32>, vector<8x384xf32> -> vector<8x384xf32>
    %469 = vector.extract_strided_slice %466 {offsets = [0, 0], sizes = [8, 128], strides = [1, 1]} : vector<8x384xf32> to vector<8x128xf32>
    %470 = vector.extract_strided_slice %468 {offsets = [0, 0], sizes = [8, 128], strides = [1, 1]} : vector<8x384xf32> to vector<8x128xf32>
    %471 = arith.addf %469, %470 : vector<8x128xf32>
    %472 = arith.negf %471 : vector<8x128xf32>
    %473 = math.exp %472 : vector<8x128xf32>
    %cst_115 = arith.constant 1.000000e+00 : f32
    %474 = vector.broadcast %cst_115 : f32 to vector<8x128xf32>
    %475 = arith.addf %474, %473 : vector<8x128xf32>
    %476 = arith.divf %474, %475 : vector<8x128xf32>
    %477 = vector.extract_strided_slice %466 {offsets = [0, 128], sizes = [8, 128], strides = [1, 1]} : vector<8x384xf32> to vector<8x128xf32>
    %478 = vector.extract_strided_slice %468 {offsets = [0, 128], sizes = [8, 128], strides = [1, 1]} : vector<8x384xf32> to vector<8x128xf32>
    %479 = arith.addf %477, %478 : vector<8x128xf32>
    %480 = arith.negf %479 : vector<8x128xf32>
    %481 = math.exp %480 : vector<8x128xf32>
    %cst_116 = arith.constant 1.000000e+00 : f32
    %482 = vector.broadcast %cst_116 : f32 to vector<8x128xf32>
    %483 = arith.addf %482, %481 : vector<8x128xf32>
    %484 = arith.divf %482, %483 : vector<8x128xf32>
    %485 = vector.extract_strided_slice %466 {offsets = [0, 256], sizes = [8, 128], strides = [1, 1]} : vector<8x384xf32> to vector<8x128xf32>
    %486 = vector.extract_strided_slice %468 {offsets = [0, 256], sizes = [8, 128], strides = [1, 1]} : vector<8x384xf32> to vector<8x128xf32>
    %487 = vector.broadcast %3 : vector<1x128xf32> to vector<8x128xf32>
    %488 = arith.addf %486, %487 : vector<8x128xf32>
    %489 = arith.mulf %476, %488 : vector<8x128xf32>
    %490 = arith.addf %485, %489 : vector<8x128xf32>
    %491 = math.tanh %490 : vector<8x128xf32>
    %cst_117 = arith.constant 1.000000e+00 : f32
    %492 = vector.broadcast %cst_117 : f32 to vector<8x128xf32>
    %493 = arith.subf %492, %484 : vector<8x128xf32>
    %494 = arith.mulf %493, %491 : vector<8x128xf32>
    %495 = arith.mulf %484, %426 : vector<8x128xf32>
    %496 = arith.addf %494, %495 : vector<8x128xf32>
    %c56 = arith.constant 56 : index
    %c0_118 = arith.constant 0 : index
    %497 = vector.load %arg0[%c56, %c0_118] : memref<80x1xf32, #tpu.memory_space<vmem>>, vector<8x1xf32>
    %498 = vector.broadcast %497 : vector<8x1xf32> to vector<8x384xf32>
    %499 = vector.broadcast %4 : vector<1x384xf32> to vector<8x384xf32>
    %500 = arith.mulf %498, %499 : vector<8x384xf32>
    %501 = vector.broadcast %0 : vector<1x384xf32> to vector<8x384xf32>
    %502 = arith.addf %500, %501 : vector<8x384xf32>
    %c16_119 = arith.constant 16 : index
    %c0_120 = arith.constant 0 : index
    %503 = vector.load %arg1[%c16_119, %c0_120] : memref<400x384xf32, #tpu.memory_space<vmem>>, vector<128x384xf32>
    %cst_121 = arith.constant dense<0.000000e+00> : vector<8x384xf32>
    %504 = tpu.matmul %462, %503, %cst_121 {dimension_numbers = #tpu.dot_dimension_numbers<[1], [0], [0], [1], [0, 0, 1, 1], [], []>} : vector<8x128xf32>, vector<128x384xf32>, vector<8x384xf32> -> vector<8x384xf32>
    %505 = vector.extract_strided_slice %502 {offsets = [0, 0], sizes = [8, 128], strides = [1, 1]} : vector<8x384xf32> to vector<8x128xf32>
    %506 = vector.extract_strided_slice %504 {offsets = [0, 0], sizes = [8, 128], strides = [1, 1]} : vector<8x384xf32> to vector<8x128xf32>
    %507 = arith.addf %505, %506 : vector<8x128xf32>
    %508 = arith.negf %507 : vector<8x128xf32>
    %509 = math.exp %508 : vector<8x128xf32>
    %cst_122 = arith.constant 1.000000e+00 : f32
    %510 = vector.broadcast %cst_122 : f32 to vector<8x128xf32>
    %511 = arith.addf %510, %509 : vector<8x128xf32>
    %512 = arith.divf %510, %511 : vector<8x128xf32>
    %513 = vector.extract_strided_slice %502 {offsets = [0, 128], sizes = [8, 128], strides = [1, 1]} : vector<8x384xf32> to vector<8x128xf32>
    %514 = vector.extract_strided_slice %504 {offsets = [0, 128], sizes = [8, 128], strides = [1, 1]} : vector<8x384xf32> to vector<8x128xf32>
    %515 = arith.addf %513, %514 : vector<8x128xf32>
    %516 = arith.negf %515 : vector<8x128xf32>
    %517 = math.exp %516 : vector<8x128xf32>
    %cst_123 = arith.constant 1.000000e+00 : f32
    %518 = vector.broadcast %cst_123 : f32 to vector<8x128xf32>
    %519 = arith.addf %518, %517 : vector<8x128xf32>
    %520 = arith.divf %518, %519 : vector<8x128xf32>
    %521 = vector.extract_strided_slice %502 {offsets = [0, 256], sizes = [8, 128], strides = [1, 1]} : vector<8x384xf32> to vector<8x128xf32>
    %522 = vector.extract_strided_slice %504 {offsets = [0, 256], sizes = [8, 128], strides = [1, 1]} : vector<8x384xf32> to vector<8x128xf32>
    %523 = vector.broadcast %2 : vector<1x128xf32> to vector<8x128xf32>
    %524 = arith.addf %522, %523 : vector<8x128xf32>
    %525 = arith.mulf %512, %524 : vector<8x128xf32>
    %526 = arith.addf %521, %525 : vector<8x128xf32>
    %527 = math.tanh %526 : vector<8x128xf32>
    %cst_124 = arith.constant 1.000000e+00 : f32
    %528 = vector.broadcast %cst_124 : f32 to vector<8x128xf32>
    %529 = arith.subf %528, %520 : vector<8x128xf32>
    %530 = arith.mulf %529, %527 : vector<8x128xf32>
    %531 = arith.mulf %520, %462 : vector<8x128xf32>
    %532 = arith.addf %530, %531 : vector<8x128xf32>
    %c144_125 = arith.constant 144 : index
    %c0_126 = arith.constant 0 : index
    %533 = vector.load %arg1[%c144_125, %c0_126] : memref<400x384xf32, #tpu.memory_space<vmem>>, vector<128x384xf32>
    %cst_127 = arith.constant dense<0.000000e+00> : vector<8x384xf32>
    %534 = tpu.matmul %532, %533, %cst_127 {dimension_numbers = #tpu.dot_dimension_numbers<[1], [0], [0], [1], [0, 0, 1, 1], [], []>} : vector<8x128xf32>, vector<128x384xf32>, vector<8x384xf32> -> vector<8x384xf32>
    %535 = vector.broadcast %1 : vector<1x384xf32> to vector<8x384xf32>
    %536 = arith.addf %534, %535 : vector<8x384xf32>
    %c272_128 = arith.constant 272 : index
    %c0_129 = arith.constant 0 : index
    %537 = vector.load %arg1[%c272_128, %c0_129] : memref<400x384xf32, #tpu.memory_space<vmem>>, vector<128x384xf32>
    %cst_130 = arith.constant dense<0.000000e+00> : vector<8x384xf32>
    %538 = tpu.matmul %496, %537, %cst_130 {dimension_numbers = #tpu.dot_dimension_numbers<[1], [0], [0], [1], [0, 0, 1, 1], [], []>} : vector<8x128xf32>, vector<128x384xf32>, vector<8x384xf32> -> vector<8x384xf32>
    %539 = vector.extract_strided_slice %536 {offsets = [0, 0], sizes = [8, 128], strides = [1, 1]} : vector<8x384xf32> to vector<8x128xf32>
    %540 = vector.extract_strided_slice %538 {offsets = [0, 0], sizes = [8, 128], strides = [1, 1]} : vector<8x384xf32> to vector<8x128xf32>
    %541 = arith.addf %539, %540 : vector<8x128xf32>
    %542 = arith.negf %541 : vector<8x128xf32>
    %543 = math.exp %542 : vector<8x128xf32>
    %cst_131 = arith.constant 1.000000e+00 : f32
    %544 = vector.broadcast %cst_131 : f32 to vector<8x128xf32>
    %545 = arith.addf %544, %543 : vector<8x128xf32>
    %546 = arith.divf %544, %545 : vector<8x128xf32>
    %547 = vector.extract_strided_slice %536 {offsets = [0, 128], sizes = [8, 128], strides = [1, 1]} : vector<8x384xf32> to vector<8x128xf32>
    %548 = vector.extract_strided_slice %538 {offsets = [0, 128], sizes = [8, 128], strides = [1, 1]} : vector<8x384xf32> to vector<8x128xf32>
    %549 = arith.addf %547, %548 : vector<8x128xf32>
    %550 = arith.negf %549 : vector<8x128xf32>
    %551 = math.exp %550 : vector<8x128xf32>
    %cst_132 = arith.constant 1.000000e+00 : f32
    %552 = vector.broadcast %cst_132 : f32 to vector<8x128xf32>
    %553 = arith.addf %552, %551 : vector<8x128xf32>
    %554 = arith.divf %552, %553 : vector<8x128xf32>
    %555 = vector.extract_strided_slice %536 {offsets = [0, 256], sizes = [8, 128], strides = [1, 1]} : vector<8x384xf32> to vector<8x128xf32>
    %556 = vector.extract_strided_slice %538 {offsets = [0, 256], sizes = [8, 128], strides = [1, 1]} : vector<8x384xf32> to vector<8x128xf32>
    %557 = vector.broadcast %3 : vector<1x128xf32> to vector<8x128xf32>
    %558 = arith.addf %556, %557 : vector<8x128xf32>
    %559 = arith.mulf %546, %558 : vector<8x128xf32>
    %560 = arith.addf %555, %559 : vector<8x128xf32>
    %561 = math.tanh %560 : vector<8x128xf32>
    %cst_133 = arith.constant 1.000000e+00 : f32
    %562 = vector.broadcast %cst_133 : f32 to vector<8x128xf32>
    %563 = arith.subf %562, %554 : vector<8x128xf32>
    %564 = arith.mulf %563, %561 : vector<8x128xf32>
    %565 = arith.mulf %554, %496 : vector<8x128xf32>
    %566 = arith.addf %564, %565 : vector<8x128xf32>
    %c64 = arith.constant 64 : index
    %c0_134 = arith.constant 0 : index
    %567 = vector.load %arg0[%c64, %c0_134] : memref<80x1xf32, #tpu.memory_space<vmem>>, vector<8x1xf32>
    %568 = vector.broadcast %567 : vector<8x1xf32> to vector<8x384xf32>
    %569 = vector.broadcast %4 : vector<1x384xf32> to vector<8x384xf32>
    %570 = arith.mulf %568, %569 : vector<8x384xf32>
    %571 = vector.broadcast %0 : vector<1x384xf32> to vector<8x384xf32>
    %572 = arith.addf %570, %571 : vector<8x384xf32>
    %c16_135 = arith.constant 16 : index
    %c0_136 = arith.constant 0 : index
    %573 = vector.load %arg1[%c16_135, %c0_136] : memref<400x384xf32, #tpu.memory_space<vmem>>, vector<128x384xf32>
    %cst_137 = arith.constant dense<0.000000e+00> : vector<8x384xf32>
    %574 = tpu.matmul %532, %573, %cst_137 {dimension_numbers = #tpu.dot_dimension_numbers<[1], [0], [0], [1], [0, 0, 1, 1], [], []>} : vector<8x128xf32>, vector<128x384xf32>, vector<8x384xf32> -> vector<8x384xf32>
    %575 = vector.extract_strided_slice %572 {offsets = [0, 0], sizes = [8, 128], strides = [1, 1]} : vector<8x384xf32> to vector<8x128xf32>
    %576 = vector.extract_strided_slice %574 {offsets = [0, 0], sizes = [8, 128], strides = [1, 1]} : vector<8x384xf32> to vector<8x128xf32>
    %577 = arith.addf %575, %576 : vector<8x128xf32>
    %578 = arith.negf %577 : vector<8x128xf32>
    %579 = math.exp %578 : vector<8x128xf32>
    %cst_138 = arith.constant 1.000000e+00 : f32
    %580 = vector.broadcast %cst_138 : f32 to vector<8x128xf32>
    %581 = arith.addf %580, %579 : vector<8x128xf32>
    %582 = arith.divf %580, %581 : vector<8x128xf32>
    %583 = vector.extract_strided_slice %572 {offsets = [0, 128], sizes = [8, 128], strides = [1, 1]} : vector<8x384xf32> to vector<8x128xf32>
    %584 = vector.extract_strided_slice %574 {offsets = [0, 128], sizes = [8, 128], strides = [1, 1]} : vector<8x384xf32> to vector<8x128xf32>
    %585 = arith.addf %583, %584 : vector<8x128xf32>
    %586 = arith.negf %585 : vector<8x128xf32>
    %587 = math.exp %586 : vector<8x128xf32>
    %cst_139 = arith.constant 1.000000e+00 : f32
    %588 = vector.broadcast %cst_139 : f32 to vector<8x128xf32>
    %589 = arith.addf %588, %587 : vector<8x128xf32>
    %590 = arith.divf %588, %589 : vector<8x128xf32>
    %591 = vector.extract_strided_slice %572 {offsets = [0, 256], sizes = [8, 128], strides = [1, 1]} : vector<8x384xf32> to vector<8x128xf32>
    %592 = vector.extract_strided_slice %574 {offsets = [0, 256], sizes = [8, 128], strides = [1, 1]} : vector<8x384xf32> to vector<8x128xf32>
    %593 = vector.broadcast %2 : vector<1x128xf32> to vector<8x128xf32>
    %594 = arith.addf %592, %593 : vector<8x128xf32>
    %595 = arith.mulf %582, %594 : vector<8x128xf32>
    %596 = arith.addf %591, %595 : vector<8x128xf32>
    %597 = math.tanh %596 : vector<8x128xf32>
    %cst_140 = arith.constant 1.000000e+00 : f32
    %598 = vector.broadcast %cst_140 : f32 to vector<8x128xf32>
    %599 = arith.subf %598, %590 : vector<8x128xf32>
    %600 = arith.mulf %599, %597 : vector<8x128xf32>
    %601 = arith.mulf %590, %532 : vector<8x128xf32>
    %602 = arith.addf %600, %601 : vector<8x128xf32>
    %c144_141 = arith.constant 144 : index
    %c0_142 = arith.constant 0 : index
    %603 = vector.load %arg1[%c144_141, %c0_142] : memref<400x384xf32, #tpu.memory_space<vmem>>, vector<128x384xf32>
    %cst_143 = arith.constant dense<0.000000e+00> : vector<8x384xf32>
    %604 = tpu.matmul %602, %603, %cst_143 {dimension_numbers = #tpu.dot_dimension_numbers<[1], [0], [0], [1], [0, 0, 1, 1], [], []>} : vector<8x128xf32>, vector<128x384xf32>, vector<8x384xf32> -> vector<8x384xf32>
    %605 = vector.broadcast %1 : vector<1x384xf32> to vector<8x384xf32>
    %606 = arith.addf %604, %605 : vector<8x384xf32>
    %c272_144 = arith.constant 272 : index
    %c0_145 = arith.constant 0 : index
    %607 = vector.load %arg1[%c272_144, %c0_145] : memref<400x384xf32, #tpu.memory_space<vmem>>, vector<128x384xf32>
    %cst_146 = arith.constant dense<0.000000e+00> : vector<8x384xf32>
    %608 = tpu.matmul %566, %607, %cst_146 {dimension_numbers = #tpu.dot_dimension_numbers<[1], [0], [0], [1], [0, 0, 1, 1], [], []>} : vector<8x128xf32>, vector<128x384xf32>, vector<8x384xf32> -> vector<8x384xf32>
    %609 = vector.extract_strided_slice %606 {offsets = [0, 0], sizes = [8, 128], strides = [1, 1]} : vector<8x384xf32> to vector<8x128xf32>
    %610 = vector.extract_strided_slice %608 {offsets = [0, 0], sizes = [8, 128], strides = [1, 1]} : vector<8x384xf32> to vector<8x128xf32>
    %611 = arith.addf %609, %610 : vector<8x128xf32>
    %612 = arith.negf %611 : vector<8x128xf32>
    %613 = math.exp %612 : vector<8x128xf32>
    %cst_147 = arith.constant 1.000000e+00 : f32
    %614 = vector.broadcast %cst_147 : f32 to vector<8x128xf32>
    %615 = arith.addf %614, %613 : vector<8x128xf32>
    %616 = arith.divf %614, %615 : vector<8x128xf32>
    %617 = vector.extract_strided_slice %606 {offsets = [0, 128], sizes = [8, 128], strides = [1, 1]} : vector<8x384xf32> to vector<8x128xf32>
    %618 = vector.extract_strided_slice %608 {offsets = [0, 128], sizes = [8, 128], strides = [1, 1]} : vector<8x384xf32> to vector<8x128xf32>
    %619 = arith.addf %617, %618 : vector<8x128xf32>
    %620 = arith.negf %619 : vector<8x128xf32>
    %621 = math.exp %620 : vector<8x128xf32>
    %cst_148 = arith.constant 1.000000e+00 : f32
    %622 = vector.broadcast %cst_148 : f32 to vector<8x128xf32>
    %623 = arith.addf %622, %621 : vector<8x128xf32>
    %624 = arith.divf %622, %623 : vector<8x128xf32>
    %625 = vector.extract_strided_slice %606 {offsets = [0, 256], sizes = [8, 128], strides = [1, 1]} : vector<8x384xf32> to vector<8x128xf32>
    %626 = vector.extract_strided_slice %608 {offsets = [0, 256], sizes = [8, 128], strides = [1, 1]} : vector<8x384xf32> to vector<8x128xf32>
    %627 = vector.broadcast %3 : vector<1x128xf32> to vector<8x128xf32>
    %628 = arith.addf %626, %627 : vector<8x128xf32>
    %629 = arith.mulf %616, %628 : vector<8x128xf32>
    %630 = arith.addf %625, %629 : vector<8x128xf32>
    %631 = math.tanh %630 : vector<8x128xf32>
    %cst_149 = arith.constant 1.000000e+00 : f32
    %632 = vector.broadcast %cst_149 : f32 to vector<8x128xf32>
    %633 = arith.subf %632, %624 : vector<8x128xf32>
    %634 = arith.mulf %633, %631 : vector<8x128xf32>
    %635 = arith.mulf %624, %566 : vector<8x128xf32>
    %636 = arith.addf %634, %635 : vector<8x128xf32>
    %c72 = arith.constant 72 : index
    %c0_150 = arith.constant 0 : index
    %637 = vector.load %arg0[%c72, %c0_150] : memref<80x1xf32, #tpu.memory_space<vmem>>, vector<8x1xf32>
    %638 = vector.broadcast %637 : vector<8x1xf32> to vector<8x384xf32>
    %639 = vector.broadcast %4 : vector<1x384xf32> to vector<8x384xf32>
    %640 = arith.mulf %638, %639 : vector<8x384xf32>
    %641 = vector.broadcast %0 : vector<1x384xf32> to vector<8x384xf32>
    %642 = arith.addf %640, %641 : vector<8x384xf32>
    %c16_151 = arith.constant 16 : index
    %c0_152 = arith.constant 0 : index
    %643 = vector.load %arg1[%c16_151, %c0_152] : memref<400x384xf32, #tpu.memory_space<vmem>>, vector<128x384xf32>
    %cst_153 = arith.constant dense<0.000000e+00> : vector<8x384xf32>
    %644 = tpu.matmul %602, %643, %cst_153 {dimension_numbers = #tpu.dot_dimension_numbers<[1], [0], [0], [1], [0, 0, 1, 1], [], []>} : vector<8x128xf32>, vector<128x384xf32>, vector<8x384xf32> -> vector<8x384xf32>
    %645 = vector.extract_strided_slice %642 {offsets = [0, 0], sizes = [8, 128], strides = [1, 1]} : vector<8x384xf32> to vector<8x128xf32>
    %646 = vector.extract_strided_slice %644 {offsets = [0, 0], sizes = [8, 128], strides = [1, 1]} : vector<8x384xf32> to vector<8x128xf32>
    %647 = arith.addf %645, %646 : vector<8x128xf32>
    %648 = arith.negf %647 : vector<8x128xf32>
    %649 = math.exp %648 : vector<8x128xf32>
    %cst_154 = arith.constant 1.000000e+00 : f32
    %650 = vector.broadcast %cst_154 : f32 to vector<8x128xf32>
    %651 = arith.addf %650, %649 : vector<8x128xf32>
    %652 = arith.divf %650, %651 : vector<8x128xf32>
    %653 = vector.extract_strided_slice %642 {offsets = [0, 128], sizes = [8, 128], strides = [1, 1]} : vector<8x384xf32> to vector<8x128xf32>
    %654 = vector.extract_strided_slice %644 {offsets = [0, 128], sizes = [8, 128], strides = [1, 1]} : vector<8x384xf32> to vector<8x128xf32>
    %655 = arith.addf %653, %654 : vector<8x128xf32>
    %656 = arith.negf %655 : vector<8x128xf32>
    %657 = math.exp %656 : vector<8x128xf32>
    %cst_155 = arith.constant 1.000000e+00 : f32
    %658 = vector.broadcast %cst_155 : f32 to vector<8x128xf32>
    %659 = arith.addf %658, %657 : vector<8x128xf32>
    %660 = arith.divf %658, %659 : vector<8x128xf32>
    %661 = vector.extract_strided_slice %642 {offsets = [0, 256], sizes = [8, 128], strides = [1, 1]} : vector<8x384xf32> to vector<8x128xf32>
    %662 = vector.extract_strided_slice %644 {offsets = [0, 256], sizes = [8, 128], strides = [1, 1]} : vector<8x384xf32> to vector<8x128xf32>
    %663 = vector.broadcast %2 : vector<1x128xf32> to vector<8x128xf32>
    %664 = arith.addf %662, %663 : vector<8x128xf32>
    %665 = arith.mulf %652, %664 : vector<8x128xf32>
    %666 = arith.addf %661, %665 : vector<8x128xf32>
    %667 = math.tanh %666 : vector<8x128xf32>
    %cst_156 = arith.constant 1.000000e+00 : f32
    %668 = vector.broadcast %cst_156 : f32 to vector<8x128xf32>
    %669 = arith.subf %668, %660 : vector<8x128xf32>
    %670 = arith.mulf %669, %667 : vector<8x128xf32>
    %671 = arith.mulf %660, %602 : vector<8x128xf32>
    %672 = arith.addf %670, %671 : vector<8x128xf32>
    %c144_157 = arith.constant 144 : index
    %c0_158 = arith.constant 0 : index
    %673 = vector.load %arg1[%c144_157, %c0_158] : memref<400x384xf32, #tpu.memory_space<vmem>>, vector<128x384xf32>
    %cst_159 = arith.constant dense<0.000000e+00> : vector<8x384xf32>
    %674 = tpu.matmul %672, %673, %cst_159 {dimension_numbers = #tpu.dot_dimension_numbers<[1], [0], [0], [1], [0, 0, 1, 1], [], []>} : vector<8x128xf32>, vector<128x384xf32>, vector<8x384xf32> -> vector<8x384xf32>
    %675 = vector.broadcast %1 : vector<1x384xf32> to vector<8x384xf32>
    %676 = arith.addf %674, %675 : vector<8x384xf32>
    %c272_160 = arith.constant 272 : index
    %c0_161 = arith.constant 0 : index
    %677 = vector.load %arg1[%c272_160, %c0_161] : memref<400x384xf32, #tpu.memory_space<vmem>>, vector<128x384xf32>
    %cst_162 = arith.constant dense<0.000000e+00> : vector<8x384xf32>
    %678 = tpu.matmul %636, %677, %cst_162 {dimension_numbers = #tpu.dot_dimension_numbers<[1], [0], [0], [1], [0, 0, 1, 1], [], []>} : vector<8x128xf32>, vector<128x384xf32>, vector<8x384xf32> -> vector<8x384xf32>
    %679 = vector.extract_strided_slice %676 {offsets = [0, 0], sizes = [8, 128], strides = [1, 1]} : vector<8x384xf32> to vector<8x128xf32>
    %680 = vector.extract_strided_slice %678 {offsets = [0, 0], sizes = [8, 128], strides = [1, 1]} : vector<8x384xf32> to vector<8x128xf32>
    %681 = arith.addf %679, %680 : vector<8x128xf32>
    %682 = arith.negf %681 : vector<8x128xf32>
    %683 = math.exp %682 : vector<8x128xf32>
    %cst_163 = arith.constant 1.000000e+00 : f32
    %684 = vector.broadcast %cst_163 : f32 to vector<8x128xf32>
    %685 = arith.addf %684, %683 : vector<8x128xf32>
    %686 = arith.divf %684, %685 : vector<8x128xf32>
    %687 = vector.extract_strided_slice %676 {offsets = [0, 128], sizes = [8, 128], strides = [1, 1]} : vector<8x384xf32> to vector<8x128xf32>
    %688 = vector.extract_strided_slice %678 {offsets = [0, 128], sizes = [8, 128], strides = [1, 1]} : vector<8x384xf32> to vector<8x128xf32>
    %689 = arith.addf %687, %688 : vector<8x128xf32>
    %690 = arith.negf %689 : vector<8x128xf32>
    %691 = math.exp %690 : vector<8x128xf32>
    %cst_164 = arith.constant 1.000000e+00 : f32
    %692 = vector.broadcast %cst_164 : f32 to vector<8x128xf32>
    %693 = arith.addf %692, %691 : vector<8x128xf32>
    %694 = arith.divf %692, %693 : vector<8x128xf32>
    %695 = vector.extract_strided_slice %676 {offsets = [0, 256], sizes = [8, 128], strides = [1, 1]} : vector<8x384xf32> to vector<8x128xf32>
    %696 = vector.extract_strided_slice %678 {offsets = [0, 256], sizes = [8, 128], strides = [1, 1]} : vector<8x384xf32> to vector<8x128xf32>
    %697 = vector.broadcast %3 : vector<1x128xf32> to vector<8x128xf32>
    %698 = arith.addf %696, %697 : vector<8x128xf32>
    %699 = arith.mulf %686, %698 : vector<8x128xf32>
    %700 = arith.addf %695, %699 : vector<8x128xf32>
    %701 = math.tanh %700 : vector<8x128xf32>
    %cst_165 = arith.constant 1.000000e+00 : f32
    %702 = vector.broadcast %cst_165 : f32 to vector<8x128xf32>
    %703 = arith.subf %702, %694 : vector<8x128xf32>
    %704 = arith.mulf %703, %701 : vector<8x128xf32>
    %705 = arith.mulf %694, %636 : vector<8x128xf32>
    %706 = arith.addf %704, %705 : vector<8x128xf32>
    %c4 = arith.constant 4 : index
    %c0_166 = arith.constant 0 : index
    %707 = vector.load %arg1[%c4, %c0_166] : memref<400x384xf32, #tpu.memory_space<vmem>>, vector<1x128xf32>
    %708 = vector.broadcast %707 : vector<1x128xf32> to vector<8x128xf32>
    %709 = arith.mulf %706, %708 : vector<8x128xf32>
    %cst_167 = arith.constant dense<0.000000e+00> : vector<8xf32>
    %710 = vector.multi_reduction <add>, %709, %cst_167 [1] : vector<8x128xf32> to vector<8xf32>
    %711 = vector.shape_cast %710 : vector<8xf32> to vector<8x1xf32>
    %c5 = arith.constant 5 : index
    %c0_168 = arith.constant 0 : index
    %712 = vector.load %arg1[%c5, %c0_168] : memref<400x384xf32, #tpu.memory_space<vmem>>, vector<1x1xf32>
    %713 = vector.broadcast %712 : vector<1x1xf32> to vector<8x1xf32>
    %714 = arith.addf %711, %713 : vector<8x1xf32>
    %c0_169 = arith.constant 0 : index
    %c0_170 = arith.constant 0 : index
    %715 = vector.load %arg2[%c0_169, %c0_170] : memref<8x1xf32, #tpu.memory_space<vmem>>, vector<8x1xf32>
    tpu.vector_store %arg2[%c0_169, %c0_170], %714 {strides = array<i32>} : memref<8x1xf32, #tpu.memory_space<vmem>>, vector<8x1xf32>,
    return
  }
}

</mosaic_0001>

<bundles_post_ra>
// kernel: rnn_forward.1
= control target key start
LH: loop header
LB: loop body
LE: loop exit
PB: predicated region body
PF: predicated region fallthrough
CT: control target
= control target key end

     0   :  { %v3906_v3 = vmov 0   ;;  %v9371_v49 = vmov 0.0   ;;  %s9368_s1 = inlined_call_operand.vmem [shape: f32[400,384], index: 1, kind: input, shape index: {}]   ;;  %s9369_s0 = inlined_call_operand.vmem [shape: f32[80,1], index: 0, kind: input, shape index: {}]   ;;  %s9370_s2 = inlined_call_operand.vmem [shape: f32[8,1], index: 2, kind: output, shape index: {}]  }
   0x1   :  { %v3926_v0 = vld [vmem:[%s9368_s1 + $0x198] sm:$0xff]  ;;  %v3931_v1 = vld [vmem:[%s9368_s1 + $0x1a0] sm:$0xff]  ;;  %3119 = vset.pattern.permute.xlu0 %v3906_v3  ;;  %3120 = vset.pattern.permute.xlu1 %v3906_v3  ;;  %v3943_v4 = vld [vmem:[%s9368_s1 + $0x188] sm:$0xff] }
   0x2   :  { %v3936_v2 = vld [vmem:[%s9368_s1 + $0x180] sm:$0xff]  ;;  %92 = vmatpush.msra.mxu0 %v3926_v0  ;;  %112 = vmatpush.msra.mxu1 %v3931_v1  ;;  %v3948_v5 = vld [vmem:[%s9368_s1 + $0x168] sm:$0xff]  ;;  %v3953_v6 = vld [vmem:[%s9368_s1 + $0x170] sm:$0xff] }
   0x3   :  { %9779 = vst [vmem:[#allocation2_spill] sm:$0xff] %v3936_v2  ;;  %3121 = vset.pattern.permute.xlu2 %v3906_v3  ;;  %v3960_v7 = vld [vmem:[%s9368_s1 + $0x150] sm:$0xff]  ;;  %v3965_v8 = vld [vmem:[%s9368_s1 + $0x158] sm:$0xff]  ;;  %v18_v9 = vld [vmem:[%s9369_s0] sm:$0xff] }
   0x4   :  { %93 = vmatpush.msra.mxu0 %v3936_v2  ;;  %113 = vmatpush.msra.mxu1 %v3943_v4  ;;  %v3975_v10 = vld [vmem:[%s9368_s1 + $0x138] sm:$0xff]  ;;  %v3980_v11 = vld [vmem:[%s9368_s1 + $0x140] sm:$0xff]  ;;  %v3992_v13 = vld [vmem:[%s9368_s1 + $0x128] sm:$0xff] }
   0x5   :  { %21 = vperm.xlu0 %3119, %v18_v9   ;;  %v3987_v12 = vld [vmem:[%s9368_s1 + $0x120] sm:$0xff]  ;;  %v3997_v14 = vld [vmem:[%s9368_s1 + $0x1a8] sm:$0xff]  ;;  %v4004_v15 = vld [vmem:[%s9368_s1 + $0x190] sm:$0xff] }
   0x6   :  { %94 = vmatpush.msra.mxu0 %v3948_v5  ;;  %114 = vmatpush.msra.mxu1 %v3953_v6  ;;  %v4009_v16 = vld [vmem:[%s9368_s1 + $0x108] sm:$0xff]  ;;  %v4014_v17 = vld [vmem:[%s9368_s1 + $0x110] sm:$0xff]  ;;  %v4025_v19 = vld [vmem:[%s9368_s1 + $0x178] sm:$0xff] }
   0x7   :  { %132 = vmatpush.msra.mxu2 %v3997_v14  ;;  %v471_v18 = vld [vmem:[%s9369_s0 + $0x8] sm:$0xff]  ;;  %v4030_v20 = vld [vmem:[%s9368_s1 + $0xf0] sm:$0xff]  ;;  %v4035_v21 = vld [vmem:[%s9368_s1 + $0xf8] sm:$0xff] }
   0x8   :  { %95 = vmatpush.msra.mxu0 %v3960_v7  ;;  %115 = vmatpush.msra.mxu1 %v3965_v8  ;;  %9780 = vst [vmem:[#allocation3_spill] sm:$0xff] %v4035_v21  ;;  %v4043_v22 = vld [vmem:[%s9368_s1 + $0x160] sm:$0xff]  ;;  %v4048_v23 = vld [vmem:[%s9368_s1 + $0xd8] sm:$0xff]  ;;  %v4061_v25 = vld [vmem:[%s9368_s1 + $0x148] sm:$0xff] }
   0x9   :  { %133 = vmatpush.msra.mxu2 %v4004_v15  ;;  %v4053_v24 = vld [vmem:[%s9368_s1 + $0xe0] sm:$0xff]  ;;  %v4071_v27 = vld [vmem:[%s9368_s1 + $0xc8] sm:$0xff]  ;;  %v4079_v28 = vld [vmem:[%s9368_s1 + $0x130] sm:$0xff] }
   0xa   :  { %96 = vmatpush.msra.mxu0 %v3975_v10  ;;  %116 = vmatpush.msra.mxu1 %v3980_v11  ;;  %9781 = vst [vmem:[#allocation4_spill] sm:$0xff] %v4053_v24  ;;  %v4066_v26 = vld [vmem:[%s9368_s1 + $0xc0] sm:$0xff]  ;;  %v4084_v29 = vld [vmem:[%s9368_s1 + $0xa8] sm:$0xff]  ;;  %v4089_v30 = vld [vmem:[%s9368_s1 + $0xb0] sm:$0xff] }
   0xb   :  { %134 = vmatpush.msra.mxu2 %v4025_v19  ;;  %9782 = vst [vmem:[#allocation5_spill] sm:$0xff] %v4071_v27  ;;  %v1911_v31 = vld [vmem:[%s9369_s0 + $0x30] sm:$0xff]  ;;  %v4100_v32 = vld [vmem:[%s9368_s1 + $0x118] sm:$0xff]  ;;  %v4118_v35 = vld [vmem:[%s9368_s1 + $0x100] sm:$0xff] }
   0xc   :  { %97 = vmatpush.msra.mxu0 %v3987_v12  ;;  %117 = vmatpush.msra.mxu1 %v3992_v13  ;;  %9783 = vst [vmem:[#allocation6_spill] sm:$0xff] %v4079_v28  ;;  %v4105_v33 = vld [vmem:[%s9368_s1 + $0x90] sm:$0xff]  ;;  %v4110_v34 = vld [vmem:[%s9368_s1 + $0x98] sm:$0xff]  ;;  %v4128_v37 = vld [vmem:[%s9368_s1 + $0x80] sm:$0xff] }
   0xd   :  { %474 = vperm.xlu0 %3119, %v471_v18   ;;  %135 = vmatpush.msra.mxu2 %v4043_v22  ;;  %9784 = vst [vmem:[#allocation7_spill] sm:$0xff] %v4089_v30  ;;  %v4123_v36 = vld [vmem:[%s9368_s1 + $0x78] sm:$0xff]  ;;  %v4136_v38 = vld [vmem:[%s9368_s1 + $0xe8] sm:$0xff]  ;;  %v4141_v39 = vld [vmem:[%s9368_s1 + $0x60] sm:$0xff] }
   0xe   :  { %98 = vmatpush.msra.mxu0 %v4009_v16  ;;  %118 = vmatpush.msra.mxu1 %v4014_v17  ;;  %9785 = vst [vmem:[#allocation8_spill] sm:$0xff] %v4100_v32  ;;  %v4146_v40 = vld [vmem:[%s9368_s1 + $0x68] sm:$0xff]  ;;  %v4154_v41 = vld [vmem:[%s9368_s1 + $0xd0] sm:$0xff]  ;;  %v4175_v45 = vld [vmem:[%s9368_s1 + $0xb8] sm:$0xff] }
   0xf   :  { %136 = vmatpush.msra.mxu2 %v4061_v25  ;;  %9786 = vst [vmem:[#allocation9_spill] sm:$0xff] %v4110_v34  ;;  %v4159_v42 = vld [vmem:[%s9368_s1 + $0x48] sm:$0xff]  ;;  %v4164_v43 = vld [vmem:[%s9368_s1 + $0x50] sm:$0xff]  ;;  %v4185_v47 = vld [vmem:[%s9368_s1 + $0x38] sm:$0xff] }
  0x10   :  { %99 = vmatpush.msra.mxu0 %v4030_v20  ;;  %119 = vmatpush.msra.mxu1 %v4035_v21  ;;  %9787 = vst [vmem:[#allocation10_spill] sm:$0xff] %v4118_v35  ;;  %v2775_v44 = vld [vmem:[%s9369_s0 + $0x48] sm:$0xff]  ;;  %v4180_v46 = vld [vmem:[%s9368_s1 + $0x30] sm:$0xff]  ;;  %v4194_v48 = vld [vmem:[%s9368_s1 + $0xa0] sm:$0xff] }
  0x11   :  { %137 = vmatpush.msra.mxu2 %v4079_v28  ;;  %9788 = vst [vmem:[#allocation11_spill] sm:$0xff] %v4128_v37  ;;  %v4203_v50 = vld [vmem:[%s9368_s1 + $0x88] sm:$0xff]  ;;  %v4209_v51 = vld [vmem:[%s9368_s1 + $0x70] sm:$0xff]  ;;  %v4215_v52 = vld [vmem:[%s9368_s1 + $0x58] sm:$0xff] }
  0x12   :  { %100 = vmatpush.msra.mxu0 %v4048_v23  ;;  %120 = vmatpush.msra.mxu1 %v4053_v24  ;;  %9789 = vst [vmem:[#allocation12_spill] sm:$0xff] %v4136_v38  ;;  %v4221_v53 = vld [vmem:[%s9368_s1 + $0x40] sm:$0xff]  ;;  %v4229_v54 = vld [vmem:[%s9368_s1 + $0x318] sm:$0xff]  ;;  %v4251_v58 = vld [vmem:[%s9368_s1 + $0x2e8] sm:$0xff] }
  0x13   :  { %138 = vmatpush.msra.mxu2 %v4100_v32  ;;  %9790 = vst [vmem:[#allocation13_spill] sm:$0xff] %v4141_v39  ;;  %v4234_v55 = vld [vmem:[%s9368_s1 + $0x498] sm:$0xff]  ;;  %v4239_v56 = vld [vmem:[%s9368_s1 + $0x300] sm:$0xff]  ;;  %255 = vmatpush.msra.mxu3 %v4229_v54  ;;  %v4256_v59 = vld [vmem:[%s9368_s1 + $0x468] sm:$0xff] }
  0x14   :  { %101 = vmatpush.msra.mxu0 %v4066_v26  ;;  %121 = vmatpush.msra.mxu1 %v4071_v27  ;;  %9791 = vst [vmem:[#allocation14_spill] sm:$0xff] %v4146_v40  ;;  %v4246_v57 = vld [vmem:[%s9368_s1 + $0x480] sm:$0xff]  ;;  %v4265_v60 = vld [vmem:[%s9368_s1 + $0x2d0] sm:$0xff]  ;;  %v4275_v62 = vld [vmem:[%s9368_s1 + $0x2b8] sm:$0xff] }
  0x15   :  { %1914 = vperm.xlu0 %3119, %v1911_v31   ;;  %139 = vmatpush.msra.mxu2 %v4118_v35  ;;  %9792 = vst [vmem:[#allocation15_spill] sm:$0xff] %v4154_v41  ;;  %v4270_v61 = vld [vmem:[%s9368_s1 + $0x450] sm:$0xff]  ;;  %v4282_v63 = vld [vmem:[%s9368_s1 + $0x328] sm:$0xff]  ;;  %v4287_v3 = vld [vmem:[%s9368_s1 + $0x438] sm:$0xff] }
  0x16   :  { %102 = vmatpush.msra.mxu0 %v4084_v29  ;;  %122 = vmatpush.msra.mxu1 %v4089_v30  ;;  %9793 = vst [vmem:[#allocation16_spill] sm:$0xff] %v4159_v42  ;;  %v4293_v9 = vld [vmem:[%s9368_s1 + $0x2a0] sm:$0xff]  ;;  %v4298_v18 = vld [vmem:[%s9368_s1 + $0x310] sm:$0xff]  ;;  %v4560_v35 = vld [vmem:[%s9368_s1 + $0x2d8] sm:$0xff] }
  0x17   :  { %9794 = vst [vmem:[#allocation17_spill] sm:$0xff] %v4164_v43  ;;  %140 = vmatpush.msra.mxu2 %v4136_v38  ;;  %256 = vmatpush.msra.mxu3 %v4239_v56  ;;  %v4303_v31 = vld [vmem:[%s9368_s1 + $0x420] sm:$0xff]  ;;  %v4540_v38 = vld [vmem:[%s9368_s1 + $0x470] sm:$0xff] }
  0x18   :  { %103 = vmatpush.msra.mxu0 %v4105_v33  ;;  %123 = vmatpush.msra.mxu1 %v4110_v34  ;;  %9795 = vst [vmem:[#allocation18_spill] sm:$0xff] %v4175_v45  ;;  %v4570_v32 = vld [vmem:[%s9368_s1] ss:$8 sm:$0x7] }
  0x19   :  { %9796 = vst [vmem:[#allocation19_spill] sm:$0xff] %v4180_v46  ;;  %141 = vmatpush.msra.mxu2 %v4154_v41  ;;  %257 = vmatpush.msra.mxu3 %v4251_v58  ;;  %v4511_v41 = vld [vmem:[%s9368_s1 + $0x308] sm:$0xff] }
  0x1a   :  { %104 = vmatpush.msra.mxu0 %v4123_v36  ;;  %124 = vmatpush.msra.mxu1 %v4128_v37  ;;  %9797 = vst [vmem:[#allocation20_spill] sm:$0xff] %v4185_v47 }
  0x1b   :  { %142 = vmatpush.msra.mxu2 %v4175_v45  ;;  %9798 = vst [vmem:[#allocation21_spill] sm:$0xff] %v4194_v48  ;;  %258 = vmatpush.msra.mxu3 %v4265_v60  ;;  %v4467_v45 = vld [vmem:[%s9368_s1 + $0x348] sm:$0xff] }
  0x1c   :  { %105 = vmatpush.msra.mxu0 %v4141_v39  ;;  %125 = vmatpush.msra.mxu1 %v4146_v40  ;;  %9799 = vst [vmem:[#allocation22_spill] sm:$0xff] %v4203_v50 }
  0x1d   :  { %2778 = vperm.xlu0 %3119, %v2775_v44   ;;  %143 = vmatpush.msra.mxu2 %v4194_v48  ;;  %9800 = vst [vmem:[#allocation23_spill] sm:$0xff] %v4209_v51  ;;  %v4310_v44 = vld [vmem:[%s9368_s1 + $0x2f8] sm:$0xff] }
  0x1e   :  { %106 = vmatpush.msra.mxu0 %v4159_v42  ;;  %126 = vmatpush.msra.mxu1 %v4164_v43  ;;  %9801 = vst [vmem:[#allocation24_spill] sm:$0xff] %v4215_v52  ;;  %v4431_v48 = vld [vmem:[%s9368_s1 + $0x378] sm:$0xff] }
  0x1f   :  { %144 = vmatpush.msra.mxu2 %v4203_v50  ;;  %9802 = vst [vmem:[#allocation25_spill] sm:$0xff] %v4221_v53  ;;  %259 = vmatpush.msra.mxu3 %v4275_v62  ;;  %v4395_v50 = vld [vmem:[%s9368_s1 + $0x3a8] sm:$0xff] }
  0x20   :  { %107 = vmatpush.msra.mxu0 %v4180_v46  ;;  %127 = vmatpush.msra.mxu1 %v4185_v47  ;;  %9803 = vst [vmem:[#allocation26_spill] sm:$0xff] %v4234_v55 }
  0x21   :  { %108 = vmatmul.f32.vlgmr.msra.gmra.mxu0 %v9371_v49  ;;  %128 = vmatmul.f32.vlgmr.msra.gmra.mxu1 %v9371_v49  ;;  %9804 = vst [vmem:[#allocation27_spill] sm:$0xff] %v4239_v56  ;;  %v4603_v56 = vperm.slane %v4570_v32, 1 }
  0x22   :  { %145 = vmatpush.msra.mxu2 %v4209_v51  ;;  %9805 = vst [vmem:[#allocation28_spill] sm:$0xff] %v4246_v57  ;;  %295 = vmatpush.msrb.mxu1 %v4282_v63  ;;  %v4390_v51 = vld [vmem:[%s9368_s1 + $0x298] sm:$0xff] }
  0x23   :  { %9806 = vst [vmem:[#allocation29_spill] sm:$0xff] %v4251_v58  ;;  %260 = vmatpush.msra.mxu3 %v4293_v9  ;;  %v4589_v58 = vld [vmem:[%s9368_s1 + $0x440] sm:$0xff] }
  0x24   :  { %146 = vmatpush.msra.mxu2 %v4215_v52  ;;  %9807 = vst [vmem:[#allocation30_spill] sm:$0xff] %v4256_v59  ;;  %296 = vmatpush.msrb.mxu1 %v4298_v18  ;;  %v4377_v52 = vld [vmem:[%s9368_s1 + $0x3c0] sm:$0xff] }
  0x25   :  { %9808 = vst [vmem:[#allocation31_spill] sm:$0xff] %v4265_v60  ;;  %v4565_v60 = vld [vmem:[%s9368_s1 + $0x458] sm:$0xff] }
  0x26   :  { %147 = vmatpush.msra.mxu2 %v4221_v53  ;;  %9809 = vst [vmem:[#allocation32_spill] sm:$0xff] %v4270_v61  ;;  %297 = vmatpush.msrb.mxu1 %v4310_v44  ;;  %v4372_v53 = vld [vmem:[%s9368_s1 + $0x2b0] sm:$0xff] }
  0x27   :  { %148 = vmatmul.f32.vlgmr.msra.gmra.mxu2 %v9371_v49  ;;  %9810 = vst [vmem:[#allocation33_spill] sm:$0xff] %v4275_v62  ;;  %v4316_v49 = vld [vmem:[%s9368_s1 + $0x288] sm:$0xff] }
  0x28   :  { %363 = vmatpush.msrb.mxu2 %v4234_v55  ;;  %9811 = vst [vmem:[#allocation34_spill] sm:$0xff] %v4287_v3  ;;  %261 = vmatpush.msra.mxu3 %v4316_v49  ;;  %v4359_v55 = vld [vmem:[%s9368_s1 + $0x3d8] sm:$0xff] }
  0x29   :  { %9812 = vst [vmem:[#allocation35_spill] sm:$0xff] %v4293_v9  ;;  %v4521_v9 = vld [vmem:[%s9368_s1 + $0x18] ss:$8 sm:$0x7] }
  0x2a   :  { %364 = vmatpush.msrb.mxu2 %v4246_v57  ;;  %9813 = vst [vmem:[#allocation36_spill] sm:$0xff] %v4303_v31  ;;  %v4354_v57 = vld [vmem:[%s9368_s1 + $0x2c8] sm:$0xff]  ;;  %v4553_v62 = vperm.slane %v4521_v9, 1 }
  0x2b   :  { %9814 = vst [vmem:[#allocation37_spill] sm:$0xff] %v4316_v49  ;;  %v4485_v49 = vld [vmem:[%s9368_s1 + $0x330] sm:$0xff] }
  0x2c   :  { %365 = vmatpush.msrb.mxu2 %v4256_v59  ;;  %v4336_v59 = vld [vmem:[%s9368_s1 + $0x2e0] sm:$0xff]  ;;  %9819 = vst [vmem:[#allocation42_spill] sm:$0xff] %v4359_v55 }
  0x2d   :  { %298 = vmatpush.msrb.mxu1 %v4336_v59  ;;  %9821 = vst [vmem:[#allocation44_spill] sm:$0xff] %v4377_v52 }
  0x2e   :  { %366 = vmatpush.msrb.mxu2 %v4270_v61  ;;  %v4321_v61 = vld [vmem:[%s9368_s1 + $0x408] sm:$0xff]  ;;  %9823 = vst [vmem:[#allocation46_spill] sm:$0xff] %v4395_v50 }
  0x2f   :  { %9815 = vst [vmem:[#allocation38_spill] sm:$0xff] %v4321_v61  ;;  %299 = vmatpush.msrb.mxu1 %v4354_v57 }
  0x30   :  { %367 = vmatpush.msrb.mxu2 %v4287_v3  ;;  %v4331_v3 = vld [vmem:[%s9368_s1 + $0x270] sm:$0xff]  ;;  %9827 = vst [vmem:[#allocation50_spill] sm:$0xff] %v4431_v48 }
  0x31   :  { %9816 = vst [vmem:[#allocation39_spill] sm:$0xff] %v4331_v3  ;;  %262 = vmatpush.msra.mxu3 %v4331_v3  ;;  %300 = vmatpush.msrb.mxu1 %v4372_v53  ;;  %v4449_v3 = vld [vmem:[%s9368_s1 + $0x360] sm:$0xff] }
  0x32   :  { %368 = vmatpush.msrb.mxu2 %v4303_v31  ;;  %v4341_v31 = vld [vmem:[%s9368_s1 + $0x3f0] sm:$0xff]  ;;  %9829 = vst [vmem:[#allocation52_spill] sm:$0xff] %v4449_v3 }
  0x33   :  { %9817 = vst [vmem:[#allocation40_spill] sm:$0xff] %v4341_v31  ;;  %301 = vmatpush.msrb.mxu1 %v4390_v51 }
  0x34   :  { %369 = vmatpush.msrb.mxu2 %v4321_v61  ;;  %v4349_v61 = vld [vmem:[%s9368_s1 + $0x258] sm:$0xff]  ;;  %9831 = vst [vmem:[#allocation54_spill] sm:$0xff] %v4467_v45 }
  0x35   :  { %9818 = vst [vmem:[#allocation41_spill] sm:$0xff] %v4349_v61  ;;  %263 = vmatpush.msra.mxu3 %v4349_v61  ;;  %v4413_v61 = vld [vmem:[%s9368_s1 + $0x390] sm:$0xff] }
  0x36   :  { %370 = vmatpush.msrb.mxu2 %v4341_v31  ;;  %v4367_v31 = vld [vmem:[%s9368_s1 + $0x240] sm:$0xff]  ;;  %9825 = vst [vmem:[#allocation48_spill] sm:$0xff] %v4413_v61 }
  0x37   :  { %9820 = vst [vmem:[#allocation43_spill] sm:$0xff] %v4367_v31  ;;  %264 = vmatpush.msra.mxu3 %v4367_v31  ;;  %v4408_v31 = vld [vmem:[%s9368_s1 + $0x280] sm:$0xff] }
  0x38   :  { %371 = vmatpush.msrb.mxu2 %v4359_v55  ;;  %v4385_v55 = vld [vmem:[%s9368_s1 + $0x228] sm:$0xff]  ;;  %302 = vmatpush.msrb.mxu1 %v4408_v31  ;;  %9833 = vst [vmem:[#allocation56_spill] sm:$0xff] %v4485_v49 }
  0x39   :  { %9822 = vst [vmem:[#allocation45_spill] sm:$0xff] %v4385_v55  ;;  %265 = vmatpush.msra.mxu3 %v4385_v55  ;;  %v4426_v55 = vld [vmem:[%s9368_s1 + $0x268] sm:$0xff] }
  0x3a   :  { %372 = vmatpush.msrb.mxu2 %v4377_v52  ;;  %v4403_v52 = vld [vmem:[%s9368_s1 + $0x210] sm:$0xff]  ;;  %303 = vmatpush.msrb.mxu1 %v4426_v55  ;;  %9836 = vst [vmem:[#allocation59_spill] sm:$0xff] %v4540_v38 }
  0x3b   :  { %9824 = vst [vmem:[#allocation47_spill] sm:$0xff] %v4403_v52  ;;  %266 = vmatpush.msra.mxu3 %v4403_v52  ;;  %v4444_v52 = vld [vmem:[%s9368_s1 + $0x250] sm:$0xff] }
  0x3c   :  { %373 = vmatpush.msrb.mxu2 %v4395_v50  ;;  %v4421_v50 = vld [vmem:[%s9368_s1 + $0x1f8] sm:$0xff]  ;;  %304 = vmatpush.msrb.mxu1 %v4444_v52  ;;  %9838 = vst [vmem:[#allocation61_spill] sm:$0xff] %v4553_v62 }
  0x3d   :  { %9826 = vst [vmem:[#allocation49_spill] sm:$0xff] %v4421_v50  ;;  %267 = vmatpush.msra.mxu3 %v4421_v50  ;;  %v4462_v50 = vld [vmem:[%s9368_s1 + $0x238] sm:$0xff] }
  0x3e   :  { %374 = vmatpush.msrb.mxu2 %v4413_v61  ;;  %v4439_v61 = vld [vmem:[%s9368_s1 + $0x1e0] sm:$0xff]  ;;  %305 = vmatpush.msrb.mxu1 %v4462_v50  ;;  %9839 = vst [vmem:[#allocation62_spill] sm:$0xff] %v4560_v35 }
  0x3f   :  { %9828 = vst [vmem:[#allocation51_spill] sm:$0xff] %v4439_v61  ;;  %268 = vmatpush.msra.mxu3 %v4439_v61  ;;  %v4480_v61 = vld [vmem:[%s9368_s1 + $0x220] sm:$0xff] }
  0x40   :  { %375 = vmatpush.msrb.mxu2 %v4431_v48  ;;  %v4457_v48 = vld [vmem:[%s9368_s1 + $0x1c8] sm:$0xff]  ;;  %306 = vmatpush.msrb.mxu1 %v4480_v61  ;;  %9840 = vst [vmem:[#allocation63_spill] sm:$0xff] %v4565_v60 }
  0x41   :  { %9830 = vst [vmem:[#allocation53_spill] sm:$0xff] %v4457_v48  ;;  %269 = vmatpush.msra.mxu3 %v4457_v48  ;;  %v4497_v48 = vld [vmem:[%s9368_s1 + $0x4a0] sm:$0xff] }
  0x42   :  { %376 = vmatpush.msrb.mxu2 %v4449_v3  ;;  %v4475_v3 = vld [vmem:[%s9368_s1 + $0x1b0] sm:$0xff]  ;;  %9834 = vst [vmem:[#allocation57_spill] sm:$0xff] %v4497_v48 }
  0x43   :  { %9832 = vst [vmem:[#allocation55_spill] sm:$0xff] %v4475_v3  ;;  %270 = vmatpush.msra.mxu3 %v4475_v3  ;;  %v4504_v3 = vld [vmem:[%s9368_s1 + $0x208] sm:$0xff] }
  0x44   :  { %377 = vmatpush.msrb.mxu2 %v4467_v45  ;;  %v4492_v45 = vld [vmem:[%s9368_s1 + $0x320] sm:$0xff]  ;;  %307 = vmatpush.msrb.mxu1 %v4504_v3  ;;  %9842 = vst [vmem:[#allocation65_spill] sm:$0xff] %v4589_v58 }
  0x45   :  { %275 = vmatpush.msrb.mxu0 %v4492_v45  ;;  %383 = vmatpush.msrb.mxu3 %v4497_v48  ;;  %v4535_v48 = vld [vmem:[%s9368_s1 + $0x2f0] sm:$0xff]  ;;  %9844 = vst [vmem:[#allocation67_spill] sm:$0xff] %v4603_v56 }
  0x46   :  { %378 = vmatpush.msrb.mxu2 %v4485_v49  ;;  %v4516_v49 = vld [vmem:[%s9368_s1 + $0x488] sm:$0xff] }
  0x47   :  { %9835 = vst [vmem:[#allocation58_spill] sm:$0xff] %v4516_v49  ;;  %276 = vmatpush.msrb.mxu0 %v4511_v41  ;;  %384 = vmatpush.msrb.mxu3 %v4516_v49  ;;  %v4547_v49 = vld [vmem:[%s9368_s1 + $0x1d8] sm:$0xff] }
  0x48   :  { %503 = vmatpush.msra.mxu2 %v3931_v1  ;;  %v4528_v1 = vld [vmem:[%s9368_s1 + $0x1f0] sm:$0xff] }
  0x49   :  { %308 = vmatpush.msrb.mxu1 %v4528_v1  ;;  %277 = vmatpush.msrb.mxu0 %v4535_v48 }
  0x4a   :  { %504 = vmatpush.msra.mxu2 %v3943_v4  ;;  %v4550_v4 = vperm.slane %v4521_v9, 0  ;;  %385 = vmatpush.msrb.mxu3 %v4540_v38  ;;  %v4584_v38 = vld [vmem:[%s9368_s1 + $0x2c0] sm:$0xff] }
  0x4b   :  { %309 = vmatpush.msrb.mxu1 %v4547_v49  ;;  %278 = vmatpush.msrb.mxu0 %v4560_v35  ;;  %9841 = vst [vmem:[#allocation64_spill] sm:$0xff] %v4584_v38  ;;  %v4600_v35 = vperm.slane %v4570_v32, 0 }
  0x4c   :  { %9837 = vst [vmem:[#allocation60_spill] sm:$0xff] %v4550_v4  ;;  %505 = vmatpush.msra.mxu2 %v3953_v6  ;;  %v4577_v6 = vld [vmem:[%s9368_s1 + $0x1c0] sm:$0xff]  ;;  %386 = vmatpush.msrb.mxu3 %v4565_v60 }
  0x4d   :  { %310 = vmatpush.msrb.mxu1 %v4577_v6  ;;  %279 = vmatpush.msrb.mxu0 %v4584_v38  ;;  %9843 = vst [vmem:[#allocation66_spill] sm:$0xff] %v4600_v35  ;;  %v4610_v38 = vld [vmem:[%s9368_s1 + $0x2a8] sm:$0xff] }
  0x4e   :  { %506 = vmatpush.msra.mxu2 %v3965_v8  ;;  %387 = vmatpush.msrb.mxu3 %v4589_v58  ;;  %9845 = vst [vmem:[#allocation68_spill] sm:$0xff] %v4610_v38  ;;  %v4629_v58 = vld [vmem:[%s9368_s1 + $0x410] sm:$0xff] }
  0x4f   :  { %483 = vmatpush.msra.mxu1 %v3926_v0  ;;  %280 = vmatpush.msrb.mxu0 %v4610_v38  ;;  %9847 = vst [vmem:[#allocation70_spill] sm:$0xff] %v4629_v58  ;;  %v4640_v38 = vld [vmem:[%s9368_s1 + $0x278] sm:$0xff] }
  0x50   :  { %507 = vmatpush.msra.mxu2 %v3980_v11 }
  0x51   :  { %484 = vmatpush.msra.mxu1 %v3936_v2  ;;  %v4645_v2 = vld [vmem:[%s9368_s1 + $0x3f8] sm:$0xff] }
  0x52   :  { %508 = vmatpush.msra.mxu2 %v3992_v13  ;;  %9848 = vst [vmem:[#allocation71_spill] sm:$0xff] %v4645_v2  ;;  %v4654_v13 = vld [vmem:[%s9368_s1 + $0x260] sm:$0xff] }
  0x53   :  { %485 = vmatpush.msra.mxu1 %v3948_v5 }
  0x54   :  { %509 = vmatpush.msra.mxu2 %v4014_v17 }
  0x55   :  { %486 = vmatpush.msra.mxu1 %v3960_v7 }
  0x56   :  { %510 = vmatpush.msra.mxu2 %v4035_v21  ;;  %v4738_v21 = vld [vmem:[%s9368_s1 + $0x1d0] sm:$0xff] }
  0x57   :  { %487 = vmatpush.msra.mxu1 %v3975_v10 }
  0x58   :  { %511 = vmatpush.msra.mxu2 %v4053_v24  ;;  %v4729_v24 = vld [vmem:[%s9368_s1 + $0x368] sm:$0xff] }
  0x59   :  { %488 = vmatpush.msra.mxu1 %v3987_v12  ;;  %9855 = vst [vmem:[#allocation77_spill] sm:$0xff] %v4729_v24 }
  0x5a   :  { %512 = vmatpush.msra.mxu2 %v4071_v27  ;;  %v4715_v27 = vld [vmem:[%s9368_s1 + $0x380] sm:$0xff] }
  0x5b   :  { %489 = vmatpush.msra.mxu1 %v4009_v16  ;;  %9853 = vst [vmem:[#allocation76_spill] sm:$0xff] %v4715_v27 }
  0x5c   :  { %513 = vmatpush.msra.mxu2 %v4089_v30  ;;  %v4724_v30 = vld [vmem:[%s9368_s1 + $0x1e8] sm:$0xff] }
  0x5d   :  { %490 = vmatpush.msra.mxu1 %v4030_v20 }
  0x5e   :  { %514 = vmatpush.msra.mxu2 %v4110_v34 }
  0x5f   :  { %491 = vmatpush.msra.mxu1 %v4048_v23 }
  0x60   :  { %515 = vmatpush.msra.mxu2 %v4128_v37  ;;  %v4750_v37 = vld [vmem:[%s9368_s1 + $0x1b8] sm:$0xff] }
  0x61   :  { %492 = vmatpush.msra.mxu1 %v4066_v26 }
  0x62   :  { %516 = vmatpush.msra.mxu2 %v4146_v40 }
  0x63   :  { %493 = vmatpush.msra.mxu1 %v4084_v29 }
  0x64   :  { %517 = vmatpush.msra.mxu2 %v4164_v43 }
  0x65   :  { %494 = vmatpush.msra.mxu1 %v4105_v33 }
  0x66   :  { %518 = vmatpush.msra.mxu2 %v4185_v47  ;;  %v4790_v47 = vperm.slane %v4521_v9, 2  ;;  %v4803_v9 = vld [vmem:[%s9368_s1 + $0x478] sm:$0xff] }
  0x67   :  { %495 = vmatpush.msra.mxu1 %v4123_v36 }
  0x68   :  { %9860 = vst [vmem:[#allocation82_spill] sm:$0xff] %v4790_v47 }
  0x69   :  { %496 = vmatpush.msra.mxu1 %v4141_v39 }
  0x6b   :  { %497 = vmatpush.msra.mxu1 %v4159_v42 }
  0x6d   :  { %498 = vmatpush.msra.mxu1 %v4180_v46  ;;  %v4814_v46 = vld [vmem:[%s9368_s1 + $0x460] sm:$0xff] }
  0x77   :  { %v4591_v28 = vpop.permute.xlu0 %21 }
  0x78   :  { %v31_v60 = vmul.f32 %v4550_v4, %v4591_v28  ;;  %v32_v8 = vmul.f32 %v4553_v62, %v4591_v28  ;;  %v4615_v4 = vld [vmem:[%s9368_s1 + $0x428] sm:$0xff]  ;;  %v4624_v62 = vld [vmem:[%s9368_s1 + $0x290] sm:$0xff]  ;;  %v33_v39 = vmul.f32 %v4790_v47, %v4591_v28 }
  0x79   :  { %9846 = vst [vmem:[#allocation69_spill] sm:$0xff] %v4615_v4  ;;  %388 = vmatpush.msrb.mxu3 %v4615_v4  ;;  %281 = vmatpush.msrb.mxu0 %v4624_v62 }
  0x7a   :  { %v41_v11 = vadd.f32 %v4600_v35, %v31_v60  ;;  %v42_v4 = vadd.f32 %v4603_v56, %v32_v8  ;;  %v4659_v60 = vld [vmem:[%s9368_s1 + $0x3e0] sm:$0xff] }
  0x7b   :  { %389 = vmatpush.msrb.mxu3 %v4629_v58  ;;  %282 = vmatpush.msrb.mxu0 %v4640_v38  ;;  %9849 = vst [vmem:[#allocation72_spill] sm:$0xff] %v4659_v60  ;;  %v4673_v58 = vld [vmem:[%s9368_s1 + $0x3c8] sm:$0xff] }
  0x7c   :  { %9850 = vst [vmem:[#allocation73_spill] sm:$0xff] %v4673_v58 }
  0x7d   :  { %390 = vmatpush.msrb.mxu3 %v4645_v2  ;;  %283 = vmatpush.msrb.mxu0 %v4654_v13  ;;  %v4668_v2 = vld [vmem:[%s9368_s1 + $0x248] sm:$0xff] }
  0x7f   :  { %391 = vmatpush.msrb.mxu3 %v4659_v60  ;;  %284 = vmatpush.msrb.mxu0 %v4668_v2 }
  0x81   :  { %392 = vmatpush.msrb.mxu3 %v4673_v58 }
  0x9e   :  { %v109_v8 = vpop.f32.mrf.mxu0  ;;  %v129_v35 = vpop.f32.mrf.mxu1 }
  0x9f   :  { %v152_v17 = vadd.f32 %v109_v8, %v41_v11  ;;  %v172_v56 = vadd.f32 %v129_v35, %v42_v4  ;;  %v4682_v4 = vld [vmem:[%s9368_s1 + $0x230] sm:$0xff] }
  0xa0   :  { %v4687_v8 = vld [vmem:[%s9368_s1 + $0x3b0] sm:$0xff]  ;;  %285 = vmatpush.msrb.mxu0 %v4682_v4 }
  0xa1   :  { %v3077_v11 = vmul.f32 -1.442695, %v152_v17  ;;  %v3078_v35 = vmul.f32 -1.442695, %v172_v56  ;;  %9851 = vst [vmem:[#allocation74_spill] sm:$0xff] %v4687_v8  ;;  %393 = vmatpush.msrb.mxu3 %v4687_v8  ;;  %v4696_v56 = vld [vmem:[%s9368_s1 + $0x218] sm:$0xff] }
  0xa2   :  { %v4701_v17 = vld [vmem:[%s9368_s1 + $0x398] sm:$0xff]  ;;  %286 = vmatpush.msrb.mxu0 %v4696_v56 }
  0xa3   :  { %3122 = vpow2.f32 %v3077_v11  ;;  %9852 = vst [vmem:[#allocation75_spill] sm:$0xff] %v4701_v17  ;;  %394 = vmatpush.msrb.mxu3 %v4701_v17  ;;  %v4710_v11 = vld [vmem:[%s9368_s1 + $0x200] sm:$0xff] }
  0xa4   :  { %3124 = vpow2.f32 %v3078_v35  ;;  %287 = vmatpush.msrb.mxu0 %v4710_v11  ;;  %v9854_v35 = vmov 0.0  }
  0xa5   :  { %379 = vmatmul.f32.vlgmr.msrb.gmra.mxu2 %v9854_v35  ;;  %395 = vmatpush.msrb.mxu3 %v4715_v27  ;;  %v4743_v27 = vld [vmem:[%s9368_s1 + $0x350] sm:$0xff] }
  0xa6   :  { %288 = vmatpush.msrb.mxu0 %v4724_v30  ;;  %9856 = vst [vmem:[#allocation78_spill] sm:$0xff] %v4743_v27  ;;  %631 = vmatpush.msrb.mxu2 %v4282_v63 }
  0xa7   :  { %396 = vmatpush.msrb.mxu3 %v4729_v24  ;;  %v4755_v24 = vld [vmem:[%s9368_s1 + $0x338] sm:$0xff] }
  0xa8   :  { %9857 = vst [vmem:[#allocation79_spill] sm:$0xff] %v4755_v24  ;;  %289 = vmatpush.msrb.mxu0 %v4738_v21  ;;  %632 = vmatpush.msrb.mxu2 %v4298_v18  ;;  %v4787_v18 = vld [vmem:[%s9368_s1 + $0x490] sm:$0xff] }
  0xa9   :  { %v3123_v34 = vpop.eup %3122  ;;  %397 = vmatpush.msrb.mxu3 %v4743_v27  ;;  %9859 = vst [vmem:[#allocation81_spill] sm:$0xff] %v4787_v18 }
  0xaa   :  { %v3125_v17 = vpop.eup %3124  ;;  %v156_v8 = vadd.f32 1.0, %v3123_v34  ;;  %290 = vmatpush.msrb.mxu0 %v4750_v37  ;;  %633 = vmatpush.msrb.mxu2 %v4310_v44  ;;  %v4797_v44 = vld [vmem:[%s9368_s1 + $0x2] ss:$0 sm:$0xff]  ;;  %v149_v60 = vpop.f32.mrf.mxu2 }
  0xab   :  { %v4757_v58 = vadd.f32 1.0, %v3125_v17  ;;  %398 = vmatpush.msrb.mxu3 %v4755_v24  ;;  %v4775_v17 = vld [vmem:[%s9368_s1 + $0x4a8] sm:$0xff] }
  0xac   :  { %3126 = vrcp.f32 %v156_v8  ;;  %9858 = vst [vmem:[#allocation80_spill] sm:$0xff] %v4775_v17  ;;  %403 = vmatpush.msra.mxu0 %v4775_v17  ;;  %634 = vmatpush.msrb.mxu2 %v4336_v59  ;;  %v168_v42 = vand.u32 2147483648, %v156_v8  ;;  %v4808_v59 = vperm.slane %v4570_v32, 2  ;;  %vm162_vm1 = vweird.f32 %v156_v8 }
  0xad   :  { %3128 = vrcp.f32 %v4757_v58  ;;  %v192_v17 = vadd.f32 %v149_v60, %v4797_v44  ;;  %vm182_vm5 = vweird.f32 %v4757_v58 }
  0xae   :  { %404 = vmatpush.msra.mxu0 %v4787_v18  ;;  %v166_v18 = vand.u32 2147483647, %v156_v8  ;;  %635 = vmatpush.msrb.mxu2 %v4354_v57  ;;  %9861 = vst [vmem:[#allocation83_spill] sm:$0xff] %v4808_v59  ;;  %v169_v32 = vor.u32 1.1754944e-38, %v168_v42  ;;  %v4833_v42 = vld [vmem:[%s9368_s1 + $0x430] sm:$0xff] }
  0xb0   :  { %405 = vmatpush.msra.mxu0 %v4803_v9  ;;  %636 = vmatpush.msrb.mxu2 %v4372_v53  ;;  %vm167_vm3 = vcmp.eq.f32.partialorder %v166_v18, 8.507059e+37  ;;  %v43_v53 = vadd.f32 %v4808_v59, %v33_v39  ;;  %v4844_v18 = vld [vmem:[%s9368_s1 + $0x418] sm:$0xff] }
  0xb2   :  { %v3127_v34 = vpop.eup %3126  ;;  %406 = vmatpush.msra.mxu0 %v4814_v46  ;;  %637 = vmatpush.msrb.mxu2 %v4390_v51  ;;  %v186_v51 = vand.u32 2147483647, %v4757_v58 }
  0xb3   :  { %v4777_v43 = vpop.eup %3128  ;;  %v158_v40 = vmul.f32 %v3127_v34, %v156_v8  ;;  %vm163_vm0 = vweird.f32 %v3127_v34  ;;  %v188_v8 = vand.u32 2147483648, %v4757_v58 }
  0xb4   :  { %v178_v63 = vmul.f32 %v4777_v43, %v4757_v58  ;;  %vm164_vm2 = vmor %vm162_vm1, %vm163_vm0  ;;  %vm183_vm4 = vweird.f32 %v4777_v43  ;;  %638 = vmatpush.msrb.mxu2 %v4408_v31  ;;  %v4852_v31 = vld [vmem:[%s9368_s1 + $0x400] sm:$0xff]  ;;  %vm187_vm7 = vcmp.eq.f32.partialorder %v186_v51, 8.507059e+37  ;;  %v4859_v58 = vld [vmem:[%s9368_s1 + $0x3e8] sm:$0xff] }
  0xb5   :  { %v159_v24 = vsub.f32 1.0, %v158_v40  ;;  %vm184_vm6 = vmor %vm182_vm5, %vm183_vm4  ;;  %v9879_v51 = vld [vmem:[#allocation37_spill] sm:$0xff] }
  0xb6   :  { %v179_v27 = vsub.f32 1.0, %v178_v63  ;;  %639 = vmatpush.msrb.mxu2 %v4426_v55 }
  0xb7   :  { %v160_v40 = vmul.f32 %v3127_v34, %v159_v24 }
  0xb8   :  { %v180_v63 = vmul.f32 %v4777_v43, %v179_v27  ;;  %v4824_v27 = vld [vmem:[%s9368_s1 + $0x448] sm:$0xff]  ;;  %640 = vmatpush.msrb.mxu2 %v4444_v52 }
  0xb9   :  { %v161_v24 = vadd.f32 %v3127_v34, %v160_v40  ;;  %407 = vmatpush.msra.mxu0 %v4824_v27 }
  0xba   :  { %v181_v28 = vadd.f32 %v4777_v43, %v180_v63  ;;  %641 = vmatpush.msrb.mxu2 %v4462_v50  ;;  %v4873_v63 = vld [vmem:[%s9368_s1 + $0x3b8] sm:$0xff] }
  0xbb   :  { %v165_v57 = vsel %vm164_vm2, %v3127_v34, %v161_v24  ;;  %408 = vmatpush.msra.mxu0 %v4833_v42 }
  0xbc   :  { %v170_v60 = vsel %vm167_vm3, %v169_v32, %v165_v57  ;;  %v185_v39 = vsel %vm184_vm6, %v4777_v43, %v181_v28  ;;  %v4866_v43 = vld [vmem:[%s9368_s1 + $0x3d0] sm:$0xff]  ;;  %642 = vmatpush.msrb.mxu2 %v4480_v61  ;;  %v4880_v57 = vld [vmem:[%s9368_s1 + $0x3a0] sm:$0xff]  ;;  %v4889_v28 = vld [vmem:[%s9368_s1 + $0x388] sm:$0xff] }
  0xbd   :  { %v193_v34 = vmul.f32 %v192_v17, %v170_v60  ;;  %409 = vmatpush.msra.mxu0 %v4844_v18  ;;  %v189_v17 = vor.u32 1.1754944e-38, %v188_v8  ;;  %v9873_v60 = vld [vmem:[#allocation68_spill] sm:$0xff] }
  0xbe   :  { %643 = vmatpush.msrb.mxu2 %v4504_v3  ;;  %v4898_v3 = vld [vmem:[%s9368_s1 + $0x370] sm:$0xff] }
  0xbf   :  { %v194_v40 = vadd.f32 %v193_v34, %v43_v53  ;;  %410 = vmatpush.msra.mxu0 %v4852_v31  ;;  %v190_v55 = vsel %vm187_vm7, %v189_v17, %v185_v39  ;;  %9862 = vst [vmem:[#allocation84_spill] sm:$0xff] %v4898_v3  ;;  %v9875_v53 = vld [vmem:[#allocation33_spill] sm:$0xff]  ;;  %v9876_v8 = vld [vmem:[#allocation12_spill] sm:$0xff]  ;;  %v9877_v34 = vld [vmem:[#allocation35_spill] sm:$0xff] }
  0xc0   :  { %v196_v52 = vsub.f32 1.0, %v190_v55  ;;  %v198_v32 = vmul.f32 0.0, %v190_v55  ;;  %644 = vmatpush.msrb.mxu2 %v4528_v1  ;;  %v4905_v1 = vld [vmem:[%s9368_s1 + $0x358] sm:$0xff]  ;;  %v9885_v17 = vld [vmem:[#allocation43_spill] sm:$0xff] }
  0xc1   :  { %3130 = vtanh.f32 %v194_v40  ;;  %411 = vmatpush.msra.mxu0 %v4859_v58  ;;  %9863 = vst [vmem:[#allocation85_spill] sm:$0xff] %v4905_v1  ;;  %v9881_v40 = vld [vmem:[#allocation39_spill] sm:$0xff]  ;;  %v9883_v39 = vld [vmem:[#allocation41_spill] sm:$0xff] }
  0xc2   :  { %645 = vmatpush.msrb.mxu2 %v4547_v49  ;;  %v4912_v49 = vld [vmem:[%s9368_s1 + $0x340] sm:$0xff]  ;;  %v9887_v55 = vld [vmem:[#allocation45_spill] sm:$0xff] }
  0xc3   :  { %412 = vmatpush.msra.mxu0 %v4866_v43  ;;  %9864 = vst [vmem:[#allocation86_spill] sm:$0xff] %v4912_v49 }
  0xc4   :  { %646 = vmatpush.msrb.mxu2 %v4577_v6  ;;  %v9870_v6 = vld [vmem:[#allocation64_spill] sm:$0xff] }
  0xc5   :  { %413 = vmatpush.msra.mxu0 %v4873_v63 }
  0xc7   :  { %v3131_v24 = vpop.eup %3130  ;;  %414 = vmatpush.msra.mxu0 %v4880_v57 }
  0xc8   :  { %v197_v50 = vmul.f32 %v3131_v24, %v196_v52  ;;  %v9889_v52 = vld [vmem:[#allocation47_spill] sm:$0xff]  ;;  %v9891_v24 = vld [vmem:[#allocation49_spill] sm:$0xff] }
  0xc9   :  { %415 = vmatpush.msra.mxu0 %v4889_v28 }
  0xca   :  { %v4884_v61 = vadd.f32 %v198_v32, %v197_v50  ;;  %v9893_v50 = vld [vmem:[#allocation51_spill] sm:$0xff]  ;;  %v9895_v32 = vld [vmem:[#allocation53_spill] sm:$0xff] }
  0xcb   :  { %416 = vmatpush.msra.mxu0 %v4898_v3 }
  0xcc   :  { %271 = vmatmul.f32.vlgmr.msra.gmra.mxu3 %v4884_v61  ;;  %291 = vmatmul.f32.vlgmr.msrb.gmra.mxu0 %v4884_v61 }
  0xcd   :  { %311 = vmatmul.f32.vlgmr.msrb.gmra.mxu1 %v4884_v61  ;;  %519 = vmatmul.f32.vlgmr.msra.gmra.mxu2 %v4884_v61 }
  0xce   :  { %523 = vmatpush.msra.mxu3 %v3997_v14  ;;  %611 = vmatpush.msrb.mxu1 %v4492_v45  ;;  %v9865_v14 = vld [vmem:[#allocation27_spill] sm:$0xff] }
  0xcf   :  { %417 = vmatpush.msra.mxu0 %v4905_v1  ;;  %771 = vmatpush.msra.mxu2 %v3926_v0  ;;  %v9866_v0 = vld [vmem:[#allocation62_spill] sm:$0xff] }
  0xd0   :  { %524 = vmatpush.msra.mxu3 %v4004_v15  ;;  %612 = vmatpush.msrb.mxu1 %v4511_v41  ;;  %v9867_v15 = vld [vmem:[#allocation2_spill] sm:$0xff] }
  0xd1   :  { %418 = vmatpush.msra.mxu0 %v4912_v49  ;;  %772 = vmatpush.msra.mxu2 %v9867_v15  ;;  %v9898_v15 = vld [vmem:[#allocation30_spill] sm:$0xff] }
  0xd2   :  { %525 = vmatpush.msra.mxu3 %v4025_v19  ;;  %613 = vmatpush.msrb.mxu1 %v4535_v48  ;;  %v9868_v19 = vld [vmem:[#allocation6_spill] sm:$0xff] }
  0xd3   :  { %591 = vmatpush.msrb.mxu0 %v4229_v54  ;;  %v9869_v54 = vld [vmem:[#allocation29_spill] sm:$0xff]  ;;  %773 = vmatpush.msra.mxu2 %v3948_v5  ;;  %v9878_v5 = vld [vmem:[#allocation15_spill] sm:$0xff] }
  0xd4   :  { %526 = vmatpush.msra.mxu3 %v4043_v22  ;;  %419 = vmatmul.f32.vlgmr.msra.gmra.mxu0 %v9854_v35  ;;  %v9871_v22 = vld [vmem:[#allocation8_spill] sm:$0xff] }
  0xd5   :  { %399 = vmatmul.f32.vlgmr.msrb.gmra.mxu3 %v9854_v35  ;;  %499 = vmatmul.f32.vlgmr.msra.gmra.mxu1 %v4884_v61  ;;  %v9872_v35 = vld [vmem:[#allocation31_spill] sm:$0xff] }
  0xd6   :  { %527 = vmatpush.msra.mxu3 %v4061_v25  ;;  %592 = vmatpush.msrb.mxu0 %v9865_v14  ;;  %v9874_v25 = vld [vmem:[#allocation10_spill] sm:$0xff]  ;;  %v9897_v14 = vld [vmem:[#allocation13_spill] sm:$0xff] }
  0xd7   :  { %614 = vmatpush.msrb.mxu1 %v9866_v0  ;;  %774 = vmatpush.msra.mxu2 %v3960_v7  ;;  %v9880_v7 = vld [vmem:[#allocation18_spill] sm:$0xff] }
  0xd8   :  { %528 = vmatpush.msra.mxu3 %v9868_v19  ;;  %593 = vmatpush.msrb.mxu0 %v9869_v54  ;;  %v9899_v19 = vld [vmem:[#allocation55_spill] sm:$0xff]  ;;  %v9900_v54 = vld [vmem:[#allocation57_spill] sm:$0xff] }
  0xd9   :  { %615 = vmatpush.msrb.mxu1 %v9870_v6  ;;  %775 = vmatpush.msra.mxu2 %v3975_v10  ;;  %v9882_v10 = vld [vmem:[#allocation21_spill] sm:$0xff] }
  0xda   :  { %529 = vmatpush.msra.mxu3 %v9871_v22  ;;  %594 = vmatpush.msrb.mxu0 %v9872_v35  ;;  %v9901_v22 = vld [vmem:[#allocation81_spill] sm:$0xff]  ;;  %v9902_v35 = vld [vmem:[#allocation32_spill] sm:$0xff] }
  0xdb   :  { %616 = vmatpush.msrb.mxu1 %v9873_v60  ;;  %776 = vmatpush.msra.mxu2 %v3987_v12  ;;  %v9884_v12 = vld [vmem:[#allocation22_spill] sm:$0xff] }
  0xdc   :  { %530 = vmatpush.msra.mxu3 %v9874_v25  ;;  %595 = vmatpush.msrb.mxu0 %v9875_v53  ;;  %v9903_v25 = vld [vmem:[#allocation16_spill] sm:$0xff]  ;;  %v9905_v53 = vld [vmem:[#allocation34_spill] sm:$0xff] }
  0xdd   :  { %617 = vmatpush.msrb.mxu1 %v4624_v62  ;;  %777 = vmatpush.msra.mxu2 %v4009_v16  ;;  %v9886_v16 = vld [vmem:[#allocation23_spill] sm:$0xff] }
  0xde   :  { %531 = vmatpush.msra.mxu3 %v9876_v8  ;;  %596 = vmatpush.msrb.mxu0 %v9877_v34  ;;  %v9906_v8 = vld [vmem:[#allocation19_spill] sm:$0xff] }
  0xdf   :  { %618 = vmatpush.msrb.mxu1 %v4640_v38  ;;  %778 = vmatpush.msra.mxu2 %v4030_v20  ;;  %v9888_v20 = vld [vmem:[#allocation24_spill] sm:$0xff]  ;;  %v9907_v34 = vld [vmem:[#allocation59_spill] sm:$0xff] }
  0xe0   :  { %532 = vmatpush.msra.mxu3 %v9878_v5  ;;  %597 = vmatpush.msrb.mxu0 %v9879_v51  ;;  %v9908_v5 = vld [vmem:[#allocation36_spill] sm:$0xff]  ;;  %v9909_v51 = vld [vmem:[#allocation63_spill] sm:$0xff] }
  0xe1   :  { %619 = vmatpush.msrb.mxu1 %v4654_v13  ;;  %779 = vmatpush.msra.mxu2 %v4048_v23  ;;  %v9890_v23 = vld [vmem:[#allocation25_spill] sm:$0xff] }
  0xe2   :  { %533 = vmatpush.msra.mxu3 %v9880_v7  ;;  %598 = vmatpush.msrb.mxu0 %v9881_v40  ;;  %v9910_v7 = vld [vmem:[#allocation38_spill] sm:$0xff]  ;;  %v9911_v40 = vld [vmem:[#allocation65_spill] sm:$0xff] }
  0xe3   :  { %620 = vmatpush.msrb.mxu1 %v4668_v2  ;;  %780 = vmatpush.msra.mxu2 %v4066_v26  ;;  %v9892_v26 = vld [vmem:[#allocation26_spill] sm:$0xff] }
  0xe4   :  { %534 = vmatpush.msra.mxu3 %v9882_v10  ;;  %599 = vmatpush.msrb.mxu0 %v9883_v39  ;;  %v9912_v10 = vld [vmem:[#allocation40_spill] sm:$0xff]  ;;  %v9913_v39 = vld [vmem:[#allocation69_spill] sm:$0xff] }
  0xe5   :  { %621 = vmatpush.msrb.mxu1 %v4682_v4  ;;  %781 = vmatpush.msra.mxu2 %v4084_v29  ;;  %v9894_v29 = vld [vmem:[#allocation28_spill] sm:$0xff] }
  0xe6   :  { %535 = vmatpush.msra.mxu3 %v9884_v12  ;;  %600 = vmatpush.msrb.mxu0 %v9885_v17  ;;  %v9914_v12 = vld [vmem:[#allocation42_spill] sm:$0xff] }
  0xe7   :  { %622 = vmatpush.msrb.mxu1 %v4696_v56  ;;  %782 = vmatpush.msra.mxu2 %v4105_v33  ;;  %v9896_v33 = vld [vmem:[#allocation80_spill] sm:$0xff]  ;;  %v9915_v17 = vld [vmem:[#allocation70_spill] sm:$0xff] }
  0xe8   :  { %536 = vmatpush.msra.mxu3 %v9886_v16  ;;  %601 = vmatpush.msrb.mxu0 %v9887_v55  ;;  %v9916_v16 = vld [vmem:[#allocation44_spill] sm:$0xff]  ;;  %v9917_v55 = vld [vmem:[#allocation71_spill] sm:$0xff] }
  0xe9   :  { %623 = vmatpush.msrb.mxu1 %v4710_v11  ;;  %783 = vmatpush.msra.mxu2 %v4123_v36  ;;  %v9904_v36 = vld [vmem:[#allocation58_spill] sm:$0xff] }
  0xea   :  { %537 = vmatpush.msra.mxu3 %v9888_v20  ;;  %602 = vmatpush.msrb.mxu0 %v9889_v52  ;;  %v9918_v20 = vld [vmem:[#allocation46_spill] sm:$0xff]  ;;  %v9919_v52 = vld [vmem:[#allocation72_spill] sm:$0xff] }
  0xeb   :  { %624 = vmatpush.msrb.mxu1 %v4724_v30  ;;  %784 = vmatpush.msra.mxu2 %v9897_v14  ;;  %v9926_v14 = vld [vmem:[#allocation54_spill] sm:$0xff] }
  0xec   :  { %538 = vmatpush.msra.mxu3 %v9890_v23  ;;  %603 = vmatpush.msrb.mxu0 %v9891_v24  ;;  %v9920_v23 = vld [vmem:[#allocation48_spill] sm:$0xff]  ;;  %v9921_v24 = vld [vmem:[#allocation73_spill] sm:$0xff] }
  0xed   :  { %539 = vmatmul.f32.vlgmr.msra.gmra.mxu3 %v4884_v61  ;;  %625 = vmatpush.msrb.mxu1 %v4738_v21 }
  0xee   :  { %651 = vmatpush.msrb.mxu3 %v9892_v26  ;;  %604 = vmatpush.msrb.mxu0 %v9893_v50  ;;  %v9922_v26 = vld [vmem:[#allocation50_spill] sm:$0xff] }
  0xef   :  { %626 = vmatpush.msrb.mxu1 %v4750_v37  ;;  %785 = vmatpush.msra.mxu2 %v9903_v25  ;;  %v9923_v50 = vld [vmem:[#allocation74_spill] sm:$0xff]  ;;  %v5038_v25 = vld [vmem:[%s9368_s1 + $0x188] sm:$0xff] }
  0xf0   :  { %652 = vmatpush.msrb.mxu3 %v9894_v29  ;;  %605 = vmatpush.msrb.mxu0 %v9895_v32  ;;  %v9924_v29 = vld [vmem:[#allocation52_spill] sm:$0xff]  ;;  %v9925_v32 = vld [vmem:[#allocation75_spill] sm:$0xff]  ;;  %9931 = vst [vmem:[#allocation62_spill] sm:$0xff] %v5038_v25 }
  0xf1   :  { %691 = vmatpush.msra.mxu1 %v9896_v33  ;;  %786 = vmatpush.msra.mxu2 %v9906_v8  ;;  %v9934_v8 = vld [vmem:[#allocation79_spill] sm:$0xff] }
  0xf2   :  { %653 = vmatpush.msrb.mxu3 %v9898_v15  ;;  %606 = vmatpush.msrb.mxu0 %v9899_v19  ;;  %v9927_v15 = vld [vmem:[#allocation76_spill] sm:$0xff] }
  0xf3   :  { %692 = vmatpush.msra.mxu1 %v9901_v22  ;;  %v9928_v19 = vld [vmem:[#allocation56_spill] sm:$0xff] }
  0xf4   :  { %671 = vmatpush.msra.mxu0 %v9900_v54  ;;  %654 = vmatpush.msrb.mxu3 %v9902_v35  ;;  %v5030_v54 = vld [vmem:[%s9368_s1 + $0x1a0] sm:$0xff]  ;;  %v9930_v35 = vld [vmem:[#allocation77_spill] sm:$0xff] }
  0xf5   :  { %693 = vmatpush.msra.mxu1 %v4803_v9  ;;  %9929 = vst [vmem:[#allocation27_spill] sm:$0xff] %v5030_v54 }
  0xf6   :  { %672 = vmatpush.msra.mxu0 %v9904_v36  ;;  %655 = vmatpush.msrb.mxu3 %v9905_v53  ;;  %v9932_v36 = vld [vmem:[#allocation78_spill] sm:$0xff]  ;;  %v5046_v53 = vld [vmem:[%s9368_s1 + $0x170] sm:$0xff] }
  0xf7   :  { %694 = vmatpush.msra.mxu1 %v4814_v46  ;;  %9933 = vst [vmem:[#allocation2_spill] sm:$0xff] %v5046_v53 }
  0xf8   :  { %673 = vmatpush.msra.mxu0 %v9907_v34  ;;  %656 = vmatpush.msrb.mxu3 %v9908_v5  ;;  %v5053_v34 = vld [vmem:[%s9368_s1 + $0x158] sm:$0xff]  ;;  %v5059_v5 = vld [vmem:[%s9368_s1 + $0x140] sm:$0xff] }
  0xf9   :  { %695 = vmatpush.msra.mxu1 %v4824_v27  ;;  %9935 = vst [vmem:[#allocation6_spill] sm:$0xff] %v5053_v34 }
  0xfa   :  { %674 = vmatpush.msra.mxu0 %v9909_v51  ;;  %657 = vmatpush.msrb.mxu3 %v9910_v7  ;;  %9936 = vst [vmem:[#allocation29_spill] sm:$0xff] %v5059_v5  ;;  %v5065_v51 = vld [vmem:[%s9368_s1 + $0x128] sm:$0xff]  ;;  %v5071_v7 = vld [vmem:[%s9368_s1 + $0x110] sm:$0xff] }
  0xfb   :  { %696 = vmatpush.msra.mxu1 %v4833_v42  ;;  %9937 = vst [vmem:[#allocation64_spill] sm:$0xff] %v5065_v51 }
  0xfc   :  { %675 = vmatpush.msra.mxu0 %v9911_v40  ;;  %658 = vmatpush.msrb.mxu3 %v9912_v10  ;;  %9938 = vst [vmem:[#allocation8_spill] sm:$0xff] %v5071_v7  ;;  %v9939_v40 = vld [vmem:[#allocation3_spill] sm:$0xff]  ;;  %v9940_v10 = vld [vmem:[#allocation4_spill] sm:$0xff] }
  0xfd   :  { %697 = vmatpush.msra.mxu1 %v4844_v18 }
  0xfe   :  { %676 = vmatpush.msra.mxu0 %v9913_v39  ;;  %659 = vmatpush.msrb.mxu3 %v9914_v12  ;;  %v9941_v39 = vld [vmem:[#allocation5_spill] sm:$0xff]  ;;  %v9942_v12 = vld [vmem:[#allocation7_spill] sm:$0xff] }
  0xff   :  { %698 = vmatpush.msra.mxu1 %v4852_v31 }
 0x100   :  { %677 = vmatpush.msra.mxu0 %v9915_v17  ;;  %660 = vmatpush.msrb.mxu3 %v9916_v16  ;;  %v9943_v17 = vld [vmem:[#allocation9_spill] sm:$0xff]  ;;  %v9944_v16 = vld [vmem:[#allocation11_spill] sm:$0xff] }
 0x101   :  { %699 = vmatpush.msra.mxu1 %v4859_v58 }
 0x102   :  { %678 = vmatpush.msra.mxu0 %v9917_v55  ;;  %661 = vmatpush.msrb.mxu3 %v9918_v20  ;;  %v9945_v55 = vld [vmem:[#allocation14_spill] sm:$0xff]  ;;  %v9946_v20 = vld [vmem:[#allocation17_spill] sm:$0xff] }
 0x103   :  { %700 = vmatpush.msra.mxu1 %v4866_v43 }
 0x104   :  { %679 = vmatpush.msra.mxu0 %v9919_v52  ;;  %662 = vmatpush.msrb.mxu3 %v9920_v23  ;;  %v9947_v52 = vld [vmem:[#allocation20_spill] sm:$0xff] }
 0x105   :  { %701 = vmatpush.msra.mxu1 %v4873_v63 }
 0x106   :  { %680 = vmatpush.msra.mxu0 %v9921_v24  ;;  %663 = vmatpush.msrb.mxu3 %v9922_v26  ;;  %v475_v24 = vpop.permute.xlu0 %474 }
 0x107   :  { %702 = vmatpush.msra.mxu1 %v4880_v57 }
 0x108   :  { %681 = vmatpush.msra.mxu0 %v9923_v50  ;;  %664 = vmatpush.msrb.mxu3 %v9924_v29  ;;  %v9948_v50 = vld [vmem:[#allocation61_spill] sm:$0xff] }
 0x109   :  { %703 = vmatpush.msra.mxu1 %v4889_v28  ;;  %v478_v29 = vmul.f32 %v475_v24, %v9948_v50 }
 0x10a   :  { %682 = vmatpush.msra.mxu0 %v9925_v32  ;;  %665 = vmatpush.msrb.mxu3 %v9926_v14  ;;  %v3075_v32 = vld [vmem:[%s9368_s1 + $0x1] ss:$8 sm:$0x7] }
 0x10b   :  { %704 = vmatpush.msra.mxu1 %v4898_v3  ;;  %v5089_v14 = vperm.slane %v3075_v32, 0  ;;  %v5095_v50 = vperm.slane %v3075_v32, 1 }
 0x10c   :  { %683 = vmatpush.msra.mxu0 %v9927_v15  ;;  %666 = vmatpush.msrb.mxu3 %v9928_v19  ;;  %v9950_v19 = vld [vmem:[#allocation60_spill] sm:$0xff] }
 0x10d   :  { %705 = vmatpush.msra.mxu1 %v4905_v1  ;;  %9949 = vst [vmem:[#allocation31_spill] sm:$0xff] %v5089_v14 }
 0x10e   :  { %791 = vmatpush.msra.mxu3 %v5030_v54  ;;  %684 = vmatpush.msra.mxu0 %v9930_v35  ;;  %9953 = vst [vmem:[#allocation68_spill] sm:$0xff] %v5095_v50 }
 0x10f   :  { %706 = vmatpush.msra.mxu1 %v4912_v49 }
 0x110   :  { %792 = vmatpush.msra.mxu3 %v5038_v25  ;;  %685 = vmatpush.msra.mxu0 %v9932_v36 }
 0x112   :  { %793 = vmatpush.msra.mxu3 %v5046_v53  ;;  %686 = vmatpush.msra.mxu0 %v9934_v8 }
 0x114   :  { %794 = vmatpush.msra.mxu3 %v5053_v34 }
 0x116   :  { %795 = vmatpush.msra.mxu3 %v5059_v5 }
 0x118   :  { %796 = vmatpush.msra.mxu3 %v5065_v51 }
 0x11a   :  { %797 = vmatpush.msra.mxu3 %v5071_v7 }
 0x11c   :  { %798 = vmatpush.msra.mxu3 %v9939_v40  ;;  %v477_v40 = vmul.f32 %v475_v24, %v9950_v19 }
 0x11e   :  { %799 = vmatpush.msra.mxu3 %v9940_v10 }
 0x120   :  { %800 = vmatpush.msra.mxu3 %v9941_v39  ;;  %v9951_v39 = vld [vmem:[#allocation67_spill] sm:$0xff] }
 0x122   :  { %801 = vmatpush.msra.mxu3 %v9942_v12  ;;  %v481_v12 = vadd.f32 %v478_v29, %v9951_v39 }
 0x124   :  { %802 = vmatpush.msra.mxu3 %v9943_v17 }
 0x126   :  { %803 = vmatpush.msra.mxu3 %v9944_v16 }
 0x128   :  { %804 = vmatpush.msra.mxu3 %v9945_v55  ;;  %v380_v23 = vpop.f32.mrf.mxu2 }
 0x12a   :  { %805 = vmatpush.msra.mxu3 %v9946_v20  ;;  %v9952_v20 = vld [vmem:[#allocation66_spill] sm:$0xff] }
 0x12c   :  { %806 = vmatpush.msra.mxu3 %v9947_v52  ;;  %v480_v52 = vadd.f32 %v477_v40, %v9952_v20 }
 0x149   :  { %v292_v49 = vpop.f32.mrf.mxu0 }
 0x14a   :  { %v5083_v26 = vpop.f32.mrf.mxu1  ;;  %v293_v19 = vadd.f32 %v292_v49, %v5095_v50 }
 0x14f   :  { %v272_v10 = vpop.f32.mrf.mxu3 }
 0x150   :  { %v273_v17 = vadd.f32 %v272_v10, %v5089_v14  ;;  %v520_v16 = vpop.f32.mrf.mxu2  ;;  %v479_v14 = vmul.f32 %v475_v24, %v4790_v47 }
 0x151   :  { %v563_v55 = vadd.f32 %v520_v16, %v481_v12 }
 0x152   :  { %v423_v7 = vadd.f32 %v380_v23, %v273_v17  ;;  %v500_v51 = vpop.f32.mrf.mxu1 }
 0x153   :  { %v3082_v5 = vmul.f32 -1.442695, %v563_v55  ;;  %v543_v34 = vadd.f32 %v500_v51, %v480_v52  ;;  %v5114_v55 = vld [vmem:[%s9368_s1 + $0x3] ss:$0 sm:$0xff]  ;;  %v420_v52 = vpop.f32.mrf.mxu0 }
 0x154   :  { %v3079_v53 = vmul.f32 -1.442695, %v423_v7  ;;  %v463_v25 = vadd.f32 %v420_v52, %v5114_v55 }
 0x155   :  { %3132 = vpow2.f32 %v3082_v5  ;;  %v3081_v1 = vmul.f32 -1.442695, %v543_v34 }
 0x156   :  { %3134 = vpow2.f32 %v3079_v53 }
 0x157   :  { %3136 = vpow2.f32 %v3081_v1 }
 0x158   :  { %v400_v29 = vpop.f32.mrf.mxu3 }
 0x159   :  { %v443_v10 = vadd.f32 %v400_v29, %v293_v19 }
 0x15b   :  { %v3133_v39 = vpop.eup %3132  ;;  %v3080_v12 = vmul.f32 -1.442695, %v443_v10 }
 0x15c   :  { %v3135_v16 = vpop.eup %3134  ;;  %v5098_v40 = vadd.f32 1.0, %v3133_v39  ;;  %v759_v39 = vld [vmem:[%s9369_s0 + $0x10] sm:$0xff] }
 0x15d   :  { %v3137_v23 = vpop.eup %3136  ;;  %v427_v17 = vadd.f32 1.0, %v3135_v16  ;;  %3138 = vpow2.f32 %v3080_v12  ;;  %762 = vperm.xlu1 %3120, %v759_v39   ;;  %v5116_v12 = vperm.slane %v3075_v32, 2 }
 0x15e   :  { %3140 = vrcp.f32 %v5098_v40  ;;  %v547_v51 = vadd.f32 1.0, %v3137_v23  ;;  %vm573_vm3 = vweird.f32 %v5098_v40 }
 0x15f   :  { %3142 = vrcp.f32 %v427_v17  ;;  %9954 = vst [vmem:[#allocation10_spill] sm:$0xff] %v5116_v12  ;;  %v437_v16 = vand.u32 2147483647, %v427_v17  ;;  %v439_v23 = vand.u32 2147483648, %v427_v17  ;;  %vm433_vm9 = vweird.f32 %v427_v17 }
 0x160   :  { %3144 = vrcp.f32 %v547_v51  ;;  %v557_v8 = vand.u32 2147483647, %v547_v51  ;;  %v559_v3 = vand.u32 2147483648, %v547_v51  ;;  %v313_v32 = vadd.f32 %v5083_v26, %v5116_v12 }
 0x161   :  { %vm438_vm12 = vcmp.eq.f32.partialorder %v437_v16, 8.507059e+37  ;;  %vm553_vm13 = vweird.f32 %v547_v51 }
 0x162   :  { %vm558_vm15 = vcmp.eq.f32.partialorder %v557_v8, 8.507059e+37  ;;  %v482_v8 = vadd.f32 %v479_v14, %v4808_v59 }
 0x163   :  { %v3139_v34 = vpop.eup %3138 }
 0x164   :  { %v5101_v53 = vpop.eup %3140  ;;  %v5103_v49 = vadd.f32 1.0, %v3139_v34 }
 0x165   :  { %v3143_v1 = vpop.eup %3142  ;;  %v569_v5 = vmul.f32 %v5101_v53, %v5098_v40  ;;  %vm574_vm1 = vweird.f32 %v5101_v53 }
 0x166   :  { %3146 = vrcp.f32 %v5103_v49  ;;  %v429_v7 = vmul.f32 %v3143_v1, %v427_v17  ;;  %v3145_v19 = vpop.eup %3144  ;;  %vm434_vm8 = vweird.f32 %v3143_v1  ;;  %v457_v16 = vand.u32 2147483647, %v5103_v49  ;;  %vm575_vm5 = vmor %vm573_vm3, %vm574_vm1 }
 0x167   :  { %v549_v10 = vmul.f32 %v3145_v19, %v547_v51  ;;  %v570_v34 = vsub.f32 1.0, %v569_v5  ;;  %vm554_vm10 = vweird.f32 %v3145_v19  ;;  %vm435_vm11 = vmor %vm433_vm9, %vm434_vm8  ;;  %v440_v5 = vor.u32 1.1754944e-38, %v439_v23 }
 0x168   :  { %v430_v29 = vsub.f32 1.0, %v429_v7  ;;  %vm555_vm14 = vmor %vm553_vm13, %vm554_vm10  ;;  %v459_v23 = vand.u32 2147483648, %v5103_v49  ;;  %vm453_vm2 = vweird.f32 %v5103_v49  ;;  %vm458_vm6 = vcmp.eq.f32.partialorder %v457_v16, 8.507059e+37  ;;  %v5150_v16 = vld [vmem:[%s9368_s1 + $0x328] sm:$0xff] }
 0x169   :  { %v550_v50 = vsub.f32 1.0, %v549_v10 }
 0x16a   :  { %v431_v20 = vmul.f32 %v3143_v1, %v430_v29  ;;  %v571_v29 = vmul.f32 %v5101_v53, %v570_v34 }
 0x16b   :  { %v551_v7 = vmul.f32 %v3145_v19, %v550_v50  ;;  %v1047_v50 = vld [vmem:[%s9369_s0 + $0x18] sm:$0xff] }
 0x16c   :  { %v3147_v54 = vpop.eup %3146  ;;  %v432_v36 = vadd.f32 %v3143_v1, %v431_v20  ;;  %v560_v20 = vor.u32 1.1754944e-38, %v559_v3  ;;  %1050 = vperm.xlu1 %3120, %v1047_v50   ;;  %v572_v3 = vadd.f32 %v5101_v53, %v571_v29 }
 0x16d   :  { %v449_v39 = vmul.f32 %v3147_v54, %v5103_v49  ;;  %v552_v10 = vadd.f32 %v3145_v19, %v551_v7  ;;  %vm454_vm0 = vweird.f32 %v3147_v54  ;;  %v2199_v49 = vld [vmem:[%s9369_s0 + $0x38] sm:$0xff] }
 0x16e   :  { %v436_v24 = vsel %vm435_vm11, %v3143_v1, %v432_v36  ;;  %vm455_vm4 = vmor %vm453_vm2, %vm454_vm0 }
 0x16f   :  { %v450_v52 = vsub.f32 1.0, %v449_v39  ;;  %v441_v47 = vsel %vm438_vm12, %v440_v5, %v436_v24  ;;  %v556_v12 = vsel %vm555_vm14, %v3145_v19, %v552_v10  ;;  %v576_v39 = vsel %vm575_vm5, %v5101_v53, %v572_v3  ;;  %v5211_v3 = vld [vmem:[%s9368_s1 + $0x2f8] sm:$0xff] }
 0x170   :  { %v464_v26 = vmul.f32 %v463_v25, %v441_v47  ;;  %v540_v17 = vpop.f32.mrf.mxu3  ;;  %v561_v1 = vsel %vm558_vm15, %v560_v20, %v556_v12  ;;  %v579_v47 = vand.u32 2147483648, %v5098_v40  ;;  %v577_v12 = vand.u32 2147483647, %v5098_v40 }
 0x171   :  { %v451_v36 = vmul.f32 %v3147_v54, %v450_v52  ;;  %v583_v51 = vadd.f32 %v540_v17, %v4797_v44  ;;  %v460_v44 = vor.u32 1.1754944e-38, %v459_v23  ;;  %v5165_v23 = vld [vmem:[%s9368_s1 + $0x318] sm:$0xff] }
 0x172   :  { %v465_v34 = vadd.f32 %v464_v26, %v313_v32  ;;  %v580_v5 = vor.u32 1.1754944e-38, %v579_v47  ;;  %vm578_vm7 = vcmp.eq.f32.partialorder %v577_v12, 8.507059e+37  ;;  %v5233_v47 = vld [vmem:[%s9368_s1 + $0x130] sm:$0xff]  ;;  %v5258_v12 = vld [vmem:[%s9368_s1 + $0x2c8] sm:$0xff] }
 0x173   :  { %v584_v25 = vmul.f32 %v583_v51, %v561_v1  ;;  %v452_v19 = vadd.f32 %v3147_v54, %v451_v36  ;;  %v5172_v36 = vld [vmem:[%s9368_s1 + $0x190] sm:$0xff]  ;;  %v5184_v51 = vld [vmem:[%s9368_s1 + $0x300] sm:$0xff] }
 0x174   :  { %3148 = vtanh.f32 %v465_v34  ;;  %2202 = vperm.xlu1 %3120, %v2199_v49   ;;  %v581_v29 = vsel %vm578_vm7, %v580_v5, %v576_v39  ;;  %v5178_v1 = vld [vmem:[%s9368_s1 + $0x310] sm:$0xff]  ;;  %v5296_v39 = vld [vmem:[%s9368_s1 + $0x298] sm:$0xff]  ;;  %v5315_v5 = vld [vmem:[%s9368_s1 + $0x280] sm:$0xff] }
 0x175   :  { %v585_v14 = vadd.f32 %v584_v25, %v482_v8  ;;  %v456_v7 = vsel %vm455_vm4, %v3147_v54, %v452_v19  ;;  %v587_v20 = vsub.f32 1.0, %v581_v29  ;;  %v589_v53 = vmul.f32 %v581_v29, %v4884_v61  ;;  %v5159_v61 = vld [vmem:[%s9368_s1 + $0x1a8] sm:$0xff]  ;;  %v5226_v34 = vld [vmem:[%s9368_s1 + $0x2d0] sm:$0xff]  ;;  %v5239_v25 = vld [vmem:[%s9368_s1 + $0x2e0] sm:$0xff] }
 0x176   :  { %v461_v32 = vsel %vm458_vm6, %v460_v44, %v456_v7  ;;  %v5198_v8 = vld [vmem:[%s9368_s1 + $0x2e8] sm:$0xff]  ;;  %v5245_v19 = vld [vmem:[%s9368_s1 + $0x2b8] sm:$0xff]  ;;  %v5264_v44 = vld [vmem:[%s9368_s1 + $0x2a0] sm:$0xff] }
 0x177   :  { %3150 = vtanh.f32 %v585_v14  ;;  %v467_v40 = vsub.f32 1.0, %v461_v32  ;;  %v469_v52 = vmul.f32 0.0, %v461_v32  ;;  %v5277_v14 = vld [vmem:[%s9368_s1 + $0x2b0] sm:$0xff]  ;;  %v5283_v7 = vld [vmem:[%s9368_s1 + $0x288] sm:$0xff]  ;;  %v5321_v49 = vld [vmem:[%s9368_s1 + $0x258] sm:$0xff] }
 0x178   :  { %v5302_v32 = vld [vmem:[%s9368_s1 + $0x270] sm:$0xff]  ;;  %v5334_v29 = vld [vmem:[%s9368_s1 + $0x268] sm:$0xff] }
 0x17a   :  { %v3149_v24 = vpop.eup %3148 }
 0x17b   :  { %v468_v10 = vmul.f32 %v3149_v24, %v467_v40  ;;  %v5340_v40 = vld [vmem:[%s9368_s1 + $0x240] sm:$0xff]  ;;  %v5353_v24 = vld [vmem:[%s9368_s1 + $0x250] sm:$0xff] }
 0x17c   :  { %9956 = vst [vmem:[#allocation12_spill] sm:$0xff] %v5340_v40 }
 0x17d   :  { %v3151_v50 = vpop.eup %3150  ;;  %v5141_v54 = vadd.f32 %v469_v52, %v468_v10  ;;  %v5359_v10 = vld [vmem:[%s9368_s1 + $0x228] sm:$0xff]  ;;  %v5372_v52 = vld [vmem:[%s9368_s1 + $0x238] sm:$0xff] }
 0x17e   :  { %v588_v26 = vmul.f32 %v3151_v50, %v587_v20  ;;  %9958 = vst [vmem:[#allocation15_spill] sm:$0xff] %v5359_v10  ;;  %v5378_v20 = vld [vmem:[%s9368_s1 + $0x210] sm:$0xff]  ;;  %v5391_v50 = vld [vmem:[%s9368_s1 + $0x220] sm:$0xff] }
 0x17f   :  { %667 = vmatmul.f32.vlgmr.msrb.gmra.mxu3 %v5141_v54  ;;  %9960 = vst [vmem:[#allocation18_spill] sm:$0xff] %v5378_v20 }
 0x180   :  { %v5145_v17 = vadd.f32 %v589_v53, %v588_v26  ;;  %919 = vmatpush.msrb.mxu3 %v5150_v16  ;;  %v5397_v26 = vld [vmem:[%s9368_s1 + $0x1f8] sm:$0xff]  ;;  %v5410_v53 = vld [vmem:[%s9368_s1 + $0x208] sm:$0xff] }
 0x181   :  { %9962 = vst [vmem:[#allocation21_spill] sm:$0xff] %v5397_v26 }
 0x182   :  { %607 = vmatmul.f32.vlgmr.msrb.gmra.mxu0 %v5145_v17  ;;  %627 = vmatmul.f32.vlgmr.msrb.gmra.mxu1 %v5145_v17 }
 0x183   :  { %647 = vmatmul.f32.vlgmr.msrb.gmra.mxu2 %v5145_v17  ;;  %811 = vmatpush.msrb.mxu0 %v5159_v61 }
 0x184   :  { %879 = vmatpush.msrb.mxu1 %v5165_v23  ;;  %899 = vmatpush.msrb.mxu2 %v4492_v45  ;;  %v5191_v45 = vld [vmem:[%s9368_s1 + $0x178] sm:$0xff] }
 0x185   :  { %812 = vmatpush.msrb.mxu0 %v5172_v36  ;;  %920 = vmatpush.msrb.mxu3 %v5178_v1 }
 0x186   :  { %880 = vmatpush.msrb.mxu1 %v5184_v51  ;;  %900 = vmatpush.msrb.mxu2 %v4511_v41  ;;  %v5205_v41 = vld [vmem:[%s9368_s1 + $0x160] sm:$0xff] }
 0x187   :  { %813 = vmatpush.msrb.mxu0 %v5191_v45  ;;  %807 = vmatmul.f32.vlgmr.msra.gmra.mxu3 %v5145_v17 }
 0x188   :  { %881 = vmatpush.msrb.mxu1 %v5198_v8  ;;  %901 = vmatpush.msrb.mxu2 %v4535_v48  ;;  %v5220_v48 = vld [vmem:[%s9368_s1 + $0x148] sm:$0xff] }
 0x189   :  { %814 = vmatpush.msrb.mxu0 %v5205_v41  ;;  %921 = vmatpush.msrb.mxu3 %v5211_v3 }
 0x18a   :  { %687 = vmatmul.f32.vlgmr.msra.gmra.mxu0 %v5141_v54  ;;  %707 = vmatmul.f32.vlgmr.msra.gmra.mxu1 %v5141_v54 }
 0x18b   :  { %787 = vmatmul.f32.vlgmr.msra.gmra.mxu2 %v5145_v17  ;;  %815 = vmatpush.msrb.mxu0 %v5220_v48 }
 0x18c   :  { %882 = vmatpush.msrb.mxu1 %v5226_v34  ;;  %902 = vmatpush.msrb.mxu2 %v9866_v0  ;;  %v5252_v0 = vld [vmem:[%s9368_s1 + $0x118] sm:$0xff] }
 0x18d   :  { %816 = vmatpush.msrb.mxu0 %v5233_v47  ;;  %922 = vmatpush.msrb.mxu3 %v5239_v25 }
 0x18e   :  { %883 = vmatpush.msrb.mxu1 %v5245_v19  ;;  %903 = vmatpush.msrb.mxu2 %v9870_v6  ;;  %v5271_v6 = vld [vmem:[%s9368_s1 + $0x100] sm:$0xff] }
 0x18f   :  { %817 = vmatpush.msrb.mxu0 %v5252_v0  ;;  %923 = vmatpush.msrb.mxu3 %v5258_v12 }
 0x190   :  { %884 = vmatpush.msrb.mxu1 %v5264_v44  ;;  %904 = vmatpush.msrb.mxu2 %v9873_v60  ;;  %v5290_v60 = vld [vmem:[%s9368_s1 + $0xe8] sm:$0xff] }
 0x191   :  { %818 = vmatpush.msrb.mxu0 %v5271_v6  ;;  %924 = vmatpush.msrb.mxu3 %v5277_v14 }
 0x192   :  { %885 = vmatpush.msrb.mxu1 %v5283_v7  ;;  %905 = vmatpush.msrb.mxu2 %v4624_v62  ;;  %v5309_v62 = vld [vmem:[%s9368_s1 + $0xd0] sm:$0xff] }
 0x193   :  { %819 = vmatpush.msrb.mxu0 %v5290_v60  ;;  %925 = vmatpush.msrb.mxu3 %v5296_v39 }
 0x194   :  { %886 = vmatpush.msrb.mxu1 %v5302_v32  ;;  %906 = vmatpush.msrb.mxu2 %v4640_v38  ;;  %v5328_v38 = vld [vmem:[%s9368_s1 + $0xb8] sm:$0xff] }
 0x195   :  { %820 = vmatpush.msrb.mxu0 %v5309_v62  ;;  %926 = vmatpush.msrb.mxu3 %v5315_v5  ;;  %9955 = vst [vmem:[#allocation33_spill] sm:$0xff] %v5328_v38 }
 0x196   :  { %887 = vmatpush.msrb.mxu1 %v5321_v49  ;;  %907 = vmatpush.msrb.mxu2 %v4654_v13  ;;  %v5347_v13 = vld [vmem:[%s9368_s1 + $0xa0] sm:$0xff] }
 0x197   :  { %821 = vmatpush.msrb.mxu0 %v5328_v38  ;;  %927 = vmatpush.msrb.mxu3 %v5334_v29  ;;  %9957 = vst [vmem:[#allocation35_spill] sm:$0xff] %v5347_v13 }
 0x198   :  { %888 = vmatpush.msrb.mxu1 %v5340_v40  ;;  %908 = vmatpush.msrb.mxu2 %v4668_v2  ;;  %v5366_v2 = vld [vmem:[%s9368_s1 + $0x88] sm:$0xff] }
 0x199   :  { %822 = vmatpush.msrb.mxu0 %v5347_v13  ;;  %928 = vmatpush.msrb.mxu3 %v5353_v24  ;;  %9959 = vst [vmem:[#allocation37_spill] sm:$0xff] %v5366_v2 }
 0x19a   :  { %889 = vmatpush.msrb.mxu1 %v5359_v10  ;;  %909 = vmatpush.msrb.mxu2 %v4682_v4  ;;  %v5385_v4 = vld [vmem:[%s9368_s1 + $0x70] sm:$0xff] }
 0x19b   :  { %823 = vmatpush.msrb.mxu0 %v5366_v2  ;;  %929 = vmatpush.msrb.mxu3 %v5372_v52  ;;  %9961 = vst [vmem:[#allocation39_spill] sm:$0xff] %v5385_v4 }
 0x19c   :  { %890 = vmatpush.msrb.mxu1 %v5378_v20  ;;  %910 = vmatpush.msrb.mxu2 %v4696_v56  ;;  %v5404_v56 = vld [vmem:[%s9368_s1 + $0x58] sm:$0xff] }
 0x19d   :  { %824 = vmatpush.msrb.mxu0 %v5385_v4  ;;  %930 = vmatpush.msrb.mxu3 %v5391_v50  ;;  %9963 = vst [vmem:[#allocation41_spill] sm:$0xff] %v5404_v56  ;;  %v10039_v4 = vld [vmem:[#allocation67_spill] sm:$0xff] }
 0x19e   :  { %891 = vmatpush.msrb.mxu1 %v5397_v26  ;;  %911 = vmatpush.msrb.mxu2 %v4710_v11  ;;  %v5416_v26 = vld [vmem:[%s9368_s1 + $0x1e0] sm:$0xff] }
 0x19f   :  { %825 = vmatpush.msrb.mxu0 %v5404_v56  ;;  %931 = vmatpush.msrb.mxu3 %v5410_v53  ;;  %9964 = vst [vmem:[#allocation22_spill] sm:$0xff] %v5416_v26  ;;  %v5423_v11 = vld [vmem:[%s9368_s1 + $0x40] sm:$0xff]  ;;  %v5429_v56 = vld [vmem:[%s9368_s1 + $0x1f0] sm:$0xff] }
 0x1a0   :  { %892 = vmatpush.msrb.mxu1 %v5416_v26  ;;  %912 = vmatpush.msrb.mxu2 %v4724_v30  ;;  %9965 = vst [vmem:[#allocation43_spill] sm:$0xff] %v5423_v11  ;;  %v5436_v30 = vld [vmem:[%s9368_s1 + $0x1c8] sm:$0xff]  ;;  %v5449_v26 = vld [vmem:[%s9368_s1 + $0x1b0] sm:$0xff] }
 0x1a1   :  { %826 = vmatpush.msrb.mxu0 %v5423_v11  ;;  %932 = vmatpush.msrb.mxu3 %v5429_v56  ;;  %9966 = vst [vmem:[#allocation23_spill] sm:$0xff] %v5436_v30  ;;  %v5442_v11 = vld [vmem:[%s9368_s1 + $0x498] sm:$0xff] }
 0x1a2   :  { %827 = vmatmul.f32.vlgmr.msrb.gmra.mxu0 %v5145_v17  ;;  %893 = vmatpush.msrb.mxu1 %v5436_v30  ;;  %9967 = vst [vmem:[#allocation45_spill] sm:$0xff] %v5442_v11  ;;  %v5455_v30 = vld [vmem:[%s9368_s1 + $0x1d8] sm:$0xff] }
 0x1a3   :  { %939 = vmatpush.msra.mxu0 %v5442_v11  ;;  %913 = vmatpush.msrb.mxu2 %v4738_v21  ;;  %9968 = vst [vmem:[#allocation24_spill] sm:$0xff] %v5449_v26  ;;  %v5461_v11 = vld [vmem:[%s9368_s1 + $0x480] sm:$0xff] }
 0x1a4   :  { %894 = vmatpush.msrb.mxu1 %v5449_v26  ;;  %9969 = vst [vmem:[#allocation47_spill] sm:$0xff] %v5455_v30  ;;  %933 = vmatpush.msrb.mxu3 %v5455_v30  ;;  %v5467_v21 = vld [vmem:[%s9368_s1 + $0x4a0] sm:$0xff] }
 0x1a5   :  { %9970 = vst [vmem:[#allocation25_spill] sm:$0xff] %v5461_v11  ;;  %940 = vmatpush.msra.mxu0 %v5461_v11  ;;  %914 = vmatpush.msrb.mxu2 %v4750_v37  ;;  %v5474_v26 = vld [vmem:[%s9368_s1 + $0x1c0] sm:$0xff]  ;;  %v5480_v11 = vld [vmem:[%s9368_s1 + $0x468] sm:$0xff]  ;;  %v5493_v37 = vld [vmem:[%s9368_s1 + $0x198] sm:$0xff] }
 0x1a6   :  { %9971 = vst [vmem:[#allocation49_spill] sm:$0xff] %v5467_v21  ;;  %959 = vmatpush.msra.mxu1 %v5467_v21  ;;  %934 = vmatpush.msrb.mxu3 %v5474_v26  ;;  %v5486_v21 = vld [vmem:[%s9368_s1 + $0x488] sm:$0xff] }
 0x1a7   :  { %9972 = vst [vmem:[#allocation26_spill] sm:$0xff] %v5474_v26  ;;  %941 = vmatpush.msra.mxu0 %v5480_v11  ;;  %979 = vmatpush.msra.mxu2 %v9896_v33  ;;  %v5512_v33 = vld [vmem:[%s9368_s1 + $0x180] sm:$0xff] }
 0x1a8   :  { %9973 = vst [vmem:[#allocation51_spill] sm:$0xff] %v5480_v11  ;;  %960 = vmatpush.msra.mxu1 %v5486_v21  ;;  %1059 = vmatpush.msra.mxu3 %v5493_v37  ;;  %v5499_v11 = vld [vmem:[%s9368_s1 + $0x450] sm:$0xff] }
 0x1a9   :  { %9974 = vst [vmem:[#allocation28_spill] sm:$0xff] %v5486_v21  ;;  %942 = vmatpush.msra.mxu0 %v5499_v11  ;;  %v5505_v21 = vld [vmem:[%s9368_s1 + $0x470] sm:$0xff]  ;;  %980 = vmatpush.msra.mxu2 %v9901_v22  ;;  %v5531_v22 = vld [vmem:[%s9368_s1 + $0x168] sm:$0xff] }
 0x1aa   :  { %9975 = vst [vmem:[#allocation53_spill] sm:$0xff] %v5493_v37  ;;  %961 = vmatpush.msra.mxu1 %v5505_v21  ;;  %1060 = vmatpush.msra.mxu3 %v5512_v33  ;;  %v10040_v37 = vld [vmem:[#allocation66_spill] sm:$0xff] }
 0x1ab   :  { %9976 = vst [vmem:[#allocation80_spill] sm:$0xff] %v5499_v11  ;;  %v5518_v11 = vld [vmem:[%s9368_s1 + $0x438] sm:$0xff]  ;;  %981 = vmatpush.msra.mxu2 %v4803_v9  ;;  %v5550_v9 = vld [vmem:[%s9368_s1 + $0x150] sm:$0xff] }
 0x1ac   :  { %9977 = vst [vmem:[#allocation13_spill] sm:$0xff] %v5505_v21  ;;  %943 = vmatpush.msra.mxu0 %v5518_v11  ;;  %v5524_v21 = vld [vmem:[%s9368_s1 + $0x458] sm:$0xff]  ;;  %1061 = vmatpush.msra.mxu3 %v5531_v22 }
 0x1ad   :  { %9978 = vst [vmem:[#allocation30_spill] sm:$0xff] %v5512_v33  ;;  %962 = vmatpush.msra.mxu1 %v5524_v21  ;;  %982 = vmatpush.msra.mxu2 %v4814_v46  ;;  %v5569_v46 = vld [vmem:[%s9368_s1 + $0x138] sm:$0xff] }
 0x1ae   :  { %9979 = vst [vmem:[#allocation55_spill] sm:$0xff] %v5518_v11  ;;  %v5537_v11 = vld [vmem:[%s9368_s1 + $0x420] sm:$0xff]  ;;  %1062 = vmatpush.msra.mxu3 %v5550_v9 }
 0x1af   :  { %9980 = vst [vmem:[#allocation57_spill] sm:$0xff] %v5524_v21  ;;  %944 = vmatpush.msra.mxu0 %v5537_v11  ;;  %v5543_v21 = vld [vmem:[%s9368_s1 + $0x440] sm:$0xff]  ;;  %983 = vmatpush.msra.mxu2 %v4824_v27 }
 0x1b0   :  { %9981 = vst [vmem:[#allocation81_spill] sm:$0xff] %v5531_v22  ;;  %963 = vmatpush.msra.mxu1 %v5543_v21  ;;  %1063 = vmatpush.msra.mxu3 %v5569_v46  ;;  %v5588_v27 = vld [vmem:[%s9368_s1 + $0x120] sm:$0xff] }
 0x1b1   :  { %9982 = vst [vmem:[#allocation32_spill] sm:$0xff] %v5537_v11  ;;  %v5556_v11 = vld [vmem:[%s9368_s1 + $0x408] sm:$0xff]  ;;  %984 = vmatpush.msra.mxu2 %v4833_v42 }
 0x1b2   :  { %9983 = vst [vmem:[#allocation16_spill] sm:$0xff] %v5543_v21  ;;  %945 = vmatpush.msra.mxu0 %v5556_v11  ;;  %v5562_v21 = vld [vmem:[%s9368_s1 + $0x428] sm:$0xff]  ;;  %1064 = vmatpush.msra.mxu3 %v5588_v27 }
 0x1b3   :  { %9984 = vst [vmem:[#allocation58_spill] sm:$0xff] %v5550_v9  ;;  %964 = vmatpush.msra.mxu1 %v5562_v21  ;;  %985 = vmatpush.msra.mxu2 %v4844_v18  ;;  %v5607_v42 = vld [vmem:[%s9368_s1 + $0x108] sm:$0xff]  ;;  %v5626_v18 = vld [vmem:[%s9368_s1 + $0xf0] sm:$0xff] }
 0x1b4   :  { %9985 = vst [vmem:[#allocation34_spill] sm:$0xff] %v5556_v11  ;;  %v5575_v11 = vld [vmem:[%s9368_s1 + $0x3f0] sm:$0xff]  ;;  %1065 = vmatpush.msra.mxu3 %v5607_v42 }
 0x1b5   :  { %9986 = vst [vmem:[#allocation19_spill] sm:$0xff] %v5562_v21  ;;  %946 = vmatpush.msra.mxu0 %v5575_v11  ;;  %v5581_v21 = vld [vmem:[%s9368_s1 + $0x410] sm:$0xff]  ;;  %986 = vmatpush.msra.mxu2 %v4852_v31  ;;  %v5645_v31 = vld [vmem:[%s9368_s1 + $0xd8] sm:$0xff] }
 0x1b6   :  { %9987 = vst [vmem:[#allocation59_spill] sm:$0xff] %v5569_v46  ;;  %965 = vmatpush.msra.mxu1 %v5581_v21  ;;  %1066 = vmatpush.msra.mxu3 %v5626_v18  ;;  %v10038_v9 = vld [vmem:[#allocation60_spill] sm:$0xff] }
 0x1b7   :  { %9988 = vst [vmem:[#allocation36_spill] sm:$0xff] %v5575_v11  ;;  %v5594_v11 = vld [vmem:[%s9368_s1 + $0x3d8] sm:$0xff]  ;;  %987 = vmatpush.msra.mxu2 %v4859_v58  ;;  %v5664_v58 = vld [vmem:[%s9368_s1 + $0xc0] sm:$0xff] }
 0x1b8   :  { %9989 = vst [vmem:[#allocation63_spill] sm:$0xff] %v5581_v21  ;;  %947 = vmatpush.msra.mxu0 %v5594_v11  ;;  %v5600_v21 = vld [vmem:[%s9368_s1 + $0x3f8] sm:$0xff]  ;;  %1067 = vmatpush.msra.mxu3 %v5645_v31 }
 0x1b9   :  { %9990 = vst [vmem:[#allocation38_spill] sm:$0xff] %v5588_v27  ;;  %966 = vmatpush.msra.mxu1 %v5600_v21  ;;  %988 = vmatpush.msra.mxu2 %v4866_v43  ;;  %v5683_v43 = vld [vmem:[%s9368_s1 + $0xa8] sm:$0xff] }
 0x1ba   :  { %9991 = vst [vmem:[#allocation65_spill] sm:$0xff] %v5594_v11  ;;  %v5613_v11 = vld [vmem:[%s9368_s1 + $0x3c0] sm:$0xff]  ;;  %1068 = vmatpush.msra.mxu3 %v5664_v58 }
 0x1bb   :  { %9992 = vst [vmem:[#allocation40_spill] sm:$0xff] %v5600_v21  ;;  %948 = vmatpush.msra.mxu0 %v5613_v11  ;;  %v5619_v21 = vld [vmem:[%s9368_s1 + $0x3e0] sm:$0xff]  ;;  %989 = vmatpush.msra.mxu2 %v4873_v63  ;;  %v5697_v63 = vld [vmem:[%s9368_s1 + $0x90] sm:$0xff] }
 0x1bc   :  { %9993 = vst [vmem:[#allocation69_spill] sm:$0xff] %v5607_v42  ;;  %967 = vmatpush.msra.mxu1 %v5619_v21  ;;  %1069 = vmatpush.msra.mxu3 %v5683_v43 }
 0x1bd   :  { %9994 = vst [vmem:[#allocation42_spill] sm:$0xff] %v5613_v11  ;;  %v5632_v11 = vld [vmem:[%s9368_s1 + $0x3a8] sm:$0xff]  ;;  %990 = vmatpush.msra.mxu2 %v4880_v57  ;;  %v5711_v57 = vld [vmem:[%s9368_s1 + $0x78] sm:$0xff] }
 0x1be   :  { %9995 = vst [vmem:[#allocation70_spill] sm:$0xff] %v5619_v21  ;;  %949 = vmatpush.msra.mxu0 %v5632_v11  ;;  %v5638_v21 = vld [vmem:[%s9368_s1 + $0x3c8] sm:$0xff]  ;;  %1070 = vmatpush.msra.mxu3 %v5697_v63 }
 0x1bf   :  { %9996 = vst [vmem:[#allocation44_spill] sm:$0xff] %v5626_v18  ;;  %968 = vmatpush.msra.mxu1 %v5638_v21  ;;  %991 = vmatpush.msra.mxu2 %v4889_v28  ;;  %v10014_v28 = vld [vmem:[#allocation79_spill] sm:$0xff] }
 0x1c0   :  { %9997 = vst [vmem:[#allocation71_spill] sm:$0xff] %v5632_v11  ;;  %v5651_v11 = vld [vmem:[%s9368_s1 + $0x390] sm:$0xff]  ;;  %1071 = vmatpush.msra.mxu3 %v5711_v57 }
 0x1c1   :  { %9998 = vst [vmem:[#allocation46_spill] sm:$0xff] %v5638_v21  ;;  %950 = vmatpush.msra.mxu0 %v5651_v11  ;;  %v5657_v21 = vld [vmem:[%s9368_s1 + $0x3b0] sm:$0xff] }
 0x1c2   :  { %9999 = vst [vmem:[#allocation72_spill] sm:$0xff] %v5645_v31  ;;  %969 = vmatpush.msra.mxu1 %v5657_v21 }
 0x1c3   :  { %10000 = vst [vmem:[#allocation48_spill] sm:$0xff] %v5651_v11  ;;  %v5670_v11 = vld [vmem:[%s9368_s1 + $0x378] sm:$0xff] }
 0x1c4   :  { %10001 = vst [vmem:[#allocation73_spill] sm:$0xff] %v5657_v21  ;;  %951 = vmatpush.msra.mxu0 %v5670_v11  ;;  %v5676_v21 = vld [vmem:[%s9368_s1 + $0x398] sm:$0xff] }
 0x1c5   :  { %10002 = vst [vmem:[#allocation50_spill] sm:$0xff] %v5664_v58  ;;  %970 = vmatpush.msra.mxu1 %v5676_v21 }
 0x1c6   :  { %10003 = vst [vmem:[#allocation74_spill] sm:$0xff] %v5670_v11  ;;  %v5689_v11 = vld [vmem:[%s9368_s1 + $0x360] sm:$0xff] }
 0x1c7   :  { %10004 = vst [vmem:[#allocation52_spill] sm:$0xff] %v5676_v21  ;;  %952 = vmatpush.msra.mxu0 %v5689_v11  ;;  %971 = vmatpush.msra.mxu1 %v9927_v15  ;;  %v5703_v21 = vld [vmem:[%s9368_s1 + $0x348] sm:$0xff]  ;;  %v5717_v15 = vld [vmem:[%s9368_s1 + $0x330] sm:$0xff] }
 0x1c8   :  { %10005 = vst [vmem:[#allocation75_spill] sm:$0xff] %v5683_v43  ;;  %v10017_v43 = vld [vmem:[#allocation85_spill] sm:$0xff] }
 0x1c9   :  { %10006 = vst [vmem:[#allocation54_spill] sm:$0xff] %v5689_v11  ;;  %953 = vmatpush.msra.mxu0 %v5703_v21  ;;  %972 = vmatpush.msra.mxu1 %v9930_v35  ;;  %v10011_v11 = vld [vmem:[#allocation78_spill] sm:$0xff]  ;;  %v10013_v35 = vld [vmem:[#allocation84_spill] sm:$0xff] }
 0x1ca   :  { %10007 = vst [vmem:[#allocation76_spill] sm:$0xff] %v5697_v63  ;;  %992 = vmatpush.msra.mxu2 %v10013_v35  ;;  %v5727_v63 = vld [vmem:[%s9368_s1 + $0x60] sm:$0xff] }
 0x1cb   :  { %10008 = vst [vmem:[#allocation56_spill] sm:$0xff] %v5703_v21  ;;  %954 = vmatpush.msra.mxu0 %v5717_v15  ;;  %973 = vmatpush.msra.mxu1 %v10011_v11  ;;  %v10012_v21 = vld [vmem:[#allocation27_spill] sm:$0xff]  ;;  %v10020_v35 = vld [vmem:[#allocation86_spill] sm:$0xff] }
 0x1cc   :  { %10009 = vst [vmem:[#allocation77_spill] sm:$0xff] %v5711_v57  ;;  %1072 = vmatpush.msra.mxu3 %v5727_v63  ;;  %v10016_v57 = vld [vmem:[#allocation62_spill] sm:$0xff]  ;;  %993 = vmatpush.msra.mxu2 %v10017_v43  ;;  %v5735_v11 = vld [vmem:[%s9368_s1 + $0x48] sm:$0xff]  ;;  %v10023_v43 = vld [vmem:[#allocation29_spill] sm:$0xff] }
 0x1cd   :  { %10010 = vst [vmem:[#allocation3_spill] sm:$0xff] %v5717_v15  ;;  %1079 = vmatpush.msrb.mxu0 %v10012_v21  ;;  %974 = vmatpush.msra.mxu1 %v10014_v28  ;;  %v10019_v21 = vld [vmem:[#allocation2_spill] sm:$0xff]  ;;  %v5743_v28 = vld [vmem:[%s9368_s1 + $0x30] sm:$0xff] }
 0x1ce   :  { %10015 = vst [vmem:[#allocation4_spill] sm:$0xff] %v5727_v63  ;;  %1073 = vmatpush.msra.mxu3 %v5735_v11  ;;  %994 = vmatpush.msra.mxu2 %v10020_v35  ;;  %v10024_v15 = vld [vmem:[#allocation64_spill] sm:$0xff]  ;;  %v5759_v35 = vld [vmem:[%s9368_s1 + $0xe0] sm:$0xff] }
 0x1cf   :  { %1080 = vmatpush.msrb.mxu0 %v10016_v57  ;;  %10018 = vst [vmem:[#allocation5_spill] sm:$0xff] %v5735_v11  ;;  %v10022_v57 = vld [vmem:[#allocation6_spill] sm:$0xff]  ;;  %v10025_v63 = vld [vmem:[#allocation8_spill] sm:$0xff]  ;;  %v10036_v11 = vld [vmem:[#allocation61_spill] sm:$0xff] }
 0x1d0   :  { %10021 = vst [vmem:[#allocation7_spill] sm:$0xff] %v5743_v28  ;;  %1074 = vmatpush.msra.mxu3 %v5743_v28  ;;  %v5805_v28 = vpop.permute.xlu1 %762 }
 0x1d1   :  { %1081 = vmatpush.msrb.mxu0 %v10019_v21  ;;  %v5753_v21 = vld [vmem:[%s9368_s1 + $0xf8] sm:$0xff]  ;;  %10027 = vst [vmem:[#allocation11_spill] sm:$0xff] %v5759_v35  ;;  %v766_v58 = vmul.f32 %v5805_v28, %v10036_v11  ;;  %v765_v22 = vmul.f32 %v5805_v28, %v10038_v9 }
 0x1d2   :  { %10026 = vst [vmem:[#allocation9_spill] sm:$0xff] %v5753_v21 }
 0x1d3   :  { %1082 = vmatpush.msrb.mxu0 %v10022_v57  ;;  %v5777_v57 = vld [vmem:[%s9368_s1 + $0x98] sm:$0xff]  ;;  %v769_v33 = vadd.f32 %v766_v58, %v10039_v4  ;;  %v768_v10 = vadd.f32 %v765_v22, %v10040_v37  ;;  %v10041_v4 = vld [vmem:[#allocation10_spill] sm:$0xff] }
 0x1d4   :  { %10030 = vst [vmem:[#allocation20_spill] sm:$0xff] %v5777_v57 }
 0x1d5   :  { %1083 = vmatpush.msrb.mxu0 %v10023_v43  ;;  %v5783_v43 = vld [vmem:[%s9368_s1 + $0x80] sm:$0xff] }
 0x1d6   :  { %10031 = vst [vmem:[#allocation78_spill] sm:$0xff] %v5783_v43 }
 0x1d7   :  { %1084 = vmatpush.msrb.mxu0 %v10024_v15  ;;  %v5765_v15 = vld [vmem:[%s9368_s1 + $0xc8] sm:$0xff] }
 0x1d8   :  { %10028 = vst [vmem:[#allocation14_spill] sm:$0xff] %v5765_v15 }
 0x1d9   :  { %1085 = vmatpush.msrb.mxu0 %v10025_v63  ;;  %v5771_v63 = vld [vmem:[%s9368_s1 + $0xb0] sm:$0xff] }
 0x1da   :  { %10029 = vst [vmem:[#allocation17_spill] sm:$0xff] %v5771_v63 }
 0x1db   :  { %1086 = vmatpush.msrb.mxu0 %v5753_v21 }
 0x1dd   :  { %1087 = vmatpush.msrb.mxu0 %v5759_v35  ;;  %v10035_v35 = vld [vmem:[#allocation31_spill] sm:$0xff] }
 0x1df   :  { %1088 = vmatpush.msrb.mxu0 %v5765_v15  ;;  %v5789_v15 = vld [vmem:[%s9368_s1 + $0x68] sm:$0xff] }
 0x1e0   :  { %10032 = vst [vmem:[#allocation27_spill] sm:$0xff] %v5789_v15 }
 0x1e1   :  { %1089 = vmatpush.msrb.mxu0 %v5771_v63  ;;  %v5795_v63 = vld [vmem:[%s9368_s1 + $0x50] sm:$0xff] }
 0x1e2   :  { %10033 = vst [vmem:[#allocation84_spill] sm:$0xff] %v5795_v63 }
 0x1e3   :  { %1090 = vmatpush.msrb.mxu0 %v5777_v57  ;;  %v5801_v57 = vld [vmem:[%s9368_s1 + $0x38] sm:$0xff] }
 0x1e4   :  { %10034 = vst [vmem:[#allocation79_spill] sm:$0xff] %v5801_v57 }
 0x1e5   :  { %1091 = vmatpush.msrb.mxu0 %v5783_v43 }
 0x1e7   :  { %1092 = vmatpush.msrb.mxu0 %v5789_v15 }
 0x1e9   :  { %1093 = vmatpush.msrb.mxu0 %v5795_v63  ;;  %v10037_v63 = vld [vmem:[#allocation68_spill] sm:$0xff] }
 0x1eb   :  { %1094 = vmatpush.msrb.mxu0 %v5801_v57 }
 0x1ff   :  { %v608_v43 = vpop.f32.mrf.mxu0  ;;  %v628_v31 = vpop.f32.mrf.mxu1 }
 0x200   :  { %v609_v21 = vadd.f32 %v608_v43, %v10035_v35  ;;  %v629_v27 = vadd.f32 %v628_v31, %v10037_v63 }
 0x202   :  { %v668_v15 = vpop.f32.mrf.mxu3 }
 0x203   :  { %v711_v18 = vadd.f32 %v668_v15, %v609_v21 }
 0x205   :  { %v3083_v42 = vmul.f32 -1.442695, %v711_v18 }
 0x206   :  { %v648_v46 = vpop.f32.mrf.mxu2 }
 0x207   :  { %3152 = vpow2.f32 %v3083_v42  ;;  %v688_v57 = vpop.f32.mrf.mxu0  ;;  %v649_v26 = vadd.f32 %v648_v46, %v10041_v4 }
 0x208   :  { %v731_v43 = vadd.f32 %v688_v57, %v629_v27 }
 0x20a   :  { %v3084_v35 = vmul.f32 -1.442695, %v731_v43  ;;  %v808_v20 = vpop.f32.mrf.mxu3 }
 0x20b   :  { %v851_v2 = vadd.f32 %v808_v20, %v769_v33 }
 0x20c   :  { %3154 = vpow2.f32 %v3084_v35 }
 0x20d   :  { %v3153_v11 = vpop.eup %3152  ;;  %v3086_v21 = vmul.f32 -1.442695, %v851_v2 }
 0x20e   :  { %v715_v18 = vadd.f32 1.0, %v3153_v11  ;;  %v788_v15 = vpop.f32.mrf.mxu2 }
 0x20f   :  { %3156 = vpow2.f32 %v3086_v21  ;;  %v831_v31 = vadd.f32 %v788_v15, %v768_v10  ;;  %v708_v21 = vpop.f32.mrf.mxu1 }
 0x210   :  { %3158 = vrcp.f32 %v715_v18  ;;  %v727_v2 = vand.u32 2147483648, %v715_v18  ;;  %v725_v10 = vand.u32 2147483647, %v715_v18  ;;  %vm721_vm9 = vweird.f32 %v715_v18 }
 0x211   :  { %v3085_v63 = vmul.f32 -1.442695, %v831_v31 }
 0x212   :  { %v3155_v9 = vpop.eup %3154  ;;  %v728_v15 = vor.u32 1.1754944e-38, %v727_v2  ;;  %vm726_vm11 = vcmp.eq.f32.partialorder %v725_v10, 8.507059e+37 }
 0x213   :  { %v735_v42 = vadd.f32 1.0, %v3155_v9  ;;  %3160 = vpow2.f32 %v3085_v63 }
 0x215   :  { %v3157_v13 = vpop.eup %3156  ;;  %3162 = vrcp.f32 %v735_v42  ;;  %vm741_vm13 = vweird.f32 %v735_v42 }
 0x216   :  { %v3159_v27 = vpop.eup %3158  ;;  %v5814_v58 = vadd.f32 1.0, %v3157_v13 }
 0x217   :  { %v717_v20 = vmul.f32 %v3159_v27, %v715_v18  ;;  %vm722_vm8 = vweird.f32 %v3159_v27 }
 0x218   :  { %3164 = vrcp.f32 %v5814_v58  ;;  %vm723_vm10 = vmor %vm721_vm9, %vm722_vm8  ;;  %vm861_vm5 = vweird.f32 %v5814_v58 }
 0x219   :  { %v3161_v33 = vpop.eup %3160  ;;  %v718_v22 = vsub.f32 1.0, %v717_v20  ;;  %v751_v20 = vadd.f32 %v708_v21, %v5114_v55 }
 0x21a   :  { %v835_v11 = vadd.f32 1.0, %v3161_v33 }
 0x21b   :  { %v3163_v35 = vpop.eup %3162  ;;  %v719_v57 = vmul.f32 %v3159_v27, %v718_v22 }
 0x21c   :  { %v737_v43 = vmul.f32 %v3163_v35, %v735_v42  ;;  %3166 = vrcp.f32 %v835_v11  ;;  %vm742_vm12 = vweird.f32 %v3163_v35  ;;  %vm841_vm1 = vweird.f32 %v835_v11 }
 0x21d   :  { %v720_v9 = vadd.f32 %v3159_v27, %v719_v57  ;;  %v747_v57 = vand.u32 2147483648, %v735_v42  ;;  %vm743_vm14 = vmor %vm741_vm13, %vm742_vm12 }
 0x21e   :  { %v5817_v63 = vpop.eup %3164  ;;  %v738_v13 = vsub.f32 1.0, %v737_v43  ;;  %v745_v43 = vand.u32 2147483647, %v735_v42 }
 0x21f   :  { %v724_v31 = vsel %vm723_vm10, %v3159_v27, %v720_v9  ;;  %v857_v22 = vmul.f32 %v5817_v63, %v5814_v58  ;;  %v748_v21 = vor.u32 1.1754944e-38, %v747_v57  ;;  %v847_v9 = vand.u32 2147483648, %v835_v11 }
 0x220   :  { %v739_v37 = vmul.f32 %v3163_v35, %v738_v13  ;;  %v729_v33 = vsel %vm726_vm11, %v728_v15, %v724_v31  ;;  %vm746_vm15 = vcmp.eq.f32.partialorder %v745_v43, 8.507059e+37  ;;  %v845_v15 = vand.u32 2147483647, %v835_v11 }
 0x221   :  { %v752_v40 = vmul.f32 %v751_v20, %v729_v33  ;;  %v858_v27 = vsub.f32 1.0, %v857_v22  ;;  %v828_v20 = vpop.f32.mrf.mxu0  ;;  %v10042_v33 = vld [vmem:[#allocation82_spill] sm:$0xff]  ;;  %vm862_vm3 = vweird.f32 %v5817_v63 }
 0x222   :  { %v3167_v18 = vpop.eup %3166  ;;  %v740_v38 = vadd.f32 %v3163_v35, %v739_v37  ;;  %v767_v37 = vmul.f32 %v5805_v28, %v10042_v33  ;;  %vm846_vm4 = vcmp.eq.f32.partialorder %v845_v15, 8.507059e+37  ;;  %vm863_vm6 = vmor %vm861_vm5, %vm862_vm3 }
 0x223   :  { %v753_v30 = vadd.f32 %v752_v40, %v649_v26  ;;  %v837_v2 = vmul.f32 %v3167_v18, %v835_v11  ;;  %vm842_vm0 = vweird.f32 %v3167_v18  ;;  %v859_v31 = vmul.f32 %v5817_v63, %v858_v27 }
 0x224   :  { %v744_v10 = vsel %vm743_vm14, %v3163_v35, %v740_v38  ;;  %vm843_vm2 = vmor %vm841_vm1, %vm842_vm0  ;;  %v848_v26 = vor.u32 1.1754944e-38, %v847_v9  ;;  %v5830_v35 = vld [vmem:[%s9368_s1 + $0x2] ss:$0 sm:$0xff]  ;;  %v867_v27 = vand.u32 2147483648, %v5814_v58 }
 0x225   :  { %3168 = vtanh.f32 %v753_v30  ;;  %v838_v55 = vsub.f32 1.0, %v837_v2  ;;  %v749_v46 = vsel %vm746_vm15, %v748_v21, %v744_v10  ;;  %v871_v22 = vadd.f32 %v5830_v35, %v828_v20  ;;  %v10062_v20 = vld [vmem:[#allocation24_spill] sm:$0xff] }
 0x226   :  { %v755_v38 = vsub.f32 1.0, %v749_v46  ;;  %v860_v57 = vadd.f32 %v5817_v63, %v859_v31  ;;  %v757_v11 = vmul.f32 %v749_v46, %v5141_v54  ;;  %v770_v2 = vadd.f32 %v767_v37, %v4808_v59  ;;  %v10063_v37 = vld [vmem:[#allocation49_spill] sm:$0xff] }
 0x227   :  { %v839_v13 = vmul.f32 %v3167_v18, %v838_v55  ;;  %v868_v54 = vor.u32 1.1754944e-38, %v867_v27  ;;  %v10071_v27 = vld [vmem:[#allocation57_spill] sm:$0xff] }
 0x228   :  { %v864_v9 = vsel %vm863_vm6, %v5817_v63, %v860_v57  ;;  %v6019_v57 = vld [vmem:[%s9368_s1 + $0x490] sm:$0xff] }
 0x229   :  { %v840_v40 = vadd.f32 %v3167_v18, %v839_v13 }
 0x22b   :  { %v3169_v30 = vpop.eup %3168  ;;  %v844_v42 = vsel %vm843_vm2, %v3167_v18, %v840_v40  ;;  %v865_v18 = vand.u32 2147483647, %v5814_v58  ;;  %v6003_v40 = vld [vmem:[%s9368_s1 + $0x1b8] sm:$0xff] }
 0x22c   :  { %v849_v28 = vsel %vm846_vm4, %v848_v26, %v844_v42  ;;  %v756_v43 = vmul.f32 %v3169_v30, %v755_v38  ;;  %v10064_v26 = vld [vmem:[#allocation25_spill] sm:$0xff]  ;;  %v6010_v38 = vld [vmem:[%s9368_s1 + $0x4a8] sm:$0xff]  ;;  %v10065_v30 = vld [vmem:[#allocation28_spill] sm:$0xff] }
 0x22d   :  { %v872_v10 = vmul.f32 %v871_v22, %v849_v28  ;;  %vm866_vm7 = vcmp.eq.f32.partialorder %v865_v18, 8.507059e+37  ;;  %v10066_v42 = vld [vmem:[#allocation59_spill] sm:$0xff]  ;;  %v10068_v28 = vld [vmem:[#allocation13_spill] sm:$0xff] }
 0x22e   :  { %v5839_v55 = vadd.f32 %v757_v11, %v756_v43  ;;  %v869_v13 = vsel %vm866_vm7, %v868_v54, %v864_v9  ;;  %v10067_v22 = vld [vmem:[#allocation51_spill] sm:$0xff]  ;;  %v10069_v43 = vld [vmem:[#allocation38_spill] sm:$0xff]  ;;  %v10070_v11 = vld [vmem:[#allocation80_spill] sm:$0xff] }
 0x22f   :  { %v873_v21 = vadd.f32 %v872_v10, %v770_v2  ;;  %v875_v58 = vsub.f32 1.0, %v869_v13  ;;  %v877_v31 = vmul.f32 %v869_v13, %v5145_v17  ;;  %v5863_v17 = vld [vmem:[%s9368_s1 + $0x320] sm:$0xff]  ;;  %v6028_v2 = vld [vmem:[%s9368_s1 + $0x478] sm:$0xff]  ;;  %v10073_v18 = vld [vmem:[#allocation55_spill] sm:$0xff] }
 0x230   :  { %955 = vmatmul.f32.vlgmr.msra.gmra.mxu0 %v5839_v55  ;;  %v10072_v10 = vld [vmem:[#allocation69_spill] sm:$0xff]  ;;  %v10074_v9 = vld [vmem:[#allocation16_spill] sm:$0xff] }
 0x231   :  { %3170 = vtanh.f32 %v873_v21  ;;  %1207 = vmatpush.msra.mxu0 %v5150_v16  ;;  %v5872_v16 = vld [vmem:[%s9368_s1 + $0x308] sm:$0xff]  ;;  %v6037_v21 = vld [vmem:[%s9368_s1 + $0x460] sm:$0xff]  ;;  %v10075_v54 = vld [vmem:[#allocation44_spill] sm:$0xff] }
 0x232   :  { %v10076_v13 = vld [vmem:[#allocation32_spill] sm:$0xff] }
 0x233   :  { %1208 = vmatpush.msra.mxu0 %v5178_v1  ;;  %v5912_v1 = vld [vmem:[%s9368_s1 + $0x2a8] sm:$0xff] }
 0x235   :  { %1209 = vmatpush.msra.mxu0 %v5211_v3  ;;  %v10044_v3 = vld [vmem:[#allocation33_spill] sm:$0xff] }
 0x237   :  { %v3171_v15 = vpop.eup %3170  ;;  %1210 = vmatpush.msra.mxu0 %v5239_v25  ;;  %v10047_v25 = vld [vmem:[#allocation35_spill] sm:$0xff] }
 0x238   :  { %v876_v46 = vmul.f32 %v3171_v15, %v875_v58  ;;  %v6046_v58 = vld [vmem:[%s9368_s1 + $0x448] sm:$0xff] }
 0x239   :  { %1211 = vmatpush.msra.mxu0 %v5258_v12  ;;  %v10049_v12 = vld [vmem:[#allocation53_spill] sm:$0xff]  ;;  %v10077_v15 = vld [vmem:[#allocation19_spill] sm:$0xff] }
 0x23a   :  { %v5851_v63 = vadd.f32 %v877_v31, %v876_v46  ;;  %v10078_v46 = vld [vmem:[#allocation72_spill] sm:$0xff]  ;;  %v10079_v31 = vld [vmem:[#allocation34_spill] sm:$0xff] }
 0x23b   :  { %1212 = vmatpush.msra.mxu0 %v5277_v14  ;;  %v5966_v14 = vld [vmem:[%s9368_s1 + $0x218] sm:$0xff] }
 0x23c   :  { %895 = vmatmul.f32.vlgmr.msrb.gmra.mxu1 %v5851_v63  ;;  %915 = vmatmul.f32.vlgmr.msrb.gmra.mxu2 %v5851_v63 }
 0x23d   :  { %935 = vmatmul.f32.vlgmr.msrb.gmra.mxu3 %v5851_v63  ;;  %1095 = vmatmul.f32.vlgmr.msrb.gmra.mxu0 %v5851_v63 }
 0x23e   :  { %1099 = vmatpush.msrb.mxu1 %v5159_v61  ;;  %1167 = vmatpush.msrb.mxu2 %v5165_v23  ;;  %v5881_v61 = vld [vmem:[%s9368_s1 + $0x2f0] sm:$0xff]  ;;  %v5894_v23 = vld [vmem:[%s9368_s1 + $0x2d8] sm:$0xff] }
 0x23f   :  { %1187 = vmatpush.msrb.mxu3 %v5863_v17  ;;  %1213 = vmatpush.msra.mxu0 %v5296_v39  ;;  %v10054_v39 = vld [vmem:[#allocation21_spill] sm:$0xff] }
 0x240   :  { %1100 = vmatpush.msrb.mxu1 %v5172_v36  ;;  %1168 = vmatpush.msrb.mxu2 %v5184_v51  ;;  %v5903_v36 = vld [vmem:[%s9368_s1 + $0x2c0] sm:$0xff]  ;;  %v5921_v51 = vld [vmem:[%s9368_s1 + $0x290] sm:$0xff] }
 0x241   :  { %1188 = vmatpush.msrb.mxu3 %v5872_v16  ;;  %1214 = vmatpush.msra.mxu0 %v5315_v5  ;;  %v10056_v5 = vld [vmem:[#allocation41_spill] sm:$0xff] }
 0x242   :  { %1101 = vmatpush.msrb.mxu1 %v5191_v45  ;;  %1169 = vmatpush.msrb.mxu2 %v5198_v8  ;;  %v5930_v45 = vld [vmem:[%s9368_s1 + $0x278] sm:$0xff]  ;;  %v5939_v8 = vld [vmem:[%s9368_s1 + $0x260] sm:$0xff] }
 0x243   :  { %1189 = vmatpush.msrb.mxu3 %v5881_v61  ;;  %1215 = vmatpush.msra.mxu0 %v5334_v29  ;;  %v5984_v29 = vld [vmem:[%s9368_s1 + $0x1e8] sm:$0xff] }
 0x244   :  { %1102 = vmatpush.msrb.mxu1 %v5205_v41  ;;  %995 = vmatmul.f32.vlgmr.msra.gmra.mxu2 %v5839_v55  ;;  %v10043_v41 = vld [vmem:[#allocation47_spill] sm:$0xff] }
 0x245   :  { %975 = vmatmul.f32.vlgmr.msra.gmra.mxu1 %v5839_v55  ;;  %1075 = vmatmul.f32.vlgmr.msra.gmra.mxu3 %v5851_v63 }
 0x246   :  { %1103 = vmatpush.msrb.mxu1 %v5220_v48  ;;  %1170 = vmatpush.msrb.mxu2 %v5226_v34  ;;  %v10045_v48 = vld [vmem:[#allocation12_spill] sm:$0xff]  ;;  %v5948_v34 = vld [vmem:[%s9368_s1 + $0x248] sm:$0xff] }
 0x247   :  { %1190 = vmatpush.msrb.mxu3 %v5894_v23  ;;  %1216 = vmatpush.msra.mxu0 %v5353_v24  ;;  %v10058_v24 = vld [vmem:[#allocation58_spill] sm:$0xff] }
 0x248   :  { %1104 = vmatpush.msrb.mxu1 %v5233_v47  ;;  %1171 = vmatpush.msrb.mxu2 %v5245_v19  ;;  %v10046_v47 = vld [vmem:[#allocation26_spill] sm:$0xff]  ;;  %v10048_v19 = vld [vmem:[#allocation15_spill] sm:$0xff] }
 0x249   :  { %1191 = vmatpush.msrb.mxu3 %v5903_v36  ;;  %1217 = vmatpush.msra.mxu0 %v5372_v52  ;;  %v10059_v52 = vld [vmem:[#allocation43_spill] sm:$0xff] }
 0x24a   :  { %1105 = vmatpush.msrb.mxu1 %v5252_v0  ;;  %1172 = vmatpush.msrb.mxu2 %v5264_v44  ;;  %v5957_v0 = vld [vmem:[%s9368_s1 + $0x230] sm:$0xff]  ;;  %v10050_v44 = vld [vmem:[#allocation37_spill] sm:$0xff] }
 0x24b   :  { %1192 = vmatpush.msrb.mxu3 %v5912_v1  ;;  %1218 = vmatpush.msra.mxu0 %v5391_v50  ;;  %v10060_v50 = vld [vmem:[#allocation23_spill] sm:$0xff] }
 0x24c   :  { %1106 = vmatpush.msrb.mxu1 %v5271_v6  ;;  %1173 = vmatpush.msrb.mxu2 %v5283_v7  ;;  %v10051_v6 = vld [vmem:[#allocation18_spill] sm:$0xff] }
 0x24d   :  { %1193 = vmatpush.msrb.mxu3 %v5921_v51  ;;  %1219 = vmatpush.msra.mxu0 %v5410_v53  ;;  %v10052_v7 = vld [vmem:[#allocation30_spill] sm:$0xff]  ;;  %v10061_v53 = vld [vmem:[#allocation45_spill] sm:$0xff] }
 0x24e   :  { %1107 = vmatpush.msrb.mxu1 %v5290_v60  ;;  %1174 = vmatpush.msrb.mxu2 %v5302_v32  ;;  %v10053_v60 = vld [vmem:[#allocation39_spill] sm:$0xff]  ;;  %v5975_v32 = vld [vmem:[%s9368_s1 + $0x200] sm:$0xff] }
 0x24f   :  { %1194 = vmatpush.msrb.mxu3 %v5930_v45  ;;  %1220 = vmatpush.msra.mxu0 %v5429_v56  ;;  %v5994_v56 = vld [vmem:[%s9368_s1 + $0x1d0] sm:$0xff] }
 0x250   :  { %1108 = vmatpush.msrb.mxu1 %v5309_v62  ;;  %1175 = vmatpush.msrb.mxu2 %v5321_v49  ;;  %v10055_v62 = vld [vmem:[#allocation81_spill] sm:$0xff]  ;;  %v10057_v49 = vld [vmem:[#allocation22_spill] sm:$0xff] }
 0x251   :  { %1195 = vmatpush.msrb.mxu3 %v5939_v8  ;;  %1221 = vmatpush.msra.mxu0 %v10043_v41  ;;  %v6055_v41 = vld [vmem:[%s9368_s1 + $0x430] sm:$0xff] }
 0x252   :  { %1109 = vmatpush.msrb.mxu1 %v10044_v3  ;;  %1176 = vmatpush.msrb.mxu2 %v10045_v48  ;;  %v10080_v3 = vld [vmem:[#allocation63_spill] sm:$0xff]  ;;  %v10081_v48 = vld [vmem:[#allocation50_spill] sm:$0xff] }
 0x253   :  { %1196 = vmatpush.msrb.mxu3 %v5948_v34  ;;  %1222 = vmatpush.msra.mxu0 %v10046_v47  ;;  %v10082_v47 = vld [vmem:[#allocation36_spill] sm:$0xff] }
 0x254   :  { %1110 = vmatpush.msrb.mxu1 %v10047_v25  ;;  %1177 = vmatpush.msrb.mxu2 %v10048_v19  ;;  %v6064_v25 = vld [vmem:[%s9368_s1 + $0x418] sm:$0xff]  ;;  %v10083_v19 = vld [vmem:[#allocation40_spill] sm:$0xff] }
 0x255   :  { %1197 = vmatpush.msrb.mxu3 %v5957_v0  ;;  %1347 = vmatpush.msrb.mxu0 %v10049_v12  ;;  %v10084_v12 = vld [vmem:[#allocation75_spill] sm:$0xff] }
 0x256   :  { %1111 = vmatpush.msrb.mxu1 %v10050_v44  ;;  %1178 = vmatpush.msrb.mxu2 %v10051_v6  ;;  %v10085_v44 = vld [vmem:[#allocation65_spill] sm:$0xff]  ;;  %v6073_v6 = vld [vmem:[%s9368_s1 + $0x400] sm:$0xff] }
 0x257   :  { %1198 = vmatpush.msrb.mxu3 %v5966_v14  ;;  %1348 = vmatpush.msrb.mxu0 %v10052_v7  ;;  %v10086_v7 = vld [vmem:[#allocation70_spill] sm:$0xff] }
 0x258   :  { %1112 = vmatpush.msrb.mxu1 %v10053_v60  ;;  %1179 = vmatpush.msrb.mxu2 %v10054_v39  ;;  %v10087_v60 = vld [vmem:[#allocation76_spill] sm:$0xff]  ;;  %v10088_v39 = vld [vmem:[#allocation42_spill] sm:$0xff] }
 0x259   :  { %1199 = vmatpush.msrb.mxu3 %v5975_v32  ;;  %1349 = vmatpush.msrb.mxu0 %v10055_v62  ;;  %v6082_v62 = vld [vmem:[%s9368_s1 + $0x3e8] sm:$0xff] }
 0x25a   :  { %1113 = vmatpush.msrb.mxu1 %v10056_v5  ;;  %1180 = vmatpush.msrb.mxu2 %v10057_v49  ;;  %v10089_v5 = vld [vmem:[#allocation46_spill] sm:$0xff]  ;;  %v10090_v49 = vld [vmem:[#allocation77_spill] sm:$0xff] }
 0x25b   :  { %1200 = vmatpush.msrb.mxu3 %v5984_v29  ;;  %1350 = vmatpush.msrb.mxu0 %v10058_v24  ;;  %v10091_v24 = vld [vmem:[#allocation71_spill] sm:$0xff] }
 0x25c   :  { %1114 = vmatpush.msrb.mxu1 %v10059_v52  ;;  %1181 = vmatpush.msrb.mxu2 %v10060_v50  ;;  %v6091_v52 = vld [vmem:[%s9368_s1 + $0x3d0] sm:$0xff]  ;;  %v10092_v50 = vld [vmem:[#allocation73_spill] sm:$0xff] }
 0x25d   :  { %1115 = vmatmul.f32.vlgmr.msrb.gmra.mxu1 %v5851_v63  ;;  %1201 = vmatpush.msrb.mxu3 %v5994_v56 }
 0x25e   :  { %1227 = vmatpush.msra.mxu1 %v10061_v53  ;;  %1182 = vmatpush.msrb.mxu2 %v10062_v20  ;;  %v10093_v53 = vld [vmem:[#allocation4_spill] sm:$0xff] }
 0x25f   :  { %1202 = vmatpush.msrb.mxu3 %v6003_v40  ;;  %1351 = vmatpush.msrb.mxu0 %v10066_v42  ;;  %v10094_v20 = vld [vmem:[#allocation48_spill] sm:$0xff]  ;;  %v10097_v42 = vld [vmem:[#allocation74_spill] sm:$0xff] }
 0x260   :  { %1247 = vmatpush.msra.mxu2 %v10063_v37  ;;  %1228 = vmatpush.msra.mxu1 %v10064_v26  ;;  %v6100_v37 = vld [vmem:[%s9368_s1 + $0x3b8] sm:$0xff]  ;;  %v10095_v26 = vld [vmem:[#allocation52_spill] sm:$0xff] }
 0x261   :  { %1267 = vmatpush.msra.mxu3 %v6010_v38  ;;  %1352 = vmatpush.msrb.mxu0 %v10069_v43  ;;  %v10098_v43 = vld [vmem:[#allocation7_spill] sm:$0xff] }
 0x262   :  { %1248 = vmatpush.msra.mxu2 %v10065_v30  ;;  %1229 = vmatpush.msra.mxu1 %v10067_v22  ;;  %v10096_v30 = vld [vmem:[#allocation5_spill] sm:$0xff]  ;;  %v6109_v22 = vld [vmem:[%s9368_s1 + $0x3a0] sm:$0xff] }
 0x263   :  { %1268 = vmatpush.msra.mxu3 %v6019_v57  ;;  %1353 = vmatpush.msrb.mxu0 %v10072_v10  ;;  %v6129_v10 = vld [vmem:[%s9368_s1 + $0x368] sm:$0xff] }
 0x264   :  { %1249 = vmatpush.msra.mxu2 %v10068_v28  ;;  %1230 = vmatpush.msra.mxu1 %v10070_v11  ;;  %v6115_v28 = vld [vmem:[%s9368_s1 + $0x380] sm:$0xff] }
 0x265   :  { %1269 = vmatpush.msra.mxu3 %v6028_v2  ;;  %1354 = vmatpush.msrb.mxu0 %v10075_v54  ;;  %v10099_v11 = vld [vmem:[#allocation54_spill] sm:$0xff]  ;;  %v6142_v54 = vld [vmem:[%s9368_s1 + $0x350] sm:$0xff] }
 0x266   :  { %1250 = vmatpush.msra.mxu2 %v10071_v27  ;;  %1231 = vmatpush.msra.mxu1 %v10073_v18  ;;  %v6123_v27 = vld [vmem:[%s9368_s1 + $0x388] sm:$0xff]  ;;  %v10100_v18 = vld [vmem:[#allocation56_spill] sm:$0xff] }
 0x267   :  { %1270 = vmatpush.msra.mxu3 %v6037_v21  ;;  %1355 = vmatpush.msrb.mxu0 %v10078_v46  ;;  %v6155_v46 = vld [vmem:[%s9368_s1 + $0x1a0] sm:$0xff] }
 0x268   :  { %1251 = vmatpush.msra.mxu2 %v10074_v9  ;;  %1232 = vmatpush.msra.mxu1 %v10076_v13  ;;  %v6136_v9 = vld [vmem:[%s9368_s1 + $0x370] sm:$0xff]  ;;  %v10102_v13 = vld [vmem:[#allocation3_spill] sm:$0xff] }
 0x269   :  { %1271 = vmatpush.msra.mxu3 %v6046_v58  ;;  %1356 = vmatpush.msrb.mxu0 %v10081_v48  ;;  %10101 = vst [vmem:[#allocation62_spill] sm:$0xff] %v6136_v9  ;;  %v6173_v48 = vld [vmem:[%s9368_s1 + $0x188] sm:$0xff] }
 0x26a   :  { %1252 = vmatpush.msra.mxu2 %v10077_v15  ;;  %1233 = vmatpush.msra.mxu1 %v10079_v31  ;;  %v6149_v15 = vld [vmem:[%s9368_s1 + $0x358] sm:$0xff]  ;;  %10106 = vst [vmem:[#allocation6_spill] sm:$0xff] %v6173_v48 }
 0x26b   :  { %1272 = vmatpush.msra.mxu3 %v6055_v41  ;;  %1357 = vmatpush.msrb.mxu0 %v10084_v12  ;;  %10103 = vst [vmem:[#allocation85_spill] sm:$0xff] %v6149_v15  ;;  %v6161_v31 = vld [vmem:[%s9368_s1 + $0x338] sm:$0xff]  ;;  %v6191_v12 = vld [vmem:[%s9368_s1 + $0x140] sm:$0xff] }
 0x26c   :  { %1253 = vmatpush.msra.mxu2 %v10080_v3  ;;  %1234 = vmatpush.msra.mxu1 %v10082_v47  ;;  %10104 = vst [vmem:[#allocation2_spill] sm:$0xff] %v6161_v31  ;;  %v6167_v3 = vld [vmem:[%s9368_s1 + $0x340] sm:$0xff]  ;;  %v6179_v47 = vld [vmem:[%s9368_s1 + $0x170] sm:$0xff] }
 0x26d   :  { %1273 = vmatpush.msra.mxu3 %v6064_v25  ;;  %1358 = vmatpush.msrb.mxu0 %v10087_v60  ;;  %10105 = vst [vmem:[#allocation86_spill] sm:$0xff] %v6167_v3  ;;  %v10112_v60 = vld [vmem:[#allocation9_spill] sm:$0xff] }
 0x26e   :  { %1254 = vmatpush.msra.mxu2 %v10083_v19  ;;  %1235 = vmatpush.msra.mxu1 %v10085_v44  ;;  %10107 = vst [vmem:[#allocation29_spill] sm:$0xff] %v6179_v47  ;;  %v6185_v19 = vld [vmem:[%s9368_s1 + $0x158] sm:$0xff]  ;;  %v6197_v44 = vld [vmem:[%s9368_s1 + $0x128] sm:$0xff] }
 0x26f   :  { %1274 = vmatpush.msra.mxu3 %v6073_v6  ;;  %1359 = vmatpush.msrb.mxu0 %v10090_v49  ;;  %10108 = vst [vmem:[#allocation64_spill] sm:$0xff] %v6185_v19  ;;  %v10115_v49 = vld [vmem:[#allocation17_spill] sm:$0xff] }
 0x270   :  { %1255 = vmatpush.msra.mxu2 %v10086_v7  ;;  %1236 = vmatpush.msra.mxu1 %v10088_v39  ;;  %10109 = vst [vmem:[#allocation8_spill] sm:$0xff] %v6191_v12  ;;  %v6203_v7 = vld [vmem:[%s9368_s1 + $0x110] sm:$0xff]  ;;  %v10113_v39 = vld [vmem:[#allocation11_spill] sm:$0xff] }
 0x271   :  { %1275 = vmatpush.msra.mxu3 %v6082_v62  ;;  %1360 = vmatpush.msrb.mxu0 %v10093_v53  ;;  %10110 = vst [vmem:[#allocation47_spill] sm:$0xff] %v6197_v44  ;;  %v10118_v53 = vld [vmem:[#allocation27_spill] sm:$0xff] }
 0x272   :  { %1256 = vmatpush.msra.mxu2 %v10089_v5  ;;  %1237 = vmatpush.msra.mxu1 %v10091_v24  ;;  %10111 = vst [vmem:[#allocation33_spill] sm:$0xff] %v6203_v7  ;;  %v10114_v5 = vld [vmem:[#allocation14_spill] sm:$0xff]  ;;  %v10116_v24 = vld [vmem:[#allocation20_spill] sm:$0xff] }
 0x273   :  { %1276 = vmatpush.msra.mxu3 %v6091_v52  ;;  %1361 = vmatpush.msrb.mxu0 %v10096_v30 }
 0x274   :  { %1257 = vmatpush.msra.mxu2 %v10092_v50  ;;  %1238 = vmatpush.msra.mxu1 %v10094_v20  ;;  %v10117_v50 = vld [vmem:[#allocation78_spill] sm:$0xff]  ;;  %v10119_v20 = vld [vmem:[#allocation84_spill] sm:$0xff] }
 0x275   :  { %1277 = vmatpush.msra.mxu3 %v6100_v37  ;;  %1362 = vmatpush.msrb.mxu0 %v10098_v43  ;;  %v10121_v43 = vld [vmem:[#allocation61_spill] sm:$0xff] }
 0x276   :  { %1258 = vmatpush.msra.mxu2 %v10095_v26  ;;  %1239 = vmatpush.msra.mxu1 %v10097_v42  ;;  %v10120_v26 = vld [vmem:[#allocation79_spill] sm:$0xff]  ;;  %v6215_v42 = vpop.permute.xlu1 %1050 }
 0x277   :  { %1278 = vmatpush.msra.mxu3 %v6109_v22 }
 0x278   :  { %1259 = vmatpush.msra.mxu2 %v6115_v28  ;;  %1240 = vmatpush.msra.mxu1 %v10099_v11  ;;  %v1054_v11 = vmul.f32 %v6215_v42, %v10121_v43 }
 0x279   :  { %1279 = vmatpush.msra.mxu3 %v6123_v27 }
 0x27a   :  { %1260 = vmatpush.msra.mxu2 %v6129_v10  ;;  %1241 = vmatpush.msra.mxu1 %v10100_v18 }
 0x27b   :  { %1280 = vmatpush.msra.mxu3 %v6136_v9 }
 0x27c   :  { %1261 = vmatpush.msra.mxu2 %v6142_v54  ;;  %1242 = vmatpush.msra.mxu1 %v10102_v13  ;;  %v10122_v13 = vld [vmem:[#allocation31_spill] sm:$0xff] }
 0x27d   :  { %1281 = vmatpush.msra.mxu3 %v6149_v15 }
 0x27e   :  { %1367 = vmatpush.msrb.mxu1 %v6155_v46  ;;  %1262 = vmatpush.msra.mxu2 %v6161_v31 }
 0x27f   :  { %1282 = vmatpush.msra.mxu3 %v6167_v3 }
 0x280   :  { %1368 = vmatpush.msrb.mxu1 %v6173_v48 }
 0x282   :  { %1369 = vmatpush.msrb.mxu1 %v6179_v47  ;;  %v10125_v47 = vld [vmem:[#allocation60_spill] sm:$0xff] }
 0x283   :  { %v1053_v43 = vmul.f32 %v6215_v42, %v10125_v47 }
 0x284   :  { %1370 = vmatpush.msrb.mxu1 %v6185_v19 }
 0x286   :  { %1371 = vmatpush.msrb.mxu1 %v6191_v12 }
 0x288   :  { %1372 = vmatpush.msrb.mxu1 %v6197_v44 }
 0x28a   :  { %1373 = vmatpush.msrb.mxu1 %v6203_v7 }
 0x28c   :  { %1374 = vmatpush.msrb.mxu1 %v10112_v60 }
 0x28e   :  { %1375 = vmatpush.msrb.mxu1 %v10113_v39 }
 0x290   :  { %1376 = vmatpush.msrb.mxu1 %v10114_v5  ;;  %v10123_v5 = vld [vmem:[#allocation67_spill] sm:$0xff] }
 0x292   :  { %1377 = vmatpush.msrb.mxu1 %v10115_v49  ;;  %v1057_v49 = vadd.f32 %v1054_v11, %v10123_v5  ;;  %v10126_v11 = vld [vmem:[#allocation66_spill] sm:$0xff] }
 0x294   :  { %1378 = vmatpush.msrb.mxu1 %v10116_v24 }
 0x296   :  { %1379 = vmatpush.msrb.mxu1 %v10117_v50 }
 0x298   :  { %1380 = vmatpush.msrb.mxu1 %v10118_v53 }
 0x29a   :  { %1381 = vmatpush.msrb.mxu1 %v10119_v20  ;;  %v10124_v20 = vld [vmem:[#allocation68_spill] sm:$0xff] }
 0x29c   :  { %1382 = vmatpush.msrb.mxu1 %v10120_v26 }
 0x2ad   :  { %v956_v30 = vpop.f32.mrf.mxu0 }
 0x2b9   :  { %v896_v18 = vpop.f32.mrf.mxu1 }
 0x2ba   :  { %v897_v60 = vadd.f32 %v896_v18, %v10122_v13  ;;  %v1096_v39 = vpop.f32.mrf.mxu0 }
 0x2bb   :  { %v1139_v50 = vadd.f32 %v1096_v39, %v1057_v49 }
 0x2bc   :  { %v999_v24 = vadd.f32 %v956_v30, %v897_v60  ;;  %v1056_v30 = vadd.f32 %v1053_v43, %v10126_v11 }
 0x2bd   :  { %v3090_v12 = vmul.f32 -1.442695, %v1139_v50 }
 0x2be   :  { %v3087_v7 = vmul.f32 -1.442695, %v999_v24 }
 0x2bf   :  { %v916_v53 = vpop.f32.mrf.mxu2 }
 0x2c0   :  { %3172 = vpow2.f32 %v3087_v7  ;;  %v917_v44 = vadd.f32 %v916_v53, %v10124_v20  ;;  %v936_v26 = vpop.f32.mrf.mxu3 }
 0x2c1   :  { %3174 = vpow2.f32 %v3090_v12 }
 0x2c2   :  { %v976_v19 = vpop.f32.mrf.mxu1 }
 0x2c3   :  { %v1019_v3 = vadd.f32 %v976_v19, %v917_v44 }
 0x2c5   :  { %v3088_v15 = vmul.f32 -1.442695, %v1019_v3 }
 0x2c6   :  { %v3173_v18 = vpop.eup %3172 }
 0x2c7   :  { %v1003_v13 = vadd.f32 1.0, %v3173_v18  ;;  %3176 = vpow2.f32 %v3088_v15  ;;  %v3175_v7 = vpop.eup %3174  ;;  %v996_v20 = vpop.f32.mrf.mxu2 }
 0x2c8   :  { %v1076_v60 = vpop.f32.mrf.mxu3  ;;  %v6225_v53 = vadd.f32 1.0, %v3175_v7 }
 0x2c9   :  { %3178 = vrcp.f32 %v1003_v13  ;;  %v1119_v39 = vadd.f32 %v1076_v60, %v1056_v30  ;;  %v1015_v12 = vand.u32 2147483648, %v1003_v13  ;;  %v1013_v43 = vand.u32 2147483647, %v1003_v13 }
 0x2ca   :  { %vm1009_vm9 = vweird.f32 %v1003_v13  ;;  %vm1149_vm5 = vweird.f32 %v6225_v53 }
 0x2cb   :  { %v3089_v49 = vmul.f32 -1.442695, %v1119_v39  ;;  %vm1014_vm11 = vcmp.eq.f32.partialorder %v1013_v43, 8.507059e+37 }
 0x2cd   :  { %v3177_v24 = vpop.eup %3176  ;;  %3180 = vpow2.f32 %v3089_v49 }
 0x2ce   :  { %v1023_v50 = vadd.f32 1.0, %v3177_v24  ;;  %v1016_v24 = vor.u32 1.1754944e-38, %v1015_v12 }
 0x2cf   :  { %v3179_v19 = vpop.eup %3178 }
 0x2d0   :  { %3182 = vrcp.f32 %v1023_v50  ;;  %v1005_v44 = vmul.f32 %v3179_v19, %v1003_v13  ;;  %vm1010_vm8 = vweird.f32 %v3179_v19  ;;  %v1035_v5 = vand.u32 2147483648, %v1023_v50 }
 0x2d1   :  { %3184 = vrcp.f32 %v6225_v53  ;;  %vm1011_vm10 = vmor %vm1009_vm9, %vm1010_vm8  ;;  %vm1029_vm13 = vweird.f32 %v1023_v50 }
 0x2d2   :  { %v1006_v3 = vsub.f32 1.0, %v1005_v44  ;;  %v6233_v44 = vld [vmem:[%s9368_s1 + $0x3] ss:$0 sm:$0xff] }
 0x2d3   :  { %v3181_v15 = vpop.eup %3180  ;;  %10127 = vst [vmem:[#allocation12_spill] sm:$0xff] %v6233_v44 }
 0x2d4   :  { %v1007_v18 = vmul.f32 %v3179_v19, %v1006_v3  ;;  %v1123_v30 = vadd.f32 1.0, %v3181_v15  ;;  %v1039_v3 = vadd.f32 %v6233_v44, %v996_v20  ;;  %v1036_v20 = vor.u32 1.1754944e-38, %v1035_v5 }
 0x2d6   :  { %v3183_v60 = vpop.eup %3182  ;;  %v1008_v39 = vadd.f32 %v3179_v19, %v1007_v18  ;;  %3186 = vrcp.f32 %v1123_v30  ;;  %v937_v18 = vadd.f32 %v936_v26, %v10041_v4  ;;  %v1133_v4 = vand.u32 2147483647, %v1123_v30 }
 0x2d7   :  { %v1025_v7 = vmul.f32 %v3183_v60, %v1023_v50  ;;  %v6228_v49 = vpop.eup %3184  ;;  %vm1030_vm12 = vweird.f32 %v3183_v60  ;;  %vm1129_vm1 = vweird.f32 %v1123_v30 }
 0x2d8   :  { %v1012_v11 = vsel %vm1011_vm10, %v3179_v19, %v1008_v39  ;;  %v1145_v12 = vmul.f32 %v6228_v49, %v6225_v53  ;;  %v1033_v19 = vand.u32 2147483647, %v1023_v50  ;;  %vm1031_vm14 = vmor %vm1029_vm13, %vm1030_vm12  ;;  %vm1134_vm3 = vcmp.eq.f32.partialorder %v1133_v4, 8.507059e+37 }
 0x2d9   :  { %v1026_v47 = vsub.f32 1.0, %v1025_v7  ;;  %v1017_v15 = vsel %vm1014_vm11, %v1016_v24, %v1012_v11  ;;  %vm1150_vm4 = vweird.f32 %v6228_v49 }
 0x2da   :  { %v1040_v13 = vmul.f32 %v1039_v3, %v1017_v15  ;;  %v1146_v7 = vsub.f32 1.0, %v1145_v12  ;;  %vm1034_vm15 = vcmp.eq.f32.partialorder %v1033_v19, 8.507059e+37  ;;  %v1135_v3 = vand.u32 2147483648, %v1123_v30  ;;  %v1116_v44 = vpop.f32.mrf.mxu1  ;;  %vm1151_vm6 = vmor %vm1149_vm5, %vm1150_vm4 }
 0x2db   :  { %v1027_v48 = vmul.f32 %v3183_v60, %v1026_v47  ;;  %v1159_v12 = vadd.f32 %v5830_v35, %v1116_v44  ;;  %v6256_v35 = vld [vmem:[%s9368_s1 + $0x328] sm:$0xff] }
 0x2dc   :  { %v1041_v43 = vadd.f32 %v1040_v13, %v937_v18  ;;  %v3187_v39 = vpop.eup %3186  ;;  %v1147_v47 = vmul.f32 %v6228_v49, %v1146_v7  ;;  %v1136_v5 = vor.u32 1.1754944e-38, %v1135_v3 }
 0x2dd   :  { %v1028_v31 = vadd.f32 %v3183_v60, %v1027_v48  ;;  %v1125_v9 = vmul.f32 %v3187_v39, %v1123_v30  ;;  %vm1130_vm0 = vweird.f32 %v3187_v39  ;;  %v1055_v48 = vmul.f32 %v6215_v42, %v10042_v33 }
 0x2de   :  { %3188 = vtanh.f32 %v1041_v43  ;;  %vm1131_vm2 = vmor %vm1129_vm1, %vm1130_vm0  ;;  %v1148_v19 = vadd.f32 %v6228_v49, %v1147_v47  ;;  %v1155_v30 = vand.u32 2147483648, %v6225_v53  ;;  %v6284_v47 = vld [vmem:[%s9368_s1 + $0x2c8] sm:$0xff] }
 0x2df   :  { %v1032_v11 = vsel %vm1031_vm14, %v3183_v60, %v1028_v31  ;;  %v1126_v26 = vsub.f32 1.0, %v1125_v9  ;;  %v1058_v42 = vadd.f32 %v1055_v48, %v4808_v59  ;;  %v6291_v48 = vld [vmem:[%s9368_s1 + $0x2b0] sm:$0xff] }
 0x2e0   :  { %v1037_v24 = vsel %vm1034_vm15, %v1036_v20, %v1032_v11  ;;  %v1152_v44 = vsel %vm1151_vm6, %v6228_v49, %v1148_v19  ;;  %v6263_v11 = vld [vmem:[%s9368_s1 + $0x310] sm:$0xff]  ;;  %v1335_v49 = vld [vmem:[%s9369_s0 + $0x20] sm:$0xff] }
 0x2e1   :  { %v1127_v15 = vmul.f32 %v3187_v39, %v1126_v26  ;;  %v1043_v18 = vsub.f32 1.0, %v1037_v24  ;;  %v1045_v9 = vmul.f32 %v1037_v24, %v5839_v55  ;;  %v1153_v55 = vand.u32 2147483647, %v6225_v53  ;;  %v6269_v26 = vld [vmem:[%s9368_s1 + $0x2f8] sm:$0xff]  ;;  %1338 = vperm.xlu2 %3121, %v1335_v49   ;;  %v6278_v24 = vld [vmem:[%s9368_s1 + $0x2e0] sm:$0xff] }
 0x2e2   :  { %v6337_v19 = vld [vmem:[%s9368_s1 + $0x300] sm:$0xff] }
 0x2e3   :  { %v1128_v50 = vadd.f32 %v3187_v39, %v1127_v15  ;;  %vm1154_vm7 = vcmp.eq.f32.partialorder %v1153_v55, 8.507059e+37  ;;  %v6388_v55 = vld [vmem:[%s9368_s1 + $0x130] sm:$0xff]  ;;  %v6432_v49 = vld [vmem:[%s9368_s1 + $0x220] sm:$0xff] }
 0x2e4   :  { %v3189_v13 = vpop.eup %3188  ;;  %10130 = vst [vmem:[#allocation15_spill] sm:$0xff] %v6432_v49 }
 0x2e5   :  { %v1044_v31 = vmul.f32 %v3189_v13, %v1043_v18  ;;  %v1132_v60 = vsel %vm1131_vm2, %v3187_v39, %v1128_v50  ;;  %v1156_v39 = vor.u32 1.1754944e-38, %v1155_v30  ;;  %v6366_v30 = vld [vmem:[%s9368_s1 + $0x160] sm:$0xff] }
 0x2e6   :  { %v1137_v43 = vsel %vm1134_vm3, %v1136_v5, %v1132_v60  ;;  %v6299_v5 = vld [vmem:[%s9368_s1 + $0x298] sm:$0xff]  ;;  %v6325_v60 = vld [vmem:[%s9368_s1 + $0x190] sm:$0xff] }
 0x2e7   :  { %v6246_v20 = vadd.f32 %v1045_v9, %v1044_v31  ;;  %v1160_v7 = vmul.f32 %v1159_v12, %v1137_v43  ;;  %v1157_v53 = vsel %vm1154_vm7, %v1156_v39, %v1152_v44  ;;  %v6312_v31 = vld [vmem:[%s9368_s1 + $0x1a8] sm:$0xff]  ;;  %v6318_v9 = vld [vmem:[%s9368_s1 + $0x318] sm:$0xff]  ;;  %v6331_v12 = vld [vmem:[%s9368_s1 + $0x280] sm:$0xff] }
 0x2e8   :  { %v1163_v3 = vsub.f32 1.0, %v1157_v53  ;;  %v1165_v13 = vmul.f32 %v1157_v53, %v5851_v63  ;;  %v1623_v63 = vld [vmem:[%s9369_s0 + $0x28] sm:$0xff]  ;;  %v6400_v44 = vld [vmem:[%s9368_s1 + $0x2b8] sm:$0xff]  ;;  %v6419_v53 = vld [vmem:[%s9368_s1 + $0x2a0] sm:$0xff] }
 0x2e9   :  { %1243 = vmatmul.f32.vlgmr.msra.gmra.mxu1 %v6246_v20  ;;  %v1161_v4 = vadd.f32 %v1160_v7, %v1058_v42  ;;  %1626 = vperm.xlu2 %3121, %v1623_v63   ;;  %v6350_v43 = vld [vmem:[%s9368_s1 + $0x268] sm:$0xff]  ;;  %v2487_v42 = vld [vmem:[%s9369_s0 + $0x40] sm:$0xff]  ;;  %v6413_v39 = vld [vmem:[%s9368_s1 + $0x238] sm:$0xff] }
 0x2ea   :  { %1495 = vmatpush.msra.mxu1 %v6256_v35  ;;  %v6375_v7 = vld [vmem:[%s9368_s1 + $0x148] sm:$0xff]  ;;  %10129 = vst [vmem:[#allocation35_spill] sm:$0xff] %v6413_v39  ;;  %v6476_v63 = vld [vmem:[%s9368_s1 + $0x258] sm:$0xff] }
 0x2eb   :  { %3190 = vtanh.f32 %v1161_v4  ;;  %v6394_v4 = vld [vmem:[%s9368_s1 + $0x250] sm:$0xff] }
 0x2ec   :  { %1496 = vmatpush.msra.mxu1 %v6263_v11  ;;  %10128 = vst [vmem:[#allocation26_spill] sm:$0xff] %v6394_v4 }
 0x2ee   :  { %1497 = vmatpush.msra.mxu1 %v6269_v26 }
 0x2f0   :  { %1498 = vmatpush.msra.mxu1 %v6278_v24 }
 0x2f1   :  { %v3191_v15 = vpop.eup %3190  ;;  %2490 = vperm.xlu2 %3121, %v2487_v42   ;;  %v6489_v42 = vld [vmem:[%s9368_s1 + $0x1d8] sm:$0xff] }
 0x2f2   :  { %1499 = vmatpush.msra.mxu1 %v6284_v47  ;;  %v1164_v18 = vmul.f32 %v3191_v15, %v1163_v3  ;;  %v6438_v3 = vld [vmem:[%s9368_s1 + $0x288] sm:$0xff]  ;;  %10133 = vst [vmem:[#allocation18_spill] sm:$0xff] %v6489_v42 }
 0x2f3   :  { %v6451_v15 = vld [vmem:[%s9368_s1 + $0x208] sm:$0xff] }
 0x2f4   :  { %1500 = vmatpush.msra.mxu1 %v6291_v48  ;;  %v6294_v50 = vadd.f32 %v1165_v13, %v1164_v18  ;;  %10131 = vst [vmem:[#allocation53_spill] sm:$0xff] %v6451_v15  ;;  %v6457_v18 = vld [vmem:[%s9368_s1 + $0x270] sm:$0xff] }
 0x2f5   :  { %v6470_v13 = vld [vmem:[%s9368_s1 + $0x1f0] sm:$0xff] }
 0x2f6   :  { %1501 = vmatpush.msra.mxu1 %v6299_v5  ;;  %1183 = vmatmul.f32.vlgmr.msrb.gmra.mxu2 %v6294_v50  ;;  %10132 = vst [vmem:[#allocation37_spill] sm:$0xff] %v6470_v13 }
 0x2f7   :  { %1203 = vmatmul.f32.vlgmr.msrb.gmra.mxu3 %v6294_v50  ;;  %1223 = vmatmul.f32.vlgmr.msra.gmra.mxu0 %v6294_v50 }
 0x2f8   :  { %1383 = vmatmul.f32.vlgmr.msrb.gmra.mxu1 %v6294_v50  ;;  %1387 = vmatpush.msrb.mxu2 %v6312_v31 }
 0x2f9   :  { %1455 = vmatpush.msrb.mxu3 %v6318_v9  ;;  %1475 = vmatpush.msra.mxu0 %v5863_v17  ;;  %v6344_v17 = vld [vmem:[%s9368_s1 + $0x178] sm:$0xff] }
 0x2fa   :  { %1388 = vmatpush.msrb.mxu2 %v6325_v60  ;;  %1502 = vmatpush.msra.mxu1 %v6331_v12 }
 0x2fb   :  { %1456 = vmatpush.msrb.mxu3 %v6337_v19  ;;  %1476 = vmatpush.msra.mxu0 %v5872_v16  ;;  %v6359_v16 = vld [vmem:[%s9368_s1 + $0x2e8] sm:$0xff] }
 0x2fc   :  { %1389 = vmatpush.msrb.mxu2 %v6344_v17  ;;  %1503 = vmatpush.msra.mxu1 %v6350_v43 }
 0x2fd   :  { %1457 = vmatpush.msrb.mxu3 %v6359_v16  ;;  %1477 = vmatpush.msra.mxu0 %v5881_v61  ;;  %v6381_v61 = vld [vmem:[%s9368_s1 + $0x2d0] sm:$0xff] }
 0x2fe   :  { %1390 = vmatpush.msrb.mxu2 %v6366_v30  ;;  %1504 = vmatpush.msra.mxu1 %v6394_v4 }
 0x2ff   :  { %1283 = vmatmul.f32.vlgmr.msra.gmra.mxu3 %v6246_v20  ;;  %1263 = vmatmul.f32.vlgmr.msra.gmra.mxu2 %v6246_v20 }
 0x300   :  { %1363 = vmatmul.f32.vlgmr.msrb.gmra.mxu0 %v6294_v50  ;;  %1391 = vmatpush.msrb.mxu2 %v6375_v7 }
 0x301   :  { %1458 = vmatpush.msrb.mxu3 %v6381_v61  ;;  %1478 = vmatpush.msra.mxu0 %v5894_v23  ;;  %v6407_v23 = vld [vmem:[%s9368_s1 + $0x118] sm:$0xff] }
 0x302   :  { %1392 = vmatpush.msrb.mxu2 %v6388_v55  ;;  %1505 = vmatpush.msra.mxu1 %v6413_v39  ;;  %v10215_v39 = vld [vmem:[#allocation12_spill] sm:$0xff] }
 0x303   :  { %1459 = vmatpush.msrb.mxu3 %v6400_v44  ;;  %1479 = vmatpush.msra.mxu0 %v5903_v36  ;;  %v6426_v36 = vld [vmem:[%s9368_s1 + $0x100] sm:$0xff] }
 0x304   :  { %1393 = vmatpush.msrb.mxu2 %v6407_v23  ;;  %1506 = vmatpush.msra.mxu1 %v6432_v49  ;;  %v6533_v49 = vld [vmem:[%s9368_s1 + $0x210] sm:$0xff] }
 0x305   :  { %1460 = vmatpush.msrb.mxu3 %v6419_v53  ;;  %1480 = vmatpush.msra.mxu0 %v5912_v1  ;;  %v6445_v1 = vld [vmem:[%s9368_s1 + $0xe8] sm:$0xff]  ;;  %10139 = vst [vmem:[#allocation22_spill] sm:$0xff] %v6533_v49 }
 0x306   :  { %1394 = vmatpush.msrb.mxu2 %v6426_v36  ;;  %1507 = vmatpush.msra.mxu1 %v6451_v15  ;;  %v6514_v15 = vld [vmem:[%s9368_s1 + $0x228] sm:$0xff] }
 0x307   :  { %1461 = vmatpush.msrb.mxu3 %v6438_v3  ;;  %1481 = vmatpush.msra.mxu0 %v5921_v51  ;;  %v6464_v51 = vld [vmem:[%s9368_s1 + $0xd0] sm:$0xff]  ;;  %10136 = vst [vmem:[#allocation21_spill] sm:$0xff] %v6514_v15 }
 0x308   :  { %1395 = vmatpush.msrb.mxu2 %v6445_v1  ;;  %1508 = vmatpush.msra.mxu1 %v6470_v13  ;;  %v6495_v13 = vld [vmem:[%s9368_s1 + $0x240] sm:$0xff] }
 0x309   :  { %1462 = vmatpush.msrb.mxu3 %v6457_v18  ;;  %1482 = vmatpush.msra.mxu0 %v5930_v45  ;;  %v6483_v45 = vld [vmem:[%s9368_s1 + $0xb8] sm:$0xff] }
 0x30a   :  { %1396 = vmatpush.msrb.mxu2 %v6464_v51  ;;  %1509 = vmatpush.msra.mxu1 %v6489_v42  ;;  %v6508_v42 = vld [vmem:[%s9368_s1 + $0x1c0] sm:$0xff] }
 0x30b   :  { %1463 = vmatpush.msrb.mxu3 %v6476_v63  ;;  %1483 = vmatpush.msra.mxu0 %v5939_v8  ;;  %v6502_v8 = vld [vmem:[%s9368_s1 + $0xa0] sm:$0xff]  ;;  %10135 = vst [vmem:[#allocation39_spill] sm:$0xff] %v6508_v42 }
 0x30c   :  { %1397 = vmatpush.msrb.mxu2 %v6483_v45  ;;  %10134 = vst [vmem:[#allocation30_spill] sm:$0xff] %v6502_v8  ;;  %1510 = vmatpush.msra.mxu1 %v6508_v42  ;;  %v6527_v42 = vld [vmem:[%s9368_s1 + $0x198] sm:$0xff] }
 0x30d   :  { %1464 = vmatpush.msrb.mxu3 %v6495_v13  ;;  %1484 = vmatpush.msra.mxu0 %v5948_v34  ;;  %v6521_v34 = vld [vmem:[%s9368_s1 + $0x88] sm:$0xff]  ;;  %10138 = vst [vmem:[#allocation41_spill] sm:$0xff] %v6527_v42 }
 0x30e   :  { %1398 = vmatpush.msrb.mxu2 %v6502_v8  ;;  %10137 = vst [vmem:[#allocation81_spill] sm:$0xff] %v6521_v34  ;;  %1635 = vmatpush.msrb.mxu1 %v6527_v42  ;;  %v6546_v42 = vld [vmem:[%s9368_s1 + $0x180] sm:$0xff] }
 0x30f   :  { %1465 = vmatpush.msrb.mxu3 %v6514_v15  ;;  %1485 = vmatpush.msra.mxu0 %v5957_v0  ;;  %v6540_v0 = vld [vmem:[%s9368_s1 + $0x70] sm:$0xff]  ;;  %10141 = vst [vmem:[#allocation43_spill] sm:$0xff] %v6546_v42 }
 0x310   :  { %1399 = vmatpush.msrb.mxu2 %v6521_v34  ;;  %10140 = vst [vmem:[#allocation58_spill] sm:$0xff] %v6540_v0  ;;  %1636 = vmatpush.msrb.mxu1 %v6546_v42  ;;  %v6565_v42 = vld [vmem:[%s9368_s1 + $0x168] sm:$0xff] }
 0x311   :  { %1466 = vmatpush.msrb.mxu3 %v6533_v49  ;;  %1486 = vmatpush.msra.mxu0 %v5966_v14  ;;  %v6552_v49 = vld [vmem:[%s9368_s1 + $0x1f8] sm:$0xff]  ;;  %10144 = vst [vmem:[#allocation24_spill] sm:$0xff] %v6565_v42 }
 0x312   :  { %1400 = vmatpush.msrb.mxu2 %v6540_v0  ;;  %10142 = vst [vmem:[#allocation23_spill] sm:$0xff] %v6552_v49  ;;  %v6559_v14 = vld [vmem:[%s9368_s1 + $0x58] sm:$0xff]  ;;  %1637 = vmatpush.msrb.mxu1 %v6565_v42  ;;  %v6584_v42 = vld [vmem:[%s9368_s1 + $0x150] sm:$0xff] }
 0x313   :  { %1467 = vmatpush.msrb.mxu3 %v6552_v49  ;;  %1487 = vmatpush.msra.mxu0 %v5975_v32  ;;  %10143 = vst [vmem:[#allocation45_spill] sm:$0xff] %v6559_v14  ;;  %v6571_v49 = vld [vmem:[%s9368_s1 + $0x1e0] sm:$0xff] }
 0x314   :  { %1401 = vmatpush.msrb.mxu2 %v6559_v14  ;;  %10145 = vst [vmem:[#allocation49_spill] sm:$0xff] %v6571_v49  ;;  %v6578_v32 = vld [vmem:[%s9368_s1 + $0x40] sm:$0xff]  ;;  %1638 = vmatpush.msrb.mxu1 %v6584_v42 }
 0x315   :  { %1468 = vmatpush.msrb.mxu3 %v6571_v49  ;;  %1488 = vmatpush.msra.mxu0 %v5984_v29  ;;  %10146 = vst [vmem:[#allocation25_spill] sm:$0xff] %v6578_v32  ;;  %v6591_v29 = vld [vmem:[%s9368_s1 + $0x1c8] sm:$0xff] }
 0x316   :  { %1402 = vmatpush.msrb.mxu2 %v6578_v32  ;;  %10147 = vst [vmem:[#allocation28_spill] sm:$0xff] %v6584_v42  ;;  %v6597_v32 = vld [vmem:[%s9368_s1 + $0x498] sm:$0xff]  ;;  %v6604_v42 = vld [vmem:[%s9368_s1 + $0x1b0] sm:$0xff] }
 0x317   :  { %1403 = vmatmul.f32.vlgmr.msrb.gmra.mxu2 %v6294_v50  ;;  %10148 = vst [vmem:[#allocation59_spill] sm:$0xff] %v6591_v29  ;;  %1469 = vmatpush.msrb.mxu3 %v6591_v29  ;;  %v6610_v29 = vld [vmem:[%s9368_s1 + $0x138] sm:$0xff] }
 0x318   :  { %10149 = vst [vmem:[#allocation51_spill] sm:$0xff] %v6597_v32  ;;  %1515 = vmatpush.msra.mxu2 %v6597_v32  ;;  %1489 = vmatpush.msra.mxu0 %v5994_v56  ;;  %v6616_v32 = vld [vmem:[%s9368_s1 + $0x480] sm:$0xff] }
 0x319   :  { %10150 = vst [vmem:[#allocation13_spill] sm:$0xff] %v6604_v42  ;;  %1470 = vmatpush.msrb.mxu3 %v6604_v42  ;;  %1639 = vmatpush.msrb.mxu1 %v6610_v29  ;;  %v6622_v56 = vld [vmem:[%s9368_s1 + $0x4a0] sm:$0xff] }
 0x31a   :  { %10151 = vst [vmem:[#allocation38_spill] sm:$0xff] %v6610_v29  ;;  %1516 = vmatpush.msra.mxu2 %v6616_v32  ;;  %1490 = vmatpush.msra.mxu0 %v6003_v40  ;;  %v6629_v29 = vld [vmem:[%s9368_s1 + $0x120] sm:$0xff]  ;;  %v6648_v40 = vld [vmem:[%s9368_s1 + $0x108] sm:$0xff] }
 0x31b   :  { %10152 = vst [vmem:[#allocation80_spill] sm:$0xff] %v6616_v32  ;;  %1535 = vmatpush.msra.mxu3 %v6622_v56  ;;  %1640 = vmatpush.msrb.mxu1 %v6629_v29  ;;  %v6635_v32 = vld [vmem:[%s9368_s1 + $0x468] sm:$0xff] }
 0x31c   :  { %10153 = vst [vmem:[#allocation57_spill] sm:$0xff] %v6622_v56  ;;  %1517 = vmatpush.msra.mxu2 %v6635_v32  ;;  %v6641_v56 = vld [vmem:[%s9368_s1 + $0x488] sm:$0xff]  ;;  %1555 = vmatpush.msrb.mxu0 %v6010_v38  ;;  %v6667_v38 = vld [vmem:[%s9368_s1 + $0xf0] sm:$0xff] }
 0x31d   :  { %10154 = vst [vmem:[#allocation69_spill] sm:$0xff] %v6629_v29  ;;  %1536 = vmatpush.msra.mxu3 %v6641_v56  ;;  %1641 = vmatpush.msrb.mxu1 %v6648_v40  ;;  %v6654_v29 = vld [vmem:[%s9368_s1 + $0x450] sm:$0xff] }
 0x31e   :  { %10155 = vst [vmem:[#allocation55_spill] sm:$0xff] %v6635_v32  ;;  %1518 = vmatpush.msra.mxu2 %v6654_v29  ;;  %1556 = vmatpush.msrb.mxu0 %v6019_v57  ;;  %v6686_v57 = vld [vmem:[%s9368_s1 + $0xd8] sm:$0xff] }
 0x31f   :  { %10156 = vst [vmem:[#allocation16_spill] sm:$0xff] %v6641_v56  ;;  %v6660_v56 = vld [vmem:[%s9368_s1 + $0x470] sm:$0xff]  ;;  %1642 = vmatpush.msrb.mxu1 %v6667_v38 }
 0x320   :  { %10157 = vst [vmem:[#allocation44_spill] sm:$0xff] %v6648_v40  ;;  %1537 = vmatpush.msra.mxu3 %v6660_v56  ;;  %v6673_v40 = vld [vmem:[%s9368_s1 + $0x438] sm:$0xff]  ;;  %1557 = vmatpush.msrb.mxu0 %v6028_v2  ;;  %v6705_v2 = vld [vmem:[%s9368_s1 + $0xc0] sm:$0xff] }
 0x321   :  { %10158 = vst [vmem:[#allocation32_spill] sm:$0xff] %v6654_v29  ;;  %1519 = vmatpush.msra.mxu2 %v6673_v40  ;;  %1643 = vmatpush.msrb.mxu1 %v6686_v57 }
 0x322   :  { %10159 = vst [vmem:[#allocation19_spill] sm:$0xff] %v6660_v56  ;;  %v6679_v56 = vld [vmem:[%s9368_s1 + $0x458] sm:$0xff]  ;;  %1558 = vmatpush.msrb.mxu0 %v6037_v21  ;;  %v6724_v21 = vld [vmem:[%s9368_s1 + $0xa8] sm:$0xff] }
 0x323   :  { %10160 = vst [vmem:[#allocation72_spill] sm:$0xff] %v6667_v38  ;;  %1538 = vmatpush.msra.mxu3 %v6679_v56  ;;  %v6692_v38 = vld [vmem:[%s9368_s1 + $0x420] sm:$0xff]  ;;  %1644 = vmatpush.msrb.mxu1 %v6705_v2 }
 0x324   :  { %10161 = vst [vmem:[#allocation34_spill] sm:$0xff] %v6673_v40  ;;  %1520 = vmatpush.msra.mxu2 %v6692_v38  ;;  %1559 = vmatpush.msrb.mxu0 %v6046_v58  ;;  %v6743_v58 = vld [vmem:[%s9368_s1 + $0x90] sm:$0xff] }
 0x325   :  { %10162 = vst [vmem:[#allocation63_spill] sm:$0xff] %v6679_v56  ;;  %v6698_v56 = vld [vmem:[%s9368_s1 + $0x440] sm:$0xff]  ;;  %1645 = vmatpush.msrb.mxu1 %v6724_v21 }
 0x326   :  { %10163 = vst [vmem:[#allocation50_spill] sm:$0xff] %v6686_v57  ;;  %1539 = vmatpush.msra.mxu3 %v6698_v56  ;;  %v6711_v57 = vld [vmem:[%s9368_s1 + $0x408] sm:$0xff]  ;;  %1560 = vmatpush.msrb.mxu0 %v6055_v41  ;;  %v6762_v41 = vld [vmem:[%s9368_s1 + $0x78] sm:$0xff] }
 0x327   :  { %10164 = vst [vmem:[#allocation36_spill] sm:$0xff] %v6692_v38  ;;  %1521 = vmatpush.msra.mxu2 %v6711_v57  ;;  %1646 = vmatpush.msrb.mxu1 %v6743_v58 }
 0x328   :  { %10165 = vst [vmem:[#allocation40_spill] sm:$0xff] %v6698_v56  ;;  %v6717_v56 = vld [vmem:[%s9368_s1 + $0x428] sm:$0xff]  ;;  %1561 = vmatpush.msrb.mxu0 %v6064_v25  ;;  %v6781_v25 = vld [vmem:[%s9368_s1 + $0x60] sm:$0xff] }
 0x329   :  { %10166 = vst [vmem:[#allocation75_spill] sm:$0xff] %v6705_v2  ;;  %1540 = vmatpush.msra.mxu3 %v6717_v56  ;;  %v6730_v2 = vld [vmem:[%s9368_s1 + $0x3f0] sm:$0xff]  ;;  %1647 = vmatpush.msrb.mxu1 %v6762_v41 }
 0x32a   :  { %10167 = vst [vmem:[#allocation65_spill] sm:$0xff] %v6711_v57  ;;  %1522 = vmatpush.msra.mxu2 %v6730_v2  ;;  %1562 = vmatpush.msrb.mxu0 %v6073_v6  ;;  %v6800_v6 = vld [vmem:[%s9368_s1 + $0x48] sm:$0xff] }
 0x32b   :  { %10168 = vst [vmem:[#allocation70_spill] sm:$0xff] %v6717_v56  ;;  %v6736_v56 = vld [vmem:[%s9368_s1 + $0x410] sm:$0xff]  ;;  %1648 = vmatpush.msrb.mxu1 %v6781_v25  ;;  %v10213_v57 = vld [vmem:[#allocation31_spill] sm:$0xff] }
 0x32c   :  { %10169 = vst [vmem:[#allocation76_spill] sm:$0xff] %v6724_v21  ;;  %1541 = vmatpush.msra.mxu3 %v6736_v56  ;;  %v6749_v21 = vld [vmem:[%s9368_s1 + $0x3d8] sm:$0xff]  ;;  %1563 = vmatpush.msrb.mxu0 %v6082_v62  ;;  %v6819_v62 = vld [vmem:[%s9368_s1 + $0x30] sm:$0xff] }
 0x32d   :  { %10170 = vst [vmem:[#allocation42_spill] sm:$0xff] %v6730_v2  ;;  %1523 = vmatpush.msra.mxu2 %v6749_v21  ;;  %1649 = vmatpush.msrb.mxu1 %v6800_v6 }
 0x32e   :  { %10171 = vst [vmem:[#allocation46_spill] sm:$0xff] %v6736_v56  ;;  %v6755_v56 = vld [vmem:[%s9368_s1 + $0x3f8] sm:$0xff]  ;;  %1564 = vmatpush.msrb.mxu0 %v6091_v52  ;;  %v6838_v52 = vld [vmem:[%s9368_s1 + $0x360] sm:$0xff] }
 0x32f   :  { %10172 = vst [vmem:[#allocation77_spill] sm:$0xff] %v6743_v58  ;;  %1542 = vmatpush.msra.mxu3 %v6755_v56  ;;  %v6768_v58 = vld [vmem:[%s9368_s1 + $0x3c0] sm:$0xff]  ;;  %1650 = vmatpush.msrb.mxu1 %v6819_v62 }
 0x330   :  { %10173 = vst [vmem:[#allocation71_spill] sm:$0xff] %v6749_v21  ;;  %1524 = vmatpush.msra.mxu2 %v6768_v58  ;;  %1565 = vmatpush.msrb.mxu0 %v6100_v37  ;;  %v6854_v37 = vld [vmem:[%s9368_s1 + $0x330] sm:$0xff]  ;;  %v10212_v21 = vld [vmem:[#allocation66_spill] sm:$0xff] }
 0x331   :  { %10174 = vst [vmem:[#allocation73_spill] sm:$0xff] %v6755_v56  ;;  %v6774_v56 = vld [vmem:[%s9368_s1 + $0x3e0] sm:$0xff] }
 0x332   :  { %10175 = vst [vmem:[#allocation4_spill] sm:$0xff] %v6762_v41  ;;  %1543 = vmatpush.msra.mxu3 %v6774_v56  ;;  %v6787_v41 = vld [vmem:[%s9368_s1 + $0x3a8] sm:$0xff]  ;;  %1566 = vmatpush.msrb.mxu0 %v6109_v22  ;;  %v10190_v22 = vld [vmem:[#allocation62_spill] sm:$0xff] }
 0x333   :  { %10176 = vst [vmem:[#allocation48_spill] sm:$0xff] %v6768_v58  ;;  %1525 = vmatpush.msra.mxu2 %v6787_v41 }
 0x334   :  { %10177 = vst [vmem:[#allocation52_spill] sm:$0xff] %v6774_v56  ;;  %v6793_v56 = vld [vmem:[%s9368_s1 + $0x3c8] sm:$0xff]  ;;  %1567 = vmatpush.msrb.mxu0 %v6123_v27  ;;  %v10194_v27 = vld [vmem:[#allocation29_spill] sm:$0xff] }
 0x335   :  { %10178 = vst [vmem:[#allocation5_spill] sm:$0xff] %v6781_v25  ;;  %1544 = vmatpush.msra.mxu3 %v6793_v56  ;;  %v6806_v25 = vld [vmem:[%s9368_s1 + $0x390] sm:$0xff] }
 0x336   :  { %10179 = vst [vmem:[#allocation74_spill] sm:$0xff] %v6787_v41  ;;  %1526 = vmatpush.msra.mxu2 %v6806_v25  ;;  %1568 = vmatpush.msrb.mxu0 %v10190_v22  ;;  %v6908_v22 = vld [vmem:[%s9368_s1 + $0x68] sm:$0xff] }
 0x337   :  { %10180 = vst [vmem:[#allocation7_spill] sm:$0xff] %v6793_v56  ;;  %v6812_v56 = vld [vmem:[%s9368_s1 + $0x3b0] sm:$0xff] }
 0x338   :  { %10181 = vst [vmem:[#allocation54_spill] sm:$0xff] %v6800_v6  ;;  %1545 = vmatpush.msra.mxu3 %v6812_v56  ;;  %v6825_v6 = vld [vmem:[%s9368_s1 + $0x378] sm:$0xff] }
 0x339   :  { %10182 = vst [vmem:[#allocation56_spill] sm:$0xff] %v6806_v25  ;;  %1527 = vmatpush.msra.mxu2 %v6825_v6 }
 0x33a   :  { %10183 = vst [vmem:[#allocation3_spill] sm:$0xff] %v6812_v56  ;;  %v6831_v56 = vld [vmem:[%s9368_s1 + $0x398] sm:$0xff] }
 0x33b   :  { %10184 = vst [vmem:[#allocation9_spill] sm:$0xff] %v6819_v62  ;;  %1546 = vmatpush.msra.mxu3 %v6831_v56  ;;  %1528 = vmatpush.msra.mxu2 %v6838_v52  ;;  %v6846_v62 = vld [vmem:[%s9368_s1 + $0x348] sm:$0xff] }
 0x33c   :  { %10185 = vst [vmem:[#allocation11_spill] sm:$0xff] %v6825_v6  ;;  %v10197_v6 = vld [vmem:[#allocation8_spill] sm:$0xff] }
 0x33d   :  { %10186 = vst [vmem:[#allocation14_spill] sm:$0xff] %v6831_v56  ;;  %1547 = vmatpush.msra.mxu3 %v6115_v28  ;;  %1529 = vmatpush.msra.mxu2 %v6846_v62  ;;  %v10191_v28 = vld [vmem:[#allocation2_spill] sm:$0xff]  ;;  %v10196_v56 = vld [vmem:[#allocation64_spill] sm:$0xff] }
 0x33e   :  { %10187 = vst [vmem:[#allocation17_spill] sm:$0xff] %v6838_v52  ;;  %v10195_v52 = vld [vmem:[#allocation86_spill] sm:$0xff] }
 0x33f   :  { %10188 = vst [vmem:[#allocation20_spill] sm:$0xff] %v6846_v62  ;;  %1548 = vmatpush.msra.mxu3 %v6129_v10  ;;  %1530 = vmatpush.msra.mxu2 %v6854_v37  ;;  %v10192_v62 = vld [vmem:[#allocation6_spill] sm:$0xff]  ;;  %v10193_v10 = vld [vmem:[#allocation85_spill] sm:$0xff] }
 0x340   :  { %10189 = vst [vmem:[#allocation78_spill] sm:$0xff] %v6854_v37  ;;  %1569 = vmatpush.msrb.mxu0 %v10193_v10  ;;  %v10198_v37 = vld [vmem:[#allocation47_spill] sm:$0xff]  ;;  %v6920_v10 = vld [vmem:[%s9368_s1 + $0x38] sm:$0xff] }
 0x341   :  { %1549 = vmatpush.msra.mxu3 %v6142_v54  ;;  %1655 = vmatpush.msrb.mxu2 %v6155_v46  ;;  %v10199_v54 = vld [vmem:[#allocation33_spill] sm:$0xff]  ;;  %10206 = vst [vmem:[#allocation85_spill] sm:$0xff] %v6908_v22 }
 0x342   :  { %1570 = vmatpush.msrb.mxu0 %v10195_v52  ;;  %v6872_v46 = vld [vmem:[%s9368_s1 + $0xf8] sm:$0xff]  ;;  %10208 = vst [vmem:[#allocation86_spill] sm:$0xff] %v6920_v10 }
 0x343   :  { %1550 = vmatpush.msra.mxu3 %v10191_v28  ;;  %1656 = vmatpush.msrb.mxu2 %v10192_v62  ;;  %10200 = vst [vmem:[#allocation27_spill] sm:$0xff] %v6872_v46  ;;  %v6878_v62 = vld [vmem:[%s9368_s1 + $0xe0] sm:$0xff]  ;;  %v6896_v52 = vld [vmem:[%s9368_s1 + $0x98] sm:$0xff]  ;;  %v6914_v28 = vld [vmem:[%s9368_s1 + $0x50] sm:$0xff] }
 0x344   :  { %10201 = vst [vmem:[#allocation84_spill] sm:$0xff] %v6878_v62 }
 0x345   :  { %1657 = vmatpush.msrb.mxu2 %v10194_v27  ;;  %10204 = vst [vmem:[#allocation2_spill] sm:$0xff] %v6896_v52 }
 0x346   :  { %10207 = vst [vmem:[#allocation29_spill] sm:$0xff] %v6914_v28 }
 0x347   :  { %1658 = vmatpush.msrb.mxu2 %v10196_v56  ;;  %v6884_v56 = vld [vmem:[%s9368_s1 + $0xc8] sm:$0xff] }
 0x348   :  { %10202 = vst [vmem:[#allocation79_spill] sm:$0xff] %v6884_v56 }
 0x349   :  { %1659 = vmatpush.msrb.mxu2 %v10197_v6  ;;  %v6890_v6 = vld [vmem:[%s9368_s1 + $0xb0] sm:$0xff] }
 0x34a   :  { %10203 = vst [vmem:[#allocation62_spill] sm:$0xff] %v6890_v6 }
 0x34b   :  { %1660 = vmatpush.msrb.mxu2 %v10198_v37  ;;  %v6902_v37 = vld [vmem:[%s9368_s1 + $0x80] sm:$0xff] }
 0x34c   :  { %10205 = vst [vmem:[#allocation6_spill] sm:$0xff] %v6902_v37 }
 0x34d   :  { %1661 = vmatpush.msrb.mxu2 %v10199_v54  ;;  %v1339_v54 = vpop.permute.xlu2 %1338 }
 0x34e   :  { %v1343_v14 = vmul.f32 %v1339_v54, %v10042_v33 }
 0x34f   :  { %1662 = vmatpush.msrb.mxu2 %v6872_v46  ;;  %v10211_v46 = vld [vmem:[#allocation60_spill] sm:$0xff] }
 0x350   :  { %v1341_v25 = vmul.f32 %v1339_v54, %v10211_v46 }
 0x351   :  { %1663 = vmatpush.msrb.mxu2 %v6878_v62 }
 0x352   :  { %v1344_v2 = vadd.f32 %v1341_v25, %v10212_v21 }
 0x353   :  { %1664 = vmatpush.msrb.mxu2 %v6884_v56 }
 0x355   :  { %1665 = vmatpush.msrb.mxu2 %v6890_v6  ;;  %v10210_v6 = vld [vmem:[#allocation67_spill] sm:$0xff] }
 0x357   :  { %1666 = vmatpush.msrb.mxu2 %v6896_v52 }
 0x359   :  { %1667 = vmatpush.msrb.mxu2 %v6902_v37  ;;  %v10209_v37 = vld [vmem:[#allocation61_spill] sm:$0xff] }
 0x35a   :  { %v1342_v52 = vmul.f32 %v1339_v54, %v10209_v37 }
 0x35b   :  { %1668 = vmatpush.msrb.mxu2 %v6908_v22 }
 0x35c   :  { %v1345_v22 = vadd.f32 %v1342_v52, %v10210_v6  ;;  %v10214_v6 = vld [vmem:[#allocation68_spill] sm:$0xff] }
 0x35d   :  { %1669 = vmatpush.msrb.mxu2 %v6914_v28 }
 0x35f   :  { %1670 = vmatpush.msrb.mxu2 %v6920_v10 }
 0x366   :  { %v1244_v27 = vpop.f32.mrf.mxu1 }
 0x374   :  { %v6925_v56 = vpop.f32.mrf.mxu0 }
 0x375   :  { %v1384_v62 = vpop.f32.mrf.mxu1 }
 0x376   :  { %v1427_v41 = vadd.f32 %v1384_v62, %v1345_v22 }
 0x378   :  { %v3094_v28 = vmul.f32 -1.442695, %v1427_v41 }
 0x379   :  { %v1184_v58 = vpop.f32.mrf.mxu2 }
 0x37a   :  { %3192 = vpow2.f32 %v3094_v28  ;;  %v1185_v38 = vadd.f32 %v1184_v58, %v10213_v57  ;;  %v1204_v37 = vpop.f32.mrf.mxu3 }
 0x37b   :  { %v1205_v49 = vadd.f32 %v1204_v37, %v10214_v6 }
 0x37c   :  { %v1287_v10 = vadd.f32 %v1244_v27, %v1185_v38 }
 0x37d   :  { %v1364_v40 = vpop.f32.mrf.mxu0 }
 0x37e   :  { %v1407_v29 = vadd.f32 %v1364_v40, %v1344_v2  ;;  %v3091_v32 = vmul.f32 -1.442695, %v1287_v10 }
 0x380   :  { %v3193_v42 = vpop.eup %3192  ;;  %v3093_v52 = vmul.f32 -1.442695, %v1407_v29  ;;  %3194 = vpow2.f32 %v3091_v32 }
 0x381   :  { %v6931_v46 = vadd.f32 1.0, %v3193_v42 }
 0x382   :  { %3196 = vpow2.f32 %v3093_v52  ;;  %v1264_v41 = vpop.f32.mrf.mxu2  ;;  %v1284_v52 = vpop.f32.mrf.mxu3 }
 0x383   :  { %v1307_v62 = vadd.f32 %v1264_v41, %v1205_v49  ;;  %3198 = vrcp.f32 %v6931_v46  ;;  %v1327_v34 = vadd.f32 %v10215_v39, %v1284_v52  ;;  %vm1437_vm3 = vweird.f32 %v6931_v46 }
 0x385   :  { %v3092_v22 = vmul.f32 -1.442695, %v1307_v62 }
 0x386   :  { %v3195_v28 = vpop.eup %3194 }
 0x387   :  { %v1291_v38 = vadd.f32 1.0, %v3195_v28  ;;  %3200 = vpow2.f32 %v3092_v22 }
 0x388   :  { %v3197_v58 = vpop.eup %3196 }
 0x389   :  { %v1411_v40 = vadd.f32 1.0, %v3197_v58  ;;  %3202 = vrcp.f32 %v1291_v38  ;;  %v6934_v2 = vpop.eup %3198  ;;  %v1301_v41 = vand.u32 2147483647, %v1291_v38  ;;  %v1303_v62 = vand.u32 2147483648, %v1291_v38 }
 0x38a   :  { %v1433_v49 = vmul.f32 %v6934_v2, %v6931_v46  ;;  %vm1297_vm10 = vweird.f32 %v1291_v38  ;;  %vm1438_vm1 = vweird.f32 %v6934_v2 }
 0x38b   :  { %3204 = vrcp.f32 %v1411_v40  ;;  %v1423_v6 = vand.u32 2147483648, %v1411_v40  ;;  %v1421_v21 = vand.u32 2147483647, %v1411_v40  ;;  %v1304_v15 = vor.u32 1.1754944e-38, %v1303_v62  ;;  %vm1439_vm5 = vmor %vm1437_vm3, %vm1438_vm1 }
 0x38c   :  { %v1434_v28 = vsub.f32 1.0, %v1433_v49  ;;  %vm1417_vm12 = vweird.f32 %v1411_v40  ;;  %vm1302_vm13 = vcmp.eq.f32.partialorder %v1301_v41, 8.507059e+37 }
 0x38d   :  { %v3201_v32 = vpop.eup %3200  ;;  %vm1422_vm15 = vcmp.eq.f32.partialorder %v1421_v21, 8.507059e+37 }
 0x38e   :  { %v6936_v29 = vadd.f32 1.0, %v3201_v32  ;;  %v1435_v49 = vmul.f32 %v6934_v2, %v1434_v28 }
 0x38f   :  { %v3203_v25 = vpop.eup %3202 }
 0x390   :  { %3206 = vrcp.f32 %v6936_v29  ;;  %v1293_v37 = vmul.f32 %v3203_v25, %v1291_v38  ;;  %vm1298_vm8 = vweird.f32 %v3203_v25  ;;  %v10216_v38 = vld [vmem:[#allocation10_spill] sm:$0xff]  ;;  %v1323_v62 = vand.u32 2147483648, %v6936_v29 }
 0x391   :  { %v3205_v42 = vpop.eup %3204  ;;  %vm1299_vm11 = vmor %vm1297_vm10, %vm1298_vm8  ;;  %v1225_v39 = vadd.f32 %v6925_v56, %v10216_v38  ;;  %v1436_v21 = vadd.f32 %v6934_v2, %v1435_v49  ;;  %vm1317_vm2 = vweird.f32 %v6936_v29 }
 0x392   :  { %v1413_v10 = vmul.f32 %v3205_v42, %v1411_v40  ;;  %v1294_v27 = vsub.f32 1.0, %v1293_v37  ;;  %vm1418_vm9 = vweird.f32 %v3205_v42  ;;  %v1324_v41 = vor.u32 1.1754944e-38, %v1323_v62  ;;  %v10235_v62 = vld [vmem:[#allocation80_spill] sm:$0xff] }
 0x393   :  { %vm1419_vm14 = vmor %vm1417_vm12, %vm1418_vm9 }
 0x394   :  { %v1414_v22 = vsub.f32 1.0, %v1413_v10  ;;  %v1295_v58 = vmul.f32 %v3203_v25, %v1294_v27  ;;  %v1424_v27 = vor.u32 1.1754944e-38, %v1423_v6 }
 0x396   :  { %v1415_v32 = vmul.f32 %v3205_v42, %v1414_v22  ;;  %v3207_v57 = vpop.eup %3206  ;;  %v1296_v0 = vadd.f32 %v3203_v25, %v1295_v58 }
 0x397   :  { %v1313_v37 = vmul.f32 %v3207_v57, %v6936_v29  ;;  %vm1318_vm0 = vweird.f32 %v3207_v57 }
 0x398   :  { %v1416_v4 = vadd.f32 %v3205_v42, %v1415_v32  ;;  %v1300_v10 = vsel %vm1299_vm11, %v3203_v25, %v1296_v0  ;;  %v6952_v0 = vld [vmem:[%s9368_s1 + $0x2] ss:$0 sm:$0xff]  ;;  %vm1319_vm4 = vmor %vm1317_vm2, %vm1318_vm0  ;;  %v1440_v32 = vsel %vm1439_vm5, %v6934_v2, %v1436_v21  ;;  %v10239_v21 = vld [vmem:[#allocation16_spill] sm:$0xff] }
 0x399   :  { %v1314_v22 = vsub.f32 1.0, %v1313_v37  ;;  %v1305_v8 = vsel %vm1302_vm13, %v1304_v15, %v1300_v10  ;;  %v1346_v15 = vadd.f32 %v1343_v14, %v4808_v59 }
 0x39a   :  { %v1420_v54 = vsel %vm1419_vm14, %v3205_v42, %v1416_v4  ;;  %v1328_v52 = vmul.f32 %v1327_v34, %v1305_v8  ;;  %v1404_v58 = vpop.f32.mrf.mxu2  ;;  %v1321_v4 = vand.u32 2147483647, %v6936_v29  ;;  %v1443_v34 = vand.u32 2147483648, %v6931_v46 }
 0x39b   :  { %v1425_v33 = vsel %vm1422_vm15, %v1424_v27, %v1420_v54  ;;  %v1315_v40 = vmul.f32 %v3207_v57, %v1314_v22  ;;  %v1447_v6 = vadd.f32 %v6952_v0, %v1404_v58  ;;  %v1441_v42 = vand.u32 2147483647, %v6931_v46  ;;  %v10234_v58 = vld [vmem:[#allocation18_spill] sm:$0xff] }
 0x39c   :  { %v1329_v8 = vadd.f32 %v1328_v52, %v1225_v39  ;;  %vm1322_vm6 = vcmp.eq.f32.partialorder %v1321_v4, 8.507059e+37  ;;  %v1444_v49 = vor.u32 1.1754944e-38, %v1443_v34  ;;  %v10237_v4 = vld [vmem:[#allocation39_spill] sm:$0xff]  ;;  %v10240_v34 = vld [vmem:[#allocation41_spill] sm:$0xff] }
 0x39d   :  { %v1448_v56 = vmul.f32 %v1447_v6, %v1425_v33  ;;  %v1316_v25 = vadd.f32 %v3207_v57, %v1315_v40  ;;  %vm1442_vm7 = vcmp.eq.f32.partialorder %v1441_v42, 8.507059e+37  ;;  %v10236_v40 = vld [vmem:[#allocation57_spill] sm:$0xff]  ;;  %v7140_v42 = vld [vmem:[%s9368_s1 + $0x490] sm:$0xff] }
 0x39e   :  { %3208 = vtanh.f32 %v1329_v8  ;;  %v1445_v29 = vsel %vm1442_vm7, %v1444_v49, %v1440_v32  ;;  %v7122_v6 = vld [vmem:[%s9368_s1 + $0x1b8] sm:$0xff]  ;;  %v7131_v8 = vld [vmem:[%s9368_s1 + $0x4a8] sm:$0xff]  ;;  %v10247_v49 = vld [vmem:[#allocation36_spill] sm:$0xff] }
 0x39f   :  { %v1449_v14 = vadd.f32 %v1448_v56, %v1346_v15  ;;  %v1320_v28 = vsel %vm1319_vm4, %v3207_v57, %v1316_v25  ;;  %v1451_v46 = vsub.f32 1.0, %v1445_v29  ;;  %v1453_v57 = vmul.f32 %v1445_v29, %v6294_v50  ;;  %v6998_v50 = vld [vmem:[%s9368_s1 + $0x2f0] sm:$0xff]  ;;  %v10238_v15 = vld [vmem:[#allocation55_spill] sm:$0xff]  ;;  %v7149_v32 = vld [vmem:[%s9368_s1 + $0x478] sm:$0xff] }
 0x3a0   :  { %v1325_v37 = vsel %vm1322_vm6, %v1324_v41, %v1320_v28  ;;  %v10241_v56 = vld [vmem:[#allocation32_spill] sm:$0xff]  ;;  %v10242_v25 = vld [vmem:[#allocation19_spill] sm:$0xff] }
 0x3a1   :  { %3210 = vtanh.f32 %v1449_v14  ;;  %v1331_v33 = vsub.f32 1.0, %v1325_v37  ;;  %v1333_v22 = vmul.f32 %v1325_v37, %v6246_v20  ;;  %v6980_v20 = vld [vmem:[%s9368_s1 + $0x320] sm:$0xff]  ;;  %v10243_v41 = vld [vmem:[#allocation43_spill] sm:$0xff]  ;;  %v10246_v37 = vld [vmem:[#allocation24_spill] sm:$0xff] }
 0x3a2   :  { %v10244_v14 = vld [vmem:[#allocation34_spill] sm:$0xff]  ;;  %v10245_v28 = vld [vmem:[#allocation63_spill] sm:$0xff]  ;;  %v10248_v29 = vld [vmem:[#allocation40_spill] sm:$0xff] }
 0x3a4   :  { %v3209_v10 = vpop.eup %3208 }
 0x3a5   :  { %v1332_v27 = vmul.f32 %v3209_v10, %v1331_v33  ;;  %v7158_v33 = vld [vmem:[%s9368_s1 + $0x460] sm:$0xff]  ;;  %v10249_v10 = vld [vmem:[#allocation28_spill] sm:$0xff] }
 0x3a7   :  { %v3211_v54 = vpop.eup %3210  ;;  %v6965_v39 = vadd.f32 %v1333_v22, %v1332_v27  ;;  %v10250_v27 = vld [vmem:[#allocation65_spill] sm:$0xff]  ;;  %v10251_v22 = vld [vmem:[#allocation70_spill] sm:$0xff] }
 0x3a8   :  { %v1452_v52 = vmul.f32 %v3211_v54, %v1451_v46  ;;  %v7167_v46 = vld [vmem:[%s9368_s1 + $0x448] sm:$0xff]  ;;  %v10252_v54 = vld [vmem:[#allocation38_spill] sm:$0xff] }
 0x3a9   :  { %1531 = vmatmul.f32.vlgmr.msra.gmra.mxu2 %v6965_v39 }
 0x3aa   :  { %v6969_v2 = vadd.f32 %v1453_v57, %v1452_v52  ;;  %1783 = vmatpush.msra.mxu2 %v6256_v35  ;;  %v6989_v35 = vld [vmem:[%s9368_s1 + $0x308] sm:$0xff]  ;;  %v10253_v52 = vld [vmem:[#allocation42_spill] sm:$0xff] }
 0x3ab   :  { %v10254_v57 = vld [vmem:[#allocation46_spill] sm:$0xff] }
 0x3ac   :  { %1471 = vmatmul.f32.vlgmr.msrb.gmra.mxu3 %v6969_v2  ;;  %1491 = vmatmul.f32.vlgmr.msra.gmra.mxu0 %v6969_v2 }
 0x3ad   :  { %1511 = vmatmul.f32.vlgmr.msra.gmra.mxu1 %v6969_v2  ;;  %1675 = vmatpush.msrb.mxu3 %v6312_v31  ;;  %v7029_v31 = vld [vmem:[%s9368_s1 + $0x2a8] sm:$0xff] }
 0x3ae   :  { %1743 = vmatpush.msra.mxu0 %v6318_v9  ;;  %1763 = vmatpush.msra.mxu1 %v6980_v20  ;;  %v10217_v9 = vld [vmem:[#allocation30_spill] sm:$0xff] }
 0x3af   :  { %1676 = vmatpush.msrb.mxu3 %v6325_v60  ;;  %1784 = vmatpush.msra.mxu2 %v6263_v11  ;;  %v7011_v11 = vld [vmem:[%s9368_s1 + $0x2d8] sm:$0xff]  ;;  %v10218_v60 = vld [vmem:[#allocation26_spill] sm:$0xff] }
 0x3b0   :  { %1744 = vmatpush.msra.mxu0 %v6337_v19  ;;  %1764 = vmatpush.msra.mxu1 %v6989_v35  ;;  %v7074_v19 = vld [vmem:[%s9368_s1 + $0x230] sm:$0xff] }
 0x3b1   :  { %1677 = vmatpush.msrb.mxu3 %v6344_v17  ;;  %1671 = vmatmul.f32.vlgmr.msrb.gmra.mxu2 %v6969_v2  ;;  %v10220_v17 = vld [vmem:[#allocation81_spill] sm:$0xff] }
 0x3b2   :  { %1745 = vmatpush.msra.mxu0 %v6359_v16  ;;  %1765 = vmatpush.msra.mxu1 %v6998_v50  ;;  %v10222_v16 = vld [vmem:[#allocation22_spill] sm:$0xff] }
 0x3b3   :  { %1678 = vmatpush.msrb.mxu3 %v6366_v30  ;;  %1785 = vmatpush.msra.mxu2 %v6269_v26  ;;  %v7020_v26 = vld [vmem:[%s9368_s1 + $0x2c0] sm:$0xff]  ;;  %v7083_v30 = vld [vmem:[%s9368_s1 + $0x218] sm:$0xff] }
 0x3b4   :  { %1551 = vmatmul.f32.vlgmr.msra.gmra.mxu3 %v6965_v39  ;;  %1571 = vmatmul.f32.vlgmr.msrb.gmra.mxu0 %v6965_v39 }
 0x3b5   :  { %1651 = vmatmul.f32.vlgmr.msrb.gmra.mxu1 %v6969_v2  ;;  %1679 = vmatpush.msrb.mxu3 %v6375_v7  ;;  %v10223_v7 = vld [vmem:[#allocation58_spill] sm:$0xff] }
 0x3b6   :  { %1746 = vmatpush.msra.mxu0 %v6381_v61  ;;  %1766 = vmatpush.msra.mxu1 %v7011_v11  ;;  %v10224_v61 = vld [vmem:[#allocation15_spill] sm:$0xff] }
 0x3b7   :  { %1680 = vmatpush.msrb.mxu3 %v6388_v55  ;;  %1786 = vmatpush.msra.mxu2 %v6278_v24  ;;  %v7038_v24 = vld [vmem:[%s9368_s1 + $0x290] sm:$0xff]  ;;  %v10225_v55 = vld [vmem:[#allocation23_spill] sm:$0xff] }
 0x3b8   :  { %1747 = vmatpush.msra.mxu0 %v6400_v44  ;;  %1767 = vmatpush.msra.mxu1 %v7020_v26  ;;  %v7092_v44 = vld [vmem:[%s9368_s1 + $0x200] sm:$0xff] }
 0x3b9   :  { %1681 = vmatpush.msrb.mxu3 %v6407_v23  ;;  %1787 = vmatpush.msra.mxu2 %v6284_v47  ;;  %v7047_v47 = vld [vmem:[%s9368_s1 + $0x278] sm:$0xff] }
 0x3ba   :  { %1748 = vmatpush.msra.mxu0 %v6419_v53  ;;  %1768 = vmatpush.msra.mxu1 %v7029_v31  ;;  %v10226_v23 = vld [vmem:[#allocation45_spill] sm:$0xff] }
 0x3bb   :  { %1682 = vmatpush.msrb.mxu3 %v6426_v36  ;;  %1788 = vmatpush.msra.mxu2 %v6291_v48  ;;  %v7056_v48 = vld [vmem:[%s9368_s1 + $0x260] sm:$0xff]  ;;  %v10227_v53 = vld [vmem:[#allocation53_spill] sm:$0xff] }
 0x3bc   :  { %1749 = vmatpush.msra.mxu0 %v6438_v3  ;;  %1769 = vmatpush.msra.mxu1 %v7038_v24  ;;  %v10228_v36 = vld [vmem:[#allocation49_spill] sm:$0xff]  ;;  %v7101_v3 = vld [vmem:[%s9368_s1 + $0x1e8] sm:$0xff] }
 0x3bd   :  { %1683 = vmatpush.msrb.mxu3 %v6445_v1  ;;  %1789 = vmatpush.msra.mxu2 %v6299_v5  ;;  %v7065_v5 = vld [vmem:[%s9368_s1 + $0x248] sm:$0xff]  ;;  %v10229_v1 = vld [vmem:[#allocation25_spill] sm:$0xff] }
 0x3be   :  { %1750 = vmatpush.msra.mxu0 %v6457_v18  ;;  %1770 = vmatpush.msra.mxu1 %v7047_v47  ;;  %v10230_v18 = vld [vmem:[#allocation37_spill] sm:$0xff] }
 0x3bf   :  { %1684 = vmatpush.msrb.mxu3 %v6464_v51  ;;  %1790 = vmatpush.msra.mxu2 %v6331_v12  ;;  %v10219_v12 = vld [vmem:[#allocation21_spill] sm:$0xff]  ;;  %v10231_v51 = vld [vmem:[#allocation59_spill] sm:$0xff] }
 0x3c0   :  { %1751 = vmatpush.msra.mxu0 %v6476_v63  ;;  %1771 = vmatpush.msra.mxu1 %v7056_v48  ;;  %v7112_v63 = vld [vmem:[%s9368_s1 + $0x1d0] sm:$0xff] }
 0x3c1   :  { %1685 = vmatpush.msrb.mxu3 %v6483_v45  ;;  %1791 = vmatpush.msra.mxu2 %v6350_v43  ;;  %v10221_v43 = vld [vmem:[#allocation35_spill] sm:$0xff]  ;;  %v10233_v45 = vld [vmem:[#allocation13_spill] sm:$0xff] }
 0x3c2   :  { %1752 = vmatpush.msra.mxu0 %v6495_v13  ;;  %1772 = vmatpush.msra.mxu1 %v7065_v5  ;;  %v10232_v13 = vld [vmem:[#allocation51_spill] sm:$0xff] }
 0x3c3   :  { %1686 = vmatpush.msrb.mxu3 %v10217_v9  ;;  %1792 = vmatpush.msra.mxu2 %v10218_v60  ;;  %v7176_v9 = vld [vmem:[%s9368_s1 + $0x430] sm:$0xff]  ;;  %v10255_v60 = vld [vmem:[#allocation69_spill] sm:$0xff] }
 0x3c4   :  { %1753 = vmatpush.msra.mxu0 %v10219_v12  ;;  %1773 = vmatpush.msra.mxu1 %v7074_v19  ;;  %v10256_v12 = vld [vmem:[#allocation71_spill] sm:$0xff] }
 0x3c5   :  { %1687 = vmatpush.msrb.mxu3 %v10220_v17  ;;  %1793 = vmatpush.msra.mxu2 %v10221_v43  ;;  %v10257_v17 = vld [vmem:[#allocation73_spill] sm:$0xff] }
 0x3c6   :  { %1754 = vmatpush.msra.mxu0 %v10222_v16  ;;  %1774 = vmatpush.msra.mxu1 %v7083_v30  ;;  %v7185_v43 = vld [vmem:[%s9368_s1 + $0x418] sm:$0xff]  ;;  %v10258_v16 = vld [vmem:[#allocation44_spill] sm:$0xff] }
 0x3c7   :  { %1688 = vmatpush.msrb.mxu3 %v10223_v7  ;;  %1794 = vmatpush.msra.mxu2 %v10224_v61  ;;  %v10259_v7 = vld [vmem:[#allocation48_spill] sm:$0xff] }
 0x3c8   :  { %1755 = vmatpush.msra.mxu0 %v10225_v55  ;;  %1775 = vmatpush.msra.mxu1 %v7092_v44  ;;  %v10260_v61 = vld [vmem:[#allocation52_spill] sm:$0xff]  ;;  %v7194_v55 = vld [vmem:[%s9368_s1 + $0x400] sm:$0xff] }
 0x3c9   :  { %1689 = vmatpush.msrb.mxu3 %v10226_v23  ;;  %1795 = vmatpush.msra.mxu2 %v10227_v53  ;;  %v10261_v23 = vld [vmem:[#allocation72_spill] sm:$0xff]  ;;  %v10262_v53 = vld [vmem:[#allocation74_spill] sm:$0xff] }
 0x3ca   :  { %1756 = vmatpush.msra.mxu0 %v10228_v36  ;;  %1776 = vmatpush.msra.mxu1 %v7101_v3  ;;  %v10263_v36 = vld [vmem:[#allocation7_spill] sm:$0xff] }
 0x3cb   :  { %1690 = vmatpush.msrb.mxu3 %v10229_v1  ;;  %1796 = vmatpush.msra.mxu2 %v10230_v18  ;;  %v7203_v1 = vld [vmem:[%s9368_s1 + $0x3e8] sm:$0xff]  ;;  %v10264_v18 = vld [vmem:[#allocation50_spill] sm:$0xff] }
 0x3cc   :  { %1691 = vmatmul.f32.vlgmr.msrb.gmra.mxu3 %v6969_v2  ;;  %1757 = vmatpush.msra.mxu0 %v10231_v51  ;;  %v10265_v51 = vld [vmem:[#allocation56_spill] sm:$0xff] }
 0x3cd   :  { %1803 = vmatpush.msra.mxu3 %v10232_v13  ;;  %1777 = vmatpush.msra.mxu1 %v7112_v63  ;;  %v10266_v13 = vld [vmem:[#allocation3_spill] sm:$0xff] }
 0x3ce   :  { %1758 = vmatpush.msra.mxu0 %v10233_v45  ;;  %1797 = vmatpush.msra.mxu2 %v10234_v58  ;;  %v7212_v45 = vld [vmem:[%s9368_s1 + $0x3d0] sm:$0xff]  ;;  %v10267_v58 = vld [vmem:[#allocation75_spill] sm:$0xff] }
 0x3cf   :  { %1804 = vmatpush.msra.mxu3 %v10235_v62  ;;  %1778 = vmatpush.msra.mxu1 %v7122_v6  ;;  %v10268_v62 = vld [vmem:[#allocation11_spill] sm:$0xff] }
 0x3d0   :  { %1823 = vmatpush.msrb.mxu0 %v10236_v40  ;;  %1798 = vmatpush.msra.mxu2 %v10237_v4  ;;  %v10269_v40 = vld [vmem:[#allocation14_spill] sm:$0xff]  ;;  %v7221_v4 = vld [vmem:[%s9368_s1 + $0x3b8] sm:$0xff] }
 0x3d1   :  { %1805 = vmatpush.msra.mxu3 %v10238_v15  ;;  %1843 = vmatpush.msrb.mxu1 %v7131_v8  ;;  %v10270_v15 = vld [vmem:[#allocation76_spill] sm:$0xff] }
 0x3d2   :  { %1824 = vmatpush.msrb.mxu0 %v10239_v21  ;;  %1923 = vmatpush.msrb.mxu2 %v10240_v34  ;;  %v10271_v21 = vld [vmem:[#allocation17_spill] sm:$0xff]  ;;  %v7229_v34 = vld [vmem:[%s9368_s1 + $0x380] sm:$0xff] }
 0x3d3   :  { %1806 = vmatpush.msra.mxu3 %v10241_v56  ;;  %1844 = vmatpush.msrb.mxu1 %v7140_v42  ;;  %v7235_v56 = vld [vmem:[%s9368_s1 + $0x3a0] sm:$0xff] }
 0x3d4   :  { %1825 = vmatpush.msrb.mxu0 %v10242_v25  ;;  %1924 = vmatpush.msrb.mxu2 %v10243_v41  ;;  %v10272_v25 = vld [vmem:[#allocation77_spill] sm:$0xff]  ;;  %v10273_v41 = vld [vmem:[#allocation20_spill] sm:$0xff] }
 0x3d5   :  { %1807 = vmatpush.msra.mxu3 %v10244_v14  ;;  %1845 = vmatpush.msrb.mxu1 %v7149_v32  ;;  %v7243_v14 = vld [vmem:[%s9368_s1 + $0x368] sm:$0xff] }
 0x3d6   :  { %1826 = vmatpush.msrb.mxu0 %v10245_v28  ;;  %1925 = vmatpush.msrb.mxu2 %v10246_v37  ;;  %v7249_v28 = vld [vmem:[%s9368_s1 + $0x388] sm:$0xff]  ;;  %v10274_v37 = vld [vmem:[#allocation4_spill] sm:$0xff] }
 0x3d7   :  { %1808 = vmatpush.msra.mxu3 %v10247_v49  ;;  %1846 = vmatpush.msrb.mxu1 %v7158_v33  ;;  %v10275_v49 = vld [vmem:[#allocation78_spill] sm:$0xff] }
 0x3d8   :  { %1827 = vmatpush.msrb.mxu0 %v10248_v29  ;;  %1926 = vmatpush.msrb.mxu2 %v10249_v10  ;;  %v7257_v29 = vld [vmem:[%s9368_s1 + $0x350] sm:$0xff]  ;;  %v7263_v10 = vld [vmem:[%s9368_s1 + $0x1a0] sm:$0xff] }
 0x3d9   :  { %1809 = vmatpush.msra.mxu3 %v10250_v27  ;;  %1847 = vmatpush.msrb.mxu1 %v7167_v46  ;;  %10276 = vst [vmem:[#allocation64_spill] sm:$0xff] %v7257_v29  ;;  %v7269_v27 = vld [vmem:[%s9368_s1 + $0x370] sm:$0xff] }
 0x3da   :  { %1828 = vmatpush.msrb.mxu0 %v10251_v22  ;;  %1927 = vmatpush.msrb.mxu2 %v10252_v54  ;;  %10277 = vst [vmem:[#allocation8_spill] sm:$0xff] %v7263_v10  ;;  %v7275_v22 = vld [vmem:[%s9368_s1 + $0x338] sm:$0xff] }
 0x3db   :  { %1810 = vmatpush.msra.mxu3 %v10253_v52  ;;  %1848 = vmatpush.msrb.mxu1 %v7176_v9  ;;  %10278 = vst [vmem:[#allocation47_spill] sm:$0xff] %v7269_v27  ;;  %v10280_v54 = vld [vmem:[#allocation5_spill] sm:$0xff]  ;;  %v7282_v52 = vld [vmem:[%s9368_s1 + $0x188] sm:$0xff] }
 0x3dc   :  { %1829 = vmatpush.msrb.mxu0 %v10254_v57  ;;  %1928 = vmatpush.msrb.mxu2 %v10255_v60  ;;  %10279 = vst [vmem:[#allocation33_spill] sm:$0xff] %v7275_v22  ;;  %v7288_v57 = vld [vmem:[%s9368_s1 + $0x358] sm:$0xff]  ;;  %v10283_v60 = vld [vmem:[#allocation54_spill] sm:$0xff] }
 0x3dd   :  { %1811 = vmatpush.msra.mxu3 %v10256_v12  ;;  %1849 = vmatpush.msrb.mxu1 %v7185_v43  ;;  %10281 = vst [vmem:[#allocation12_spill] sm:$0xff] %v7282_v52  ;;  %v7295_v12 = vld [vmem:[%s9368_s1 + $0x170] sm:$0xff] }
 0x3de   :  { %1830 = vmatpush.msrb.mxu0 %v10257_v17  ;;  %1929 = vmatpush.msrb.mxu2 %v10258_v16  ;;  %10282 = vst [vmem:[#allocation30_spill] sm:$0xff] %v7288_v57  ;;  %v7301_v17 = vld [vmem:[%s9368_s1 + $0x340] sm:$0xff]  ;;  %v10286_v16 = vld [vmem:[#allocation9_spill] sm:$0xff] }
 0x3df   :  { %1812 = vmatpush.msra.mxu3 %v10259_v7  ;;  %1850 = vmatpush.msrb.mxu1 %v7194_v55  ;;  %10284 = vst [vmem:[#allocation26_spill] sm:$0xff] %v7295_v12  ;;  %v7308_v7 = vld [vmem:[%s9368_s1 + $0x158] sm:$0xff] }
 0x3e0   :  { %1831 = vmatpush.msrb.mxu0 %v10260_v61  ;;  %1930 = vmatpush.msrb.mxu2 %v10261_v23  ;;  %10285 = vst [vmem:[#allocation21_spill] sm:$0xff] %v7301_v17  ;;  %v7314_v61 = vld [vmem:[%s9368_s1 + $0x140] sm:$0xff]  ;;  %v7320_v23 = vld [vmem:[%s9368_s1 + $0x128] sm:$0xff] }
 0x3e1   :  { %1813 = vmatpush.msra.mxu3 %v10262_v53  ;;  %1851 = vmatpush.msrb.mxu1 %v7203_v1  ;;  %10287 = vst [vmem:[#allocation81_spill] sm:$0xff] %v7308_v7  ;;  %v7326_v53 = vld [vmem:[%s9368_s1 + $0x110] sm:$0xff] }
 0x3e2   :  { %1832 = vmatpush.msrb.mxu0 %v10263_v36  ;;  %1931 = vmatpush.msrb.mxu2 %v10264_v18  ;;  %10288 = vst [vmem:[#allocation35_spill] sm:$0xff] %v7314_v61  ;;  %v10291_v36 = vld [vmem:[#allocation27_spill] sm:$0xff]  ;;  %v10292_v18 = vld [vmem:[#allocation84_spill] sm:$0xff] }
 0x3e3   :  { %1814 = vmatpush.msra.mxu3 %v10265_v51  ;;  %1852 = vmatpush.msrb.mxu1 %v7212_v45  ;;  %10289 = vst [vmem:[#allocation22_spill] sm:$0xff] %v7320_v23  ;;  %v10293_v51 = vld [vmem:[#allocation79_spill] sm:$0xff] }
 0x3e4   :  { %1833 = vmatpush.msrb.mxu0 %v10266_v13  ;;  %1932 = vmatpush.msrb.mxu2 %v10267_v58  ;;  %10290 = vst [vmem:[#allocation58_spill] sm:$0xff] %v7326_v53  ;;  %v10294_v13 = vld [vmem:[#allocation62_spill] sm:$0xff] }
 0x3e5   :  { %1815 = vmatpush.msra.mxu3 %v10268_v62  ;;  %1853 = vmatpush.msrb.mxu1 %v7221_v4  ;;  %v10295_v58 = vld [vmem:[#allocation2_spill] sm:$0xff] }
 0x3e6   :  { %1834 = vmatpush.msrb.mxu0 %v10269_v40  ;;  %1933 = vmatpush.msrb.mxu2 %v10270_v15  ;;  %v10296_v62 = vld [vmem:[#allocation6_spill] sm:$0xff]  ;;  %v10297_v40 = vld [vmem:[#allocation85_spill] sm:$0xff] }
 0x3e7   :  { %1816 = vmatpush.msra.mxu3 %v10271_v21  ;;  %1854 = vmatpush.msrb.mxu1 %v7235_v56  ;;  %v10298_v15 = vld [vmem:[#allocation29_spill] sm:$0xff]  ;;  %v10299_v21 = vld [vmem:[#allocation86_spill] sm:$0xff] }
 0x3e8   :  { %1835 = vmatpush.msrb.mxu0 %v7229_v34  ;;  %1934 = vmatpush.msrb.mxu2 %v10272_v25 }
 0x3e9   :  { %1817 = vmatpush.msra.mxu3 %v10273_v41  ;;  %1855 = vmatpush.msrb.mxu1 %v7249_v28  ;;  %v1627_v41 = vpop.permute.xlu2 %1626 }
 0x3ea   :  { %1836 = vmatpush.msrb.mxu0 %v7243_v14  ;;  %1935 = vmatpush.msrb.mxu2 %v10274_v37 }
 0x3eb   :  { %1818 = vmatpush.msra.mxu3 %v10275_v49  ;;  %1856 = vmatpush.msrb.mxu1 %v7269_v27  ;;  %v10300_v49 = vld [vmem:[#allocation60_spill] sm:$0xff] }
 0x3ec   :  { %1837 = vmatpush.msrb.mxu0 %v7257_v29  ;;  %1936 = vmatpush.msrb.mxu2 %v10280_v54  ;;  %v1629_v54 = vmul.f32 %v1627_v41, %v10300_v49 }
 0x3ed   :  { %1943 = vmatpush.msrb.mxu3 %v7263_v10  ;;  %1857 = vmatpush.msrb.mxu1 %v7288_v57  ;;  %v10305_v57 = vld [vmem:[#allocation68_spill] sm:$0xff] }
 0x3ee   :  { %1838 = vmatpush.msrb.mxu0 %v7275_v22  ;;  %1937 = vmatpush.msrb.mxu2 %v10283_v60  ;;  %v10301_v60 = vld [vmem:[#allocation61_spill] sm:$0xff] }
 0x3ef   :  { %1944 = vmatpush.msrb.mxu3 %v7282_v52  ;;  %1858 = vmatpush.msrb.mxu1 %v7301_v17 }
 0x3f0   :  { %1938 = vmatpush.msrb.mxu2 %v10286_v16  ;;  %v1630_v16 = vmul.f32 %v1627_v41, %v10301_v60 }
 0x3f1   :  { %1945 = vmatpush.msrb.mxu3 %v7295_v12 }
 0x3f3   :  { %1946 = vmatpush.msrb.mxu3 %v7308_v7 }
 0x3f5   :  { %1947 = vmatpush.msrb.mxu3 %v7314_v61  ;;  %v10304_v61 = vld [vmem:[#allocation67_spill] sm:$0xff] }
 0x3f7   :  { %1948 = vmatpush.msrb.mxu3 %v7320_v23 }
 0x3f9   :  { %1949 = vmatpush.msrb.mxu3 %v7326_v53 }
 0x3fb   :  { %1950 = vmatpush.msrb.mxu3 %v10291_v36 }
 0x3fd   :  { %1951 = vmatpush.msrb.mxu3 %v10292_v18  ;;  %v10302_v18 = vld [vmem:[#allocation31_spill] sm:$0xff] }
 0x3ff   :  { %1952 = vmatpush.msrb.mxu3 %v10293_v51 }
 0x401   :  { %1953 = vmatpush.msrb.mxu3 %v10294_v13  ;;  %v10303_v13 = vld [vmem:[#allocation66_spill] sm:$0xff] }
 0x403   :  { %1954 = vmatpush.msrb.mxu3 %v10295_v58  ;;  %v1632_v58 = vadd.f32 %v1629_v54, %v10303_v13 }
 0x405   :  { %1955 = vmatpush.msrb.mxu3 %v10296_v62 }
 0x407   :  { %1956 = vmatpush.msrb.mxu3 %v10297_v40 }
 0x409   :  { %1957 = vmatpush.msrb.mxu3 %v10298_v15  ;;  %v1633_v15 = vadd.f32 %v1630_v16, %v10304_v61 }
 0x40b   :  { %1958 = vmatpush.msrb.mxu3 %v10299_v21 }
 0x429   :  { %v1492_v23 = vpop.f32.mrf.mxu0 }
 0x42a   :  { %v1512_v25 = vpop.f32.mrf.mxu1  ;;  %v1493_v52 = vadd.f32 %v1492_v23, %v10305_v57  ;;  %v7360_v57 = vld [vmem:[%s9368_s1 + $0x3] ss:$0 sm:$0xff] }
 0x42b   :  { %10307 = vst [vmem:[#allocation15_spill] sm:$0xff] %v7360_v57 }
 0x42c   :  { %v1532_v37 = vpop.f32.mrf.mxu2 }
 0x42f   :  { %v1472_v36 = vpop.f32.mrf.mxu3 }
 0x430   :  { %v1473_v51 = vadd.f32 %v1472_v36, %v10302_v18 }
 0x432   :  { %v1575_v53 = vadd.f32 %v1532_v37, %v1473_v51  ;;  %v1652_v62 = vpop.f32.mrf.mxu1 }
 0x433   :  { %v1695_v40 = vadd.f32 %v1652_v62, %v1632_v58 }
 0x434   :  { %v3095_v7 = vmul.f32 -1.442695, %v1575_v53  ;;  %v1672_v21 = vpop.f32.mrf.mxu2 }
 0x435   :  { %v3097_v17 = vmul.f32 -1.442695, %v1695_v40  ;;  %v1715_v12 = vadd.f32 %v1672_v21, %v1633_v15  ;;  %v1513_v15 = vadd.f32 %v1512_v25, %v10216_v38  ;;  %v1572_v21 = vpop.f32.mrf.mxu0 }
 0x436   :  { %3212 = vpow2.f32 %v3095_v7  ;;  %v1615_v25 = vadd.f32 %v7360_v57, %v1572_v21 }
 0x437   :  { %3214 = vpow2.f32 %v3097_v17  ;;  %v3098_v49 = vmul.f32 -1.442695, %v1715_v12  ;;  %v1552_v60 = vpop.f32.mrf.mxu3  ;;  %v10306_v12 = vld [vmem:[#allocation82_spill] sm:$0xff] }
 0x438   :  { %v1595_v22 = vadd.f32 %v1552_v60, %v1493_v52  ;;  %v1631_v17 = vmul.f32 %v1627_v41, %v10306_v12 }
 0x439   :  { %3216 = vpow2.f32 %v3098_v49 }
 0x43a   :  { %v3096_v36 = vmul.f32 -1.442695, %v1595_v22  ;;  %v1634_v40 = vadd.f32 %v1631_v17, %v4808_v59 }
 0x43c   :  { %v3213_v54 = vpop.eup %3212  ;;  %3218 = vpow2.f32 %v3096_v36 }
 0x43d   :  { %v3215_v37 = vpop.eup %3214  ;;  %v1579_v51 = vadd.f32 1.0, %v3213_v54 }
 0x43e   :  { %v1699_v58 = vadd.f32 1.0, %v3215_v37 }
 0x43f   :  { %v3217_v62 = vpop.eup %3216  ;;  %3220 = vrcp.f32 %v1579_v51  ;;  %v1589_v54 = vand.u32 2147483647, %v1579_v51  ;;  %v1591_v37 = vand.u32 2147483648, %v1579_v51  ;;  %vm1585_vm10 = vweird.f32 %v1579_v51 }
 0x440   :  { %3222 = vrcp.f32 %v1699_v58  ;;  %v7344_v53 = vadd.f32 1.0, %v3217_v62  ;;  %v1709_v12 = vand.u32 2147483647, %v1699_v58  ;;  %v1711_v13 = vand.u32 2147483648, %v1699_v58 }
 0x441   :  { %vm1705_vm11 = vweird.f32 %v1699_v58  ;;  %vm1590_vm13 = vcmp.eq.f32.partialorder %v1589_v54, 8.507059e+37 }
 0x442   :  { %v3219_v16 = vpop.eup %3218  ;;  %3224 = vrcp.f32 %v7344_v53  ;;  %vm1710_vm15 = vcmp.eq.f32.partialorder %v1709_v12, 8.507059e+37  ;;  %v1712_v29 = vor.u32 1.1754944e-38, %v1711_v13  ;;  %vm1725_vm3 = vweird.f32 %v7344_v53 }
 0x443   :  { %v7347_v7 = vadd.f32 1.0, %v3219_v16 }
 0x445   :  { %v3221_v52 = vpop.eup %3220  ;;  %3226 = vrcp.f32 %v7347_v7  ;;  %vm1605_vm2 = vweird.f32 %v7347_v7 }
 0x446   :  { %v3223_v22 = vpop.eup %3222  ;;  %v1581_v23 = vmul.f32 %v3221_v52, %v1579_v51  ;;  %vm1586_vm8 = vweird.f32 %v3221_v52  ;;  %v1611_v51 = vand.u32 2147483648, %v7347_v7 }
 0x447   :  { %v1701_v49 = vmul.f32 %v3223_v22, %v1699_v58  ;;  %vm1706_vm9 = vweird.f32 %v3223_v22  ;;  %vm1587_vm12 = vmor %vm1585_vm10, %vm1586_vm8 }
 0x448   :  { %v7351_v60 = vpop.eup %3224  ;;  %v1582_v36 = vsub.f32 1.0, %v1581_v23  ;;  %vm1707_vm14 = vmor %vm1705_vm11, %vm1706_vm9  ;;  %v1612_v12 = vor.u32 1.1754944e-38, %v1611_v51  ;;  %v7420_v51 = vld [vmem:[%s9368_s1 + $0x300] sm:$0xff] }
 0x449   :  { %v1721_v62 = vmul.f32 %v7351_v60, %v7344_v53  ;;  %v1702_v41 = vsub.f32 1.0, %v1701_v49  ;;  %v1592_v49 = vor.u32 1.1754944e-38, %v1591_v37  ;;  %vm1726_vm1 = vweird.f32 %v7351_v60 }
 0x44a   :  { %v1583_v16 = vmul.f32 %v3221_v52, %v1582_v36  ;;  %vm1727_vm5 = vmor %vm1725_vm3, %vm1726_vm1 }
 0x44b   :  { %v3227_v61 = vpop.eup %3226  ;;  %v1722_v17 = vsub.f32 1.0, %v1721_v62  ;;  %v1703_v23 = vmul.f32 %v3223_v22, %v1702_v41 }
 0x44c   :  { %v1584_v59 = vadd.f32 %v3221_v52, %v1583_v16  ;;  %v1601_v38 = vmul.f32 %v3227_v61, %v7347_v7  ;;  %vm1606_vm0 = vweird.f32 %v3227_v61 }
 0x44d   :  { %v1723_v36 = vmul.f32 %v7351_v60, %v1722_v17  ;;  %v1704_v18 = vadd.f32 %v3223_v22, %v1703_v23  ;;  %vm1607_vm4 = vmor %vm1605_vm2, %vm1606_vm0 }
 0x44e   :  { %v1588_v27 = vsel %vm1587_vm12, %v3221_v52, %v1584_v59  ;;  %v1602_v10 = vsub.f32 1.0, %v1601_v38  ;;  %v1731_v59 = vand.u32 2147483648, %v7344_v53  ;;  %v1609_v38 = vand.u32 2147483647, %v7347_v7 }
 0x44f   :  { %v1593_v21 = vsel %vm1590_vm13, %v1592_v49, %v1588_v27  ;;  %v1692_v62 = vpop.f32.mrf.mxu3  ;;  %v1708_v41 = vsel %vm1707_vm14, %v3223_v22, %v1704_v18  ;;  %v1724_v37 = vadd.f32 %v7351_v60, %v1723_v36 }
 0x450   :  { %v1616_v16 = vmul.f32 %v1615_v25, %v1593_v21  ;;  %v1603_v57 = vmul.f32 %v3227_v61, %v1602_v10  ;;  %v1713_v58 = vsel %vm1710_vm15, %v1712_v29, %v1708_v41  ;;  %v1735_v54 = vadd.f32 %v6952_v0, %v1692_v62  ;;  %v7408_v62 = vld [vmem:[%s9368_s1 + $0x190] sm:$0xff] }
 0x451   :  { %v1729_v10 = vand.u32 2147483647, %v7344_v53  ;;  %v1728_v52 = vsel %vm1727_vm5, %v7351_v60, %v1724_v37  ;;  %vm1610_vm6 = vcmp.eq.f32.partialorder %v1609_v38, 8.507059e+37  ;;  %v1732_v22 = vor.u32 1.1754944e-38, %v1731_v59  ;;  %v7386_v60 = vld [vmem:[%s9368_s1 + $0x328] sm:$0xff]  ;;  %v7414_v41 = vld [vmem:[%s9368_s1 + $0x310] sm:$0xff] }
 0x452   :  { %v1617_v13 = vadd.f32 %v1616_v16, %v1513_v15  ;;  %v1736_v27 = vmul.f32 %v1735_v54, %v1713_v58  ;;  %v1604_v18 = vadd.f32 %v3227_v61, %v1603_v57  ;;  %v7433_v16 = vld [vmem:[%s9368_s1 + $0x2f8] sm:$0xff]  ;;  %v7446_v58 = vld [vmem:[%s9368_s1 + $0x160] sm:$0xff]  ;;  %v7456_v54 = vld [vmem:[%s9368_s1 + $0x148] sm:$0xff] }
 0x453   :  { %vm1730_vm7 = vcmp.eq.f32.partialorder %v1729_v10, 8.507059e+37  ;;  %v7462_v37 = vld [vmem:[%s9368_s1 + $0x2d0] sm:$0xff]  ;;  %v7475_v59 = vld [vmem:[%s9368_s1 + $0x2e0] sm:$0xff]  ;;  %v7481_v38 = vld [vmem:[%s9368_s1 + $0x2b8] sm:$0xff] }
 0x454   :  { %3228 = vtanh.f32 %v1617_v13  ;;  %v1737_v0 = vadd.f32 %v1736_v27, %v1634_v40  ;;  %v1608_v29 = vsel %vm1607_vm4, %v3227_v61, %v1604_v18  ;;  %v1733_v7 = vsel %vm1730_vm7, %v1732_v22, %v1728_v52  ;;  %v7494_v13 = vld [vmem:[%s9368_s1 + $0x2c8] sm:$0xff]  ;;  %v7500_v27 = vld [vmem:[%s9368_s1 + $0x2a0] sm:$0xff]  ;;  %v7513_v18 = vld [vmem:[%s9368_s1 + $0x2b0] sm:$0xff] }
 0x455   :  { %v1613_v15 = vsel %vm1610_vm6, %v1612_v12, %v1608_v29  ;;  %v1739_v17 = vsub.f32 1.0, %v1733_v7  ;;  %v1741_v40 = vmul.f32 %v1733_v7, %v6969_v2  ;;  %v7401_v2 = vld [vmem:[%s9368_s1 + $0x318] sm:$0xff]  ;;  %v7519_v10 = vld [vmem:[%s9368_s1 + $0x288] sm:$0xff]  ;;  %v7538_v29 = vld [vmem:[%s9368_s1 + $0x270] sm:$0xff] }
 0x456   :  { %3230 = vtanh.f32 %v1737_v0  ;;  %v1619_v57 = vsub.f32 1.0, %v1613_v15  ;;  %v1621_v53 = vmul.f32 %v1613_v15, %v6965_v39  ;;  %v7395_v39 = vld [vmem:[%s9368_s1 + $0x1a8] sm:$0xff]  ;;  %v7532_v0 = vld [vmem:[%s9368_s1 + $0x298] sm:$0xff]  ;;  %v7551_v12 = vld [vmem:[%s9368_s1 + $0x280] sm:$0xff] }
 0x457   :  { %v7557_v52 = vld [vmem:[%s9368_s1 + $0x258] sm:$0xff]  ;;  %v7570_v22 = vld [vmem:[%s9368_s1 + $0x268] sm:$0xff]  ;;  %v7576_v15 = vld [vmem:[%s9368_s1 + $0x240] sm:$0xff] }
 0x458   :  { %10309 = vst [vmem:[#allocation45_spill] sm:$0xff] %v7576_v15  ;;  %v7589_v7 = vld [vmem:[%s9368_s1 + $0x250] sm:$0xff] }
 0x45a   :  { %v3229_v25 = vpop.eup %3228 }
 0x45b   :  { %v1620_v23 = vmul.f32 %v3229_v25, %v1619_v57  ;;  %v7595_v57 = vld [vmem:[%s9368_s1 + $0x228] sm:$0xff]  ;;  %v7608_v25 = vld [vmem:[%s9368_s1 + $0x238] sm:$0xff] }
 0x45c   :  { %v3231_v49 = vpop.eup %3230  ;;  %10311 = vst [vmem:[#allocation49_spill] sm:$0xff] %v7595_v57 }
 0x45d   :  { %v1740_v36 = vmul.f32 %v3231_v49, %v1739_v17  ;;  %v7378_v61 = vadd.f32 %v1621_v53, %v1620_v23  ;;  %v7614_v17 = vld [vmem:[%s9368_s1 + $0x210] sm:$0xff]  ;;  %v7627_v23 = vld [vmem:[%s9368_s1 + $0x220] sm:$0xff]  ;;  %v7633_v53 = vld [vmem:[%s9368_s1 + $0x1f8] sm:$0xff] }
 0x45e   :  { %10313 = vst [vmem:[#allocation37_spill] sm:$0xff] %v7614_v17  ;;  %v7646_v49 = vld [vmem:[%s9368_s1 + $0x208] sm:$0xff] }
 0x45f   :  { %v7380_v21 = vadd.f32 %v1741_v40, %v1740_v36  ;;  %1819 = vmatmul.f32.vlgmr.msra.gmra.mxu3 %v7378_v61  ;;  %10315 = vst [vmem:[#allocation51_spill] sm:$0xff] %v7633_v53  ;;  %v7652_v36 = vld [vmem:[%s9368_s1 + $0x1e0] sm:$0xff]  ;;  %v7665_v40 = vld [vmem:[%s9368_s1 + $0x1f0] sm:$0xff] }
 0x460   :  { %2071 = vmatpush.msra.mxu3 %v7386_v60  ;;  %10317 = vst [vmem:[#allocation18_spill] sm:$0xff] %v7652_v36 }
 0x461   :  { %1759 = vmatmul.f32.vlgmr.msra.gmra.mxu0 %v7380_v21  ;;  %1779 = vmatmul.f32.vlgmr.msra.gmra.mxu1 %v7380_v21 }
 0x462   :  { %1799 = vmatmul.f32.vlgmr.msra.gmra.mxu2 %v7380_v21  ;;  %1963 = vmatpush.msra.mxu0 %v7395_v39 }
 0x463   :  { %2031 = vmatpush.msra.mxu1 %v7401_v2  ;;  %2051 = vmatpush.msra.mxu2 %v6980_v20  ;;  %v7427_v20 = vld [vmem:[%s9368_s1 + $0x178] sm:$0xff] }
 0x464   :  { %1964 = vmatpush.msra.mxu0 %v7408_v62  ;;  %2072 = vmatpush.msra.mxu3 %v7414_v41 }
 0x465   :  { %2032 = vmatpush.msra.mxu1 %v7420_v51  ;;  %2052 = vmatpush.msra.mxu2 %v6989_v35  ;;  %v7440_v35 = vld [vmem:[%s9368_s1 + $0x2e8] sm:$0xff] }
 0x466   :  { %1965 = vmatpush.msra.mxu0 %v7427_v20  ;;  %2073 = vmatpush.msra.mxu3 %v7433_v16 }
 0x467   :  { %1959 = vmatmul.f32.vlgmr.msrb.gmra.mxu3 %v7380_v21  ;;  %2033 = vmatpush.msra.mxu1 %v7440_v35 }
 0x468   :  { %1966 = vmatpush.msra.mxu0 %v7446_v58  ;;  %2053 = vmatpush.msra.mxu2 %v6998_v50  ;;  %v7469_v50 = vld [vmem:[%s9368_s1 + $0x130] sm:$0xff] }
 0x469   :  { %1839 = vmatmul.f32.vlgmr.msrb.gmra.mxu0 %v7378_v61  ;;  %1859 = vmatmul.f32.vlgmr.msrb.gmra.mxu1 %v7378_v61 }
 0x46a   :  { %1939 = vmatmul.f32.vlgmr.msrb.gmra.mxu2 %v7380_v21  ;;  %1967 = vmatpush.msra.mxu0 %v7456_v54 }
 0x46b   :  { %2034 = vmatpush.msra.mxu1 %v7462_v37  ;;  %2054 = vmatpush.msra.mxu2 %v7011_v11  ;;  %v7488_v11 = vld [vmem:[%s9368_s1 + $0x118] sm:$0xff] }
 0x46c   :  { %1968 = vmatpush.msra.mxu0 %v7469_v50  ;;  %2074 = vmatpush.msra.mxu3 %v7475_v59 }
 0x46d   :  { %2035 = vmatpush.msra.mxu1 %v7481_v38  ;;  %2055 = vmatpush.msra.mxu2 %v7020_v26  ;;  %v7507_v26 = vld [vmem:[%s9368_s1 + $0x100] sm:$0xff] }
 0x46e   :  { %1969 = vmatpush.msra.mxu0 %v7488_v11  ;;  %2075 = vmatpush.msra.mxu3 %v7494_v13 }
 0x46f   :  { %2036 = vmatpush.msra.mxu1 %v7500_v27  ;;  %2056 = vmatpush.msra.mxu2 %v7029_v31  ;;  %v7526_v31 = vld [vmem:[%s9368_s1 + $0xe8] sm:$0xff] }
 0x470   :  { %1970 = vmatpush.msra.mxu0 %v7507_v26  ;;  %2076 = vmatpush.msra.mxu3 %v7513_v18 }
 0x471   :  { %2037 = vmatpush.msra.mxu1 %v7519_v10  ;;  %2057 = vmatpush.msra.mxu2 %v7038_v24  ;;  %v7545_v24 = vld [vmem:[%s9368_s1 + $0xd0] sm:$0xff] }
 0x472   :  { %1971 = vmatpush.msra.mxu0 %v7526_v31  ;;  %2077 = vmatpush.msra.mxu3 %v7532_v0 }
 0x473   :  { %2038 = vmatpush.msra.mxu1 %v7538_v29  ;;  %2058 = vmatpush.msra.mxu2 %v7047_v47  ;;  %v7564_v47 = vld [vmem:[%s9368_s1 + $0xb8] sm:$0xff] }
 0x474   :  { %1972 = vmatpush.msra.mxu0 %v7545_v24  ;;  %2078 = vmatpush.msra.mxu3 %v7551_v12  ;;  %10308 = vst [vmem:[#allocation23_spill] sm:$0xff] %v7564_v47 }
 0x475   :  { %2039 = vmatpush.msra.mxu1 %v7557_v52  ;;  %2059 = vmatpush.msra.mxu2 %v7056_v48  ;;  %v7583_v48 = vld [vmem:[%s9368_s1 + $0xa0] sm:$0xff] }
 0x476   :  { %1973 = vmatpush.msra.mxu0 %v7564_v47  ;;  %2079 = vmatpush.msra.mxu3 %v7570_v22  ;;  %10310 = vst [vmem:[#allocation53_spill] sm:$0xff] %v7583_v48 }
 0x477   :  { %2040 = vmatpush.msra.mxu1 %v7576_v15  ;;  %2060 = vmatpush.msra.mxu2 %v7065_v5  ;;  %v7602_v5 = vld [vmem:[%s9368_s1 + $0x88] sm:$0xff] }
 0x478   :  { %1974 = vmatpush.msra.mxu0 %v7583_v48  ;;  %2080 = vmatpush.msra.mxu3 %v7589_v7  ;;  %10312 = vst [vmem:[#allocation25_spill] sm:$0xff] %v7602_v5 }
 0x479   :  { %2041 = vmatpush.msra.mxu1 %v7595_v57  ;;  %2061 = vmatpush.msra.mxu2 %v7074_v19  ;;  %v7621_v19 = vld [vmem:[%s9368_s1 + $0x70] sm:$0xff] }
 0x47a   :  { %1975 = vmatpush.msra.mxu0 %v7602_v5  ;;  %2081 = vmatpush.msra.mxu3 %v7608_v25  ;;  %10314 = vst [vmem:[#allocation59_spill] sm:$0xff] %v7621_v19 }
 0x47b   :  { %2042 = vmatpush.msra.mxu1 %v7614_v17  ;;  %2062 = vmatpush.msra.mxu2 %v7083_v30  ;;  %v7640_v30 = vld [vmem:[%s9368_s1 + $0x58] sm:$0xff] }
 0x47c   :  { %1976 = vmatpush.msra.mxu0 %v7621_v19  ;;  %2082 = vmatpush.msra.mxu3 %v7627_v23  ;;  %10316 = vst [vmem:[#allocation13_spill] sm:$0xff] %v7640_v30 }
 0x47d   :  { %2043 = vmatpush.msra.mxu1 %v7633_v53  ;;  %2063 = vmatpush.msra.mxu2 %v7092_v44  ;;  %v7659_v44 = vld [vmem:[%s9368_s1 + $0x40] sm:$0xff] }
 0x47e   :  { %1977 = vmatpush.msra.mxu0 %v7640_v30  ;;  %2083 = vmatpush.msra.mxu3 %v7646_v49  ;;  %10318 = vst [vmem:[#allocation80_spill] sm:$0xff] %v7659_v44 }
 0x47f   :  { %2044 = vmatpush.msra.mxu1 %v7652_v36  ;;  %2064 = vmatpush.msra.mxu2 %v7101_v3  ;;  %v7672_v3 = vld [vmem:[%s9368_s1 + $0x1c8] sm:$0xff]  ;;  %v7685_v36 = vld [vmem:[%s9368_s1 + $0x1b0] sm:$0xff] }
 0x480   :  { %1978 = vmatpush.msra.mxu0 %v7659_v44  ;;  %2084 = vmatpush.msra.mxu3 %v7665_v40  ;;  %10319 = vst [vmem:[#allocation57_spill] sm:$0xff] %v7672_v3  ;;  %v7678_v44 = vld [vmem:[%s9368_s1 + $0x498] sm:$0xff] }
 0x481   :  { %1979 = vmatmul.f32.vlgmr.msra.gmra.mxu0 %v7380_v21  ;;  %2045 = vmatpush.msra.mxu1 %v7672_v3  ;;  %10320 = vst [vmem:[#allocation39_spill] sm:$0xff] %v7678_v44  ;;  %v7691_v3 = vld [vmem:[%s9368_s1 + $0x1d8] sm:$0xff] }
 0x482   :  { %2091 = vmatpush.msrb.mxu0 %v7678_v44  ;;  %2065 = vmatpush.msra.mxu2 %v7112_v63  ;;  %10321 = vst [vmem:[#allocation55_spill] sm:$0xff] %v7685_v36  ;;  %v7697_v44 = vld [vmem:[%s9368_s1 + $0x480] sm:$0xff] }
 0x483   :  { %2046 = vmatpush.msra.mxu1 %v7685_v36  ;;  %2085 = vmatpush.msra.mxu3 %v7691_v3  ;;  %10322 = vst [vmem:[#allocation16_spill] sm:$0xff] %v7697_v44  ;;  %v7703_v63 = vld [vmem:[%s9368_s1 + $0x4a0] sm:$0xff] }
 0x484   :  { %2092 = vmatpush.msrb.mxu0 %v7697_v44  ;;  %10323 = vst [vmem:[#allocation41_spill] sm:$0xff] %v7703_v63  ;;  %2066 = vmatpush.msra.mxu2 %v7122_v6  ;;  %v7710_v36 = vld [vmem:[%s9368_s1 + $0x1c0] sm:$0xff]  ;;  %v7716_v44 = vld [vmem:[%s9368_s1 + $0x468] sm:$0xff]  ;;  %v7729_v6 = vld [vmem:[%s9368_s1 + $0x198] sm:$0xff] }
 0x485   :  { %2111 = vmatpush.msrb.mxu1 %v7703_v63  ;;  %10324 = vst [vmem:[#allocation32_spill] sm:$0xff] %v7710_v36  ;;  %2086 = vmatpush.msra.mxu3 %v7710_v36  ;;  %v7722_v63 = vld [vmem:[%s9368_s1 + $0x488] sm:$0xff] }
 0x486   :  { %10325 = vst [vmem:[#allocation19_spill] sm:$0xff] %v7716_v44  ;;  %2093 = vmatpush.msrb.mxu0 %v7716_v44  ;;  %2131 = vmatpush.msrb.mxu2 %v7131_v8  ;;  %v7735_v44 = vld [vmem:[%s9368_s1 + $0x450] sm:$0xff]  ;;  %v7748_v8 = vld [vmem:[%s9368_s1 + $0x180] sm:$0xff] }
 0x487   :  { %10326 = vst [vmem:[#allocation43_spill] sm:$0xff] %v7722_v63  ;;  %2112 = vmatpush.msrb.mxu1 %v7722_v63  ;;  %2211 = vmatpush.msrb.mxu3 %v7729_v6  ;;  %v7741_v63 = vld [vmem:[%s9368_s1 + $0x470] sm:$0xff] }
 0x488   :  { %10327 = vst [vmem:[#allocation34_spill] sm:$0xff] %v7729_v6  ;;  %2094 = vmatpush.msrb.mxu0 %v7735_v44  ;;  %2132 = vmatpush.msrb.mxu2 %v7140_v42  ;;  %v7767_v42 = vld [vmem:[%s9368_s1 + $0x168] sm:$0xff] }
 0x489   :  { %10328 = vst [vmem:[#allocation63_spill] sm:$0xff] %v7735_v44  ;;  %2113 = vmatpush.msrb.mxu1 %v7741_v63  ;;  %2212 = vmatpush.msrb.mxu3 %v7748_v8  ;;  %v7754_v44 = vld [vmem:[%s9368_s1 + $0x438] sm:$0xff] }
 0x48a   :  { %10329 = vst [vmem:[#allocation24_spill] sm:$0xff] %v7741_v63  ;;  %2095 = vmatpush.msrb.mxu0 %v7754_v44  ;;  %v7760_v63 = vld [vmem:[%s9368_s1 + $0x458] sm:$0xff]  ;;  %2133 = vmatpush.msrb.mxu2 %v7149_v32  ;;  %v7786_v32 = vld [vmem:[%s9368_s1 + $0x150] sm:$0xff] }
 0x48b   :  { %10330 = vst [vmem:[#allocation36_spill] sm:$0xff] %v7748_v8  ;;  %2114 = vmatpush.msrb.mxu1 %v7760_v63  ;;  %2213 = vmatpush.msrb.mxu3 %v7767_v42 }
 0x48c   :  { %10331 = vst [vmem:[#allocation40_spill] sm:$0xff] %v7754_v44  ;;  %v7773_v44 = vld [vmem:[%s9368_s1 + $0x420] sm:$0xff]  ;;  %2134 = vmatpush.msrb.mxu2 %v7158_v33  ;;  %v7805_v33 = vld [vmem:[%s9368_s1 + $0x138] sm:$0xff] }
 0x48d   :  { %10332 = vst [vmem:[#allocation28_spill] sm:$0xff] %v7760_v63  ;;  %2096 = vmatpush.msrb.mxu0 %v7773_v44  ;;  %v7779_v63 = vld [vmem:[%s9368_s1 + $0x440] sm:$0xff]  ;;  %2214 = vmatpush.msrb.mxu3 %v7786_v32 }
 0x48e   :  { %10333 = vst [vmem:[#allocation65_spill] sm:$0xff] %v7767_v42  ;;  %2115 = vmatpush.msrb.mxu1 %v7779_v63  ;;  %2135 = vmatpush.msrb.mxu2 %v7167_v46  ;;  %v7824_v46 = vld [vmem:[%s9368_s1 + $0x120] sm:$0xff]  ;;  %v10390_v42 = vld [vmem:[#allocation60_spill] sm:$0xff] }
 0x48f   :  { %10334 = vst [vmem:[#allocation70_spill] sm:$0xff] %v7773_v44  ;;  %v7792_v44 = vld [vmem:[%s9368_s1 + $0x408] sm:$0xff]  ;;  %2215 = vmatpush.msrb.mxu3 %v7805_v33 }
 0x490   :  { %10335 = vst [vmem:[#allocation38_spill] sm:$0xff] %v7779_v63  ;;  %2097 = vmatpush.msrb.mxu0 %v7792_v44  ;;  %v7798_v63 = vld [vmem:[%s9368_s1 + $0x428] sm:$0xff]  ;;  %2136 = vmatpush.msrb.mxu2 %v7176_v9 }
 0x491   :  { %10336 = vst [vmem:[#allocation42_spill] sm:$0xff] %v7786_v32  ;;  %2116 = vmatpush.msrb.mxu1 %v7798_v63  ;;  %2216 = vmatpush.msrb.mxu3 %v7824_v46  ;;  %v7843_v9 = vld [vmem:[%s9368_s1 + $0x108] sm:$0xff] }
 0x492   :  { %10337 = vst [vmem:[#allocation46_spill] sm:$0xff] %v7792_v44  ;;  %v7811_v44 = vld [vmem:[%s9368_s1 + $0x3f0] sm:$0xff]  ;;  %2137 = vmatpush.msrb.mxu2 %v7185_v43 }
 0x493   :  { %10338 = vst [vmem:[#allocation69_spill] sm:$0xff] %v7798_v63  ;;  %2098 = vmatpush.msrb.mxu0 %v7811_v44  ;;  %v7817_v63 = vld [vmem:[%s9368_s1 + $0x410] sm:$0xff]  ;;  %2217 = vmatpush.msrb.mxu3 %v7843_v9 }
 0x494   :  { %10339 = vst [vmem:[#allocation71_spill] sm:$0xff] %v7805_v33  ;;  %2117 = vmatpush.msrb.mxu1 %v7817_v63  ;;  %2138 = vmatpush.msrb.mxu2 %v7194_v55  ;;  %v7862_v43 = vld [vmem:[%s9368_s1 + $0xf0] sm:$0xff]  ;;  %v7881_v55 = vld [vmem:[%s9368_s1 + $0xd8] sm:$0xff] }
 0x495   :  { %10340 = vst [vmem:[#allocation73_spill] sm:$0xff] %v7811_v44  ;;  %v7830_v44 = vld [vmem:[%s9368_s1 + $0x3d8] sm:$0xff]  ;;  %2218 = vmatpush.msrb.mxu3 %v7862_v43 }
 0x496   :  { %10341 = vst [vmem:[#allocation44_spill] sm:$0xff] %v7817_v63  ;;  %2099 = vmatpush.msrb.mxu0 %v7830_v44  ;;  %v7836_v63 = vld [vmem:[%s9368_s1 + $0x3f8] sm:$0xff]  ;;  %2139 = vmatpush.msrb.mxu2 %v7203_v1  ;;  %v7900_v1 = vld [vmem:[%s9368_s1 + $0xc0] sm:$0xff] }
 0x497   :  { %10342 = vst [vmem:[#allocation48_spill] sm:$0xff] %v7824_v46  ;;  %2118 = vmatpush.msrb.mxu1 %v7836_v63  ;;  %2219 = vmatpush.msrb.mxu3 %v7881_v55 }
 0x498   :  { %10343 = vst [vmem:[#allocation52_spill] sm:$0xff] %v7830_v44  ;;  %v7849_v44 = vld [vmem:[%s9368_s1 + $0x3c0] sm:$0xff]  ;;  %2140 = vmatpush.msrb.mxu2 %v7212_v45  ;;  %v7919_v45 = vld [vmem:[%s9368_s1 + $0xa8] sm:$0xff] }
 0x499   :  { %10344 = vst [vmem:[#allocation72_spill] sm:$0xff] %v7836_v63  ;;  %2100 = vmatpush.msrb.mxu0 %v7849_v44  ;;  %v7855_v63 = vld [vmem:[%s9368_s1 + $0x3e0] sm:$0xff]  ;;  %2220 = vmatpush.msrb.mxu3 %v7900_v1 }
 0x49a   :  { %10345 = vst [vmem:[#allocation74_spill] sm:$0xff] %v7843_v9  ;;  %2119 = vmatpush.msrb.mxu1 %v7855_v63  ;;  %2141 = vmatpush.msrb.mxu2 %v7221_v4  ;;  %v7933_v4 = vld [vmem:[%s9368_s1 + $0x90] sm:$0xff] }
 0x49b   :  { %10346 = vst [vmem:[#allocation7_spill] sm:$0xff] %v7849_v44  ;;  %v7868_v44 = vld [vmem:[%s9368_s1 + $0x3a8] sm:$0xff]  ;;  %2221 = vmatpush.msrb.mxu3 %v7919_v45  ;;  %v10389_v9 = vld [vmem:[#allocation68_spill] sm:$0xff] }
 0x49c   :  { %10347 = vst [vmem:[#allocation50_spill] sm:$0xff] %v7855_v63  ;;  %2101 = vmatpush.msrb.mxu0 %v7868_v44  ;;  %v7874_v63 = vld [vmem:[%s9368_s1 + $0x3c8] sm:$0xff]  ;;  %2142 = vmatpush.msrb.mxu2 %v7235_v56  ;;  %v7953_v56 = vld [vmem:[%s9368_s1 + $0x330] sm:$0xff] }
 0x49d   :  { %10348 = vst [vmem:[#allocation56_spill] sm:$0xff] %v7862_v43  ;;  %2120 = vmatpush.msrb.mxu1 %v7874_v63  ;;  %2222 = vmatpush.msrb.mxu3 %v7933_v4 }
 0x49e   :  { %10349 = vst [vmem:[#allocation3_spill] sm:$0xff] %v7868_v44  ;;  %v7887_v44 = vld [vmem:[%s9368_s1 + $0x390] sm:$0xff]  ;;  %2143 = vmatpush.msrb.mxu2 %v7249_v28  ;;  %v10366_v28 = vld [vmem:[#allocation33_spill] sm:$0xff] }
 0x49f   :  { %10350 = vst [vmem:[#allocation75_spill] sm:$0xff] %v7874_v63  ;;  %2102 = vmatpush.msrb.mxu0 %v7887_v44  ;;  %v7893_v63 = vld [vmem:[%s9368_s1 + $0x3b0] sm:$0xff] }
 0x4a0   :  { %10351 = vst [vmem:[#allocation11_spill] sm:$0xff] %v7881_v55  ;;  %2121 = vmatpush.msrb.mxu1 %v7893_v63  ;;  %v10388_v55 = vld [vmem:[#allocation61_spill] sm:$0xff] }
 0x4a1   :  { %10352 = vst [vmem:[#allocation14_spill] sm:$0xff] %v7887_v44  ;;  %v7906_v44 = vld [vmem:[%s9368_s1 + $0x378] sm:$0xff] }
 0x4a2   :  { %10353 = vst [vmem:[#allocation76_spill] sm:$0xff] %v7893_v63  ;;  %2103 = vmatpush.msrb.mxu0 %v7906_v44  ;;  %v7912_v63 = vld [vmem:[%s9368_s1 + $0x398] sm:$0xff] }
 0x4a3   :  { %10354 = vst [vmem:[#allocation17_spill] sm:$0xff] %v7900_v1  ;;  %2122 = vmatpush.msrb.mxu1 %v7912_v63  ;;  %v8041_v1 = vpop.permute.xlu0 %1914 }
 0x4a4   :  { %10355 = vst [vmem:[#allocation77_spill] sm:$0xff] %v7906_v44  ;;  %v7925_v44 = vld [vmem:[%s9368_s1 + $0x360] sm:$0xff]  ;;  %v1918_v43 = vmul.f32 %v8041_v1, %v10388_v55 }
 0x4a5   :  { %10356 = vst [vmem:[#allocation20_spill] sm:$0xff] %v7912_v63  ;;  %2104 = vmatpush.msrb.mxu0 %v7925_v44  ;;  %2123 = vmatpush.msrb.mxu1 %v7229_v34  ;;  %v7939_v63 = vld [vmem:[%s9368_s1 + $0x348] sm:$0xff]  ;;  %v7947_v34 = vld [vmem:[%s9368_s1 + $0x78] sm:$0xff] }
 0x4a6   :  { %10357 = vst [vmem:[#allocation4_spill] sm:$0xff] %v7919_v45  ;;  %2223 = vmatpush.msrb.mxu3 %v7947_v34  ;;  %v10369_v45 = vld [vmem:[#allocation30_spill] sm:$0xff] }
 0x4a7   :  { %10358 = vst [vmem:[#allocation78_spill] sm:$0xff] %v7925_v44  ;;  %2105 = vmatpush.msrb.mxu0 %v7939_v63  ;;  %2124 = vmatpush.msrb.mxu1 %v7243_v14  ;;  %v10363_v44 = vld [vmem:[#allocation64_spill] sm:$0xff]  ;;  %v10365_v14 = vld [vmem:[#allocation47_spill] sm:$0xff] }
 0x4a8   :  { %10359 = vst [vmem:[#allocation5_spill] sm:$0xff] %v7933_v4  ;;  %2144 = vmatpush.msrb.mxu2 %v10365_v14  ;;  %v7963_v4 = vld [vmem:[%s9368_s1 + $0x60] sm:$0xff]  ;;  %v10372_v14 = vld [vmem:[#allocation21_spill] sm:$0xff] }
 0x4a9   :  { %10360 = vst [vmem:[#allocation54_spill] sm:$0xff] %v7939_v63  ;;  %2106 = vmatpush.msrb.mxu0 %v7953_v56  ;;  %2125 = vmatpush.msrb.mxu1 %v10363_v44  ;;  %v10364_v63 = vld [vmem:[#allocation8_spill] sm:$0xff]  ;;  %v7971_v44 = vld [vmem:[%s9368_s1 + $0x48] sm:$0xff] }
 0x4aa   :  { %10361 = vst [vmem:[#allocation9_spill] sm:$0xff] %v7947_v34  ;;  %2224 = vmatpush.msrb.mxu3 %v7963_v4  ;;  %v10368_v34 = vld [vmem:[#allocation12_spill] sm:$0xff]  ;;  %2145 = vmatpush.msrb.mxu2 %v10369_v45  ;;  %v10375_v45 = vld [vmem:[#allocation35_spill] sm:$0xff] }
 0x4ab   :  { %10362 = vst [vmem:[#allocation27_spill] sm:$0xff] %v7953_v56  ;;  %2231 = vmatpush.msra.mxu0 %v10364_v63  ;;  %2126 = vmatpush.msrb.mxu1 %v10366_v28  ;;  %v10371_v63 = vld [vmem:[#allocation26_spill] sm:$0xff]  ;;  %v7979_v28 = vld [vmem:[%s9368_s1 + $0x30] sm:$0xff] }
 0x4ac   :  { %10367 = vst [vmem:[#allocation84_spill] sm:$0xff] %v7963_v4  ;;  %2225 = vmatpush.msrb.mxu3 %v7971_v44  ;;  %2146 = vmatpush.msrb.mxu2 %v10372_v14  ;;  %v10376_v56 = vld [vmem:[#allocation22_spill] sm:$0xff] }
 0x4ad   :  { %2232 = vmatpush.msra.mxu0 %v10368_v34  ;;  %10370 = vst [vmem:[#allocation79_spill] sm:$0xff] %v7971_v44  ;;  %v10374_v34 = vld [vmem:[#allocation81_spill] sm:$0xff]  ;;  %v10377_v4 = vld [vmem:[#allocation58_spill] sm:$0xff] }
 0x4ae   :  { %10373 = vst [vmem:[#allocation62_spill] sm:$0xff] %v7979_v28  ;;  %2226 = vmatpush.msrb.mxu3 %v7979_v28  ;;  %v7995_v14 = vld [vmem:[%s9368_s1 + $0xe0] sm:$0xff] }
 0x4af   :  { %2233 = vmatpush.msra.mxu0 %v10371_v63  ;;  %v7989_v63 = vld [vmem:[%s9368_s1 + $0xf8] sm:$0xff]  ;;  %10379 = vst [vmem:[#allocation6_spill] sm:$0xff] %v7995_v14 }
 0x4b0   :  { %10378 = vst [vmem:[#allocation2_spill] sm:$0xff] %v7989_v63 }
 0x4b1   :  { %2234 = vmatpush.msra.mxu0 %v10374_v34  ;;  %v8013_v34 = vld [vmem:[%s9368_s1 + $0x98] sm:$0xff] }
 0x4b2   :  { %10382 = vst [vmem:[#allocation86_spill] sm:$0xff] %v8013_v34 }
 0x4b3   :  { %2235 = vmatpush.msra.mxu0 %v10375_v45  ;;  %v8019_v45 = vld [vmem:[%s9368_s1 + $0x80] sm:$0xff] }
 0x4b4   :  { %10383 = vst [vmem:[#allocation64_spill] sm:$0xff] %v8019_v45 }
 0x4b5   :  { %2236 = vmatpush.msra.mxu0 %v10376_v56  ;;  %v8001_v56 = vld [vmem:[%s9368_s1 + $0xc8] sm:$0xff] }
 0x4b6   :  { %10380 = vst [vmem:[#allocation85_spill] sm:$0xff] %v8001_v56 }
 0x4b7   :  { %2237 = vmatpush.msra.mxu0 %v10377_v4  ;;  %v8007_v4 = vld [vmem:[%s9368_s1 + $0xb0] sm:$0xff] }
 0x4b8   :  { %10381 = vst [vmem:[#allocation29_spill] sm:$0xff] %v8007_v4 }
 0x4b9   :  { %2238 = vmatpush.msra.mxu0 %v7989_v63 }
 0x4bb   :  { %2239 = vmatpush.msra.mxu0 %v7995_v14  ;;  %v10387_v14 = vld [vmem:[#allocation31_spill] sm:$0xff] }
 0x4bd   :  { %2240 = vmatpush.msra.mxu0 %v8001_v56  ;;  %v8025_v56 = vld [vmem:[%s9368_s1 + $0x68] sm:$0xff] }
 0x4be   :  { %10384 = vst [vmem:[#allocation8_spill] sm:$0xff] %v8025_v56 }
 0x4bf   :  { %2241 = vmatpush.msra.mxu0 %v8007_v4  ;;  %v8031_v4 = vld [vmem:[%s9368_s1 + $0x50] sm:$0xff] }
 0x4c0   :  { %10385 = vst [vmem:[#allocation47_spill] sm:$0xff] %v8031_v4 }
 0x4c1   :  { %2242 = vmatpush.msra.mxu0 %v8013_v34  ;;  %v8037_v34 = vld [vmem:[%s9368_s1 + $0x38] sm:$0xff] }
 0x4c2   :  { %10386 = vst [vmem:[#allocation33_spill] sm:$0xff] %v8037_v34 }
 0x4c3   :  { %2243 = vmatpush.msra.mxu0 %v8019_v45 }
 0x4c5   :  { %2244 = vmatpush.msra.mxu0 %v8025_v56 }
 0x4c7   :  { %2245 = vmatpush.msra.mxu0 %v8031_v4 }
 0x4c9   :  { %2246 = vmatpush.msra.mxu0 %v8037_v34  ;;  %v1917_v34 = vmul.f32 %v8041_v1, %v10390_v42 }
 0x4de   :  { %v1760_v45 = vpop.f32.mrf.mxu0  ;;  %v1780_v28 = vpop.f32.mrf.mxu1 }
 0x4df   :  { %v1761_v63 = vadd.f32 %v1760_v45, %v10387_v14  ;;  %v1781_v4 = vadd.f32 %v1780_v28, %v10389_v9  ;;  %v10391_v45 = vld [vmem:[#allocation67_spill] sm:$0xff] }
 0x4e0   :  { %v1921_v14 = vadd.f32 %v1918_v43, %v10391_v45 }
 0x4e2   :  { %v1820_v44 = vpop.f32.mrf.mxu3 }
 0x4e3   :  { %v1863_v56 = vadd.f32 %v1820_v44, %v1761_v63  ;;  %v10392_v63 = vld [vmem:[#allocation66_spill] sm:$0xff] }
 0x4e4   :  { %v1920_v8 = vadd.f32 %v1917_v34, %v10392_v63 }
 0x4e5   :  { %v3099_v46 = vmul.f32 -1.442695, %v1863_v56  ;;  %v1800_v33 = vpop.f32.mrf.mxu2 }
 0x4e6   :  { %v1840_v32 = vpop.f32.mrf.mxu0 }
 0x4e7   :  { %3232 = vpow2.f32 %v3099_v46  ;;  %v1883_v30 = vadd.f32 %v1840_v32, %v1781_v4 }
 0x4e9   :  { %v3100_v53 = vmul.f32 -1.442695, %v1883_v30 }
 0x4ea   :  { %v1960_v19 = vpop.f32.mrf.mxu3 }
 0x4eb   :  { %3234 = vpow2.f32 %v3100_v53  ;;  %v2003_v44 = vadd.f32 %v1960_v19, %v1921_v14 }
 0x4ed   :  { %v3233_v17 = vpop.eup %3232  ;;  %v3102_v55 = vmul.f32 -1.442695, %v2003_v44  ;;  %v1940_v5 = vpop.f32.mrf.mxu2 }
 0x4ee   :  { %v1867_v28 = vadd.f32 1.0, %v3233_v17  ;;  %v1983_v56 = vadd.f32 %v1940_v5, %v1920_v8 }
 0x4ef   :  { %3236 = vpow2.f32 %v3102_v55 }
 0x4f0   :  { %3238 = vrcp.f32 %v1867_v28  ;;  %v3101_v32 = vmul.f32 -1.442695, %v1983_v56  ;;  %v1879_v44 = vand.u32 2147483648, %v1867_v28  ;;  %v1877_v55 = vand.u32 2147483647, %v1867_v28  ;;  %v1860_v56 = vpop.f32.mrf.mxu1 }
 0x4f1   :  { %v3235_v46 = vpop.eup %3234  ;;  %vm1873_vm9 = vweird.f32 %v1867_v28 }
 0x4f2   :  { %v1887_v4 = vadd.f32 1.0, %v3235_v46  ;;  %3240 = vpow2.f32 %v3101_v32  ;;  %vm1878_vm11 = vcmp.eq.f32.partialorder %v1877_v55, 8.507059e+37 }
 0x4f4   :  { %3242 = vrcp.f32 %v1887_v4  ;;  %vm1893_vm13 = vweird.f32 %v1887_v4  ;;  %v1897_v15 = vand.u32 2147483647, %v1887_v4 }
 0x4f5   :  { %v3237_v30 = vpop.eup %3236 }
 0x4f6   :  { %v3239_v42 = vpop.eup %3238  ;;  %v8050_v43 = vadd.f32 1.0, %v3237_v30  ;;  %v1880_v30 = vor.u32 1.1754944e-38, %v1879_v44  ;;  %vm1898_vm15 = vcmp.eq.f32.partialorder %v1897_v15, 8.507059e+37  ;;  %v8066_v15 = vld [vmem:[%s9368_s1 + $0x2] ss:$0 sm:$0xff] }
 0x4f7   :  { %v1869_v53 = vmul.f32 %v3239_v42, %v1867_v28  ;;  %vm1874_vm8 = vweird.f32 %v3239_v42 }
 0x4f8   :  { %3244 = vrcp.f32 %v8050_v43  ;;  %v3241_v19 = vpop.eup %3240  ;;  %vm1875_vm10 = vmor %vm1873_vm9, %vm1874_vm8  ;;  %vm2013_vm5 = vweird.f32 %v8050_v43 }
 0x4f9   :  { %v1870_v14 = vsub.f32 1.0, %v1869_v53  ;;  %v1987_v17 = vadd.f32 1.0, %v3241_v19  ;;  %v10393_v53 = vld [vmem:[#allocation15_spill] sm:$0xff] }
 0x4fa   :  { %v3243_v34 = vpop.eup %3242  ;;  %v1903_v6 = vadd.f32 %v10393_v53, %v1860_v56 }
 0x4fb   :  { %v1889_v5 = vmul.f32 %v3243_v34, %v1887_v4  ;;  %v1871_v8 = vmul.f32 %v3239_v42, %v1870_v14  ;;  %3246 = vrcp.f32 %v1987_v17  ;;  %vm1894_vm12 = vweird.f32 %v3243_v34  ;;  %v10394_v14 = vld [vmem:[#allocation10_spill] sm:$0xff] }
 0x4fc   :  { %v1801_v48 = vadd.f32 %v1800_v33, %v10394_v14  ;;  %vm1895_vm14 = vmor %vm1893_vm13, %vm1894_vm12  ;;  %vm1993_vm1 = vweird.f32 %v1987_v17 }
 0x4fd   :  { %v1890_v46 = vsub.f32 1.0, %v1889_v5  ;;  %v1872_v32 = vadd.f32 %v3239_v42, %v1871_v8  ;;  %v1899_v8 = vand.u32 2147483648, %v1887_v4 }
 0x4fe   :  { %v8053_v63 = vpop.eup %3244 }
 0x4ff   :  { %v1891_v9 = vmul.f32 %v3243_v34, %v1890_v46  ;;  %v1876_v45 = vsel %vm1875_vm10, %v3239_v42, %v1872_v32  ;;  %v2009_v19 = vmul.f32 %v8053_v63, %v8050_v43  ;;  %v1999_v46 = vand.u32 2147483648, %v1987_v17 }
 0x500   :  { %v1881_v57 = vsel %vm1878_vm11, %v1880_v30, %v1876_v45  ;;  %v1900_v45 = vor.u32 1.1754944e-38, %v1899_v8  ;;  %v1997_v30 = vand.u32 2147483647, %v1987_v17  ;;  %vm2014_vm3 = vweird.f32 %v8053_v63 }
 0x501   :  { %v1904_v36 = vmul.f32 %v1903_v6, %v1881_v57  ;;  %v1892_v5 = vadd.f32 %v3243_v34, %v1891_v9  ;;  %v3247_v28 = vpop.eup %3246  ;;  %v2010_v42 = vsub.f32 1.0, %v2009_v19  ;;  %v1980_v6 = vpop.f32.mrf.mxu0  ;;  %v10395_v9 = vld [vmem:[#allocation82_spill] sm:$0xff]  ;;  %vm2015_vm6 = vmor %vm2013_vm5, %vm2014_vm3 }
 0x502   :  { %v1989_v44 = vmul.f32 %v3247_v28, %v1987_v17  ;;  %vm1994_vm0 = vweird.f32 %v3247_v28  ;;  %v1919_v4 = vmul.f32 %v8041_v1, %v10395_v9  ;;  %vm1998_vm4 = vcmp.eq.f32.partialorder %v1997_v30, 8.507059e+37 }
 0x503   :  { %v1905_v47 = vadd.f32 %v1904_v36, %v1801_v48  ;;  %v1896_v55 = vsel %vm1895_vm14, %v3243_v34, %v1892_v5  ;;  %v2011_v57 = vmul.f32 %v8053_v63, %v2010_v42  ;;  %vm1995_vm2 = vmor %vm1993_vm1, %vm1994_vm0  ;;  %v2000_v36 = vor.u32 1.1754944e-38, %v1999_v46 }
 0x504   :  { %v1990_v56 = vsub.f32 1.0, %v1989_v44  ;;  %v1901_v33 = vsel %vm1898_vm15, %v1900_v45, %v1896_v55  ;;  %v2023_v19 = vadd.f32 %v8066_v15, %v1980_v6  ;;  %v10396_v44 = vld [vmem:[#allocation83_spill] sm:$0xff]  ;;  %v2019_v55 = vand.u32 2147483648, %v8050_v43 }
 0x505   :  { %3248 = vtanh.f32 %v1905_v47  ;;  %v1907_v34 = vsub.f32 1.0, %v1901_v33  ;;  %v2012_v5 = vadd.f32 %v8053_v63, %v2011_v57  ;;  %v1909_v17 = vmul.f32 %v1901_v33, %v7378_v61 }
 0x506   :  { %v1991_v32 = vmul.f32 %v3247_v28, %v1990_v56  ;;  %v1922_v42 = vadd.f32 %v1919_v4, %v10396_v44  ;;  %v2020_v61 = vor.u32 1.1754944e-38, %v2019_v55  ;;  %v10416_v4 = vld [vmem:[#allocation41_spill] sm:$0xff]  ;;  %v10424_v55 = vld [vmem:[#allocation28_spill] sm:$0xff] }
 0x508   :  { %v1992_v48 = vadd.f32 %v3247_v28, %v1991_v32  ;;  %v2016_v32 = vsel %vm2015_vm6, %v8053_v63, %v2012_v5  ;;  %v8255_v5 = vld [vmem:[%s9368_s1 + $0x490] sm:$0xff] }
 0x50a   :  { %v1996_v53 = vsel %vm1995_vm2, %v3247_v28, %v1992_v48  ;;  %v2017_v28 = vand.u32 2147483647, %v8050_v43  ;;  %v8239_v48 = vld [vmem:[%s9368_s1 + $0x1b8] sm:$0xff] }
 0x50b   :  { %v3249_v47 = vpop.eup %3248  ;;  %v2001_v1 = vsel %vm1998_vm4, %v2000_v36, %v1996_v53  ;;  %v10417_v36 = vld [vmem:[#allocation16_spill] sm:$0xff]  ;;  %v10419_v53 = vld [vmem:[#allocation71_spill] sm:$0xff] }
 0x50c   :  { %v1908_v8 = vmul.f32 %v3249_v47, %v1907_v34  ;;  %v2024_v56 = vmul.f32 %v2023_v19, %v2001_v1  ;;  %vm2018_vm7 = vcmp.eq.f32.partialorder %v2017_v28, 8.507059e+37  ;;  %v8246_v34 = vld [vmem:[%s9368_s1 + $0x4a8] sm:$0xff]  ;;  %v10421_v1 = vld [vmem:[#allocation24_spill] sm:$0xff] }
 0x50d   :  { %v2021_v30 = vsel %vm2018_vm7, %v2020_v61, %v2016_v32  ;;  %v10418_v47 = vld [vmem:[#allocation43_spill] sm:$0xff]  ;;  %v10426_v28 = vld [vmem:[#allocation40_spill] sm:$0xff]  ;;  %v10427_v32 = vld [vmem:[#allocation38_spill] sm:$0xff] }
 0x50e   :  { %v8075_v45 = vadd.f32 %v1909_v17, %v1908_v8  ;;  %v2025_v46 = vadd.f32 %v2024_v56, %v1922_v42  ;;  %v2027_v43 = vsub.f32 1.0, %v2021_v30  ;;  %v2029_v6 = vmul.f32 %v2021_v30, %v7380_v21  ;;  %v8099_v21 = vld [vmem:[%s9368_s1 + $0x320] sm:$0xff]  ;;  %v10420_v19 = vld [vmem:[#allocation19_spill] sm:$0xff]  ;;  %v10422_v8 = vld [vmem:[#allocation48_spill] sm:$0xff] }
 0x50f   :  { %v10423_v17 = vld [vmem:[#allocation63_spill] sm:$0xff]  ;;  %v8264_v42 = vld [vmem:[%s9368_s1 + $0x478] sm:$0xff]  ;;  %v10425_v56 = vld [vmem:[#allocation74_spill] sm:$0xff] }
 0x510   :  { %2107 = vmatmul.f32.vlgmr.msrb.gmra.mxu0 %v8075_v45  ;;  %3250 = vtanh.f32 %v2025_v46  ;;  %v8273_v46 = vld [vmem:[%s9368_s1 + $0x460] sm:$0xff]  ;;  %v10428_v61 = vld [vmem:[#allocation56_spill] sm:$0xff] }
 0x511   :  { %2359 = vmatpush.msrb.mxu0 %v7386_v60  ;;  %v8108_v60 = vld [vmem:[%s9368_s1 + $0x308] sm:$0xff]  ;;  %v10429_v30 = vld [vmem:[#allocation70_spill] sm:$0xff] }
 0x513   :  { %2360 = vmatpush.msrb.mxu0 %v7414_v41  ;;  %v8148_v41 = vld [vmem:[%s9368_s1 + $0x2a8] sm:$0xff] }
 0x515   :  { %2361 = vmatpush.msrb.mxu0 %v7433_v16  ;;  %v8175_v16 = vld [vmem:[%s9368_s1 + $0x260] sm:$0xff] }
 0x516   :  { %v3251_v33 = vpop.eup %3250 }
 0x517   :  { %2362 = vmatpush.msrb.mxu0 %v7475_v59  ;;  %v2028_v57 = vmul.f32 %v3251_v33, %v2027_v43  ;;  %v10401_v59 = vld [vmem:[#allocation49_spill] sm:$0xff]  ;;  %v8282_v43 = vld [vmem:[%s9368_s1 + $0x448] sm:$0xff] }
 0x518   :  { %v10430_v33 = vld [vmem:[#allocation69_spill] sm:$0xff] }
 0x519   :  { %2363 = vmatpush.msrb.mxu0 %v7494_v13  ;;  %v8087_v63 = vadd.f32 %v2029_v6, %v2028_v57  ;;  %v10403_v13 = vld [vmem:[#allocation25_spill] sm:$0xff]  ;;  %v10431_v57 = vld [vmem:[#allocation11_spill] sm:$0xff]  ;;  %v10432_v6 = vld [vmem:[#allocation46_spill] sm:$0xff] }
 0x51b   :  { %2364 = vmatpush.msrb.mxu0 %v7513_v18  ;;  %2047 = vmatmul.f32.vlgmr.msra.gmra.mxu1 %v8087_v63  ;;  %v10405_v18 = vld [vmem:[#allocation36_spill] sm:$0xff] }
 0x51c   :  { %2067 = vmatmul.f32.vlgmr.msra.gmra.mxu2 %v8087_v63  ;;  %2087 = vmatmul.f32.vlgmr.msra.gmra.mxu3 %v8087_v63 }
 0x51d   :  { %2247 = vmatmul.f32.vlgmr.msra.gmra.mxu0 %v8087_v63  ;;  %2251 = vmatpush.msra.mxu1 %v7395_v39  ;;  %v8117_v39 = vld [vmem:[%s9368_s1 + $0x2f0] sm:$0xff] }
 0x51e   :  { %2319 = vmatpush.msra.mxu2 %v7401_v2  ;;  %2339 = vmatpush.msra.mxu3 %v8099_v21  ;;  %v8130_v2 = vld [vmem:[%s9368_s1 + $0x2d8] sm:$0xff] }
 0x51f   :  { %2365 = vmatpush.msrb.mxu0 %v7532_v0  ;;  %2252 = vmatpush.msra.mxu1 %v7408_v62  ;;  %v8139_v62 = vld [vmem:[%s9368_s1 + $0x2c0] sm:$0xff] }
 0x520   :  { %2320 = vmatpush.msra.mxu2 %v7420_v51  ;;  %2340 = vmatpush.msra.mxu3 %v8108_v60  ;;  %v8157_v51 = vld [vmem:[%s9368_s1 + $0x290] sm:$0xff] }
 0x521   :  { %2366 = vmatpush.msrb.mxu0 %v7551_v12  ;;  %2253 = vmatpush.msra.mxu1 %v7427_v20  ;;  %v8166_v20 = vld [vmem:[%s9368_s1 + $0x278] sm:$0xff] }
 0x522   :  { %2321 = vmatpush.msra.mxu2 %v7440_v35  ;;  %2341 = vmatpush.msra.mxu3 %v8117_v39  ;;  %v10397_v35 = vld [vmem:[#allocation23_spill] sm:$0xff]  ;;  %v10409_v12 = vld [vmem:[#allocation13_spill] sm:$0xff] }
 0x523   :  { %2367 = vmatpush.msrb.mxu0 %v7570_v22  ;;  %2254 = vmatpush.msra.mxu1 %v7446_v58  ;;  %v10398_v58 = vld [vmem:[#allocation45_spill] sm:$0xff]  ;;  %v8220_v22 = vld [vmem:[%s9368_s1 + $0x1e8] sm:$0xff] }
 0x524   :  { %2147 = vmatmul.f32.vlgmr.msrb.gmra.mxu2 %v8075_v45  ;;  %2127 = vmatmul.f32.vlgmr.msrb.gmra.mxu1 %v8075_v45 }
 0x525   :  { %2227 = vmatmul.f32.vlgmr.msrb.gmra.mxu3 %v8087_v63  ;;  %2255 = vmatpush.msra.mxu1 %v7456_v54  ;;  %v8184_v54 = vld [vmem:[%s9368_s1 + $0x248] sm:$0xff] }
 0x526   :  { %2322 = vmatpush.msra.mxu2 %v7462_v37  ;;  %2342 = vmatpush.msra.mxu3 %v8130_v2  ;;  %v10399_v37 = vld [vmem:[#allocation32_spill] sm:$0xff] }
 0x527   :  { %2368 = vmatpush.msrb.mxu0 %v7589_v7  ;;  %2256 = vmatpush.msra.mxu1 %v7469_v50  ;;  %v10400_v50 = vld [vmem:[#allocation53_spill] sm:$0xff]  ;;  %v10411_v7 = vld [vmem:[#allocation42_spill] sm:$0xff] }
 0x528   :  { %2323 = vmatpush.msra.mxu2 %v7481_v38  ;;  %2343 = vmatpush.msra.mxu3 %v8139_v62  ;;  %v8193_v38 = vld [vmem:[%s9368_s1 + $0x230] sm:$0xff] }
 0x529   :  { %2369 = vmatpush.msrb.mxu0 %v7608_v25  ;;  %2257 = vmatpush.msra.mxu1 %v7488_v11  ;;  %v10402_v11 = vld [vmem:[#allocation34_spill] sm:$0xff]  ;;  %v10412_v25 = vld [vmem:[#allocation80_spill] sm:$0xff] }
 0x52a   :  { %2324 = vmatpush.msra.mxu2 %v7500_v27  ;;  %2344 = vmatpush.msra.mxu3 %v8148_v41  ;;  %v10404_v27 = vld [vmem:[#allocation37_spill] sm:$0xff] }
 0x52b   :  { %2370 = vmatpush.msrb.mxu0 %v7627_v23  ;;  %2258 = vmatpush.msra.mxu1 %v7507_v26  ;;  %v8202_v26 = vld [vmem:[%s9368_s1 + $0x218] sm:$0xff] }
 0x52c   :  { %2325 = vmatpush.msra.mxu2 %v7519_v10  ;;  %2345 = vmatpush.msra.mxu3 %v8157_v51  ;;  %v10406_v10 = vld [vmem:[#allocation59_spill] sm:$0xff]  ;;  %v10413_v23 = vld [vmem:[#allocation57_spill] sm:$0xff] }
 0x52d   :  { %2371 = vmatpush.msrb.mxu0 %v7646_v49  ;;  %2259 = vmatpush.msra.mxu1 %v7526_v31  ;;  %v10407_v31 = vld [vmem:[#allocation51_spill] sm:$0xff]  ;;  %v8230_v49 = vld [vmem:[%s9368_s1 + $0x1d0] sm:$0xff] }
 0x52e   :  { %2326 = vmatpush.msra.mxu2 %v7538_v29  ;;  %2346 = vmatpush.msra.mxu3 %v8166_v20  ;;  %v8211_v29 = vld [vmem:[%s9368_s1 + $0x200] sm:$0xff] }
 0x52f   :  { %2372 = vmatpush.msrb.mxu0 %v7665_v40  ;;  %2260 = vmatpush.msra.mxu1 %v7545_v24  ;;  %v10408_v24 = vld [vmem:[#allocation65_spill] sm:$0xff]  ;;  %v10414_v40 = vld [vmem:[#allocation39_spill] sm:$0xff] }
 0x530   :  { %2327 = vmatpush.msra.mxu2 %v7557_v52  ;;  %2347 = vmatpush.msra.mxu3 %v8175_v16  ;;  %v10410_v52 = vld [vmem:[#allocation18_spill] sm:$0xff] }
 0x531   :  { %2373 = vmatpush.msrb.mxu0 %v7691_v3  ;;  %2261 = vmatpush.msra.mxu1 %v10397_v35  ;;  %v10415_v3 = vld [vmem:[#allocation55_spill] sm:$0xff]  ;;  %v8291_v35 = vld [vmem:[%s9368_s1 + $0x430] sm:$0xff] }
 0x532   :  { %2328 = vmatpush.msra.mxu2 %v10398_v58  ;;  %2348 = vmatpush.msra.mxu3 %v8184_v54  ;;  %v10433_v58 = vld [vmem:[#allocation44_spill] sm:$0xff] }
 0x533   :  { %2374 = vmatpush.msrb.mxu0 %v10399_v37  ;;  %2262 = vmatpush.msra.mxu1 %v10400_v50  ;;  %v10434_v37 = vld [vmem:[#allocation17_spill] sm:$0xff] }
 0x534   :  { %2329 = vmatpush.msra.mxu2 %v10401_v59  ;;  %2349 = vmatpush.msra.mxu3 %v8193_v38  ;;  %v10435_v50 = vld [vmem:[#allocation73_spill] sm:$0xff] }
 0x535   :  { %2499 = vmatpush.msra.mxu0 %v10402_v11  ;;  %2263 = vmatpush.msra.mxu1 %v10403_v13  ;;  %v8300_v59 = vld [vmem:[%s9368_s1 + $0x418] sm:$0xff]  ;;  %v10436_v11 = vld [vmem:[#allocation72_spill] sm:$0xff] }
 0x536   :  { %2330 = vmatpush.msra.mxu2 %v10404_v27  ;;  %2350 = vmatpush.msra.mxu3 %v8202_v26  ;;  %v10437_v13 = vld [vmem:[#allocation4_spill] sm:$0xff] }
 0x537   :  { %2500 = vmatpush.msra.mxu0 %v10405_v18  ;;  %2264 = vmatpush.msra.mxu1 %v10406_v10  ;;  %v10438_v27 = vld [vmem:[#allocation52_spill] sm:$0xff]  ;;  %v8309_v18 = vld [vmem:[%s9368_s1 + $0x400] sm:$0xff] }
 0x538   :  { %2331 = vmatpush.msra.mxu2 %v10407_v31  ;;  %2351 = vmatpush.msra.mxu3 %v8211_v29  ;;  %v10439_v10 = vld [vmem:[#allocation50_spill] sm:$0xff]  ;;  %v10440_v31 = vld [vmem:[#allocation5_spill] sm:$0xff] }
 0x539   :  { %2501 = vmatpush.msra.mxu0 %v10408_v24  ;;  %2265 = vmatpush.msra.mxu1 %v10409_v12  ;;  %v10441_v24 = vld [vmem:[#allocation7_spill] sm:$0xff] }
 0x53a   :  { %2332 = vmatpush.msra.mxu2 %v10410_v52  ;;  %2352 = vmatpush.msra.mxu3 %v8220_v22  ;;  %v8318_v12 = vld [vmem:[%s9368_s1 + $0x3e8] sm:$0xff] }
 0x53b   :  { %2502 = vmatpush.msra.mxu0 %v10411_v7  ;;  %2266 = vmatpush.msra.mxu1 %v10412_v25  ;;  %v10442_v52 = vld [vmem:[#allocation75_spill] sm:$0xff]  ;;  %v10443_v7 = vld [vmem:[#allocation9_spill] sm:$0xff] }
 0x53c   :  { %2333 = vmatpush.msra.mxu2 %v10413_v23  ;;  %2267 = vmatmul.f32.vlgmr.msra.gmra.mxu1 %v8087_v63  ;;  %v10444_v25 = vld [vmem:[#allocation3_spill] sm:$0xff]  ;;  %v8327_v23 = vld [vmem:[%s9368_s1 + $0x3d0] sm:$0xff] }
 0x53d   :  { %2353 = vmatpush.msra.mxu3 %v8230_v49  ;;  %2379 = vmatpush.msrb.mxu1 %v10414_v40  ;;  %v10445_v40 = vld [vmem:[#allocation76_spill] sm:$0xff] }
 0x53e   :  { %2334 = vmatpush.msra.mxu2 %v10415_v3  ;;  %2503 = vmatpush.msra.mxu0 %v10419_v53  ;;  %v10446_v3 = vld [vmem:[#allocation84_spill] sm:$0xff]  ;;  %v10449_v53 = vld [vmem:[#allocation79_spill] sm:$0xff] }
 0x53f   :  { %2354 = vmatpush.msra.mxu3 %v8239_v48  ;;  %2380 = vmatpush.msrb.mxu1 %v10417_v36  ;;  %v8336_v36 = vld [vmem:[%s9368_s1 + $0x3b8] sm:$0xff] }
 0x540   :  { %2399 = vmatpush.msrb.mxu2 %v10416_v4  ;;  %2504 = vmatpush.msra.mxu0 %v10422_v8  ;;  %v10447_v4 = vld [vmem:[#allocation14_spill] sm:$0xff] }
 0x541   :  { %2419 = vmatpush.msrb.mxu3 %v8246_v34  ;;  %2381 = vmatpush.msrb.mxu1 %v10420_v19  ;;  %v10450_v19 = vld [vmem:[#allocation77_spill] sm:$0xff]  ;;  %v8351_v8 = vld [vmem:[%s9368_s1 + $0x380] sm:$0xff] }
 0x542   :  { %2400 = vmatpush.msrb.mxu2 %v10418_v47  ;;  %2505 = vmatpush.msra.mxu0 %v10425_v56  ;;  %v10448_v47 = vld [vmem:[#allocation20_spill] sm:$0xff]  ;;  %v8359_v56 = vld [vmem:[%s9368_s1 + $0x388] sm:$0xff] }
 0x543   :  { %2420 = vmatpush.msrb.mxu3 %v8255_v5  ;;  %2382 = vmatpush.msrb.mxu1 %v10423_v17  ;;  %v10451_v17 = vld [vmem:[#allocation62_spill] sm:$0xff] }
 0x544   :  { %2401 = vmatpush.msrb.mxu2 %v10421_v1  ;;  %2506 = vmatpush.msra.mxu0 %v10428_v61  ;;  %v8345_v1 = vld [vmem:[%s9368_s1 + $0x3a0] sm:$0xff]  ;;  %v8372_v61 = vld [vmem:[%s9368_s1 + $0x370] sm:$0xff] }
 0x545   :  { %2421 = vmatpush.msrb.mxu3 %v8264_v42  ;;  %2383 = vmatpush.msrb.mxu1 %v10426_v28  ;;  %v8365_v28 = vld [vmem:[%s9368_s1 + $0x368] sm:$0xff] }
 0x546   :  { %2402 = vmatpush.msrb.mxu2 %v10424_v55  ;;  %2507 = vmatpush.msra.mxu0 %v10431_v57  ;;  %v10452_v55 = vld [vmem:[#allocation78_spill] sm:$0xff]  ;;  %v8385_v57 = vld [vmem:[%s9368_s1 + $0x358] sm:$0xff] }
 0x547   :  { %2422 = vmatpush.msrb.mxu3 %v8273_v46  ;;  %2384 = vmatpush.msrb.mxu1 %v10429_v30  ;;  %v8378_v30 = vld [vmem:[%s9368_s1 + $0x350] sm:$0xff]  ;;  %10456 = vst [vmem:[#allocation30_spill] sm:$0xff] %v8385_v57 }
 0x548   :  { %2403 = vmatpush.msrb.mxu2 %v10427_v32  ;;  %2508 = vmatpush.msra.mxu0 %v10434_v37  ;;  %v10453_v32 = vld [vmem:[#allocation54_spill] sm:$0xff]  ;;  %10454 = vst [vmem:[#allocation12_spill] sm:$0xff] %v8378_v30 }
 0x549   :  { %2423 = vmatpush.msrb.mxu3 %v8282_v43  ;;  %2385 = vmatpush.msrb.mxu1 %v10432_v6  ;;  %v8391_v6 = vld [vmem:[%s9368_s1 + $0x1a0] sm:$0xff] }
 0x54a   :  { %2404 = vmatpush.msrb.mxu2 %v10430_v33  ;;  %2509 = vmatpush.msra.mxu0 %v10437_v13  ;;  %v10455_v33 = vld [vmem:[#allocation27_spill] sm:$0xff]  ;;  %10457 = vst [vmem:[#allocation26_spill] sm:$0xff] %v8391_v6  ;;  %v8403_v37 = vld [vmem:[%s9368_s1 + $0x340] sm:$0xff]  ;;  %v8421_v13 = vld [vmem:[%s9368_s1 + $0x158] sm:$0xff] }
 0x54b   :  { %2424 = vmatpush.msrb.mxu3 %v8291_v35  ;;  %2386 = vmatpush.msrb.mxu1 %v10435_v50  ;;  %10459 = vst [vmem:[#allocation81_spill] sm:$0xff] %v8403_v37  ;;  %v8409_v50 = vld [vmem:[%s9368_s1 + $0x188] sm:$0xff] }
 0x54c   :  { %2405 = vmatpush.msrb.mxu2 %v10433_v58  ;;  %2510 = vmatpush.msra.mxu0 %v10440_v31  ;;  %v8397_v58 = vld [vmem:[%s9368_s1 + $0x338] sm:$0xff]  ;;  %10460 = vst [vmem:[#allocation35_spill] sm:$0xff] %v8409_v50  ;;  %v8439_v31 = vld [vmem:[%s9368_s1 + $0x110] sm:$0xff] }
 0x54d   :  { %2425 = vmatpush.msrb.mxu3 %v8300_v59  ;;  %2387 = vmatpush.msrb.mxu1 %v10438_v27  ;;  %10458 = vst [vmem:[#allocation21_spill] sm:$0xff] %v8397_v58  ;;  %v8427_v27 = vld [vmem:[%s9368_s1 + $0x140] sm:$0xff] }
 0x54e   :  { %2406 = vmatpush.msrb.mxu2 %v10436_v11  ;;  %2511 = vmatpush.msra.mxu0 %v10443_v7  ;;  %v8415_v11 = vld [vmem:[%s9368_s1 + $0x170] sm:$0xff]  ;;  %10462 = vst [vmem:[#allocation58_spill] sm:$0xff] %v8421_v13  ;;  %v10468_v7 = vld [vmem:[#allocation85_spill] sm:$0xff] }
 0x54f   :  { %2426 = vmatpush.msrb.mxu3 %v8309_v18  ;;  %2388 = vmatpush.msrb.mxu1 %v10441_v24  ;;  %10461 = vst [vmem:[#allocation22_spill] sm:$0xff] %v8415_v11  ;;  %v10466_v24 = vld [vmem:[#allocation2_spill] sm:$0xff] }
 0x550   :  { %2407 = vmatpush.msrb.mxu2 %v10439_v10  ;;  %2512 = vmatpush.msra.mxu0 %v10446_v3  ;;  %10463 = vst [vmem:[#allocation15_spill] sm:$0xff] %v8427_v27  ;;  %v8433_v10 = vld [vmem:[%s9368_s1 + $0x128] sm:$0xff]  ;;  %v10471_v3 = vld [vmem:[#allocation64_spill] sm:$0xff] }
 0x551   :  { %2427 = vmatpush.msrb.mxu3 %v8318_v12  ;;  %2389 = vmatpush.msrb.mxu1 %v10444_v25  ;;  %10464 = vst [vmem:[#allocation83_spill] sm:$0xff] %v8433_v10  ;;  %v10469_v25 = vld [vmem:[#allocation29_spill] sm:$0xff] }
 0x552   :  { %2408 = vmatpush.msrb.mxu2 %v10442_v52  ;;  %2513 = vmatpush.msra.mxu0 %v10449_v53  ;;  %10465 = vst [vmem:[#allocation23_spill] sm:$0xff] %v8439_v31  ;;  %v10467_v52 = vld [vmem:[#allocation6_spill] sm:$0xff]  ;;  %v10474_v53 = vld [vmem:[#allocation33_spill] sm:$0xff] }
 0x553   :  { %2428 = vmatpush.msrb.mxu3 %v8327_v23  ;;  %2390 = vmatpush.msrb.mxu1 %v10447_v4  ;;  %v10472_v4 = vld [vmem:[#allocation8_spill] sm:$0xff] }
 0x554   :  { %2409 = vmatpush.msrb.mxu2 %v10445_v40  ;;  %2514 = vmatpush.msra.mxu0 %v10451_v17  ;;  %v10470_v40 = vld [vmem:[#allocation86_spill] sm:$0xff]  ;;  %v8451_v17 = vpop.permute.xlu1 %2202 }
 0x555   :  { %2429 = vmatpush.msrb.mxu3 %v8336_v36  ;;  %2391 = vmatpush.msrb.mxu1 %v10450_v19 }
 0x556   :  { %2410 = vmatpush.msrb.mxu2 %v10448_v47  ;;  %v10473_v47 = vld [vmem:[#allocation47_spill] sm:$0xff] }
 0x557   :  { %2430 = vmatpush.msrb.mxu3 %v8345_v1  ;;  %2392 = vmatpush.msrb.mxu1 %v10452_v55  ;;  %v10475_v55 = vld [vmem:[#allocation61_spill] sm:$0xff] }
 0x558   :  { %2411 = vmatpush.msrb.mxu2 %v8351_v8 }
 0x559   :  { %2431 = vmatpush.msrb.mxu3 %v8359_v56  ;;  %2393 = vmatpush.msrb.mxu1 %v10453_v32  ;;  %v2206_v32 = vmul.f32 %v8451_v17, %v10475_v55 }
 0x55a   :  { %2412 = vmatpush.msrb.mxu2 %v8365_v28 }
 0x55b   :  { %2432 = vmatpush.msrb.mxu3 %v8372_v61  ;;  %2394 = vmatpush.msrb.mxu1 %v10455_v33 }
 0x55c   :  { %2413 = vmatpush.msrb.mxu2 %v8378_v30 }
 0x55d   :  { %2433 = vmatpush.msrb.mxu3 %v8385_v57  ;;  %2519 = vmatpush.msra.mxu1 %v8391_v6 }
 0x55e   :  { %2414 = vmatpush.msrb.mxu2 %v8397_v58 }
 0x55f   :  { %2434 = vmatpush.msrb.mxu3 %v8403_v37  ;;  %2520 = vmatpush.msra.mxu1 %v8409_v50  ;;  %v10479_v37 = vld [vmem:[#allocation60_spill] sm:$0xff] }
 0x560   :  { %v2205_v55 = vmul.f32 %v8451_v17, %v10479_v37 }
 0x561   :  { %2521 = vmatpush.msra.mxu1 %v8415_v11 }
 0x563   :  { %2522 = vmatpush.msra.mxu1 %v8421_v13 }
 0x565   :  { %2523 = vmatpush.msra.mxu1 %v8427_v27 }
 0x567   :  { %2524 = vmatpush.msra.mxu1 %v8433_v10 }
 0x569   :  { %2525 = vmatpush.msra.mxu1 %v8439_v31 }
 0x56b   :  { %2526 = vmatpush.msra.mxu1 %v10466_v24  ;;  %v10476_v24 = vld [vmem:[#allocation31_spill] sm:$0xff] }
 0x56d   :  { %2527 = vmatpush.msra.mxu1 %v10467_v52 }
 0x56f   :  { %2528 = vmatpush.msra.mxu1 %v10468_v7 }
 0x571   :  { %2529 = vmatpush.msra.mxu1 %v10469_v25  ;;  %v10477_v25 = vld [vmem:[#allocation67_spill] sm:$0xff] }
 0x573   :  { %2530 = vmatpush.msra.mxu1 %v10470_v40  ;;  %v2209_v40 = vadd.f32 %v2206_v32, %v10477_v25  ;;  %v10480_v32 = vld [vmem:[#allocation66_spill] sm:$0xff] }
 0x575   :  { %2531 = vmatpush.msra.mxu1 %v10471_v3 }
 0x577   :  { %2532 = vmatpush.msra.mxu1 %v10472_v4 }
 0x579   :  { %2533 = vmatpush.msra.mxu1 %v10473_v47  ;;  %v10478_v47 = vld [vmem:[#allocation68_spill] sm:$0xff] }
 0x57b   :  { %2534 = vmatpush.msra.mxu1 %v10474_v53 }
 0x58d   :  { %v2108_v19 = vpop.f32.mrf.mxu0 }
 0x598   :  { %v2048_v33 = vpop.f32.mrf.mxu1 }
 0x599   :  { %v2049_v52 = vadd.f32 %v2048_v33, %v10476_v24 }
 0x59a   :  { %v2248_v7 = vpop.f32.mrf.mxu0 }
 0x59b   :  { %v2151_v31 = vadd.f32 %v2108_v19, %v2049_v52  ;;  %v2291_v3 = vadd.f32 %v2248_v7, %v2209_v40  ;;  %v2208_v19 = vadd.f32 %v2205_v55, %v10480_v32 }
 0x59d   :  { %v3103_v10 = vmul.f32 -1.442695, %v2151_v31  ;;  %v3106_v13 = vmul.f32 -1.442695, %v2291_v3 }
 0x59f   :  { %v2068_v4 = vpop.f32.mrf.mxu2  ;;  %3252 = vpow2.f32 %v3103_v10  ;;  %v2088_v53 = vpop.f32.mrf.mxu3 }
 0x5a0   :  { %v2069_v27 = vadd.f32 %v2068_v4, %v10478_v47  ;;  %3254 = vpow2.f32 %v3106_v13 }
 0x5a1   :  { %v2128_v11 = vpop.f32.mrf.mxu1 }
 0x5a2   :  { %v2171_v50 = vadd.f32 %v2128_v11, %v2069_v27 }
 0x5a4   :  { %v3104_v58 = vmul.f32 -1.442695, %v2171_v50 }
 0x5a5   :  { %v3253_v33 = vpop.eup %3252 }
 0x5a6   :  { %v2155_v24 = vadd.f32 1.0, %v3253_v33  ;;  %3256 = vpow2.f32 %v3104_v58  ;;  %v3255_v10 = vpop.eup %3254 }
 0x5a7   :  { %v8461_v4 = vadd.f32 1.0, %v3255_v10  ;;  %v2148_v47 = vpop.f32.mrf.mxu2 }
 0x5a8   :  { %v2228_v52 = vpop.f32.mrf.mxu3  ;;  %3258 = vrcp.f32 %v2155_v24  ;;  %v2167_v13 = vand.u32 2147483648, %v2155_v24  ;;  %v2165_v55 = vand.u32 2147483647, %v2155_v24  ;;  %vm2161_vm9 = vweird.f32 %v2155_v24 }
 0x5a9   :  { %v2271_v31 = vadd.f32 %v2228_v52, %v2208_v19  ;;  %vm2301_vm5 = vweird.f32 %v8461_v4 }
 0x5aa   :  { %vm2166_vm11 = vcmp.eq.f32.partialorder %v2165_v55, 8.507059e+37 }
 0x5ab   :  { %v3105_v7 = vmul.f32 -1.442695, %v2271_v31 }
 0x5ac   :  { %v3257_v40 = vpop.eup %3256 }
 0x5ad   :  { %v2175_v3 = vadd.f32 1.0, %v3257_v40  ;;  %3260 = vpow2.f32 %v3105_v7  ;;  %v2168_v40 = vor.u32 1.1754944e-38, %v2167_v13 }
 0x5ae   :  { %v3259_v11 = vpop.eup %3258 }
 0x5af   :  { %3262 = vrcp.f32 %v2175_v3  ;;  %v2157_v27 = vmul.f32 %v3259_v11, %v2155_v24  ;;  %vm2162_vm8 = vweird.f32 %v3259_v11  ;;  %v2187_v25 = vand.u32 2147483648, %v2175_v3 }
 0x5b0   :  { %3264 = vrcp.f32 %v8461_v4  ;;  %vm2163_vm10 = vmor %vm2161_vm9, %vm2162_vm8  ;;  %vm2181_vm13 = vweird.f32 %v2175_v3 }
 0x5b1   :  { %v2158_v50 = vsub.f32 1.0, %v2157_v27  ;;  %v8469_v27 = vld [vmem:[%s9368_s1 + $0x3] ss:$0 sm:$0xff] }
 0x5b2   :  { %10481 = vst [vmem:[#allocation45_spill] sm:$0xff] %v8469_v27 }
 0x5b3   :  { %v3261_v58 = vpop.eup %3260  ;;  %v2159_v33 = vmul.f32 %v3259_v11, %v2158_v50  ;;  %v2191_v50 = vadd.f32 %v8469_v27, %v2148_v47  ;;  %v2188_v47 = vor.u32 1.1754944e-38, %v2187_v25 }
 0x5b4   :  { %v2275_v19 = vadd.f32 1.0, %v3261_v58 }
 0x5b5   :  { %v3263_v52 = vpop.eup %3262  ;;  %v2160_v31 = vadd.f32 %v3259_v11, %v2159_v33  ;;  %v2089_v33 = vadd.f32 %v2088_v53, %v10394_v14 }
 0x5b6   :  { %v2177_v10 = vmul.f32 %v3263_v52, %v2175_v3  ;;  %3266 = vrcp.f32 %v2275_v19  ;;  %v8464_v7 = vpop.eup %3264  ;;  %vm2182_vm12 = vweird.f32 %v3263_v52  ;;  %v2285_v14 = vand.u32 2147483647, %v2275_v19 }
 0x5b7   :  { %v2164_v32 = vsel %vm2163_vm10, %v3259_v11, %v2160_v31  ;;  %v2297_v13 = vmul.f32 %v8464_v7, %v8461_v4  ;;  %v2185_v11 = vand.u32 2147483647, %v2175_v3  ;;  %vm2183_vm14 = vmor %vm2181_vm13, %vm2182_vm12  ;;  %vm2281_vm1 = vweird.f32 %v2275_v19 }
 0x5b8   :  { %v2178_v37 = vsub.f32 1.0, %v2177_v10  ;;  %v2169_v58 = vsel %vm2166_vm11, %v2168_v40, %v2164_v32  ;;  %vm2286_vm3 = vcmp.eq.f32.partialorder %v2285_v14, 8.507059e+37  ;;  %vm2302_vm4 = vweird.f32 %v8464_v7 }
 0x5b9   :  { %v2192_v24 = vmul.f32 %v2191_v50, %v2169_v58  ;;  %v2298_v10 = vsub.f32 1.0, %v2297_v13  ;;  %vm2186_vm15 = vcmp.eq.f32.partialorder %v2185_v11, 8.507059e+37  ;;  %v2287_v50 = vand.u32 2147483648, %v2275_v19  ;;  %v2268_v27 = vpop.f32.mrf.mxu1  ;;  %vm2303_vm6 = vmor %vm2301_vm5, %vm2302_vm4 }
 0x5ba   :  { %v2179_v6 = vmul.f32 %v3263_v52, %v2178_v37  ;;  %v2311_v13 = vadd.f32 %v8066_v15, %v2268_v27  ;;  %v8492_v15 = vld [vmem:[%s9368_s1 + $0x328] sm:$0xff] }
 0x5bb   :  { %v2193_v55 = vadd.f32 %v2192_v24, %v2089_v33  ;;  %v2299_v37 = vmul.f32 %v8464_v7, %v2298_v10  ;;  %v2288_v25 = vor.u32 1.1754944e-38, %v2287_v50 }
 0x5bc   :  { %v3267_v31 = vpop.eup %3266  ;;  %v2180_v57 = vadd.f32 %v3263_v52, %v2179_v6  ;;  %v2207_v6 = vmul.f32 %v8451_v17, %v10395_v9 }
 0x5bd   :  { %3268 = vtanh.f32 %v2193_v55  ;;  %v2277_v30 = vmul.f32 %v3267_v31, %v2275_v19  ;;  %vm2282_vm0 = vweird.f32 %v3267_v31  ;;  %v2300_v11 = vadd.f32 %v8464_v7, %v2299_v37 }
 0x5be   :  { %v2184_v32 = vsel %vm2183_vm14, %v3263_v52, %v2180_v57  ;;  %vm2283_vm2 = vmor %vm2281_vm1, %vm2282_vm0  ;;  %v2210_v17 = vadd.f32 %v2207_v6, %v10396_v44  ;;  %v2307_v19 = vand.u32 2147483648, %v8461_v4 }
 0x5bf   :  { %v2278_v53 = vsub.f32 1.0, %v2277_v30  ;;  %v2189_v40 = vsel %vm2186_vm15, %v2188_v47, %v2184_v32  ;;  %v2304_v27 = vsel %vm2303_vm6, %v8464_v7, %v2300_v11  ;;  %v8499_v32 = vld [vmem:[%s9368_s1 + $0x310] sm:$0xff]  ;;  %v8511_v7 = vld [vmem:[%s9368_s1 + $0x2e0] sm:$0xff] }
 0x5c0   :  { %v2195_v33 = vsub.f32 1.0, %v2189_v40  ;;  %v2197_v30 = vmul.f32 %v2189_v40, %v8075_v45  ;;  %v2305_v45 = vand.u32 2147483647, %v8461_v4  ;;  %v8609_v11 = vld [vmem:[%s9368_s1 + $0x2d0] sm:$0xff] }
 0x5c1   :  { %v2279_v58 = vmul.f32 %v3267_v31, %v2278_v53  ;;  %v8505_v53 = vld [vmem:[%s9368_s1 + $0x2f8] sm:$0xff] }
 0x5c2   :  { %vm2306_vm7 = vcmp.eq.f32.partialorder %v2305_v45, 8.507059e+37  ;;  %v8647_v45 = vld [vmem:[%s9368_s1 + $0x2a0] sm:$0xff] }
 0x5c3   :  { %v3269_v24 = vpop.eup %3268  ;;  %v2280_v3 = vadd.f32 %v3267_v31, %v2279_v58  ;;  %v8517_v58 = vld [vmem:[%s9368_s1 + $0x2c8] sm:$0xff] }
 0x5c4   :  { %v2196_v57 = vmul.f32 %v3269_v24, %v2195_v33  ;;  %v8524_v24 = vld [vmem:[%s9368_s1 + $0x2b0] sm:$0xff] }
 0x5c5   :  { %v2284_v52 = vsel %vm2283_vm2, %v3267_v31, %v2280_v3  ;;  %v2308_v31 = vor.u32 1.1754944e-38, %v2307_v19  ;;  %v8543_v3 = vld [vmem:[%s9368_s1 + $0x318] sm:$0xff] }
 0x5c6   :  { %v2289_v55 = vsel %vm2286_vm3, %v2288_v25, %v2284_v52  ;;  %v8482_v47 = vadd.f32 %v2197_v30, %v2196_v57  ;;  %v8556_v25 = vld [vmem:[%s9368_s1 + $0x190] sm:$0xff]  ;;  %v8562_v57 = vld [vmem:[%s9368_s1 + $0x300] sm:$0xff]  ;;  %v8575_v30 = vld [vmem:[%s9368_s1 + $0x178] sm:$0xff] }
 0x5c7   :  { %v2312_v10 = vmul.f32 %v2311_v13, %v2289_v55  ;;  %v2309_v4 = vsel %vm2306_vm7, %v2308_v31, %v2304_v27  ;;  %v8581_v52 = vld [vmem:[%s9368_s1 + $0x2e8] sm:$0xff]  ;;  %v8594_v13 = vld [vmem:[%s9368_s1 + $0x160] sm:$0xff]  ;;  %v8616_v55 = vld [vmem:[%s9368_s1 + $0x238] sm:$0xff] }
 0x5c8   :  { %2395 = vmatmul.f32.vlgmr.msrb.gmra.mxu1 %v8482_v47  ;;  %v2315_v40 = vsub.f32 1.0, %v2309_v4  ;;  %v2317_v33 = vmul.f32 %v2309_v4, %v8087_v63  ;;  %v8537_v63 = vld [vmem:[%s9368_s1 + $0x1a8] sm:$0xff]  ;;  %10483 = vst [vmem:[#allocation53_spill] sm:$0xff] %v8616_v55  ;;  %v8628_v19 = vld [vmem:[%s9368_s1 + $0x2b8] sm:$0xff]  ;;  %v8685_v4 = vld [vmem:[%s9368_s1 + $0x270] sm:$0xff] }
 0x5c9   :  { %v2313_v14 = vadd.f32 %v2312_v10, %v2210_v17  ;;  %2647 = vmatpush.msrb.mxu1 %v8492_v15  ;;  %v8622_v17 = vld [vmem:[%s9368_s1 + $0x130] sm:$0xff]  ;;  %v8641_v10 = vld [vmem:[%s9368_s1 + $0x118] sm:$0xff]  ;;  %v8666_v27 = vld [vmem:[%s9368_s1 + $0x288] sm:$0xff] }
 0x5ca   :  { %v8679_v31 = vld [vmem:[%s9368_s1 + $0xe8] sm:$0xff] }
 0x5cb   :  { %3270 = vtanh.f32 %v2313_v14  ;;  %2648 = vmatpush.msrb.mxu1 %v8499_v32  ;;  %v8660_v14 = vld [vmem:[%s9368_s1 + $0x100] sm:$0xff] }
 0x5cd   :  { %2649 = vmatpush.msrb.mxu1 %v8505_v53 }
 0x5cf   :  { %2650 = vmatpush.msrb.mxu1 %v8511_v7 }
 0x5d1   :  { %v3271_v50 = vpop.eup %3270  ;;  %2651 = vmatpush.msrb.mxu1 %v8517_v58 }
 0x5d2   :  { %v2316_v37 = vmul.f32 %v3271_v50, %v2315_v40  ;;  %v8698_v40 = vld [vmem:[%s9368_s1 + $0xd0] sm:$0xff]  ;;  %v8704_v50 = vld [vmem:[%s9368_s1 + $0x258] sm:$0xff] }
 0x5d3   :  { %2652 = vmatpush.msrb.mxu1 %v8524_v24 }
 0x5d4   :  { %v8527_v6 = vadd.f32 %v2317_v33, %v2316_v37  ;;  %v8717_v37 = vld [vmem:[%s9368_s1 + $0xb8] sm:$0xff]  ;;  %v8723_v33 = vld [vmem:[%s9368_s1 + $0x240] sm:$0xff] }
 0x5d5   :  { %2653 = vmatpush.msrb.mxu1 %v7532_v0  ;;  %v8550_v0 = vld [vmem:[%s9368_s1 + $0x280] sm:$0xff] }
 0x5d6   :  { %2335 = vmatmul.f32.vlgmr.msra.gmra.mxu2 %v8527_v6  ;;  %2355 = vmatmul.f32.vlgmr.msra.gmra.mxu3 %v8527_v6 }
 0x5d7   :  { %2375 = vmatmul.f32.vlgmr.msrb.gmra.mxu0 %v8527_v6  ;;  %2535 = vmatmul.f32.vlgmr.msra.gmra.mxu1 %v8527_v6 }
 0x5d8   :  { %2539 = vmatpush.msra.mxu2 %v8537_v63  ;;  %2607 = vmatpush.msra.mxu3 %v8543_v3 }
 0x5d9   :  { %2627 = vmatpush.msrb.mxu0 %v8099_v21  ;;  %2654 = vmatpush.msrb.mxu1 %v8550_v0  ;;  %v8569_v21 = vld [vmem:[%s9368_s1 + $0x268] sm:$0xff] }
 0x5da   :  { %2540 = vmatpush.msra.mxu2 %v8556_v25  ;;  %2608 = vmatpush.msra.mxu3 %v8562_v57 }
 0x5db   :  { %2628 = vmatpush.msrb.mxu0 %v8108_v60  ;;  %2655 = vmatpush.msrb.mxu1 %v8569_v21  ;;  %v8588_v60 = vld [vmem:[%s9368_s1 + $0x250] sm:$0xff] }
 0x5dc   :  { %2541 = vmatpush.msra.mxu2 %v8575_v30  ;;  %2609 = vmatpush.msra.mxu3 %v8581_v52  ;;  %10482 = vst [vmem:[#allocation32_spill] sm:$0xff] %v8588_v60 }
 0x5dd   :  { %2629 = vmatpush.msrb.mxu0 %v8117_v39  ;;  %2656 = vmatpush.msrb.mxu1 %v8588_v60  ;;  %v8603_v39 = vld [vmem:[%s9368_s1 + $0x148] sm:$0xff] }
 0x5de   :  { %2542 = vmatpush.msra.mxu2 %v8594_v13  ;;  %2435 = vmatmul.f32.vlgmr.msrb.gmra.mxu3 %v8482_v47 }
 0x5df   :  { %2415 = vmatmul.f32.vlgmr.msrb.gmra.mxu2 %v8482_v47  ;;  %2515 = vmatmul.f32.vlgmr.msra.gmra.mxu0 %v8527_v6 }
 0x5e0   :  { %2543 = vmatpush.msra.mxu2 %v8603_v39  ;;  %2610 = vmatpush.msra.mxu3 %v8609_v11 }
 0x5e1   :  { %2630 = vmatpush.msrb.mxu0 %v8130_v2  ;;  %2657 = vmatpush.msrb.mxu1 %v8616_v55  ;;  %v8635_v2 = vld [vmem:[%s9368_s1 + $0x220] sm:$0xff] }
 0x5e2   :  { %2544 = vmatpush.msra.mxu2 %v8622_v17  ;;  %2611 = vmatpush.msra.mxu3 %v8628_v19  ;;  %10484 = vst [vmem:[#allocation49_spill] sm:$0xff] %v8635_v2 }
 0x5e3   :  { %2631 = vmatpush.msrb.mxu0 %v8139_v62  ;;  %2658 = vmatpush.msrb.mxu1 %v8635_v2  ;;  %v8654_v62 = vld [vmem:[%s9368_s1 + $0x208] sm:$0xff]  ;;  %v8787_v2 = vld [vmem:[%s9368_s1 + $0x1e0] sm:$0xff] }
 0x5e4   :  { %2545 = vmatpush.msra.mxu2 %v8641_v10  ;;  %2612 = vmatpush.msra.mxu3 %v8647_v45  ;;  %10485 = vst [vmem:[#allocation34_spill] sm:$0xff] %v8654_v62 }
 0x5e5   :  { %2632 = vmatpush.msrb.mxu0 %v8148_v41  ;;  %2659 = vmatpush.msrb.mxu1 %v8654_v62  ;;  %v8673_v41 = vld [vmem:[%s9368_s1 + $0x1f0] sm:$0xff]  ;;  %v8771_v62 = vld [vmem:[%s9368_s1 + $0x1f8] sm:$0xff]  ;;  %10495 = vst [vmem:[#allocation80_spill] sm:$0xff] %v8787_v2 }
 0x5e6   :  { %2546 = vmatpush.msra.mxu2 %v8660_v14  ;;  %2613 = vmatpush.msra.mxu3 %v8666_v27  ;;  %10486 = vst [vmem:[#allocation25_spill] sm:$0xff] %v8673_v41 }
 0x5e7   :  { %2633 = vmatpush.msrb.mxu0 %v8157_v51  ;;  %2660 = vmatpush.msrb.mxu1 %v8673_v41  ;;  %v8692_v51 = vld [vmem:[%s9368_s1 + $0x1d8] sm:$0xff]  ;;  %v8755_v41 = vld [vmem:[%s9368_s1 + $0x210] sm:$0xff]  ;;  %10493 = vst [vmem:[#allocation18_spill] sm:$0xff] %v8771_v62 }
 0x5e8   :  { %2547 = vmatpush.msra.mxu2 %v8679_v31  ;;  %2614 = vmatpush.msra.mxu3 %v8685_v4  ;;  %10487 = vst [vmem:[#allocation37_spill] sm:$0xff] %v8692_v51 }
 0x5e9   :  { %2634 = vmatpush.msrb.mxu0 %v8166_v20  ;;  %2661 = vmatpush.msrb.mxu1 %v8692_v51  ;;  %v8711_v20 = vld [vmem:[%s9368_s1 + $0x1c0] sm:$0xff]  ;;  %v8739_v51 = vld [vmem:[%s9368_s1 + $0x228] sm:$0xff]  ;;  %10491 = vst [vmem:[#allocation65_spill] sm:$0xff] %v8755_v41 }
 0x5ea   :  { %2548 = vmatpush.msra.mxu2 %v8698_v40  ;;  %2615 = vmatpush.msra.mxu3 %v8704_v50  ;;  %10488 = vst [vmem:[#allocation36_spill] sm:$0xff] %v8711_v20 }
 0x5eb   :  { %2635 = vmatpush.msrb.mxu0 %v8175_v16  ;;  %2662 = vmatpush.msrb.mxu1 %v8711_v20  ;;  %v3803_v16 = vld [vmem:[%s9368_s1 + $0x198] sm:$0xff]  ;;  %v8733_v20 = vld [vmem:[%s9368_s1 + $0xa0] sm:$0xff]  ;;  %10489 = vst [vmem:[#allocation59_spill] sm:$0xff] %v8739_v51 }
 0x5ec   :  { %2549 = vmatpush.msra.mxu2 %v8717_v37  ;;  %2616 = vmatpush.msra.mxu3 %v8723_v33 }
 0x5ed   :  { %2636 = vmatpush.msrb.mxu0 %v8184_v54  ;;  %2787 = vmatpush.msra.mxu1 %v3803_v16  ;;  %v3806_v54 = vld [vmem:[%s9368_s1 + $0x180] sm:$0xff]  ;;  %v8749_v16 = vld [vmem:[%s9368_s1 + $0x88] sm:$0xff] }
 0x5ee   :  { %2550 = vmatpush.msra.mxu2 %v8733_v20  ;;  %2617 = vmatpush.msra.mxu3 %v8739_v51  ;;  %10490 = vst [vmem:[#allocation51_spill] sm:$0xff] %v8749_v16 }
 0x5ef   :  { %2637 = vmatpush.msrb.mxu0 %v8193_v38  ;;  %2788 = vmatpush.msra.mxu1 %v3806_v54  ;;  %v3809_v38 = vld [vmem:[%s9368_s1 + $0x168] sm:$0xff]  ;;  %v8765_v54 = vld [vmem:[%s9368_s1 + $0x70] sm:$0xff] }
 0x5f0   :  { %2551 = vmatpush.msra.mxu2 %v8749_v16  ;;  %2618 = vmatpush.msra.mxu3 %v8755_v41  ;;  %10492 = vst [vmem:[#allocation13_spill] sm:$0xff] %v8765_v54  ;;  %v10544_v41 = vld [vmem:[#allocation45_spill] sm:$0xff] }
 0x5f1   :  { %2638 = vmatpush.msrb.mxu0 %v8202_v26  ;;  %2789 = vmatpush.msra.mxu1 %v3809_v38  ;;  %v3812_v26 = vld [vmem:[%s9368_s1 + $0x150] sm:$0xff]  ;;  %v8781_v38 = vld [vmem:[%s9368_s1 + $0x58] sm:$0xff] }
 0x5f2   :  { %2552 = vmatpush.msra.mxu2 %v8765_v54  ;;  %2619 = vmatpush.msra.mxu3 %v8771_v62  ;;  %10494 = vst [vmem:[#allocation42_spill] sm:$0xff] %v8781_v38 }
 0x5f3   :  { %2639 = vmatpush.msrb.mxu0 %v8211_v29  ;;  %2790 = vmatpush.msra.mxu1 %v3812_v26  ;;  %v3815_v29 = vld [vmem:[%s9368_s1 + $0x138] sm:$0xff]  ;;  %v8797_v26 = vld [vmem:[%s9368_s1 + $0x40] sm:$0xff] }
 0x5f4   :  { %2553 = vmatpush.msra.mxu2 %v8781_v38  ;;  %2620 = vmatpush.msra.mxu3 %v8787_v2  ;;  %10496 = vst [vmem:[#allocation57_spill] sm:$0xff] %v8797_v26  ;;  %v8803_v38 = vld [vmem:[%s9368_s1 + $0x1c8] sm:$0xff] }
 0x5f5   :  { %2640 = vmatpush.msrb.mxu0 %v8220_v22  ;;  %2791 = vmatpush.msra.mxu1 %v3815_v29  ;;  %10497 = vst [vmem:[#allocation39_spill] sm:$0xff] %v8803_v38  ;;  %v8811_v22 = vld [vmem:[%s9368_s1 + $0x498] sm:$0xff]  ;;  %v8817_v29 = vld [vmem:[%s9368_s1 + $0x1b0] sm:$0xff] }
 0x5f6   :  { %2554 = vmatpush.msra.mxu2 %v8797_v26  ;;  %2621 = vmatpush.msra.mxu3 %v8803_v38  ;;  %10498 = vst [vmem:[#allocation55_spill] sm:$0xff] %v8811_v22  ;;  %v8823_v38 = vld [vmem:[%s9368_s1 + $0x4a0] sm:$0xff] }
 0x5f7   :  { %2555 = vmatmul.f32.vlgmr.msra.gmra.mxu2 %v8527_v6  ;;  %2641 = vmatpush.msrb.mxu0 %v8230_v49  ;;  %10499 = vst [vmem:[#allocation41_spill] sm:$0xff] %v8817_v29  ;;  %v8830_v49 = vld [vmem:[%s9368_s1 + $0x480] sm:$0xff] }
 0x5f8   :  { %2667 = vmatpush.msrb.mxu2 %v8811_v22  ;;  %2622 = vmatpush.msra.mxu3 %v8817_v29  ;;  %10500 = vst [vmem:[#allocation16_spill] sm:$0xff] %v8823_v38  ;;  %v8837_v29 = vld [vmem:[%s9368_s1 + $0x488] sm:$0xff] }
 0x5f9   :  { %2642 = vmatpush.msrb.mxu0 %v8239_v48  ;;  %10501 = vst [vmem:[#allocation43_spill] sm:$0xff] %v8830_v49  ;;  %v3823_v48 = vld [vmem:[%s9368_s1 + $0x120] sm:$0xff] }
 0x5fa   :  { %2687 = vmatpush.msrb.mxu3 %v8823_v38  ;;  %2668 = vmatpush.msrb.mxu2 %v8830_v49  ;;  %10502 = vst [vmem:[#allocation71_spill] sm:$0xff] %v8837_v29  ;;  %v8846_v38 = vld [vmem:[%s9368_s1 + $0x468] sm:$0xff] }
 0x5fb   :  { %2707 = vmatpush.msra.mxu0 %v8246_v34  ;;  %2792 = vmatpush.msra.mxu1 %v3823_v48  ;;  %10503 = vst [vmem:[#allocation19_spill] sm:$0xff] %v8846_v38  ;;  %v8853_v34 = vld [vmem:[%s9368_s1 + $0x470] sm:$0xff]  ;;  %v3826_v48 = vld [vmem:[%s9368_s1 + $0x108] sm:$0xff] }
 0x5fc   :  { %2688 = vmatpush.msrb.mxu3 %v8837_v29  ;;  %2669 = vmatpush.msrb.mxu2 %v8846_v38  ;;  %10504 = vst [vmem:[#allocation24_spill] sm:$0xff] %v8853_v34  ;;  %v8862_v29 = vld [vmem:[%s9368_s1 + $0x450] sm:$0xff] }
 0x5fd   :  { %2708 = vmatpush.msra.mxu0 %v8255_v5  ;;  %2793 = vmatpush.msra.mxu1 %v3826_v48  ;;  %10505 = vst [vmem:[#allocation48_spill] sm:$0xff] %v8862_v29  ;;  %v8869_v5 = vld [vmem:[%s9368_s1 + $0x458] sm:$0xff]  ;;  %v3829_v48 = vld [vmem:[%s9368_s1 + $0xf0] sm:$0xff] }
 0x5fe   :  { %2689 = vmatpush.msrb.mxu3 %v8853_v34  ;;  %2670 = vmatpush.msrb.mxu2 %v8862_v29  ;;  %10506 = vst [vmem:[#allocation63_spill] sm:$0xff] %v8869_v5  ;;  %v8878_v34 = vld [vmem:[%s9368_s1 + $0x438] sm:$0xff] }
 0x5ff   :  { %2709 = vmatpush.msra.mxu0 %v8264_v42  ;;  %2794 = vmatpush.msra.mxu1 %v3829_v48  ;;  %10507 = vst [vmem:[#allocation28_spill] sm:$0xff] %v8878_v34  ;;  %v8885_v42 = vld [vmem:[%s9368_s1 + $0x440] sm:$0xff]  ;;  %v3832_v48 = vld [vmem:[%s9368_s1 + $0xd8] sm:$0xff] }
 0x600   :  { %2690 = vmatpush.msrb.mxu3 %v8869_v5  ;;  %2671 = vmatpush.msrb.mxu2 %v8878_v34  ;;  %10508 = vst [vmem:[#allocation74_spill] sm:$0xff] %v8885_v42  ;;  %v8894_v5 = vld [vmem:[%s9368_s1 + $0x420] sm:$0xff] }
 0x601   :  { %2710 = vmatpush.msra.mxu0 %v8273_v46  ;;  %2795 = vmatpush.msra.mxu1 %v3832_v48  ;;  %10509 = vst [vmem:[#allocation40_spill] sm:$0xff] %v8894_v5  ;;  %v8901_v46 = vld [vmem:[%s9368_s1 + $0x428] sm:$0xff]  ;;  %v3835_v48 = vld [vmem:[%s9368_s1 + $0xc0] sm:$0xff] }
 0x602   :  { %2691 = vmatpush.msrb.mxu3 %v8885_v42  ;;  %2672 = vmatpush.msrb.mxu2 %v8894_v5  ;;  %10510 = vst [vmem:[#allocation38_spill] sm:$0xff] %v8901_v46  ;;  %v8910_v42 = vld [vmem:[%s9368_s1 + $0x408] sm:$0xff]  ;;  %v10542_v34 = vld [vmem:[#allocation66_spill] sm:$0xff] }
 0x603   :  { %2711 = vmatpush.msra.mxu0 %v8282_v43  ;;  %2796 = vmatpush.msra.mxu1 %v3835_v48  ;;  %10511 = vst [vmem:[#allocation56_spill] sm:$0xff] %v8910_v42  ;;  %v8917_v43 = vld [vmem:[%s9368_s1 + $0x410] sm:$0xff]  ;;  %v3838_v48 = vld [vmem:[%s9368_s1 + $0xa8] sm:$0xff] }
 0x604   :  { %2692 = vmatpush.msrb.mxu3 %v8901_v46  ;;  %2673 = vmatpush.msrb.mxu2 %v8910_v42  ;;  %10512 = vst [vmem:[#allocation70_spill] sm:$0xff] %v8917_v43  ;;  %v8926_v46 = vld [vmem:[%s9368_s1 + $0x3f0] sm:$0xff]  ;;  %v10541_v42 = vld [vmem:[#allocation31_spill] sm:$0xff] }
 0x605   :  { %2712 = vmatpush.msra.mxu0 %v8291_v35  ;;  %2797 = vmatpush.msra.mxu1 %v3838_v48  ;;  %10513 = vst [vmem:[#allocation69_spill] sm:$0xff] %v8926_v46  ;;  %v8933_v35 = vld [vmem:[%s9368_s1 + $0x3f8] sm:$0xff]  ;;  %v3841_v48 = vld [vmem:[%s9368_s1 + $0x90] sm:$0xff] }
 0x606   :  { %2693 = vmatpush.msrb.mxu3 %v8917_v43  ;;  %2674 = vmatpush.msrb.mxu2 %v8926_v46  ;;  %10514 = vst [vmem:[#allocation11_spill] sm:$0xff] %v8933_v35  ;;  %v8942_v43 = vld [vmem:[%s9368_s1 + $0x3d8] sm:$0xff] }
 0x607   :  { %2713 = vmatpush.msra.mxu0 %v8300_v59  ;;  %2798 = vmatpush.msra.mxu1 %v3841_v48  ;;  %10515 = vst [vmem:[#allocation46_spill] sm:$0xff] %v8942_v43  ;;  %v8949_v59 = vld [vmem:[%s9368_s1 + $0x3e0] sm:$0xff]  ;;  %v3844_v48 = vld [vmem:[%s9368_s1 + $0x78] sm:$0xff] }
 0x608   :  { %2694 = vmatpush.msrb.mxu3 %v8933_v35  ;;  %2675 = vmatpush.msrb.mxu2 %v8942_v43  ;;  %10516 = vst [vmem:[#allocation44_spill] sm:$0xff] %v8949_v59  ;;  %v8958_v35 = vld [vmem:[%s9368_s1 + $0x3c0] sm:$0xff] }
 0x609   :  { %2714 = vmatpush.msra.mxu0 %v8309_v18  ;;  %2799 = vmatpush.msra.mxu1 %v3844_v48  ;;  %10517 = vst [vmem:[#allocation17_spill] sm:$0xff] %v8958_v35  ;;  %v8965_v18 = vld [vmem:[%s9368_s1 + $0x3c8] sm:$0xff]  ;;  %v3847_v48 = vld [vmem:[%s9368_s1 + $0x60] sm:$0xff] }
 0x60a   :  { %2695 = vmatpush.msrb.mxu3 %v8949_v59  ;;  %2676 = vmatpush.msrb.mxu2 %v8958_v35  ;;  %10518 = vst [vmem:[#allocation73_spill] sm:$0xff] %v8965_v18  ;;  %v8974_v59 = vld [vmem:[%s9368_s1 + $0x3a8] sm:$0xff]  ;;  %v10540_v35 = vld [vmem:[#allocation60_spill] sm:$0xff] }
 0x60b   :  { %2715 = vmatpush.msra.mxu0 %v8318_v12  ;;  %2800 = vmatpush.msra.mxu1 %v3847_v48  ;;  %10519 = vst [vmem:[#allocation72_spill] sm:$0xff] %v8974_v59  ;;  %v8981_v12 = vld [vmem:[%s9368_s1 + $0x3b0] sm:$0xff]  ;;  %v3850_v48 = vld [vmem:[%s9368_s1 + $0x48] sm:$0xff] }
 0x60c   :  { %2696 = vmatpush.msrb.mxu3 %v8965_v18  ;;  %2677 = vmatpush.msrb.mxu2 %v8974_v59  ;;  %10520 = vst [vmem:[#allocation4_spill] sm:$0xff] %v8981_v12  ;;  %v8990_v18 = vld [vmem:[%s9368_s1 + $0x390] sm:$0xff]  ;;  %v10537_v59 = vld [vmem:[#allocation23_spill] sm:$0xff] }
 0x60d   :  { %2716 = vmatpush.msra.mxu0 %v8327_v23  ;;  %2801 = vmatpush.msra.mxu1 %v3850_v48  ;;  %10521 = vst [vmem:[#allocation52_spill] sm:$0xff] %v8990_v18  ;;  %v8997_v23 = vld [vmem:[%s9368_s1 + $0x398] sm:$0xff]  ;;  %v3853_v48 = vld [vmem:[%s9368_s1 + $0x30] sm:$0xff] }
 0x60e   :  { %2697 = vmatpush.msrb.mxu3 %v8981_v12  ;;  %2678 = vmatpush.msrb.mxu2 %v8990_v18  ;;  %10522 = vst [vmem:[#allocation50_spill] sm:$0xff] %v8997_v23  ;;  %v9006_v12 = vld [vmem:[%s9368_s1 + $0x378] sm:$0xff]  ;;  %v10536_v18 = vld [vmem:[#allocation83_spill] sm:$0xff] }
 0x60f   :  { %2717 = vmatpush.msra.mxu0 %v8336_v36  ;;  %2802 = vmatpush.msra.mxu1 %v3853_v48  ;;  %10523 = vst [vmem:[#allocation5_spill] sm:$0xff] %v9006_v12  ;;  %v9014_v36 = vld [vmem:[%s9368_s1 + $0x360] sm:$0xff]  ;;  %v9022_v48 = vld [vmem:[%s9368_s1 + $0x348] sm:$0xff] }
 0x610   :  { %2698 = vmatpush.msrb.mxu3 %v8997_v23  ;;  %2679 = vmatpush.msrb.mxu2 %v9006_v12  ;;  %10524 = vst [vmem:[#allocation7_spill] sm:$0xff] %v9014_v36  ;;  %v10531_v23 = vld [vmem:[#allocation81_spill] sm:$0xff]  ;;  %v10535_v12 = vld [vmem:[#allocation15_spill] sm:$0xff] }
 0x611   :  { %2718 = vmatpush.msra.mxu0 %v8345_v1  ;;  %10525 = vst [vmem:[#allocation75_spill] sm:$0xff] %v9022_v48  ;;  %v10526_v1 = vld [vmem:[#allocation12_spill] sm:$0xff] }
 0x612   :  { %2699 = vmatpush.msrb.mxu3 %v8351_v8  ;;  %2680 = vmatpush.msrb.mxu2 %v9014_v36  ;;  %v9030_v8 = vld [vmem:[%s9368_s1 + $0x330] sm:$0xff]  ;;  %v10530_v36 = vld [vmem:[#allocation21_spill] sm:$0xff] }
 0x613   :  { %2719 = vmatpush.msra.mxu0 %v8359_v56  ;;  %10527 = vst [vmem:[#allocation9_spill] sm:$0xff] %v9030_v8  ;;  %v10528_v56 = vld [vmem:[#allocation30_spill] sm:$0xff] }
 0x614   :  { %2700 = vmatpush.msrb.mxu3 %v8365_v28  ;;  %2681 = vmatpush.msrb.mxu2 %v9022_v48  ;;  %v10529_v28 = vld [vmem:[#allocation26_spill] sm:$0xff]  ;;  %v10532_v48 = vld [vmem:[#allocation35_spill] sm:$0xff] }
 0x615   :  { %2720 = vmatpush.msra.mxu0 %v8372_v61  ;;  %v10533_v61 = vld [vmem:[#allocation22_spill] sm:$0xff] }
 0x616   :  { %2701 = vmatpush.msrb.mxu3 %v10526_v1  ;;  %2682 = vmatpush.msrb.mxu2 %v9030_v8  ;;  %v10534_v1 = vld [vmem:[#allocation58_spill] sm:$0xff] }
 0x617   :  { %2721 = vmatpush.msra.mxu0 %v10528_v56  ;;  %v3858_v56 = vld [vmem:[%s9368_s1 + $0xf8] sm:$0xff] }
 0x618   :  { %2807 = vmatpush.msra.mxu2 %v10529_v28  ;;  %2702 = vmatpush.msrb.mxu3 %v10530_v36  ;;  %v3860_v36 = vld [vmem:[%s9368_s1 + $0xc8] sm:$0xff]  ;;  %v3865_v28 = vld [vmem:[%s9368_s1 + $0x50] sm:$0xff] }
 0x619   :  { %2722 = vmatpush.msra.mxu0 %v10531_v23  ;;  %v3859_v23 = vld [vmem:[%s9368_s1 + $0xe0] sm:$0xff] }
 0x61a   :  { %2808 = vmatpush.msra.mxu2 %v10532_v48  ;;  %v3864_v48 = vld [vmem:[%s9368_s1 + $0x68] sm:$0xff] }
 0x61c   :  { %2809 = vmatpush.msra.mxu2 %v10533_v61  ;;  %v3866_v61 = vld [vmem:[%s9368_s1 + $0x38] sm:$0xff] }
 0x61e   :  { %2810 = vmatpush.msra.mxu2 %v10534_v1  ;;  %v2491_v1 = vpop.permute.xlu2 %2490 }
 0x61f   :  { %v2493_v43 = vmul.f32 %v2491_v1, %v10540_v35  ;;  %v2495_v62 = vmul.f32 %v2491_v1, %v10395_v9 }
 0x620   :  { %2811 = vmatpush.msra.mxu2 %v10535_v12  ;;  %v3863_v12 = vld [vmem:[%s9368_s1 + $0x80] sm:$0xff] }
 0x621   :  { %v2496_v29 = vadd.f32 %v2493_v43, %v10542_v34 }
 0x622   :  { %2812 = vmatpush.msra.mxu2 %v10536_v18  ;;  %v3861_v18 = vld [vmem:[%s9368_s1 + $0xb0] sm:$0xff] }
 0x624   :  { %2813 = vmatpush.msra.mxu2 %v10537_v59  ;;  %v3862_v59 = vld [vmem:[%s9368_s1 + $0x98] sm:$0xff] }
 0x626   :  { %2814 = vmatpush.msra.mxu2 %v3858_v56 }
 0x628   :  { %2815 = vmatpush.msra.mxu2 %v3859_v23  ;;  %v10538_v23 = vld [vmem:[#allocation61_spill] sm:$0xff] }
 0x62a   :  { %2816 = vmatpush.msra.mxu2 %v3860_v36  ;;  %v2494_v36 = vmul.f32 %v2491_v1, %v10538_v23 }
 0x62c   :  { %2817 = vmatpush.msra.mxu2 %v3861_v18  ;;  %v10539_v18 = vld [vmem:[#allocation67_spill] sm:$0xff] }
 0x62e   :  { %2818 = vmatpush.msra.mxu2 %v3862_v59  ;;  %v2497_v59 = vadd.f32 %v2494_v36, %v10539_v18  ;;  %v10543_v18 = vld [vmem:[#allocation68_spill] sm:$0xff] }
 0x630   :  { %2819 = vmatpush.msra.mxu2 %v3863_v12 }
 0x632   :  { %2820 = vmatpush.msra.mxu2 %v3864_v48 }
 0x634   :  { %2821 = vmatpush.msra.mxu2 %v3865_v28 }
 0x636   :  { %2822 = vmatpush.msra.mxu2 %v3866_v61 }
 0x645   :  { %v2396_v56 = vpop.f32.mrf.mxu1 }
 0x654   :  { %v9072_v12 = vpop.f32.mrf.mxu0  ;;  %v2536_v8 = vpop.f32.mrf.mxu1 }
 0x655   :  { %v2579_v48 = vadd.f32 %v2536_v8, %v2497_v59 }
 0x657   :  { %v3110_v46 = vmul.f32 -1.442695, %v2579_v48 }
 0x659   :  { %3272 = vpow2.f32 %v3110_v46  ;;  %v2336_v28 = vpop.f32.mrf.mxu2  ;;  %v2356_v23 = vpop.f32.mrf.mxu3 }
 0x65a   :  { %v2337_v5 = vadd.f32 %v2336_v28, %v10541_v42  ;;  %v2357_v2 = vadd.f32 %v2356_v23, %v10543_v18 }
 0x65c   :  { %v2439_v61 = vadd.f32 %v2396_v56, %v2337_v5  ;;  %v2516_v38 = vpop.f32.mrf.mxu0 }
 0x65d   :  { %v2559_v49 = vadd.f32 %v2516_v38, %v2496_v29 }
 0x65e   :  { %v3107_v22 = vmul.f32 -1.442695, %v2439_v61 }
 0x65f   :  { %v3273_v26 = vpop.eup %3272  ;;  %v3109_v36 = vmul.f32 -1.442695, %v2559_v49 }
 0x660   :  { %3274 = vpow2.f32 %v3107_v22  ;;  %v9078_v8 = vadd.f32 1.0, %v3273_v26 }
 0x661   :  { %3276 = vpow2.f32 %v3109_v36 }
 0x662   :  { %v2416_v59 = vpop.f32.mrf.mxu2  ;;  %3278 = vrcp.f32 %v9078_v8  ;;  %vm2589_vm3 = vweird.f32 %v9078_v8 }
 0x663   :  { %v2459_v46 = vadd.f32 %v2416_v59, %v2357_v2 }
 0x665   :  { %v3108_v48 = vmul.f32 -1.442695, %v2459_v46 }
 0x666   :  { %v3275_v35 = vpop.eup %3274 }
 0x667   :  { %v3277_v43 = vpop.eup %3276  ;;  %v2443_v5 = vadd.f32 1.0, %v3275_v35  ;;  %3280 = vpow2.f32 %v3108_v48  ;;  %v2436_v35 = vpop.f32.mrf.mxu3 }
 0x668   :  { %v2563_v38 = vadd.f32 1.0, %v3277_v43  ;;  %v9081_v29 = vpop.eup %3278  ;;  %v2479_v55 = vadd.f32 %v10544_v41, %v2436_v35 }
 0x669   :  { %3282 = vrcp.f32 %v2443_v5  ;;  %v2585_v2 = vmul.f32 %v9081_v29, %v9078_v8  ;;  %v2453_v36 = vand.u32 2147483647, %v2443_v5  ;;  %v2455_v59 = vand.u32 2147483648, %v2443_v5 }
 0x66a   :  { %3284 = vrcp.f32 %v2563_v38  ;;  %v2575_v18 = vand.u32 2147483648, %v2563_v38  ;;  %v2573_v34 = vand.u32 2147483647, %v2563_v38  ;;  %vm2449_vm10 = vweird.f32 %v2443_v5 }
 0x66b   :  { %v2586_v48 = vsub.f32 1.0, %v2585_v2  ;;  %v2456_v16 = vor.u32 1.1754944e-38, %v2455_v59  ;;  %vm2569_vm12 = vweird.f32 %v2563_v38  ;;  %vm2454_vm13 = vcmp.eq.f32.partialorder %v2453_v36, 8.507059e+37 }
 0x66c   :  { %vm2574_vm15 = vcmp.eq.f32.partialorder %v2573_v34, 8.507059e+37  ;;  %vm2590_vm1 = vweird.f32 %v9081_v29 }
 0x66d   :  { %v3281_v22 = vpop.eup %3280  ;;  %v2587_v2 = vmul.f32 %v9081_v29, %v2586_v48  ;;  %vm2591_vm5 = vmor %vm2589_vm3, %vm2590_vm1 }
 0x66e   :  { %v9083_v49 = vadd.f32 1.0, %v3281_v22 }
 0x66f   :  { %v3283_v56 = vpop.eup %3282  ;;  %v2588_v34 = vadd.f32 %v9081_v29, %v2587_v2 }
 0x670   :  { %v3285_v26 = vpop.eup %3284  ;;  %3286 = vrcp.f32 %v9083_v49  ;;  %v2445_v23 = vmul.f32 %v3283_v56, %v2443_v5  ;;  %vm2450_vm8 = vweird.f32 %v3283_v56  ;;  %v10545_v5 = vld [vmem:[#allocation10_spill] sm:$0xff]  ;;  %v2475_v59 = vand.u32 2147483648, %v9083_v49 }
 0x671   :  { %v2565_v28 = vmul.f32 %v3285_v26, %v2563_v38  ;;  %vm2570_vm9 = vweird.f32 %v3285_v26  ;;  %vm2451_vm11 = vmor %vm2449_vm10, %vm2450_vm8  ;;  %v2377_v35 = vadd.f32 %v9072_v12, %v10545_v5  ;;  %vm2469_vm2 = vweird.f32 %v9083_v49 }
 0x672   :  { %v2446_v61 = vsub.f32 1.0, %v2445_v23  ;;  %vm2571_vm14 = vmor %vm2569_vm12, %vm2570_vm9  ;;  %v2592_v48 = vsel %vm2591_vm5, %v9081_v29, %v2588_v34  ;;  %v10566_v34 = vld [vmem:[#allocation36_spill] sm:$0xff] }
 0x673   :  { %v2566_v46 = vsub.f32 1.0, %v2565_v28 }
 0x674   :  { %v2447_v43 = vmul.f32 %v3283_v56, %v2446_v61  ;;  %v2576_v61 = vor.u32 1.1754944e-38, %v2575_v18 }
 0x675   :  { %v2567_v22 = vmul.f32 %v3285_v26, %v2566_v46 }
 0x676   :  { %v3287_v42 = vpop.eup %3286  ;;  %v2448_v54 = vadd.f32 %v3283_v56, %v2447_v43 }
 0x677   :  { %v2465_v23 = vmul.f32 %v3287_v42, %v9083_v49  ;;  %v2568_v51 = vadd.f32 %v3285_v26, %v2567_v22  ;;  %vm2470_vm0 = vweird.f32 %v3287_v42 }
 0x678   :  { %v2452_v28 = vsel %vm2451_vm11, %v3283_v56, %v2448_v54  ;;  %v9099_v54 = vld [vmem:[%s9368_s1 + $0x2] ss:$0 sm:$0xff]  ;;  %vm2471_vm4 = vmor %vm2469_vm2, %vm2470_vm0 }
 0x679   :  { %v2466_v46 = vsub.f32 1.0, %v2465_v23  ;;  %v2457_v60 = vsel %vm2454_vm13, %v2456_v16, %v2452_v28  ;;  %v2572_v1 = vsel %vm2571_vm14, %v3285_v26, %v2568_v51  ;;  %v2473_v51 = vand.u32 2147483647, %v9083_v49 }
 0x67a   :  { %v2480_v43 = vmul.f32 %v2479_v55, %v2457_v60  ;;  %v2556_v41 = vpop.f32.mrf.mxu2  ;;  %v2577_v9 = vsel %vm2574_vm15, %v2576_v61, %v2572_v1  ;;  %v2498_v16 = vadd.f32 %v2495_v62, %v10396_v44  ;;  %v2595_v55 = vand.u32 2147483648, %v9078_v8 }
 0x67b   :  { %v2467_v38 = vmul.f32 %v3287_v42, %v2466_v46  ;;  %v2599_v18 = vadd.f32 %v9099_v54, %v2556_v41  ;;  %v2593_v41 = vand.u32 2147483647, %v9078_v8  ;;  %v2476_v26 = vor.u32 1.1754944e-38, %v2475_v59  ;;  %v10563_v59 = vld [vmem:[#allocation43_spill] sm:$0xff] }
 0x67c   :  { %v2481_v60 = vadd.f32 %v2480_v43, %v2377_v35  ;;  %vm2474_vm6 = vcmp.eq.f32.partialorder %v2473_v51, 8.507059e+37  ;;  %v2596_v23 = vor.u32 1.1754944e-38, %v2595_v55  ;;  %v10562_v43 = vld [vmem:[#allocation37_spill] sm:$0xff]  ;;  %v3885_v51 = vld [vmem:[%s9368_s1 + $0x4a8] sm:$0xff]  ;;  %v3886_v55 = vld [vmem:[%s9368_s1 + $0x490] sm:$0xff] }
 0x67d   :  { %v2600_v12 = vmul.f32 %v2599_v18, %v2577_v9  ;;  %v2468_v56 = vadd.f32 %v3287_v42, %v2467_v38  ;;  %vm2594_vm7 = vcmp.eq.f32.partialorder %v2593_v41, 8.507059e+37  ;;  %v3884_v38 = vld [vmem:[%s9368_s1 + $0x1b8] sm:$0xff]  ;;  %v10564_v18 = vld [vmem:[#allocation16_spill] sm:$0xff] }
 0x67e   :  { %3288 = vtanh.f32 %v2481_v60  ;;  %v2597_v49 = vsel %vm2594_vm7, %v2596_v23, %v2592_v48  ;;  %v10567_v60 = vld [vmem:[#allocation71_spill] sm:$0xff]  ;;  %v3887_v41 = vld [vmem:[%s9368_s1 + $0x478] sm:$0xff]  ;;  %v10572_v48 = vld [vmem:[#allocation40_spill] sm:$0xff] }
 0x67f   :  { %v2601_v62 = vadd.f32 %v2600_v12, %v2498_v16  ;;  %v2472_v36 = vsel %vm2471_vm4, %v3287_v42, %v2468_v56  ;;  %v2603_v8 = vsub.f32 1.0, %v2597_v49  ;;  %v2605_v42 = vmul.f32 %v2597_v49, %v8527_v6  ;;  %v3870_v6 = vld [vmem:[%s9368_s1 + $0x2f0] sm:$0xff]  ;;  %v10565_v16 = vld [vmem:[#allocation19_spill] sm:$0xff] }
 0x680   :  { %v2477_v22 = vsel %vm2474_vm6, %v2476_v26, %v2472_v36  ;;  %v10568_v12 = vld [vmem:[#allocation48_spill] sm:$0xff]  ;;  %v3888_v36 = vld [vmem:[%s9368_s1 + $0x460] sm:$0xff]  ;;  %v3889_v23 = vld [vmem:[%s9368_s1 + $0x448] sm:$0xff] }
 0x681   :  { %3290 = vtanh.f32 %v2601_v62  ;;  %v2483_v9 = vsub.f32 1.0, %v2477_v22  ;;  %v2485_v61 = vmul.f32 %v2477_v22, %v8482_v47  ;;  %v3868_v47 = vld [vmem:[%s9368_s1 + $0x320] sm:$0xff]  ;;  %v10569_v56 = vld [vmem:[#allocation24_spill] sm:$0xff]  ;;  %v10571_v62 = vld [vmem:[#allocation63_spill] sm:$0xff] }
 0x682   :  { %v10570_v26 = vld [vmem:[#allocation28_spill] sm:$0xff]  ;;  %v10573_v22 = vld [vmem:[#allocation74_spill] sm:$0xff] }
 0x683   :  { %v10574_v49 = vld [vmem:[#allocation56_spill] sm:$0xff] }
 0x684   :  { %v3289_v2 = vpop.eup %3288 }
 0x685   :  { %v2484_v28 = vmul.f32 %v3289_v2, %v2483_v9  ;;  %v10575_v9 = vld [vmem:[#allocation38_spill] sm:$0xff]  ;;  %v3890_v2 = vld [vmem:[%s9368_s1 + $0x430] sm:$0xff] }
 0x687   :  { %v3291_v46 = vpop.eup %3290  ;;  %v9112_v1 = vadd.f32 %v2485_v61, %v2484_v28  ;;  %v10576_v28 = vld [vmem:[#allocation69_spill] sm:$0xff]  ;;  %v10577_v61 = vld [vmem:[#allocation70_spill] sm:$0xff] }
 0x688   :  { %v2604_v35 = vmul.f32 %v3291_v46, %v2603_v8  ;;  %v3891_v8 = vld [vmem:[%s9368_s1 + $0x418] sm:$0xff]  ;;  %v10578_v46 = vld [vmem:[#allocation46_spill] sm:$0xff] }
 0x689   :  { %2683 = vmatmul.f32.vlgmr.msrb.gmra.mxu2 %v9112_v1 }
 0x68a   :  { %v9116_v29 = vadd.f32 %v2605_v42, %v2604_v35  ;;  %2935 = vmatpush.msrb.mxu2 %v8492_v15  ;;  %v3869_v15 = vld [vmem:[%s9368_s1 + $0x308] sm:$0xff]  ;;  %v3892_v42 = vld [vmem:[%s9368_s1 + $0x400] sm:$0xff] }
 0x68b   :  { %v10579_v35 = vld [vmem:[#allocation11_spill] sm:$0xff] }
 0x68c   :  { %2623 = vmatmul.f32.vlgmr.msra.gmra.mxu3 %v9116_v29  ;;  %2643 = vmatmul.f32.vlgmr.msrb.gmra.mxu0 %v9116_v29 }
 0x68d   :  { %2663 = vmatmul.f32.vlgmr.msrb.gmra.mxu1 %v9116_v29  ;;  %2827 = vmatpush.msra.mxu3 %v8537_v63  ;;  %v3873_v63 = vld [vmem:[%s9368_s1 + $0x2a8] sm:$0xff] }
 0x68e   :  { %2895 = vmatpush.msrb.mxu0 %v8543_v3  ;;  %2915 = vmatpush.msrb.mxu1 %v3868_v47  ;;  %v3877_v3 = vld [vmem:[%s9368_s1 + $0x260] sm:$0xff]  ;;  %v10580_v47 = vld [vmem:[#allocation17_spill] sm:$0xff] }
 0x68f   :  { %2828 = vmatpush.msra.mxu3 %v8556_v25  ;;  %2936 = vmatpush.msrb.mxu2 %v8499_v32  ;;  %v3871_v32 = vld [vmem:[%s9368_s1 + $0x2d8] sm:$0xff]  ;;  %v3878_v25 = vld [vmem:[%s9368_s1 + $0x248] sm:$0xff] }
 0x690   :  { %2896 = vmatpush.msrb.mxu0 %v8562_v57  ;;  %2916 = vmatpush.msrb.mxu1 %v3869_v15  ;;  %v10547_v57 = vld [vmem:[#allocation59_spill] sm:$0xff]  ;;  %v10581_v15 = vld [vmem:[#allocation44_spill] sm:$0xff] }
 0x691   :  { %2829 = vmatpush.msra.mxu3 %v8575_v30  ;;  %2823 = vmatmul.f32.vlgmr.msra.gmra.mxu2 %v9116_v29  ;;  %v3879_v30 = vld [vmem:[%s9368_s1 + $0x230] sm:$0xff] }
 0x692   :  { %2897 = vmatpush.msrb.mxu0 %v8581_v52  ;;  %2917 = vmatpush.msrb.mxu1 %v3870_v6  ;;  %v10548_v52 = vld [vmem:[#allocation51_spill] sm:$0xff] }
 0x693   :  { %2830 = vmatpush.msra.mxu3 %v8594_v13  ;;  %2937 = vmatpush.msrb.mxu2 %v8505_v53  ;;  %v3872_v53 = vld [vmem:[%s9368_s1 + $0x2c0] sm:$0xff]  ;;  %v10550_v13 = vld [vmem:[#allocation65_spill] sm:$0xff]  ;;  %v3893_v6 = vld [vmem:[%s9368_s1 + $0x3e8] sm:$0xff] }
 0x694   :  { %2703 = vmatmul.f32.vlgmr.msrb.gmra.mxu3 %v9112_v1  ;;  %2723 = vmatmul.f32.vlgmr.msra.gmra.mxu0 %v9112_v1 }
 0x695   :  { %2803 = vmatmul.f32.vlgmr.msra.gmra.mxu1 %v9116_v29  ;;  %2831 = vmatpush.msra.mxu3 %v8603_v39  ;;  %v3880_v39 = vld [vmem:[%s9368_s1 + $0x218] sm:$0xff] }
 0x696   :  { %2898 = vmatpush.msrb.mxu0 %v8609_v11  ;;  %2918 = vmatpush.msrb.mxu1 %v3871_v32  ;;  %v10551_v11 = vld [vmem:[#allocation13_spill] sm:$0xff]  ;;  %v10582_v32 = vld [vmem:[#allocation72_spill] sm:$0xff] }
 0x697   :  { %2832 = vmatpush.msra.mxu3 %v8622_v17  ;;  %2938 = vmatpush.msrb.mxu2 %v8511_v7  ;;  %v3874_v7 = vld [vmem:[%s9368_s1 + $0x290] sm:$0xff]  ;;  %v10552_v17 = vld [vmem:[#allocation49_spill] sm:$0xff] }
 0x698   :  { %2899 = vmatpush.msrb.mxu0 %v8628_v19  ;;  %2919 = vmatpush.msrb.mxu1 %v3872_v53  ;;  %v10553_v19 = vld [vmem:[#allocation18_spill] sm:$0xff]  ;;  %v10583_v53 = vld [vmem:[#allocation73_spill] sm:$0xff] }
 0x699   :  { %2833 = vmatpush.msra.mxu3 %v8641_v10  ;;  %2939 = vmatpush.msrb.mxu2 %v8517_v58  ;;  %v3875_v58 = vld [vmem:[%s9368_s1 + $0x298] sm:$0xff]  ;;  %v3881_v10 = vld [vmem:[%s9368_s1 + $0x200] sm:$0xff] }
 0x69a   :  { %2900 = vmatpush.msrb.mxu0 %v8647_v45  ;;  %2920 = vmatpush.msrb.mxu1 %v3873_v63  ;;  %v10554_v45 = vld [vmem:[#allocation42_spill] sm:$0xff]  ;;  %v3894_v63 = vld [vmem:[%s9368_s1 + $0x3d0] sm:$0xff] }
 0x69b   :  { %2834 = vmatpush.msra.mxu3 %v8660_v14  ;;  %2940 = vmatpush.msrb.mxu2 %v8524_v24  ;;  %v3876_v24 = vld [vmem:[%s9368_s1 + $0x278] sm:$0xff]  ;;  %v10555_v14 = vld [vmem:[#allocation34_spill] sm:$0xff] }
 0x69c   :  { %2901 = vmatpush.msrb.mxu0 %v8666_v27  ;;  %2921 = vmatpush.msrb.mxu1 %v3874_v7  ;;  %v10556_v27 = vld [vmem:[#allocation80_spill] sm:$0xff] }
 0x69d   :  { %2835 = vmatpush.msra.mxu3 %v8679_v31  ;;  %2941 = vmatpush.msrb.mxu2 %v3875_v58  ;;  %v3882_v31 = vld [vmem:[%s9368_s1 + $0x1e8] sm:$0xff]  ;;  %v10584_v7 = vld [vmem:[#allocation52_spill] sm:$0xff] }
 0x69e   :  { %2902 = vmatpush.msrb.mxu0 %v8685_v4  ;;  %2922 = vmatpush.msrb.mxu1 %v3876_v24  ;;  %v10557_v4 = vld [vmem:[#allocation57_spill] sm:$0xff]  ;;  %v10585_v58 = vld [vmem:[#allocation4_spill] sm:$0xff] }
 0x69f   :  { %2836 = vmatpush.msra.mxu3 %v8698_v40  ;;  %2942 = vmatpush.msrb.mxu2 %v8550_v0  ;;  %v10546_v0 = vld [vmem:[#allocation32_spill] sm:$0xff]  ;;  %v10558_v40 = vld [vmem:[#allocation25_spill] sm:$0xff] }
 0x6a0   :  { %2903 = vmatpush.msrb.mxu0 %v8704_v50  ;;  %2923 = vmatpush.msrb.mxu1 %v3877_v3  ;;  %v10559_v50 = vld [vmem:[#allocation39_spill] sm:$0xff]  ;;  %v3895_v24 = vld [vmem:[%s9368_s1 + $0x3b8] sm:$0xff] }
 0x6a1   :  { %2837 = vmatpush.msra.mxu3 %v8717_v37  ;;  %2943 = vmatpush.msrb.mxu2 %v8569_v21  ;;  %v10549_v21 = vld [vmem:[#allocation53_spill] sm:$0xff]  ;;  %v3883_v37 = vld [vmem:[%s9368_s1 + $0x1d0] sm:$0xff] }
 0x6a2   :  { %2904 = vmatpush.msrb.mxu0 %v8723_v33  ;;  %2924 = vmatpush.msrb.mxu1 %v3878_v25  ;;  %v10561_v33 = vld [vmem:[#allocation41_spill] sm:$0xff]  ;;  %v10587_v25 = vld [vmem:[#allocation50_spill] sm:$0xff] }
 0x6a3   :  { %2838 = vmatpush.msra.mxu3 %v8733_v20  ;;  %2944 = vmatpush.msrb.mxu2 %v10546_v0  ;;  %v10560_v20 = vld [vmem:[#allocation55_spill] sm:$0xff]  ;;  %v10586_v3 = vld [vmem:[#allocation5_spill] sm:$0xff]  ;;  %v3896_v0 = vld [vmem:[%s9368_s1 + $0x3a0] sm:$0xff] }
 0x6a4   :  { %2905 = vmatpush.msrb.mxu0 %v10547_v57  ;;  %2925 = vmatpush.msrb.mxu1 %v3879_v30  ;;  %v10588_v57 = vld [vmem:[#allocation7_spill] sm:$0xff]  ;;  %v3897_v30 = vld [vmem:[%s9368_s1 + $0x380] sm:$0xff] }
 0x6a5   :  { %2839 = vmatpush.msra.mxu3 %v10548_v52  ;;  %2945 = vmatpush.msrb.mxu2 %v10549_v21  ;;  %v3898_v52 = vld [vmem:[%s9368_s1 + $0x388] sm:$0xff] }
 0x6a6   :  { %2906 = vmatpush.msrb.mxu0 %v10550_v13  ;;  %2926 = vmatpush.msrb.mxu1 %v3880_v39  ;;  %v10589_v21 = vld [vmem:[#allocation75_spill] sm:$0xff]  ;;  %v3900_v39 = vld [vmem:[%s9368_s1 + $0x370] sm:$0xff] }
 0x6a7   :  { %2840 = vmatpush.msra.mxu3 %v10551_v11  ;;  %2946 = vmatpush.msrb.mxu2 %v10552_v17  ;;  %v3899_v13 = vld [vmem:[%s9368_s1 + $0x368] sm:$0xff]  ;;  %v10590_v11 = vld [vmem:[#allocation9_spill] sm:$0xff]  ;;  %v3901_v17 = vld [vmem:[%s9368_s1 + $0x350] sm:$0xff] }
 0x6a8   :  { %2907 = vmatpush.msrb.mxu0 %v10553_v19  ;;  %2927 = vmatpush.msrb.mxu1 %v3881_v10  ;;  %v3902_v19 = vld [vmem:[%s9368_s1 + $0x358] sm:$0xff] }
 0x6a9   :  { %2841 = vmatpush.msra.mxu3 %v10554_v45  ;;  %2947 = vmatpush.msrb.mxu2 %v10555_v14  ;;  %v3903_v10 = vld [vmem:[%s9368_s1 + $0x338] sm:$0xff]  ;;  %v3904_v45 = vld [vmem:[%s9368_s1 + $0x340] sm:$0xff]  ;;  %v2779_v14 = vpop.permute.xlu0 %2778 }
 0x6aa   :  { %2908 = vmatpush.msrb.mxu0 %v10556_v27  ;;  %2928 = vmatpush.msrb.mxu1 %v3882_v31 }
 0x6ab   :  { %2842 = vmatpush.msra.mxu3 %v10557_v4  ;;  %2948 = vmatpush.msrb.mxu2 %v10558_v40  ;;  %v10591_v4 = vld [vmem:[#allocation60_spill] sm:$0xff] }
 0x6ac   :  { %2843 = vmatmul.f32.vlgmr.msra.gmra.mxu3 %v9116_v29  ;;  %2909 = vmatpush.msrb.mxu0 %v10559_v50  ;;  %v2781_v40 = vmul.f32 %v2779_v14, %v10591_v4  ;;  %v10592_v50 = vld [vmem:[#allocation61_spill] sm:$0xff] }
 0x6ad   :  { %2955 = vmatpush.msrb.mxu3 %v10560_v20  ;;  %2929 = vmatpush.msrb.mxu1 %v3883_v37  ;;  %v2782_v20 = vmul.f32 %v2779_v14, %v10592_v50 }
 0x6ae   :  { %2910 = vmatpush.msrb.mxu0 %v10561_v33  ;;  %2949 = vmatpush.msrb.mxu2 %v10562_v43  ;;  %v10593_v33 = vld [vmem:[#allocation31_spill] sm:$0xff] }
 0x6af   :  { %2956 = vmatpush.msrb.mxu3 %v10563_v59  ;;  %2930 = vmatpush.msrb.mxu1 %v3884_v38  ;;  %v10594_v59 = vld [vmem:[#allocation66_spill] sm:$0xff] }
 0x6b0   :  { %2975 = vmatpush.msra.mxu0 %v10564_v18  ;;  %2950 = vmatpush.msrb.mxu2 %v10566_v34  ;;  %v2784_v38 = vadd.f32 %v2781_v40, %v10594_v59 }
 0x6b1   :  { %2995 = vmatpush.msra.mxu1 %v3885_v51  ;;  %2957 = vmatpush.msrb.mxu3 %v10565_v16 }
 0x6b2   :  { %2976 = vmatpush.msra.mxu0 %v10567_v60  ;;  %v10595_v60 = vld [vmem:[#allocation67_spill] sm:$0xff] }
 0x6b3   :  { %2996 = vmatpush.msra.mxu1 %v3886_v55  ;;  %2958 = vmatpush.msrb.mxu3 %v10568_v12  ;;  %v2785_v55 = vadd.f32 %v2782_v20, %v10595_v60 }
 0x6b4   :  { %2977 = vmatpush.msra.mxu0 %v10569_v56 }
 0x6b5   :  { %2997 = vmatpush.msra.mxu1 %v3887_v41  ;;  %2959 = vmatpush.msrb.mxu3 %v10570_v26 }
 0x6b6   :  { %2978 = vmatpush.msra.mxu0 %v10571_v62  ;;  %v10596_v62 = vld [vmem:[#allocation68_spill] sm:$0xff] }
 0x6b7   :  { %2998 = vmatpush.msra.mxu1 %v3888_v36  ;;  %2960 = vmatpush.msrb.mxu3 %v10572_v48 }
 0x6b8   :  { %2979 = vmatpush.msra.mxu0 %v10573_v22 }
 0x6b9   :  { %2999 = vmatpush.msra.mxu1 %v3889_v23  ;;  %2961 = vmatpush.msrb.mxu3 %v10574_v49 }
 0x6ba   :  { %2980 = vmatpush.msra.mxu0 %v10575_v9 }
 0x6bb   :  { %3000 = vmatpush.msra.mxu1 %v3890_v2  ;;  %2962 = vmatpush.msrb.mxu3 %v10576_v28 }
 0x6bc   :  { %2981 = vmatpush.msra.mxu0 %v10577_v61 }
 0x6bd   :  { %3001 = vmatpush.msra.mxu1 %v3891_v8  ;;  %2963 = vmatpush.msrb.mxu3 %v10578_v46 }
 0x6be   :  { %2982 = vmatpush.msra.mxu0 %v10579_v35 }
 0x6bf   :  { %3002 = vmatpush.msra.mxu1 %v3892_v42  ;;  %2964 = vmatpush.msrb.mxu3 %v10580_v47  ;;  %v10597_v47 = vld [vmem:[#allocation82_spill] sm:$0xff] }
 0x6c0   :  { %2983 = vmatpush.msra.mxu0 %v10581_v15  ;;  %v2783_v15 = vmul.f32 %v2779_v14, %v10597_v47 }
 0x6c1   :  { %3003 = vmatpush.msra.mxu1 %v3893_v6  ;;  %2965 = vmatpush.msrb.mxu3 %v10582_v32 }
 0x6c2   :  { %2984 = vmatpush.msra.mxu0 %v10583_v53 }
 0x6c3   :  { %3004 = vmatpush.msra.mxu1 %v3894_v63  ;;  %2966 = vmatpush.msrb.mxu3 %v10584_v7 }
 0x6c4   :  { %2985 = vmatpush.msra.mxu0 %v10585_v58  ;;  %v2786_v58 = vadd.f32 %v2783_v15, %v10396_v44 }
 0x6c5   :  { %3005 = vmatpush.msra.mxu1 %v3895_v24  ;;  %2967 = vmatpush.msrb.mxu3 %v10586_v3 }
 0x6c6   :  { %2986 = vmatpush.msra.mxu0 %v10587_v25 }
 0x6c7   :  { %3006 = vmatpush.msra.mxu1 %v3896_v0  ;;  %2968 = vmatpush.msrb.mxu3 %v10588_v57 }
 0x6c8   :  { %2987 = vmatpush.msra.mxu0 %v3897_v30 }
 0x6c9   :  { %3007 = vmatpush.msra.mxu1 %v3898_v52  ;;  %2969 = vmatpush.msrb.mxu3 %v10589_v21 }
 0x6ca   :  { %2988 = vmatpush.msra.mxu0 %v3899_v13 }
 0x6cb   :  { %3008 = vmatpush.msra.mxu1 %v3900_v39  ;;  %2970 = vmatpush.msrb.mxu3 %v10590_v11 }
 0x6cc   :  { %2989 = vmatpush.msra.mxu0 %v3901_v17  ;;  %v10598_v17 = vld [vmem:[#allocation45_spill] sm:$0xff] }
 0x6cd   :  { %3009 = vmatpush.msra.mxu1 %v3902_v19 }
 0x6ce   :  { %2990 = vmatpush.msra.mxu0 %v3903_v10 }
 0x6cf   :  { %3010 = vmatpush.msra.mxu1 %v3904_v45 }
 0x709   :  { %v2644_v16 = vpop.f32.mrf.mxu0 }
 0x70a   :  { %v2664_v27 = vpop.f32.mrf.mxu1  ;;  %v2645_v36 = vadd.f32 %v2644_v16, %v10596_v62 }
 0x70b   :  { %v2665_v24 = vadd.f32 %v2664_v27, %v10545_v5 }
 0x70c   :  { %v2684_v31 = vpop.f32.mrf.mxu2 }
 0x70f   :  { %v2624_v37 = vpop.f32.mrf.mxu3 }
 0x710   :  { %v2625_v43 = vadd.f32 %v2624_v37, %v10593_v33 }
 0x711   :  { %v2724_v3 = vpop.f32.mrf.mxu0 }
 0x712   :  { %v2727_v18 = vadd.f32 %v2684_v31, %v2625_v43  ;;  %v2804_v51 = vpop.f32.mrf.mxu1  ;;  %v2767_v19 = vadd.f32 %v10598_v17, %v2724_v3 }
 0x713   :  { %v2847_v34 = vadd.f32 %v2804_v51, %v2784_v38 }
 0x714   :  { %v3111_v12 = vmul.f32 -1.442695, %v2727_v18  ;;  %v2824_v56 = vpop.f32.mrf.mxu2 }
 0x715   :  { %v3113_v41 = vmul.f32 -1.442695, %v2847_v34  ;;  %v2867_v26 = vadd.f32 %v2824_v56, %v2785_v55 }
 0x716   :  { %3292 = vpow2.f32 %v3111_v12 }
 0x717   :  { %3294 = vpow2.f32 %v3113_v41  ;;  %v3114_v48 = vmul.f32 -1.442695, %v2867_v26  ;;  %v2704_v22 = vpop.f32.mrf.mxu3 }
 0x718   :  { %v2747_v23 = vadd.f32 %v2704_v22, %v2645_v36 }
 0x719   :  { %3296 = vpow2.f32 %v3114_v48 }
 0x71a   :  { %v3112_v49 = vmul.f32 -1.442695, %v2747_v23 }
 0x71c   :  { %v3293_v9 = vpop.eup %3292  ;;  %3298 = vpow2.f32 %v3112_v49 }
 0x71d   :  { %v3295_v2 = vpop.eup %3294  ;;  %v2731_v28 = vadd.f32 1.0, %v3293_v9 }
 0x71e   :  { %v2851_v61 = vadd.f32 1.0, %v3295_v2 }
 0x71f   :  { %v3297_v8 = vpop.eup %3296  ;;  %3300 = vrcp.f32 %v2731_v28  ;;  %v2741_v0 = vand.u32 2147483647, %v2731_v28  ;;  %v2743_v57 = vand.u32 2147483648, %v2731_v28  ;;  %vm2737_vm10 = vweird.f32 %v2731_v28 }
 0x720   :  { %3302 = vrcp.f32 %v2851_v61  ;;  %v9318_v46 = vadd.f32 1.0, %v3297_v8  ;;  %v2861_v13 = vand.u32 2147483647, %v2851_v61  ;;  %v2863_v39 = vand.u32 2147483648, %v2851_v61 }
 0x721   :  { %vm2857_vm11 = vweird.f32 %v2851_v61  ;;  %vm2742_vm13 = vcmp.eq.f32.partialorder %v2741_v0, 8.507059e+37  ;;  %v2744_v27 = vor.u32 1.1754944e-38, %v2743_v57 }
 0x722   :  { %v3299_v35 = vpop.eup %3298  ;;  %3304 = vrcp.f32 %v9318_v46  ;;  %vm2862_vm15 = vcmp.eq.f32.partialorder %v2861_v13, 8.507059e+37  ;;  %v2864_v20 = vor.u32 1.1754944e-38, %v2863_v39  ;;  %v2883_v12 = vand.u32 2147483648, %v9318_v46 }
 0x723   :  { %v9321_v42 = vadd.f32 1.0, %v3299_v35  ;;  %vm2877_vm3 = vweird.f32 %v9318_v46  ;;  %v2881_v36 = vand.u32 2147483647, %v9318_v46 }
 0x724   :  { %v2884_v9 = vor.u32 1.1754944e-38, %v2883_v12 }
 0x725   :  { %v3301_v6 = vpop.eup %3300  ;;  %3306 = vrcp.f32 %v9321_v42  ;;  %v2763_v38 = vand.u32 2147483648, %v9321_v42  ;;  %v2761_v60 = vand.u32 2147483647, %v9321_v42  ;;  %vm2757_vm2 = vweird.f32 %v9321_v42 }
 0x726   :  { %v3303_v32 = vpop.eup %3302  ;;  %v2733_v53 = vmul.f32 %v3301_v6, %v2731_v28  ;;  %vm2738_vm8 = vweird.f32 %v3301_v6  ;;  %vm2882_vm7 = vcmp.eq.f32.partialorder %v2881_v36, 8.507059e+37 }
 0x727   :  { %v2853_v63 = vmul.f32 %v3303_v32, %v2851_v61  ;;  %vm2858_vm9 = vweird.f32 %v3303_v32  ;;  %vm2739_vm12 = vmor %vm2737_vm10, %vm2738_vm8  ;;  %v2764_v22 = vor.u32 1.1754944e-38, %v2763_v38  ;;  %vm2762_vm6 = vcmp.eq.f32.partialorder %v2761_v60, 8.507059e+37 }
 0x728   :  { %v9325_v7 = vpop.eup %3304  ;;  %v2734_v25 = vsub.f32 1.0, %v2733_v53  ;;  %vm2859_vm14 = vmor %vm2857_vm11, %vm2858_vm9 }
 0x729   :  { %v2873_v30 = vmul.f32 %v9325_v7, %v9318_v46  ;;  %v2854_v52 = vsub.f32 1.0, %v2853_v63  ;;  %vm2878_vm1 = vweird.f32 %v9325_v7 }
 0x72a   :  { %v2735_v21 = vmul.f32 %v3301_v6, %v2734_v25  ;;  %vm2879_vm5 = vmor %vm2877_vm3, %vm2878_vm1 }
 0x72b   :  { %v3307_v11 = vpop.eup %3306  ;;  %v2874_v10 = vsub.f32 1.0, %v2873_v30  ;;  %v2855_v45 = vmul.f32 %v3303_v32, %v2854_v52 }
 0x72c   :  { %v2736_v44 = vadd.f32 %v3301_v6, %v2735_v21  ;;  %v2753_v14 = vmul.f32 %v3307_v11, %v9321_v42  ;;  %vm2758_vm0 = vweird.f32 %v3307_v11 }
 0x72d   :  { %v2875_v31 = vmul.f32 %v9325_v7, %v2874_v10  ;;  %v2856_v4 = vadd.f32 %v3303_v32, %v2855_v45  ;;  %vm2759_vm4 = vmor %vm2757_vm2, %vm2758_vm0  ;;  %vm3069_vm0 = vcmask 7168  }
 0x72e   :  { %v2740_v40 = vsel %vm2739_vm12, %v3301_v6, %v2736_v44  ;;  %v2754_v50 = vsub.f32 1.0, %v2753_v14 }
 0x72f   :  { %v2745_v37 = vsel %vm2742_vm13, %v2744_v27, %v2740_v40  ;;  %v2844_v43 = vpop.f32.mrf.mxu3  ;;  %v2860_v59 = vsel %vm2859_vm14, %v3303_v32, %v2856_v4  ;;  %v2876_v55 = vadd.f32 %v9325_v7, %v2875_v31  ;;  %v3905_v40 = vld [vmem:[%s9368_s1 + $0x3] ss:$0 sm:$0xff] }
 0x730   :  { %v2768_v18 = vmul.f32 %v2767_v19, %v2745_v37  ;;  %v2755_v51 = vmul.f32 %v3307_v11, %v2754_v50  ;;  %v2865_v16 = vsel %vm2862_vm15, %v2864_v20, %v2860_v59  ;;  %v2887_v34 = vadd.f32 %v9099_v54, %v2844_v43 }
 0x731   :  { %v2880_v23 = vsel %vm2879_vm5, %v9325_v7, %v2876_v55 }
 0x732   :  { %v2769_v56 = vadd.f32 %v2768_v18, %v2665_v24  ;;  %v2888_v41 = vmul.f32 %v2887_v34, %v2865_v16  ;;  %v2756_v26 = vadd.f32 %v3307_v11, %v2755_v51  ;;  %v2885_v2 = vsel %vm2882_vm7, %v2884_v9, %v2880_v23 }
 0x733   :  { %v2891_v42 = vsub.f32 1.0, %v2885_v2  ;;  %v2893_v6 = vmul.f32 %v2885_v2, %v9116_v29 }
 0x734   :  { %3308 = vtanh.f32 %v2769_v56  ;;  %v2889_v54 = vadd.f32 %v2888_v41, %v2786_v58  ;;  %v2760_v48 = vsel %vm2759_vm4, %v3307_v11, %v2756_v26 }
 0x735   :  { %v2765_v49 = vsel %vm2762_vm6, %v2764_v22, %v2760_v48  ;;  %v3067_v48 = vld [vmem:[%s9368_s1 + $0x5] ss:$0 sm:$0xff] }
 0x736   :  { %3310 = vtanh.f32 %v2889_v54  ;;  %v2771_v28 = vsub.f32 1.0, %v2765_v49  ;;  %v2773_v35 = vmul.f32 %v2765_v49, %v9112_v1 }
 0x73a   :  { %v3309_v61 = vpop.eup %3308 }
 0x73b   :  { %v2772_v8 = vmul.f32 %v3309_v61, %v2771_v28 }
 0x73c   :  { %v3311_v46 = vpop.eup %3310 }
 0x73d   :  { %v9346_v47 = vadd.f32 %v2773_v35, %v2772_v8  ;;  %v2892_v15 = vmul.f32 %v3311_v46, %v2891_v42 }
 0x73f   :  { %2971 = vmatmul.f32.vlgmr.msrb.gmra.mxu3 %v9346_v47  ;;  %v2894_v32 = vadd.f32 %v2893_v6, %v2892_v15 }
 0x741   :  { %2911 = vmatmul.f32.vlgmr.msrb.gmra.mxu0 %v2894_v32  ;;  %2931 = vmatmul.f32.vlgmr.msrb.gmra.mxu1 %v2894_v32 }
 0x742   :  { %2951 = vmatmul.f32.vlgmr.msrb.gmra.mxu2 %v2894_v32 }
 0x749   :  { %2991 = vmatmul.f32.vlgmr.msra.gmra.mxu0 %v9346_v47  ;;  %3011 = vmatmul.f32.vlgmr.msra.gmra.mxu1 %v9346_v47 }
 0x7be   :  { %v2912_v53 = vpop.f32.mrf.mxu0  ;;  %v2932_v63 = vpop.f32.mrf.mxu1 }
 0x7bf   :  { %v2913_v1 = vadd.f32 %v2912_v53, %v10593_v33  ;;  %v2933_v24 = vadd.f32 %v2932_v63, %v10596_v62 }
 0x7c2   :  { %v2972_v7 = vpop.f32.mrf.mxu3 }
 0x7c3   :  { %v3015_v58 = vadd.f32 %v2972_v7, %v2913_v1 }
 0x7c5   :  { %v3115_v3 = vmul.f32 -1.442695, %v3015_v58  ;;  %v2952_v27 = vpop.f32.mrf.mxu2 }
 0x7c6   :  { %v2992_v29 = vpop.f32.mrf.mxu0  ;;  %v3012_v45 = vpop.f32.mrf.mxu1  ;;  %v2953_v43 = vadd.f32 %v2952_v27, %v10545_v5  ;;  %v3063_v5 = vld [vmem:[%s9368_s1 + $0x4] ss:$0 sm:$0xff] }
 0x7c7   :  { %3312 = vpow2.f32 %v3115_v3  ;;  %v3035_v25 = vadd.f32 %v2992_v29, %v2933_v24  ;;  %v3055_v50 = vadd.f32 %v3905_v40, %v3012_v45 }
 0x7c9   :  { %v3116_v0 = vmul.f32 -1.442695, %v3035_v25 }
 0x7cb   :  { %3314 = vpow2.f32 %v3116_v0 }
 0x7cd   :  { %v3313_v57 = vpop.eup %3312 }
 0x7ce   :  { %v3019_v30 = vadd.f32 1.0, %v3313_v57 }
 0x7d0   :  { %3316 = vrcp.f32 %v3019_v30  ;;  %v3031_v17 = vand.u32 2147483648, %v3019_v30  ;;  %v3029_v62 = vand.u32 2147483647, %v3019_v30  ;;  %vm3025_vm9 = vweird.f32 %v3019_v30 }
 0x7d1   :  { %v3315_v52 = vpop.eup %3314 }
 0x7d2   :  { %v3039_v21 = vadd.f32 1.0, %v3315_v52  ;;  %v3032_v31 = vor.u32 1.1754944e-38, %v3031_v17  ;;  %vm3030_vm11 = vcmp.eq.f32.partialorder %v3029_v62, 8.507059e+37 }
 0x7d4   :  { %3318 = vrcp.f32 %v3039_v21  ;;  %v3051_v18 = vand.u32 2147483648, %v3039_v21  ;;  %vm3045_vm13 = vweird.f32 %v3039_v21  ;;  %v3049_v51 = vand.u32 2147483647, %v3039_v21 }
 0x7d6   :  { %v3317_v13 = vpop.eup %3316  ;;  %v3052_v60 = vor.u32 1.1754944e-38, %v3051_v18  ;;  %vm3050_vm15 = vcmp.eq.f32.partialorder %v3049_v51, 8.507059e+37 }
 0x7d7   :  { %v3021_v39 = vmul.f32 %v3317_v13, %v3019_v30  ;;  %vm3026_vm8 = vweird.f32 %v3317_v13 }
 0x7d8   :  { %vm3027_vm10 = vmor %vm3025_vm9, %vm3026_vm8 }
 0x7d9   :  { %v3022_v33 = vsub.f32 1.0, %v3021_v39 }
 0x7da   :  { %v3319_v11 = vpop.eup %3318 }
 0x7db   :  { %v3041_v19 = vmul.f32 %v3319_v11, %v3039_v21  ;;  %v3023_v10 = vmul.f32 %v3317_v13, %v3022_v33  ;;  %vm3046_vm12 = vweird.f32 %v3319_v11 }
 0x7dc   :  { %vm3047_vm14 = vmor %vm3045_vm13, %vm3046_vm12 }
 0x7dd   :  { %v3042_v44 = vsub.f32 1.0, %v3041_v19  ;;  %v3024_v14 = vadd.f32 %v3317_v13, %v3023_v10 }
 0x7df   :  { %v3028_v4 = vsel %vm3027_vm10, %v3317_v13, %v3024_v14  ;;  %v3043_v20 = vmul.f32 %v3319_v11, %v3042_v44 }
 0x7e0   :  { %v3033_v37 = vsel %vm3030_vm11, %v3032_v31, %v3028_v4 }
 0x7e1   :  { %v3056_v59 = vmul.f32 %v3055_v50, %v3033_v37  ;;  %v3044_v38 = vadd.f32 %v3319_v11, %v3043_v20 }
 0x7e3   :  { %v3057_v16 = vadd.f32 %v3056_v59, %v2953_v43  ;;  %v3048_v34 = vsel %vm3047_vm14, %v3319_v11, %v3044_v38 }
 0x7e4   :  { %v3053_v55 = vsel %vm3050_vm15, %v3052_v60, %v3048_v34 }
 0x7e5   :  { %3320 = vtanh.f32 %v3057_v16  ;;  %v3059_v12 = vsub.f32 1.0, %v3053_v55  ;;  %v3061_v26 = vmul.f32 %v3053_v55, %v9346_v47 }
 0x7eb   :  { %v3321_v56 = vpop.eup %3320 }
 0x7ec   :  { %v3060_v41 = vmul.f32 %v3321_v56, %v3059_v12 }
 0x7ee   :  { %v3062_v36 = vadd.f32 %v3061_v26, %v3060_v41 }
 0x7f0   :  { %v3064_v54 = vmul.f32 %v3063_v5, %v3062_v36 }
 0x7f2   :  { %3065 = vadd.xlane.f32.xlu1 %v3064_v54 }
 0x865   :  { %v3066_v22 = vpop.xlane.xlu1 %3065 }
 0x866   :  { %v3068_v23 = vadd.f32 %v3067_v48, %v3066_v22 }
 0x868   :  { %3070 = vst.msk [vmem:[%s9370_s2] sm:$0xff] %vm3069_vm0, %v3068_v23 }

</bundles_post_ra>
